<compile_context>
chip_gen: v5e
topology: v5e:2x2
jax: 0.10.0
libtpu: 0.0.40
codegen_flags: <defaults>
</compile_context>

<pallas_src>
import numpy as np
import jax
import jax.numpy as jnp
from jax.experimental import pallas as pl
from jax.experimental.pallas import tpu as pltpu


# ----------------------------- glue: operator matrices -----------------------

def _avg_pool_matrix(size, k):
    """P (size//k, size): one axis of AvgPool2d(k, stride=k); entries 1/k."""
    s = size // k
    m = np.zeros((s, size), dtype=np.float32)
    for i in range(s):
        m[i, i * k:(i + 1) * k] = 1.0 / k
    return m


def _bilinear_up_matrix(out_size, in_size):
    """U (out_size, in_size): F.interpolate(mode='bilinear', align_corners=False)."""
    m = np.zeros((out_size, in_size), dtype=np.float32)
    scale = in_size / out_size
    for i in range(out_size):
        src = (i + 0.5) * scale - 0.5
        if src < 0.0:
            src = 0.0
        j0 = min(int(np.floor(src)), in_size - 1)
        j1 = min(j0 + 1, in_size - 1)
        w1 = src - j0
        m[i, j0] += 1.0 - w1
        m[i, j1] += w1
    return m


def _build_ssp_operators(C, H, W, conv_ws, conv_bs, pool_sizes, block_n):
    """Operator matrices in output-slot order (branch4, branch3, branch2, branch1)."""
    Co = C // 4
    slot_order = (3, 2, 1, 0)   # torch.cat((x, b4, b3, b2, b1), dim=1)

    # 1x1 conv as one block-diagonal matmul over the batched (Nb*C, S*S) pooled
    # activations; bias folded in as a column vector. (4, Nb*Co, Nb*C) / (4, Nb*Co, 1).
    w_bd, b_bd = [], []
    for i in slot_order:
        w = np.asarray(conv_ws[i], dtype=np.float32)                   # (Co, C)
        b = np.asarray(conv_bs[i], dtype=np.float32)                   # (Co,)
        w_bd.append(np.kron(np.eye(block_n, dtype=np.float32), w))     # (Nb*Co, Nb*C)
        b_bd.append(np.tile(b, block_n)[:, None])                      # (Nb*Co, 1)
    Wbd = jnp.asarray(np.stack(w_bd))     # f32
    Bbd = jnp.asarray(np.stack(b_bd))     # f32

    pools, ups, matmul_slots, global_slots = [], [], [], []
    for slot, i in enumerate(slot_order):
        k = pool_sizes[i]
        assert H % k == 0 and W % k == 0, "spatial dims must be divisible by pool size"
        Sh, Sw = H // k, W // k
        if Sh * Sw == 1:
            global_slots.append(slot)     # pool window == full image -> global mean
            continue
        matmul_slots.append(slot)
        Ph, Pw = _avg_pool_matrix(H, k), _avg_pool_matrix(W, k)
        Uh, Uw = _bilinear_up_matrix(H, Sh), _bilinear_up_matrix(W, Sw)
        # 2-D pooling / bilinear upsampling as single matrices over flattened HW.
        pools.append(jnp.asarray(np.kron(Ph, Pw).T, dtype=jnp.bfloat16))  # (HW, Sh*Sw)
        ups.append(jnp.asarray(np.kron(Uh, Uw).T, dtype=jnp.bfloat16))    # (Sh*Sw, HW)
    return pools, ups, Wbd, Bbd, matmul_slots, global_slots


# ------------------------------- Pallas kernel --------------------------------

def _make_ssp_kernel(matmul_slots, global_slots):
    n_mm = len(matmul_slots)

    def kernel(x_ref, *refs):
        pool_refs = refs[:n_mm]
        up_refs = refs[n_mm:2 * n_mm]
        w_ref = refs[2 * n_mm]          # (4, Nb*Co, Nb*C) f32 block-diag 1x1 conv
        b_ref = refs[2 * n_mm + 1]      # (4, Nb*Co, 1)    f32 bias
        out_ref = refs[-1]              # (Nb, 2C, HW)

        Nb, C, HW = x_ref.shape
        Co = C // 4

        x = x_ref[...]                                   # (Nb, C, HW) f32
        out_ref[:, 0:C, :] = x                           # pass-through, lane-dense

        # bf16 MXU operands, f32 accumulation / elementwise.
        x2d = x.astype(jnp.bfloat16).reshape(Nb * C, HW)

        for j, slot in enumerate(matmul_slots):
            # AvgPool2d: single (Nb*C, HW) @ (HW, S*S) matmul (K = HW).
            pooled = jnp.dot(x2d, pool_refs[j][...],
                             preferred_element_type=jnp.float32)        # (Nb*C, SS)
            # 1x1 conv (+ bias) + ReLU, f32.
            y = jnp.dot(w_ref[slot], pooled,
                        preferred_element_type=jnp.float32) + b_ref[slot]  # (Nb*Co, SS)
            y = jnp.maximum(y, 0.0)
            # Bilinear upsample: (Nb*Co, S*S) @ (S*S, HW), lane-dense N = HW.
            o = jnp.dot(y.astype(jnp.bfloat16), up_refs[j][...],
                        preferred_element_type=jnp.float32)             # (Nb*Co, HW)
            c0 = C + slot * Co
            out_ref[:, c0:c0 + Co, :] = o.reshape(Nb, Co, HW).astype(out_ref.dtype)

        if global_slots:
            # 64x64 pool (S=1): global mean -> micro matmul -> broadcast.
            gmean = jnp.mean(x, axis=2, keepdims=True).reshape(Nb * C, 1)   # f32
            for slot in global_slots:
                y = jnp.dot(w_ref[slot], gmean,
                            preferred_element_type=jnp.float32) + b_ref[slot]  # (Nb*Co, 1)
                y = jnp.maximum(y, 0.0)
                c0 = C + slot * Co
                out_ref[:, c0:c0 + Co, :] = jnp.broadcast_to(
                    y.reshape(Nb, Co, 1), (Nb, Co, HW)).astype(out_ref.dtype)

    return kernel


# ------------------------------- wrapper --------------------------------------

def _const_spec(arr):
    nd = arr.ndim
    return pl.BlockSpec(arr.shape, lambda b, _nd=nd: (0,) * _nd)


def ssp_forward(x, conv_ws, conv_bs, *, pool_sizes=(64, 32, 16, 8), block_n=2):
    """SSP forward. x: (N, C, H, W) f32; conv_ws/conv_bs: 1x1-conv params, branch1..branch4."""
    N, C, H, W = x.shape
    HW = H * W
    assert C % 4 == 0
    if N % block_n != 0:
        block_n = 1

    pools, ups, Wbd, Bbd, mm_slots, gl_slots = _build_ssp_operators(
        C, H, W, conv_ws, conv_bs, pool_sizes, block_n)

    x_flat = x.reshape(N, C, HW)
    params = [*pools, *ups, Wbd, Bbd]

    in_specs = [pl.BlockSpec((block_n, C, HW), lambda b: (b, 0, 0))]
    in_specs += [_const_spec(arr) for arr in params]
    out_spec = pl.BlockSpec((block_n, 2 * C, HW), lambda b: (b, 0, 0))

    out = pl.pallas_call(
        _make_ssp_kernel(mm_slots, gl_slots),
        out_shape=jax.ShapeDtypeStruct((N, 2 * C, HW), x.dtype),
        grid_spec=pltpu.PrefetchScalarGridSpec(
            num_scalar_prefetch=0,
            grid=(N // block_n,),
            in_specs=in_specs,
            out_specs=out_spec,
        ),
        compiler_params=pltpu.CompilerParams(
            dimension_semantics=("parallel",),
            vmem_limit_bytes=32 * 1024 * 1024,
        ),
    )(x_flat, *params)
    return out.reshape(N, 2 * C, H, W)


# ------------------------------- main ------------------------------------------

if __name__ == "__main__":
    key = jax.random.PRNGKey(0)
    N, C, H, W = 4, 8, 64, 64     # H=W=64 is the smallest size the 64x64 pool branch allows
    Co = C // 4
    pool_sizes = (64, 32, 16, 8)  # branch1 .. branch4

    keys = jax.random.split(key, 1 + 2 * len(pool_sizes))
    x = jax.random.normal(keys[0], (N, C, H, W), dtype=jnp.float32)
    conv_ws, conv_bs = [], []
    for i in range(len(pool_sizes)):
        conv_ws.append(0.1 * jax.random.normal(keys[1 + 2 * i], (Co, C), dtype=jnp.float32))
        conv_bs.append(0.1 * jax.random.normal(keys[2 + 2 * i], (Co,), dtype=jnp.float32))

    out = ssp_forward(x, conv_ws, conv_bs, pool_sizes=pool_sizes, block_n=2)
    out = jax.block_until_ready(out)
    assert out.shape == (N, 2 * C, H, W)

    # Pure-JAX f32 reference (same align_corners=False bilinear definition as PyTorch).
    def ref_branch(xb, wk, bk, k):
        S = H // k
        Uh = jnp.asarray(_bilinear_up_matrix(H, S))
        Uw = jnp.asarray(_bilinear_up_matrix(W, S))
        pooled = xb.reshape(N, C, H // k, k, W // k, k).mean(axis=(3, 5))   # AvgPool2d
        y = jnp.einsum('oc,ncpq->nopq', wk, pooled) + bk[None, :, None, None]
        y = jnp.maximum(y, 0.0)
        t = jnp.einsum('hp,nopq->nohq', Uh, y)
        return jnp.einsum('wq,nohq->nohw', Uw, t)

    refs = [x]
    for bi in [3, 2, 1, 0]:       # branch4, branch3, branch2, branch1
        refs.append(ref_branch(x, conv_ws[bi], conv_bs[bi], pool_sizes[bi]))
    ref = jnp.concatenate(refs, axis=1)

    # bf16 MXU operands (pool weights exact; bilinear weights rounded) vs f32 reference.
    np.testing.assert_allclose(np.asarray(out), np.asarray(ref), rtol=5e-3, atol=5e-3)
    print("KERNEL_OK")
</pallas_src>

<mosaic_0001>
module attributes {stable_mosaic.version = 11 : i64} {
  func.func @kernel(%arg0: i32, %arg1: memref<2x8x4096xf32, #tpu.memory_space<vmem>>, %arg2: memref<4096x64xbf16, #tpu.memory_space<vmem>>, %arg3: memref<4096x16xbf16, #tpu.memory_space<vmem>>, %arg4: memref<4096x4xbf16, #tpu.memory_space<vmem>>, %arg5: memref<64x4096xbf16, #tpu.memory_space<vmem>>, %arg6: memref<16x4096xbf16, #tpu.memory_space<vmem>>, %arg7: memref<4x4096xbf16, #tpu.memory_space<vmem>>, %arg8: memref<4x4x16xf32, #tpu.memory_space<vmem>>, %arg9: memref<4x4x1xf32, #tpu.memory_space<vmem>>, %arg10: memref<2x16x4096xf32, #tpu.memory_space<vmem>>) attributes {dimension_semantics = [#tpu.dimension_semantics<parallel>], iteration_bounds = array<i64: 2>, scalar_prefetch = 0 : i64, scratch_operands = 0 : i64, tpu.core_type = #tpu.core_type<tc>, window_params = [{transform_indices = @transform_0, window_bounds = array<i64: 2, 8, 4096>}, {pipeline_mode = #tpu.pipeline_mode<synchronous>, transform_indices = @transform_1, window_bounds = array<i64: 4096, 64>}, {pipeline_mode = #tpu.pipeline_mode<synchronous>, transform_indices = @transform_2, window_bounds = array<i64: 4096, 16>}, {pipeline_mode = #tpu.pipeline_mode<synchronous>, transform_indices = @transform_3, window_bounds = array<i64: 4096, 4>}, {pipeline_mode = #tpu.pipeline_mode<synchronous>, transform_indices = @transform_4, window_bounds = array<i64: 64, 4096>}, {pipeline_mode = #tpu.pipeline_mode<synchronous>, transform_indices = @transform_5, window_bounds = array<i64: 16, 4096>}, {pipeline_mode = #tpu.pipeline_mode<synchronous>, transform_indices = @transform_6, window_bounds = array<i64: 4, 4096>}, {pipeline_mode = #tpu.pipeline_mode<synchronous>, transform_indices = @transform_7, window_bounds = array<i64: 4, 4, 16>}, {pipeline_mode = #tpu.pipeline_mode<synchronous>, transform_indices = @transform_8, window_bounds = array<i64: 4, 4, 1>}, {transform_indices = @transform_9, window_bounds = array<i64: 2, 16, 4096>}]} {
    %c0 = arith.constant 0 : index
    %c0_0 = arith.constant 0 : index
    %c0_1 = arith.constant 0 : index
    %0 = vector.load %arg1[%c0, %c0_0, %c0_1] : memref<2x8x4096xf32, #tpu.memory_space<vmem>>, vector<2x8x4096xf32>
    %c0_2 = arith.constant 0 : index
    %c0_3 = arith.constant 0 : index
    %c0_4 = arith.constant 0 : index
    %1 = vector.load %arg10[%c0_2, %c0_3, %c0_4] : memref<2x16x4096xf32, #tpu.memory_space<vmem>>, vector<2x8x4096xf32>
    tpu.vector_store %arg10[%c0_2, %c0_3, %c0_4], %0 {strides = array<i32>} : memref<2x16x4096xf32, #tpu.memory_space<vmem>>, vector<2x8x4096xf32>,
    %2 = arith.truncf %0 : vector<2x8x4096xf32> to vector<2x8x4096xbf16>
    %3 = vector.shape_cast %2 : vector<2x8x4096xbf16> to vector<16x4096xbf16>
    %c0_5 = arith.constant 0 : index
    %c0_6 = arith.constant 0 : index
    %4 = vector.load %arg2[%c0_5, %c0_6] : memref<4096x64xbf16, #tpu.memory_space<vmem>>, vector<4096x64xbf16>
    %cst = arith.constant dense<0.000000e+00> : vector<16x64xf32>
    %5 = tpu.matmul %3, %4, %cst {dimension_numbers = #tpu.dot_dimension_numbers<[1], [0], [0], [1], [0, 0, 1, 1], [], []>} : vector<16x4096xbf16>, vector<4096x64xbf16>, vector<16x64xf32> -> vector<16x64xf32>
    %c0_7 = arith.constant 0 : index
    %c0_8 = arith.constant 0 : index
    %c0_9 = arith.constant 0 : index
    %6 = vector.load %arg8[%c0_7, %c0_8, %c0_9] : memref<4x4x16xf32, #tpu.memory_space<vmem>>, vector<1x4x16xf32>
    %7 = vector.shape_cast %6 : vector<1x4x16xf32> to vector<4x16xf32>
    %cst_10 = arith.constant dense<0.000000e+00> : vector<4x64xf32>
    %8 = tpu.matmul %7, %5, %cst_10 {dimension_numbers = #tpu.dot_dimension_numbers<[1], [0], [0], [1], [0, 0, 1, 1], [], []>} : vector<4x16xf32>, vector<16x64xf32>, vector<4x64xf32> -> vector<4x64xf32>
    %c0_11 = arith.constant 0 : index
    %c0_12 = arith.constant 0 : index
    %c0_13 = arith.constant 0 : index
    %9 = vector.load %arg9[%c0_11, %c0_12, %c0_13] : memref<4x4x1xf32, #tpu.memory_space<vmem>>, vector<1x4x1xf32>
    %10 = vector.shape_cast %9 : vector<1x4x1xf32> to vector<4x1xf32>
    %11 = vector.broadcast %10 : vector<4x1xf32> to vector<4x64xf32>
    %12 = arith.addf %8, %11 : vector<4x64xf32>
    %cst_14 = arith.constant 0.000000e+00 : f32
    %13 = vector.broadcast %cst_14 : f32 to vector<4x64xf32>
    %14 = arith.maximumf %12, %13 : vector<4x64xf32>
    %15 = arith.truncf %14 : vector<4x64xf32> to vector<4x64xbf16>
    %c0_15 = arith.constant 0 : index
    %c0_16 = arith.constant 0 : index
    %16 = vector.load %arg5[%c0_15, %c0_16] : memref<64x4096xbf16, #tpu.memory_space<vmem>>, vector<64x4096xbf16>
    %cst_17 = arith.constant dense<0.000000e+00> : vector<4x4096xf32>
    %17 = tpu.matmul %15, %16, %cst_17 {dimension_numbers = #tpu.dot_dimension_numbers<[1], [0], [0], [1], [0, 0, 1, 1], [], []>} : vector<4x64xbf16>, vector<64x4096xbf16>, vector<4x4096xf32> -> vector<4x4096xf32>
    %18 = vector.shape_cast %17 : vector<4x4096xf32> to vector<2x2x4096xf32>
    %c0_18 = arith.constant 0 : index
    %c8 = arith.constant 8 : index
    %c0_19 = arith.constant 0 : index
    %19 = vector.load %arg10[%c0_18, %c8, %c0_19] : memref<2x16x4096xf32, #tpu.memory_space<vmem>>, vector<2x2x4096xf32>
    tpu.vector_store %arg10[%c0_18, %c8, %c0_19], %18 {strides = array<i32>} : memref<2x16x4096xf32, #tpu.memory_space<vmem>>, vector<2x2x4096xf32>,
    %c0_20 = arith.constant 0 : index
    %c0_21 = arith.constant 0 : index
    %20 = vector.load %arg3[%c0_20, %c0_21] : memref<4096x16xbf16, #tpu.memory_space<vmem>>, vector<4096x16xbf16>
    %cst_22 = arith.constant dense<0.000000e+00> : vector<16x16xf32>
    %21 = tpu.matmul %3, %20, %cst_22 {dimension_numbers = #tpu.dot_dimension_numbers<[1], [0], [0], [1], [0, 0, 1, 1], [], []>} : vector<16x4096xbf16>, vector<4096x16xbf16>, vector<16x16xf32> -> vector<16x16xf32>
    %c1 = arith.constant 1 : index
    %c0_23 = arith.constant 0 : index
    %c0_24 = arith.constant 0 : index
    %22 = vector.load %arg8[%c1, %c0_23, %c0_24] : memref<4x4x16xf32, #tpu.memory_space<vmem>>, vector<1x4x16xf32>
    %23 = vector.shape_cast %22 : vector<1x4x16xf32> to vector<4x16xf32>
    %cst_25 = arith.constant dense<0.000000e+00> : vector<4x16xf32>
    %24 = tpu.matmul %23, %21, %cst_25 {dimension_numbers = #tpu.dot_dimension_numbers<[1], [0], [0], [1], [0, 0, 1, 1], [], []>} : vector<4x16xf32>, vector<16x16xf32>, vector<4x16xf32> -> vector<4x16xf32>
    %c1_26 = arith.constant 1 : index
    %c0_27 = arith.constant 0 : index
    %c0_28 = arith.constant 0 : index
    %25 = vector.load %arg9[%c1_26, %c0_27, %c0_28] : memref<4x4x1xf32, #tpu.memory_space<vmem>>, vector<1x4x1xf32>
    %26 = vector.shape_cast %25 : vector<1x4x1xf32> to vector<4x1xf32>
    %27 = vector.broadcast %26 : vector<4x1xf32> to vector<4x16xf32>
    %28 = arith.addf %24, %27 : vector<4x16xf32>
    %cst_29 = arith.constant 0.000000e+00 : f32
    %29 = vector.broadcast %cst_29 : f32 to vector<4x16xf32>
    %30 = arith.maximumf %28, %29 : vector<4x16xf32>
    %31 = arith.truncf %30 : vector<4x16xf32> to vector<4x16xbf16>
    %c0_30 = arith.constant 0 : index
    %c0_31 = arith.constant 0 : index
    %32 = vector.load %arg6[%c0_30, %c0_31] : memref<16x4096xbf16, #tpu.memory_space<vmem>>, vector<16x4096xbf16>
    %cst_32 = arith.constant dense<0.000000e+00> : vector<4x4096xf32>
    %33 = tpu.matmul %31, %32, %cst_32 {dimension_numbers = #tpu.dot_dimension_numbers<[1], [0], [0], [1], [0, 0, 1, 1], [], []>} : vector<4x16xbf16>, vector<16x4096xbf16>, vector<4x4096xf32> -> vector<4x4096xf32>
    %34 = vector.shape_cast %33 : vector<4x4096xf32> to vector<2x2x4096xf32>
    %c0_33 = arith.constant 0 : index
    %c10 = arith.constant 10 : index
    %c0_34 = arith.constant 0 : index
    %35 = vector.load %arg10[%c0_33, %c10, %c0_34] : memref<2x16x4096xf32, #tpu.memory_space<vmem>>, vector<2x2x4096xf32>
    tpu.vector_store %arg10[%c0_33, %c10, %c0_34], %34 {strides = array<i32>} : memref<2x16x4096xf32, #tpu.memory_space<vmem>>, vector<2x2x4096xf32>,
    %c0_35 = arith.constant 0 : index
    %c0_36 = arith.constant 0 : index
    %36 = vector.load %arg4[%c0_35, %c0_36] : memref<4096x4xbf16, #tpu.memory_space<vmem>>, vector<4096x4xbf16>
    %cst_37 = arith.constant dense<0.000000e+00> : vector<16x4xf32>
    %37 = tpu.matmul %3, %36, %cst_37 {dimension_numbers = #tpu.dot_dimension_numbers<[1], [0], [0], [1], [0, 0, 1, 1], [], []>} : vector<16x4096xbf16>, vector<4096x4xbf16>, vector<16x4xf32> -> vector<16x4xf32>
    %c2 = arith.constant 2 : index
    %c0_38 = arith.constant 0 : index
    %c0_39 = arith.constant 0 : index
    %38 = vector.load %arg8[%c2, %c0_38, %c0_39] : memref<4x4x16xf32, #tpu.memory_space<vmem>>, vector<1x4x16xf32>
    %39 = vector.shape_cast %38 : vector<1x4x16xf32> to vector<4x16xf32>
    %cst_40 = arith.constant dense<0.000000e+00> : vector<4x4xf32>
    %40 = tpu.matmul %39, %37, %cst_40 {dimension_numbers = #tpu.dot_dimension_numbers<[1], [0], [0], [1], [0, 0, 1, 1], [], []>} : vector<4x16xf32>, vector<16x4xf32>, vector<4x4xf32> -> vector<4x4xf32>
    %c2_41 = arith.constant 2 : index
    %c0_42 = arith.constant 0 : index
    %c0_43 = arith.constant 0 : index
    %41 = vector.load %arg9[%c2_41, %c0_42, %c0_43] : memref<4x4x1xf32, #tpu.memory_space<vmem>>, vector<1x4x1xf32>
    %42 = vector.shape_cast %41 : vector<1x4x1xf32> to vector<4x1xf32>
    %43 = vector.broadcast %42 : vector<4x1xf32> to vector<4x4xf32>
    %44 = arith.addf %40, %43 : vector<4x4xf32>
    %cst_44 = arith.constant 0.000000e+00 : f32
    %45 = vector.broadcast %cst_44 : f32 to vector<4x4xf32>
    %46 = arith.maximumf %44, %45 : vector<4x4xf32>
    %47 = arith.truncf %46 : vector<4x4xf32> to vector<4x4xbf16>
    %c0_45 = arith.constant 0 : index
    %c0_46 = arith.constant 0 : index
    %48 = vector.load %arg7[%c0_45, %c0_46] : memref<4x4096xbf16, #tpu.memory_space<vmem>>, vector<4x4096xbf16>
    %cst_47 = arith.constant dense<0.000000e+00> : vector<4x4096xf32>
    %49 = tpu.matmul %47, %48, %cst_47 {dimension_numbers = #tpu.dot_dimension_numbers<[1], [0], [0], [1], [0, 0, 1, 1], [], []>} : vector<4x4xbf16>, vector<4x4096xbf16>, vector<4x4096xf32> -> vector<4x4096xf32>
    %50 = vector.shape_cast %49 : vector<4x4096xf32> to vector<2x2x4096xf32>
    %c0_48 = arith.constant 0 : index
    %c12 = arith.constant 12 : index
    %c0_49 = arith.constant 0 : index
    %51 = vector.load %arg10[%c0_48, %c12, %c0_49] : memref<2x16x4096xf32, #tpu.memory_space<vmem>>, vector<2x2x4096xf32>
    tpu.vector_store %arg10[%c0_48, %c12, %c0_49], %50 {strides = array<i32>} : memref<2x16x4096xf32, #tpu.memory_space<vmem>>, vector<2x2x4096xf32>,
    %cst_50 = arith.constant dense<0.000000e+00> : vector<2x8xf32>
    %52 = vector.multi_reduction <add>, %0, %cst_50 [2] : vector<2x8x4096xf32> to vector<2x8xf32>
    %53 = vector.shape_cast %52 : vector<2x8xf32> to vector<2x8x1xf32>
    %cst_51 = arith.constant 4.096000e+03 : f32
    %54 = vector.broadcast %cst_51 : f32 to vector<2x8x1xf32>
    %55 = arith.divf %53, %54 : vector<2x8x1xf32>
    %56 = vector.shape_cast %55 : vector<2x8x1xf32> to vector<16x1xf32>
    %c3 = arith.constant 3 : index
    %c0_52 = arith.constant 0 : index
    %c0_53 = arith.constant 0 : index
    %57 = vector.load %arg8[%c3, %c0_52, %c0_53] : memref<4x4x16xf32, #tpu.memory_space<vmem>>, vector<1x4x16xf32>
    %58 = vector.shape_cast %57 : vector<1x4x16xf32> to vector<4x16xf32>
    %cst_54 = arith.constant dense<0.000000e+00> : vector<4x1xf32>
    %59 = tpu.matmul %58, %56, %cst_54 {dimension_numbers = #tpu.dot_dimension_numbers<[1], [0], [0], [1], [0, 0, 1, 1], [], []>} : vector<4x16xf32>, vector<16x1xf32>, vector<4x1xf32> -> vector<4x1xf32>
    %c3_55 = arith.constant 3 : index
    %c0_56 = arith.constant 0 : index
    %c0_57 = arith.constant 0 : index
    %60 = vector.load %arg9[%c3_55, %c0_56, %c0_57] : memref<4x4x1xf32, #tpu.memory_space<vmem>>, vector<1x4x1xf32>
    %61 = vector.shape_cast %60 : vector<1x4x1xf32> to vector<4x1xf32>
    %62 = arith.addf %59, %61 : vector<4x1xf32>
    %cst_58 = arith.constant 0.000000e+00 : f32
    %63 = vector.broadcast %cst_58 : f32 to vector<4x1xf32>
    %64 = arith.maximumf %62, %63 : vector<4x1xf32>
    %65 = vector.shape_cast %64 : vector<4x1xf32> to vector<2x2x1xf32>
    %66 = vector.shape_cast %65 : vector<2x2x1xf32> to vector<2x2x1xf32>
    %67 = vector.broadcast %66 : vector<2x2x1xf32> to vector<2x2x4096xf32>
    %c0_59 = arith.constant 0 : index
    %c14 = arith.constant 14 : index
    %c0_60 = arith.constant 0 : index
    %68 = vector.load %arg10[%c0_59, %c14, %c0_60] : memref<2x16x4096xf32, #tpu.memory_space<vmem>>, vector<2x2x4096xf32>
    tpu.vector_store %arg10[%c0_59, %c14, %c0_60], %67 {strides = array<i32>} : memref<2x16x4096xf32, #tpu.memory_space<vmem>>, vector<2x2x4096xf32>,
    return
  }
  func.func @transform_0(%arg0: i32) -> (i32, i32, i32) {
    %c0_i32 = arith.constant 0 : i32
    %c0_i32_0 = arith.constant 0 : i32
    %c0_i32_1 = arith.constant 0 : i32
    return %arg0, %c0_i32, %c0_i32_0 : i32, i32, i32
  }
  func.func @transform_1(%arg0: i32) -> (i32, i32) {
    %c0_i32 = arith.constant 0 : i32
    %c0_i32_0 = arith.constant 0 : i32
    %c0_i32_1 = arith.constant 0 : i32
    return %c0_i32, %c0_i32_0 : i32, i32
  }
  func.func @transform_2(%arg0: i32) -> (i32, i32) {
    %c0_i32 = arith.constant 0 : i32
    %c0_i32_0 = arith.constant 0 : i32
    %c0_i32_1 = arith.constant 0 : i32
    return %c0_i32, %c0_i32_0 : i32, i32
  }
  func.func @transform_3(%arg0: i32) -> (i32, i32) {
    %c0_i32 = arith.constant 0 : i32
    %c0_i32_0 = arith.constant 0 : i32
    %c0_i32_1 = arith.constant 0 : i32
    return %c0_i32, %c0_i32_0 : i32, i32
  }
  func.func @transform_4(%arg0: i32) -> (i32, i32) {
    %c0_i32 = arith.constant 0 : i32
    %c0_i32_0 = arith.constant 0 : i32
    %c0_i32_1 = arith.constant 0 : i32
    return %c0_i32, %c0_i32_0 : i32, i32
  }
  func.func @transform_5(%arg0: i32) -> (i32, i32) {
    %c0_i32 = arith.constant 0 : i32
    %c0_i32_0 = arith.constant 0 : i32
    %c0_i32_1 = arith.constant 0 : i32
    return %c0_i32, %c0_i32_0 : i32, i32
  }
  func.func @transform_6(%arg0: i32) -> (i32, i32) {
    %c0_i32 = arith.constant 0 : i32
    %c0_i32_0 = arith.constant 0 : i32
    %c0_i32_1 = arith.constant 0 : i32
    return %c0_i32, %c0_i32_0 : i32, i32
  }
  func.func @transform_7(%arg0: i32) -> (i32, i32, i32) {
    %c0_i32 = arith.constant 0 : i32
    %c0_i32_0 = arith.constant 0 : i32
    %c0_i32_1 = arith.constant 0 : i32
    %c0_i32_2 = arith.constant 0 : i32
    return %c0_i32, %c0_i32_0, %c0_i32_1 : i32, i32, i32
  }
  func.func @transform_8(%arg0: i32) -> (i32, i32, i32) {
    %c0_i32 = arith.constant 0 : i32
    %c0_i32_0 = arith.constant 0 : i32
    %c0_i32_1 = arith.constant 0 : i32
    %c0_i32_2 = arith.constant 0 : i32
    return %c0_i32, %c0_i32_0, %c0_i32_1 : i32, i32, i32
  }
  func.func @transform_9(%arg0: i32) -> (i32, i32, i32) {
    %c0_i32 = arith.constant 0 : i32
    %c0_i32_0 = arith.constant 0 : i32
    %c0_i32_1 = arith.constant 0 : i32
    return %arg0, %c0_i32, %c0_i32_0 : i32, i32, i32
  }
}

</mosaic_0001>

<bundles_post_ra>
// kernel: tpu_custom_call.1
= control target key start
LH: loop header
LB: loop body
LE: loop exit
PB: predicated region body
PF: predicated region fallthrough
CT: control target
= control target key end

     0   :  { %14 = vsyncpa [#allocation3], 0  ;;  %s21793_s0 = inlined_call_operand.vmem [shape: f32[4,8,4096], index: 0, kind: input, shape index: {}]   ;;  %s21794_s1 = inlined_call_operand.vmem [shape: bf16[4096,64], index: 1, kind: input, shape index: {}]   ;;  %s21795_s2 = inlined_call_operand.vmem [shape: bf16[4096,16], index: 2, kind: input, shape index: {}]   ;;  %s21796_s3 = inlined_call_operand.vmem [shape: bf16[4096,4], index: 3, kind: input, shape index: {}]   ;;  %s21797_s4 = inlined_call_operand.vmem [shape: bf16[64,4096], index: 4, kind: input, shape index: {}]   ;;  %s21798_s5 = inlined_call_operand.vmem [shape: bf16[16,4096], index: 5, kind: input, shape index: {}]   ;;  %s21799_s6 = inlined_call_operand.vmem [shape: bf16[4,4096], index: 6, kind: input, shape index: {}]   ;;  %s21800_s7 = inlined_call_operand.vmem [shape: f32[4,4,16], index: 7, kind: input, shape index: {}]   ;;  %s21801_s8 = inlined_call_operand.vmem [shape: f32[4,4,1], index: 8, kind: input, shape index: {}]   ;;  %s21802_s9 = inlined_call_operand.hbm [shape: f32[4,16,4096], index: 9, kind: output, shape index: {}]  }
   0x1   :  { %16 = vsyncpa [#allocation3 + $0x1], 0  ;;  %s16918_s30 = smov 0   ;;  %s16920_s10 = smov 0  }
   0x2   :  { %s16922_s11 = smov 0   ;;  %s16924_s12 = smov 0  }
   0x3 LB: > { %s16939_s13 = sadd.s32 4294967295, %s16861_s12   ;;  %s11970_s14 = sadd.s32 4294967294, %s16861_s12   ;;  %s16861_s12 = sphi %s16924_s12, %s21869_s12   ;;  %s16857_s11 = sphi %s16922_s11, %s21868_s11   ;;  %s16853_s10 = sphi %s16920_s10, %s21867_s10   ;;  %s16849_s30 = sphi %s16918_s30, %s21866_s30  }
   0x4   : > { %s16943_s15 = sadd.s32 1, %s16861_s12   ;;  %s223_s16 = sadd.s32 1, %s16857_s11 }
   0x5   : > { %s220_s17 = ssub.s32 %s16861_s12, %s16943_s15  ;;  %p233_p0 = scmp.ne.s32.totalorder %s16857_s11, %s16853_s10 }
   0x6   : > { %p221_p1 = scmp.eq.s32.totalorder %s220_s17, 0  ;;  %p234_p2 = scmp.eq.s32.totalorder %s16939_s13, 1 }
   0x7   : > { %p239_p3 = scmp.ne.s32.totalorder %s16853_s10, %s16849_s30  ;;  %p240_p4 = scmp.eq.s32.totalorder %s11970_s14, 1 }
   0x8   : > { %s16954_s18 = scalar_select %p221_p1, %s16857_s11, %s223_s16  }
   0x9   : > { %p16956_p5 = por %p234_p2, %p233_p0  ;;  %p16960_p6 = por %p240_p4, %p239_p3 }
   0xa   : > { %21825 = sst [smem:[#allocation5_spill]] %s16954_s18  ;;  %p11973_p7 = scmp.ge.s32.totalorder %s16861_s12, 1 }
   0xb   : > { %p292_p8 = scmp.lt.s32.totalorder %s16861_s12, 3 }
   0xd   : > { %p293_p9 = pnand %p11973_p7, %p292_p8 }
   0xf   : > { %296 = sbr.rel (%p293_p9) target bundleno = 2307 (0x903), region = 56 }
  0x14   : > { %v15810_v0 = vld [vmem:[%s21794_s1 + $0x38] sm:$0xff]  ;;  %s11975_s27 = sshll.u32 %s16939_s13, 1  ;;  %v15809_v4 = vld [vmem:[%s21794_s1 + $0x30] sm:$0xff]  ;;  %v15808_v8 = vld [vmem:[%s21794_s1 + $0x28] sm:$0xff]  ;;  %s21823_s28 = sand.u32 1, %s16853_s10   ;;  %vm3161_vm0 = vcmask 130048  }
  0x15   : > { %v15818_v1 = vld [vmem:[%s21794_s1 + $0x78] sm:$0xff]  ;;  %2706 = vmatpush.bf16.msra.mxu0 %v15810_v0  ;;  %v15817_v5 = vld [vmem:[%s21794_s1 + $0x70] sm:$0xff]  ;;  %p330_p10 = scmp.lt.s32.totalorder %s11975_s27, 3  ;;  %v15816_v9 = vld [vmem:[%s21794_s1 + $0x68] sm:$0xff]  ;;  %s11974_s22 = sshll.u32 %s21823_s28, 10  ;;  %vm3955_vm1 = vcmask 523264  }
  0x16   : > { %v15826_v2 = vld [vmem:[%s21794_s1 + $0xb8] sm:$0xff]  ;;  %2720 = vmatpush.bf16.msra.mxu1 %v15818_v1  ;;  %v15825_v6 = vld [vmem:[%s21794_s1 + $0xb0] sm:$0xff]  ;;  %v15824_v10 = vld [vmem:[%s21794_s1 + $0xa8] sm:$0xff]  ;;  %s17045_s26 = scalar_lea.vmem [#allocation2], %s11974_s22  ;;  %vm4431_vm2 = vcmask 1041408   ;;  %vm4458_vm3 = vcmask 1043458  }
  0x17   : > { %v15834_v3 = vld [vmem:[%s21794_s1 + $0xf8] sm:$0xff]  ;;  %2734 = vmatpush.bf16.msra.mxu2 %v15826_v2  ;;  %v15833_v7 = vld [vmem:[%s21794_s1 + $0xf0] sm:$0xff]  ;;  %s21871_s27 = smov (!%p330_p10, %s11975_s27), 3  ;;  %v15832_v11 = vld [vmem:[%s21794_s1 + $0xe8] sm:$0xff]  ;;  %vm4433_vm4 = vcmask 1045508   ;;  %vm4460_vm5 = vcmask 1045504  }
  0x18   : > { %2748 = vmatpush.bf16.msra.mxu3 %v15834_v3  ;;  %v15807_v12 = vld [vmem:[%s21794_s1 + $0x20] sm:$0xff]  ;;  %s15802_s29 = sshll.u32 %s21871_s27, 8  ;;  %v15806_v16 = vld [vmem:[%s21794_s1 + $0x18] sm:$0xff]  ;;  %v15805_v20 = vld [vmem:[%s21794_s1 + $0x10] sm:$0xff]  ;;  %vm4435_vm6 = vcmask 1043456   ;;  %vm4462_vm7 = vcmask 1045506  }
  0x19   : > { %2707 = vmatpush.bf16.msra.mxu0 %v15809_v4  ;;  %v15815_v13 = vld [vmem:[%s21794_s1 + $0x60] sm:$0xff]  ;;  %s17021_s18 = scalar_lea.vmem %s21793_s0, %s15802_s29  ;;  %v15814_v17 = vld [vmem:[%s21794_s1 + $0x58] sm:$0xff]  ;;  %v15813_v23 = vld [vmem:[%s21794_s1 + $0x50] sm:$0xff]  ;;  %vm10752_vm8 = vcmask 31744   ;;  %s16732_s24 = sshll.u32 %s16939_s13, 10 }
  0x1a   : > { %2721 = vmatpush.bf16.msra.mxu1 %v15817_v5  ;;  %v15823_v14 = vld [vmem:[%s21794_s1 + $0xa0] sm:$0xff]  ;;  %v15822_v18 = vld [vmem:[%s21794_s1 + $0x98] sm:$0xff]  ;;  %v339_v22 = vld [vmem:[%s17021_s18 + $0x8] sm:$0xff]  ;;  %s11905_s13 = sshll.u32 %s17045_s26, 4  ;;  %s21864_s14 = sand.u32 1, %s16853_s10   ;;  %s11906_s13 = int_to_ptr.vmem [resolvable:$true] %s11905_s13 }
  0x1b   : > { %2735 = vmatpush.bf16.msra.mxu2 %v15825_v6  ;;  %v15831_v15 = vld [vmem:[%s21794_s1 + $0xe0] sm:$0xff]  ;;  %v15830_v19 = vld [vmem:[%s21794_s1 + $0xd8] sm:$0xff]  ;;  %v371_v25 = vld [vmem:[%s17021_s18 + $0x108] sm:$0xff]  ;;  %403 = vst [vmem:[%s17045_s26 + $0x8] sm:$0xff] %v339_v22  ;;  %s11892_s16 = scalar_lea.sflag [#allocation3], %s21864_s14  ;;  %s16819_s23 = scalar_lea.hbm %s21802_s9, 2048 }
  0x1c   : > { %2749 = vmatpush.bf16.msra.mxu3 %v15833_v7  ;;  %v338_v21 = vld [vmem:[%s17021_s18] sm:$0xff]  ;;  %v15821_v27 = vld [vmem:[%s21794_s1 + $0x90] sm:$0xff]  ;;  %v341_v31 = vld [vmem:[%s17021_s18 + $0x18] sm:$0xff]  ;;  %435 = vst [vmem:[%s17045_s26 + $0x208] sm:$0xff] %v371_v25 }
  0x1d   : > { %2708 = vmatpush.bf16.msra.mxu0 %v15808_v8  ;;  %v370_v24 = vld [vmem:[%s17021_s18 + $0x100] sm:$0xff]  ;;  %402 = vst [vmem:[%s17045_s26] sm:$0xff] %v338_v21  ;;  %v11558_v26 = vadd.f32 %v339_v22, %v338_v21  ;;  %v15829_v28 = vld [vmem:[%s21794_s1 + $0xd0] sm:$0xff]  ;;  %v373_v33 = vld [vmem:[%s17021_s18 + $0x118] sm:$0xff]  ;;  %v466_v36 = vpack.c.bf16 %v339_v22, %v338_v21 }
  0x1e   : > { %2722 = vmatpush.bf16.msra.mxu1 %v15816_v9  ;;  %v11591_v29 = vadd.f32 %v371_v25, %v370_v24  ;;  %v340_v30 = vld [vmem:[%s17021_s18 + $0x10] sm:$0xff]  ;;  %434 = vst [vmem:[%s17045_s26 + $0x200] sm:$0xff] %v370_v24  ;;  %v482_v37 = vpack.c.bf16 %v371_v25, %v370_v24  ;;  %v15804_v39 = vld [vmem:[%s21794_s1 + $0x8] sm:$0xff]  ;;  %v15803_v46 = vld [vmem:[%s21794_s1] sm:$0xff] }
  0x1f   : > { %2736 = vmatpush.bf16.msra.mxu2 %v15824_v10  ;;  %v372_v32 = vld [vmem:[%s17021_s18 + $0x110] sm:$0xff]  ;;  %v11559_v34 = vadd.f32 %v11558_v26, %v340_v30  ;;  %404 = vst [vmem:[%s17045_s26 + $0x10] sm:$0xff] %v340_v30  ;;  %v15812_v40 = vld [vmem:[%s21794_s1 + $0x48] sm:$0xff]  ;;  %v467_v41 = vpack.c.bf16 %v341_v31, %v340_v30  ;;  %v15811_v47 = vld [vmem:[%s21794_s1 + $0x40] sm:$0xff]  ;;  %v1042_v48 = vunpack.c.l.b16 %v466_v36  ;;  %v1043_v55 = vunpack.c.h.b16 %v466_v36 }
  0x20   : > { %2750 = vmatpush.bf16.msra.mxu3 %v15832_v11  ;;  %v11592_v35 = vadd.f32 %v11591_v29, %v372_v32  ;;  %405 = vst [vmem:[%s17045_s26 + $0x18] sm:$0xff] %v341_v31  ;;  %v483_v42 = vpack.c.bf16 %v373_v33, %v372_v32  ;;  %v15820_v44 = vld [vmem:[%s21794_s1 + $0x88] sm:$0xff]  ;;  %v1074_v49 = vunpack.c.l.b16 %v482_v37  ;;  %v17084_v52 = vld [vmem:[%s17021_s18 + $0x20] sm:$0xff]  ;;  %v1075_v56 = vunpack.c.h.b16 %v482_v37  ;;  %v15842_v60 = vld [vmem:[%s21794_s1 + $0x138] sm:$0xff] }
  0x21   : > { %2709 = vmatpush.bf16.msra.mxu0 %v15807_v12  ;;  %v11560_v38 = vadd.f32 %v11559_v34, %v341_v31  ;;  %v15828_v45 = vld [vmem:[%s21794_s1 + $0xc8] sm:$0xff]  ;;  %436 = vst [vmem:[%s17045_s26 + $0x210] sm:$0xff] %v372_v32  ;;  %v1044_v50 = vunpack.c.l.b16 %v467_v41  ;;  %v15819_v53 = vld [vmem:[%s21794_s1 + $0x80] sm:$0xff]  ;;  %v1045_v57 = vunpack.c.h.b16 %v467_v41  ;;  %v15850_v61 = vld [vmem:[%s21794_s1 + $0x178] sm:$0xff] }
  0x22   : > { %2723 = vmatpush.bf16.msra.mxu1 %v15815_v13  ;;  %v11593_v43 = vadd.f32 %v11592_v35, %v373_v33  ;;  %437 = vst [vmem:[%s17045_s26 + $0x218] sm:$0xff] %v373_v33  ;;  %v1076_v51 = vunpack.c.l.b16 %v483_v42  ;;  %v15827_v54 = vld [vmem:[%s21794_s1 + $0xc0] sm:$0xff]  ;;  %v1077_v58 = vunpack.c.h.b16 %v483_v42  ;;  %v17093_v59 = vld [vmem:[%s17021_s18 + $0x28] sm:$0xff]  ;;  %v15858_v63 = vld [vmem:[%s21794_s1 + $0x1b8] sm:$0xff]  ;;  %v17119_v2 = vpack.c.b16 %v1074_v49, %v1042_v48 }
  0x23   : > { %2737 = vmatpush.bf16.msra.mxu2 %v15823_v14  ;;  %406 = vst [vmem:[%s17045_s26 + $0x20] sm:$0xff] %v17084_v52  ;;  %v17104_v62 = vld [vmem:[%s17021_s18 + $0x120] sm:$0xff]  ;;  %v15866_v0 = vld [vmem:[%s21794_s1 + $0x1f8] sm:$0xff]  ;;  %v17115_v1 = vld [vmem:[%s17021_s18 + $0x128] sm:$0xff]  ;;  %v17128_v5 = vpack.c.b16 %v1075_v56, %v1043_v55  ;;  %v11561_v10 = vadd.f32 %v11560_v38, %v17084_v52  ;;  %v468_v38 = vpack.c.bf16 %v17093_v59, %v17084_v52 }
  0x24   : > { %2751 = vmatpush.bf16.msra.mxu3 %v15831_v15  ;;  %407 = vst [vmem:[%s17045_s26 + $0x28] sm:$0xff] %v17093_v59  ;;  %v17121_v3 = vpack.c.b16 %v1076_v51, %v1044_v50  ;;  %v17126_v4 = vld [vmem:[%s17021_s18 + $0x30] sm:$0xff]  ;;  %v17130_v6 = vpack.c.b16 %v1077_v58, %v1045_v57  ;;  %v17133_v7 = vld [vmem:[%s17021_s18 + $0x38] sm:$0xff]  ;;  %v11594_v11 = vadd.f32 %v11593_v43, %v17104_v62  ;;  %v15856_v22 = vld [vmem:[%s21794_s1 + $0x1a8] sm:$0xff] }
  0x25   : > { %2710 = vmatpush.bf16.msra.mxu0 %v15806_v16  ;;  %438 = vst [vmem:[%s17045_s26 + $0x220] sm:$0xff] %v17104_v62  ;;  %v15841_v8 = vld [vmem:[%s21794_s1 + $0x130] sm:$0xff]  ;;  %v377_v15 = vld [vmem:[%s17021_s18 + $0x138] sm:$0xff]  ;;  %v11562_v16 = vadd.f32 %v11561_v10, %v17093_v59  ;;  %v15839_v26 = vld [vmem:[%s21794_s1 + $0x120] sm:$0xff]  ;;  %v484_v41 = vpack.c.bf16 %v17115_v1, %v17104_v62  ;;  %v469_v42 = vpack.c.bf16 %v17133_v7, %v17126_v4  ;;  %v1046_v48 = vunpack.c.l.b16 %v468_v38 }
  0x26   : > { %2724 = vmatpush.bf16.msra.mxu1 %v15814_v17  ;;  %439 = vst [vmem:[%s17045_s26 + $0x228] sm:$0xff] %v17115_v1  ;;  %v15849_v9 = vld [vmem:[%s21794_s1 + $0x170] sm:$0xff]  ;;  %v11595_v17 = vadd.f32 %v11594_v11, %v17115_v1  ;;  %v15863_v29 = vld [vmem:[%s21794_s1 + $0x1e0] sm:$0xff]  ;;  %v15838_v30 = vld [vmem:[%s21794_s1 + $0x118] sm:$0xff]  ;;  %v1047_v55 = vunpack.c.h.b16 %v468_v38 }
  0x27   : > { %2738 = vmatpush.bf16.msra.mxu2 %v15822_v18  ;;  %408 = vst [vmem:[%s17045_s26 + $0x30] sm:$0xff] %v17126_v4  ;;  %v376_v12 = vld [vmem:[%s17021_s18 + $0x130] sm:$0xff]  ;;  %v15840_v18 = vld [vmem:[%s21794_s1 + $0x128] sm:$0xff]  ;;  %v15846_v31 = vld [vmem:[%s21794_s1 + $0x158] sm:$0xff]  ;;  %v1078_v49 = vunpack.c.l.b16 %v484_v41  ;;  %v1048_v50 = vunpack.c.l.b16 %v469_v42  ;;  %v1079_v56 = vunpack.c.h.b16 %v484_v41  ;;  %v1049_v57 = vunpack.c.h.b16 %v469_v42 }
  0x28   : > { %2752 = vmatpush.bf16.msra.mxu3 %v15830_v19  ;;  %409 = vst [vmem:[%s17045_s26 + $0x38] sm:$0xff] %v17133_v7  ;;  %v15857_v13 = vld [vmem:[%s21794_s1 + $0x1b0] sm:$0xff]  ;;  %v15848_v19 = vld [vmem:[%s21794_s1 + $0x168] sm:$0xff]  ;;  %v11596_v21 = vadd.f32 %v11595_v17, %v376_v12  ;;  %v15854_v32 = vld [vmem:[%s21794_s1 + $0x198] sm:$0xff]  ;;  %v485_v43 = vpack.c.bf16 %v377_v15, %v376_v12 }
  0x29   : > { %2711 = vmatpush.bf16.msra.mxu0 %v15805_v20  ;;  %v15865_v14 = vld [vmem:[%s21794_s1 + $0x1f0] sm:$0xff]  ;;  %440 = vst [vmem:[%s17045_s26 + $0x230] sm:$0xff] %v376_v12  ;;  %v11563_v20 = vadd.f32 %v11562_v16, %v17126_v4  ;;  %v15862_v33 = vld [vmem:[%s21794_s1 + $0x1d8] sm:$0xff]  ;;  %v17242_v52 = vld [vmem:[%s17021_s18 + $0x40] sm:$0xff]  ;;  %v17277_v4 = vpack.c.b16 %v1078_v49, %v1046_v48 }
  0x2a   : > { %2725 = vmatpush.bf16.msra.mxu1 %v15813_v23  ;;  %441 = vst [vmem:[%s17045_s26 + $0x238] sm:$0xff] %v377_v15  ;;  %v15864_v23 = vld [vmem:[%s21794_s1 + $0x1e8] sm:$0xff]  ;;  %v17179_v25 = vadd.f32 %v11596_v21, %v377_v15  ;;  %v15837_v34 = vld [vmem:[%s21794_s1 + $0x110] sm:$0xff]  ;;  %v1080_v51 = vunpack.c.l.b16 %v485_v43  ;;  %v1081_v58 = vunpack.c.h.b16 %v485_v43  ;;  %v17262_v62 = vld [vmem:[%s17021_s18 + $0x140] sm:$0xff] }
  0x2b   : > { %2739 = vmatpush.bf16.msra.mxu2 %v15821_v27  ;;  %v17177_v24 = vadd.f32 %v11563_v20, %v17133_v7  ;;  %v15847_v27 = vld [vmem:[%s21794_s1 + $0x160] sm:$0xff]  ;;  %v15845_v35 = vld [vmem:[%s21794_s1 + $0x150] sm:$0xff]  ;;  %v17251_v59 = vld [vmem:[%s17021_s18 + $0x48] sm:$0xff]  ;;  %410 = vst [vmem:[%s17045_s26 + $0x40] sm:$0xff] %v17242_v52 }
  0x2c   : > { %2753 = vmatpush.bf16.msra.mxu3 %v15829_v28  ;;  %v15855_v28 = vld [vmem:[%s21794_s1 + $0x1a0] sm:$0xff]  ;;  %v15853_v36 = vld [vmem:[%s21794_s1 + $0x190] sm:$0xff]  ;;  %411 = vst [vmem:[%s17045_s26 + $0x48] sm:$0xff] %v17251_v59  ;;  %v17273_v1 = vld [vmem:[%s17021_s18 + $0x148] sm:$0xff]  ;;  %v17279_v7 = vpack.c.b16 %v1080_v51, %v1048_v50  ;;  %v17288_v10 = vpack.c.b16 %v1081_v58, %v1049_v57  ;;  %v11598_v15 = vadd.f32 %v17179_v25, %v17262_v62 }
  0x2d   : > { %2712 = vmatpush.bf16.msra.mxu0 %v15804_v39  ;;  %v15861_v37 = vld [vmem:[%s21794_s1 + $0x1d0] sm:$0xff]  ;;  %v15836_v39 = vld [vmem:[%s21794_s1 + $0x108] sm:$0xff]  ;;  %442 = vst [vmem:[%s17045_s26 + $0x240] sm:$0xff] %v17262_v62  ;;  %v17291_v11 = vld [vmem:[%s17021_s18 + $0x58] sm:$0xff]  ;;  %v470_v42 = vpack.c.bf16 %v17251_v59, %v17242_v52 }
  0x2e   : > { %2726 = vmatpush.bf16.msra.mxu1 %v15812_v40  ;;  %v15844_v40 = vld [vmem:[%s21794_s1 + $0x148] sm:$0xff]  ;;  %443 = vst [vmem:[%s17045_s26 + $0x248] sm:$0xff] %v17273_v1  ;;  %v15873_v12 = vld [vmem:[%s21794_s1 + $0x230] sm:$0xff]  ;;  %v11599_v21 = vadd.f32 %v11598_v15, %v17273_v1  ;;  %v15867_v50 = vld [vmem:[%s21794_s1 + $0x200] sm:$0xff] }
  0x2f   : > { %2740 = vmatpush.bf16.msra.mxu2 %v15820_v44  ;;  %v15852_v44 = vld [vmem:[%s21794_s1 + $0x188] sm:$0xff]  ;;  %v380_v16 = vld [vmem:[%s17021_s18 + $0x150] sm:$0xff]  ;;  %413 = vst [vmem:[%s17045_s26 + $0x58] sm:$0xff] %v17291_v11  ;;  %v15875_v51 = vld [vmem:[%s21794_s1 + $0x240] sm:$0xff] }
  0x30   : > { %2754 = vmatpush.bf16.msra.mxu3 %v15828_v45  ;;  %v15860_v45 = vld [vmem:[%s21794_s1 + $0x1c8] sm:$0xff]  ;;  %v15889_v17 = vld [vmem:[%s21794_s1 + $0x2b0] sm:$0xff]  ;;  %444 = vst [vmem:[%s17045_s26 + $0x250] sm:$0xff] %v380_v16  ;;  %v11600_v25 = vadd.f32 %v11599_v21, %v380_v16  ;;  %v15883_v57 = vld [vmem:[%s21794_s1 + $0x280] sm:$0xff] }
  0x31   : > { %2713 = vmatpush.bf16.msra.mxu0 %v15803_v46  ;;  %v15835_v46 = vld [vmem:[%s21794_s1 + $0x100] sm:$0xff]  ;;  %v15869_v38 = vld [vmem:[%s21794_s1 + $0x210] sm:$0xff]  ;;  %v15868_v43 = vld [vmem:[%s21794_s1 + $0x208] sm:$0xff] }
  0x32   : > { %2727 = vmatpush.bf16.msra.mxu1 %v15811_v47  ;;  %v15843_v47 = vld [vmem:[%s21794_s1 + $0x140] sm:$0xff]  ;;  %v15893_v41 = vld [vmem:[%s21794_s1 + $0x2d0] sm:$0xff]  ;;  %v15884_v48 = vld [vmem:[%s21794_s1 + $0x288] sm:$0xff] }
  0x33   : > { %2741 = vmatpush.bf16.msra.mxu2 %v15819_v53  ;;  %v15851_v53 = vld [vmem:[%s21794_s1 + $0x180] sm:$0xff]  ;;  %v15892_v49 = vld [vmem:[%s21794_s1 + $0x2c8] sm:$0xff]  ;;  %v15913_v21 = vld [vmem:[%s21794_s1 + $0x370] sm:$0xff] }
  0x34   : > { %2755 = vmatpush.bf16.msra.mxu3 %v15827_v54  ;;  %2714 = vmatmul.bf16.vlgmr.msra.gmra.mxu0 %v17119_v2  ;;  %v15859_v54 = vld [vmem:[%s21794_s1 + $0x1c0] sm:$0xff] }
  0x35   : > { %2762 = vmatpush.bf16.msrb.mxu0 %v15842_v60  ;;  %2728 = vmatmul.bf16.vlgmr.msra.gmra.mxu1 %v17128_v5  ;;  %v15874_v60 = vld [vmem:[%s21794_s1 + $0x238] sm:$0xff]  ;;  %v15891_v58 = vld [vmem:[%s21794_s1 + $0x2c0] sm:$0xff] }
  0x36   : > { %2776 = vmatpush.bf16.msrb.mxu1 %v15850_v61  ;;  %2742 = vmatmul.bf16.vlgmr.msra.gmra.mxu2 %v17121_v3  ;;  %v15882_v61 = vld [vmem:[%s21794_s1 + $0x278] sm:$0xff] }
  0x37   : > { %2790 = vmatpush.bf16.msrb.mxu2 %v15858_v63  ;;  %2756 = vmatmul.bf16.vlgmr.msra.gmra.mxu3 %v17130_v6  ;;  %v15890_v63 = vld [vmem:[%s21794_s1 + $0x2b8] sm:$0xff] }
  0x38   : > { %2804 = vmatpush.bf16.msrb.mxu3 %v15866_v0  ;;  %v15898_v0 = vld [vmem:[%s21794_s1 + $0x2f8] sm:$0xff] }
  0x39   : > { %2763 = vmatpush.bf16.msrb.mxu0 %v15841_v8  ;;  %v17284_v8 = vld [vmem:[%s17021_s18 + $0x50] sm:$0xff] }
  0x3a   : > { %2777 = vmatpush.bf16.msrb.mxu1 %v15849_v9  ;;  %v17286_v9 = vpack.c.b16 %v1079_v56, %v1047_v55  ;;  %412 = vst [vmem:[%s17045_s26 + $0x50] sm:$0xff] %v17284_v8  ;;  %v17402_v56 = vld [vmem:[%s17021_s18 + $0x60] sm:$0xff] }
  0x3b   : > { %2791 = vmatpush.bf16.msrb.mxu2 %v15857_v13  ;;  %v15881_v13 = vld [vmem:[%s21794_s1 + $0x270] sm:$0xff]  ;;  %414 = vst [vmem:[%s17045_s26 + $0x60] sm:$0xff] %v17402_v56 }
  0x3c   : > { %2805 = vmatpush.bf16.msrb.mxu3 %v15865_v14  ;;  %v11565_v14 = vadd.f32 %v17177_v24, %v17242_v52  ;;  %v1050_v52 = vunpack.c.l.b16 %v470_v42 }
  0x3d   : > { %2764 = vmatpush.bf16.msrb.mxu0 %v15840_v18  ;;  %v15897_v18 = vld [vmem:[%s21794_s1 + $0x2f0] sm:$0xff] }
  0x3e   : > { %2778 = vmatpush.bf16.msrb.mxu1 %v15848_v19  ;;  %v381_v19 = vld [vmem:[%s17021_s18 + $0x158] sm:$0xff]  ;;  %v11566_v20 = vadd.f32 %v11565_v14, %v17251_v59  ;;  %v1051_v59 = vunpack.c.h.b16 %v470_v42 }
  0x3f   : > { %2792 = vmatpush.bf16.msrb.mxu2 %v15856_v22  ;;  %445 = vst [vmem:[%s17045_s26 + $0x258] sm:$0xff] %v381_v19  ;;  %v15872_v22 = vld [vmem:[%s21794_s1 + $0x228] sm:$0xff]  ;;  %v15902_v42 = vld [vmem:[%s21794_s1 + $0x318] sm:$0xff] }
  0x40   : > { %2806 = vmatpush.bf16.msrb.mxu3 %v15864_v23  ;;  %v15880_v23 = vld [vmem:[%s21794_s1 + $0x268] sm:$0xff]  ;;  %v11567_v24 = vadd.f32 %v11566_v20, %v17284_v8  ;;  %v15905_v20 = vld [vmem:[%s21794_s1 + $0x330] sm:$0xff] }
  0x41   : > { %2765 = vmatpush.bf16.msrb.mxu0 %v15839_v26  ;;  %v15888_v26 = vld [vmem:[%s21794_s1 + $0x2a8] sm:$0xff] }
  0x42   : > { %2779 = vmatpush.bf16.msrb.mxu1 %v15847_v27  ;;  %v15896_v27 = vld [vmem:[%s21794_s1 + $0x2e8] sm:$0xff] }
  0x43   : > { %2793 = vmatpush.bf16.msrb.mxu2 %v15855_v28  ;;  %v17337_v28 = vadd.f32 %v11567_v24, %v17291_v11  ;;  %v384_v24 = vld [vmem:[%s17021_s18 + $0x170] sm:$0xff] }
  0x44   : > { %2807 = vmatpush.bf16.msrb.mxu3 %v15863_v29  ;;  %v17339_v29 = vadd.f32 %v11600_v25, %v381_v19  ;;  %v15921_v25 = vld [vmem:[%s21794_s1 + $0x3b0] sm:$0xff]  ;;  %448 = vst [vmem:[%s17045_s26 + $0x270] sm:$0xff] %v384_v24 }
  0x45   : > { %2766 = vmatpush.bf16.msrb.mxu0 %v15838_v30  ;;  %v15871_v30 = vld [vmem:[%s21794_s1 + $0x220] sm:$0xff] }
  0x46   : > { %2780 = vmatpush.bf16.msrb.mxu1 %v15846_v31  ;;  %v15879_v31 = vld [vmem:[%s21794_s1 + $0x260] sm:$0xff] }
  0x47   : > { %2794 = vmatpush.bf16.msrb.mxu2 %v15854_v32  ;;  %v15887_v32 = vld [vmem:[%s21794_s1 + $0x2a0] sm:$0xff] }
  0x48   : > { %2808 = vmatpush.bf16.msrb.mxu3 %v15862_v33  ;;  %v15895_v33 = vld [vmem:[%s21794_s1 + $0x2e0] sm:$0xff] }
  0x49   : > { %2767 = vmatpush.bf16.msrb.mxu0 %v15837_v34  ;;  %v15870_v34 = vld [vmem:[%s21794_s1 + $0x218] sm:$0xff] }
  0x4a   : > { %2781 = vmatpush.bf16.msrb.mxu1 %v15845_v35  ;;  %v15878_v35 = vld [vmem:[%s21794_s1 + $0x258] sm:$0xff] }
  0x4b   : > { %2795 = vmatpush.bf16.msrb.mxu2 %v15853_v36  ;;  %v15886_v36 = vld [vmem:[%s21794_s1 + $0x298] sm:$0xff] }
  0x4c   : > { %2809 = vmatpush.bf16.msrb.mxu3 %v15861_v37  ;;  %v15894_v37 = vld [vmem:[%s21794_s1 + $0x2d8] sm:$0xff] }
  0x4d   : > { %2768 = vmatpush.bf16.msrb.mxu0 %v15836_v39  ;;  %v15877_v39 = vld [vmem:[%s21794_s1 + $0x250] sm:$0xff] }
  0x4e   : > { %2782 = vmatpush.bf16.msrb.mxu1 %v15844_v40  ;;  %v15885_v40 = vld [vmem:[%s21794_s1 + $0x290] sm:$0xff] }
  0x4f   : > { %2796 = vmatpush.bf16.msrb.mxu2 %v15852_v44  ;;  %v15876_v44 = vld [vmem:[%s21794_s1 + $0x248] sm:$0xff] }
  0x50   : > { %2810 = vmatpush.bf16.msrb.mxu3 %v15860_v45  ;;  %v486_v45 = vpack.c.bf16 %v17273_v1, %v17262_v62  ;;  %v15914_v1 = vld [vmem:[%s21794_s1 + $0x378] sm:$0xff] }
  0x51   : > { %2769 = vmatpush.bf16.msrb.mxu0 %v15835_v46  ;;  %v471_v46 = vpack.c.bf16 %v17291_v11, %v17284_v8  ;;  %v17422_v8 = vld [vmem:[%s17021_s18 + $0x160] sm:$0xff]  ;;  %v15922_v11 = vld [vmem:[%s21794_s1 + $0x3b8] sm:$0xff] }
  0x52   : > { %2783 = vmatpush.bf16.msrb.mxu1 %v15843_v47  ;;  %v487_v47 = vpack.c.bf16 %v381_v19, %v380_v16  ;;  %446 = vst [vmem:[%s17045_s26 + $0x260] sm:$0xff] %v17422_v8  ;;  %v17444_v16 = vld [vmem:[%s17021_s18 + $0x70] sm:$0xff]  ;;  %v17451_v19 = vld [vmem:[%s17021_s18 + $0x78] sm:$0xff] }
  0x53   : > { %2797 = vmatpush.bf16.msrb.mxu2 %v15851_v53  ;;  %v1082_v53 = vunpack.c.l.b16 %v486_v45  ;;  %416 = vst [vmem:[%s17045_s26 + $0x70] sm:$0xff] %v17444_v16 }
  0x54   : > { %2811 = vmatpush.bf16.msrb.mxu3 %v15859_v54  ;;  %2770 = vmatmul.bf16.vlgmr.msrb.gmra.mxu0 %v17277_v4  ;;  %v1052_v54 = vunpack.c.l.b16 %v471_v46  ;;  %v1084_v55 = vunpack.c.l.b16 %v487_v47  ;;  %v1085_v62 = vunpack.c.h.b16 %v487_v47  ;;  %417 = vst [vmem:[%s17045_s26 + $0x78] sm:$0xff] %v17451_v19  ;;  %v15909_v47 = vld [vmem:[%s21794_s1 + $0x350] sm:$0xff] }
  0x55   : > { %2818 = vmatpush.bf16.msra.mxu0 %v15874_v60  ;;  %2784 = vmatmul.bf16.vlgmr.msrb.gmra.mxu1 %v17286_v9  ;;  %v1083_v60 = vunpack.c.h.b16 %v486_v45  ;;  %v17437_v14 = vpack.c.b16 %v1082_v53, %v1050_v52  ;;  %v15926_v45 = vld [vmem:[%s21794_s1 + $0x3d8] sm:$0xff]  ;;  %v15908_v52 = vld [vmem:[%s21794_s1 + $0x348] sm:$0xff] }
  0x56   : > { %2832 = vmatpush.bf16.msra.mxu1 %v15882_v61  ;;  %2798 = vmatmul.bf16.vlgmr.msrb.gmra.mxu2 %v17279_v7  ;;  %v1053_v61 = vunpack.c.h.b16 %v471_v46  ;;  %v17439_v15 = vpack.c.b16 %v1084_v55, %v1052_v54  ;;  %v15901_v46 = vld [vmem:[%s21794_s1 + $0x310] sm:$0xff]  ;;  %v473_v54 = vpack.c.bf16 %v17451_v19, %v17444_v16 }
  0x57   : > { %2846 = vmatpush.bf16.msra.mxu2 %v15890_v63  ;;  %2812 = vmatmul.bf16.vlgmr.msrb.gmra.mxu3 %v17288_v10  ;;  %v17411_v63 = vld [vmem:[%s17021_s18 + $0x68] sm:$0xff] }
  0x58   : > { %2860 = vmatpush.bf16.msra.mxu3 %v15898_v0  ;;  %v15906_v0 = vld [vmem:[%s21794_s1 + $0x338] sm:$0xff]  ;;  %415 = vst [vmem:[%s17045_s26 + $0x68] sm:$0xff] %v17411_v63 }
  0x59   : > { %2819 = vmatpush.bf16.msra.mxu0 %v15873_v12  ;;  %v15930_v12 = vld [vmem:[%s21794_s1 + $0x3f8] sm:$0xff] }
  0x5a   : > { %2833 = vmatpush.bf16.msra.mxu1 %v15881_v13  ;;  %v17433_v13 = vld [vmem:[%s17021_s18 + $0x168] sm:$0xff] }
  0x5b   : > { %2847 = vmatpush.bf16.msra.mxu2 %v15889_v17  ;;  %447 = vst [vmem:[%s17045_s26 + $0x268] sm:$0xff] %v17433_v13  ;;  %v17446_v17 = vpack.c.b16 %v1083_v60, %v1051_v59  ;;  %v488_v53 = vpack.c.bf16 %v17433_v13, %v17422_v8  ;;  %v15907_v59 = vld [vmem:[%s21794_s1 + $0x340] sm:$0xff] }
  0x5c   : > { %2861 = vmatpush.bf16.msra.mxu3 %v15897_v18  ;;  %v17448_v18 = vpack.c.b16 %v1085_v62, %v1053_v61  ;;  %v1056_v62 = vunpack.c.l.b16 %v473_v54 }
  0x5d   : > { %2820 = vmatpush.bf16.msra.mxu0 %v15872_v22  ;;  %v11569_v22 = vadd.f32 %v17337_v28, %v17402_v56  ;;  %v1086_v61 = vunpack.c.l.b16 %v488_v53 }
  0x5e   : > { %2834 = vmatpush.bf16.msra.mxu1 %v15880_v23  ;;  %v11602_v23 = vadd.f32 %v17339_v29, %v17422_v8  ;;  %v15923_v8 = vld [vmem:[%s21794_s1 + $0x3c0] sm:$0xff] }
  0x5f   : > { %2848 = vmatpush.bf16.msra.mxu2 %v15888_v26  ;;  %v15929_v26 = vld [vmem:[%s21794_s1 + $0x3f0] sm:$0xff]  ;;  %v11570_v28 = vadd.f32 %v11569_v22, %v17411_v63  ;;  %v17582_v22 = vld [vmem:[%s17021_s18 + $0x180] sm:$0xff] }
  0x60   : > { %2862 = vmatpush.bf16.msra.mxu3 %v15896_v27  ;;  %v385_v27 = vld [vmem:[%s17021_s18 + $0x178] sm:$0xff]  ;;  %v11603_v29 = vadd.f32 %v11602_v23, %v17433_v13  ;;  %v1057_v13 = vunpack.c.h.b16 %v473_v54  ;;  %450 = vst [vmem:[%s17045_s26 + $0x280] sm:$0xff] %v17582_v22 }
  0x61   : > { %2821 = vmatpush.bf16.msra.mxu0 %v15871_v30  ;;  %449 = vst [vmem:[%s17045_s26 + $0x278] sm:$0xff] %v385_v27  ;;  %v15904_v30 = vld [vmem:[%s21794_s1 + $0x328] sm:$0xff]  ;;  %v489_v55 = vpack.c.bf16 %v385_v27, %v384_v24  ;;  %v15954_v23 = vld [vmem:[%s21794_s1 + $0x4b8] sm:$0xff] }
  0x62   : > { %2835 = vmatpush.bf16.msra.mxu1 %v15879_v31  ;;  %v15912_v31 = vld [vmem:[%s21794_s1 + $0x368] sm:$0xff]  ;;  %v15934_v54 = vld [vmem:[%s21794_s1 + $0x418] sm:$0xff] }
  0x63   : > { %2849 = vmatpush.bf16.msra.mxu2 %v15887_v32  ;;  %v11571_v32 = vadd.f32 %v11570_v28, %v17444_v16  ;;  %v1089_v16 = vunpack.c.h.b16 %v489_v55  ;;  %v17604_v28 = vld [vmem:[%s17021_s18 + $0x90] sm:$0xff] }
  0x64   : > { %2863 = vmatpush.bf16.msra.mxu3 %v15895_v33  ;;  %v11604_v33 = vadd.f32 %v11603_v29, %v384_v24  ;;  %v15962_v24 = vld [vmem:[%s21794_s1 + $0x4f8] sm:$0xff]  ;;  %420 = vst [vmem:[%s17045_s26 + $0x90] sm:$0xff] %v17604_v28 }
  0x65   : > { %2822 = vmatpush.bf16.msra.mxu0 %v15870_v34  ;;  %v15920_v34 = vld [vmem:[%s21794_s1 + $0x3a8] sm:$0xff] }
  0x66   : > { %2836 = vmatpush.bf16.msra.mxu1 %v15878_v35  ;;  %v15928_v35 = vld [vmem:[%s21794_s1 + $0x3e8] sm:$0xff] }
  0x67   : > { %2850 = vmatpush.bf16.msra.mxu2 %v15886_v36  ;;  %v17497_v36 = vadd.f32 %v11571_v32, %v17451_v19  ;;  %v17571_v19 = vld [vmem:[%s17021_s18 + $0x88] sm:$0xff]  ;;  %v15937_v32 = vld [vmem:[%s21794_s1 + $0x430] sm:$0xff] }
  0x68   : > { %2864 = vmatpush.bf16.msra.mxu3 %v15894_v37  ;;  %v17499_v37 = vadd.f32 %v11604_v33, %v385_v27  ;;  %419 = vst [vmem:[%s17045_s26 + $0x88] sm:$0xff] %v17571_v19  ;;  %v15945_v33 = vld [vmem:[%s21794_s1 + $0x470] sm:$0xff] }
  0x69   : > { %2823 = vmatpush.bf16.msra.mxu0 %v15869_v38  ;;  %v15903_v38 = vld [vmem:[%s21794_s1 + $0x320] sm:$0xff] }
  0x6a   : > { %2837 = vmatpush.bf16.msra.mxu1 %v15877_v39  ;;  %v15911_v39 = vld [vmem:[%s21794_s1 + $0x360] sm:$0xff] }
  0x6b   : > { %2851 = vmatpush.bf16.msra.mxu2 %v15885_v40  ;;  %v15919_v40 = vld [vmem:[%s21794_s1 + $0x3a0] sm:$0xff] }
  0x6c   : > { %2865 = vmatpush.bf16.msra.mxu3 %v15893_v41  ;;  %v15927_v41 = vld [vmem:[%s21794_s1 + $0x3e0] sm:$0xff] }
  0x6d   : > { %2824 = vmatpush.bf16.msra.mxu0 %v15868_v43  ;;  %v15910_v43 = vld [vmem:[%s21794_s1 + $0x358] sm:$0xff] }
  0x6e   : > { %2838 = vmatpush.bf16.msra.mxu1 %v15876_v44  ;;  %v15918_v44 = vld [vmem:[%s21794_s1 + $0x398] sm:$0xff] }
  0x6f   : > { %2852 = vmatpush.bf16.msra.mxu2 %v15884_v48  ;;  %v15917_v48 = vld [vmem:[%s21794_s1 + $0x390] sm:$0xff] }
  0x70   : > { %2866 = vmatpush.bf16.msra.mxu3 %v15892_v49  ;;  %v15925_v49 = vld [vmem:[%s21794_s1 + $0x3d0] sm:$0xff] }
  0x71   : > { %2825 = vmatpush.bf16.msra.mxu0 %v15867_v50  ;;  %v472_v50 = vpack.c.bf16 %v17411_v63, %v17402_v56  ;;  %v15916_v56 = vld [vmem:[%s21794_s1 + $0x388] sm:$0xff]  ;;  %v1088_v63 = vunpack.c.l.b16 %v489_v55  ;;  %v15942_v55 = vld [vmem:[%s21794_s1 + $0x458] sm:$0xff] }
  0x72   : > { %2839 = vmatpush.bf16.msra.mxu1 %v15875_v51  ;;  %v15900_v51 = vld [vmem:[%s21794_s1 + $0x308] sm:$0xff] }
  0x73   : > { %2853 = vmatpush.bf16.msra.mxu2 %v15883_v57  ;;  %v15924_v57 = vld [vmem:[%s21794_s1 + $0x3c8] sm:$0xff]  ;;  %v1054_v60 = vunpack.c.l.b16 %v472_v50  ;;  %v17599_v27 = vpack.c.b16 %v1088_v63, %v1056_v62 }
  0x74   : > { %2867 = vmatpush.bf16.msra.mxu3 %v15891_v58  ;;  %2826 = vmatmul.bf16.vlgmr.msra.gmra.mxu0 %v17437_v14  ;;  %v15899_v58 = vld [vmem:[%s21794_s1 + $0x300] sm:$0xff]  ;;  %v15932_v63 = vld [vmem:[%s21794_s1 + $0x408] sm:$0xff] }
  0x75   : > { %2874 = vmatpush.bf16.msrb.mxu0 %v15906_v0  ;;  %2840 = vmatmul.bf16.vlgmr.msra.gmra.mxu1 %v17446_v17  ;;  %v17562_v0 = vld [vmem:[%s17021_s18 + $0x80] sm:$0xff] }
  0x76   : > { %2888 = vmatpush.bf16.msrb.mxu1 %v15914_v1  ;;  %2854 = vmatmul.bf16.vlgmr.msra.gmra.mxu2 %v17439_v15  ;;  %v15915_v1 = vld [vmem:[%s21794_s1 + $0x380] sm:$0xff]  ;;  %418 = vst [vmem:[%s17045_s26 + $0x80] sm:$0xff] %v17562_v0  ;;  %v474_v62 = vpack.c.bf16 %v17571_v19, %v17562_v0 }
  0x77   : > { %2902 = vmatpush.bf16.msrb.mxu2 %v15922_v11  ;;  %2868 = vmatmul.bf16.vlgmr.msra.gmra.mxu3 %v17448_v18  ;;  %v1055_v11 = vunpack.c.h.b16 %v472_v50  ;;  %v15935_v50 = vld [vmem:[%s21794_s1 + $0x420] sm:$0xff] }
  0x78   : > { %2916 = vmatpush.bf16.msrb.mxu3 %v15930_v12  ;;  %v1087_v12 = vunpack.c.h.b16 %v488_v53  ;;  %v15959_v53 = vld [vmem:[%s21794_s1 + $0x4e0] sm:$0xff] }
  0x79   : > { %2875 = vmatpush.bf16.msrb.mxu0 %v15905_v20  ;;  %v15938_v20 = vld [vmem:[%s21794_s1 + $0x438] sm:$0xff] }
  0x7a   : > { %2889 = vmatpush.bf16.msrb.mxu1 %v15913_v21  ;;  %v15946_v21 = vld [vmem:[%s21794_s1 + $0x478] sm:$0xff]  ;;  %v17606_v29 = vpack.c.b16 %v1087_v12, %v1055_v11 }
  0x7b   : > { %2903 = vmatpush.bf16.msrb.mxu2 %v15921_v25  ;;  %v17593_v25 = vld [vmem:[%s17021_s18 + $0x188] sm:$0xff] }
  0x7c   : > { %2917 = vmatpush.bf16.msrb.mxu3 %v15929_v26  ;;  %v17597_v26 = vpack.c.b16 %v1086_v61, %v1054_v60  ;;  %451 = vst [vmem:[%s17045_s26 + $0x288] sm:$0xff] %v17593_v25  ;;  %v15949_v60 = vld [vmem:[%s21794_s1 + $0x490] sm:$0xff] }
  0x7d   : > { %2876 = vmatpush.bf16.msrb.mxu0 %v15904_v30  ;;  %v17608_v30 = vpack.c.b16 %v1089_v16, %v1057_v13  ;;  %v15957_v61 = vld [vmem:[%s21794_s1 + $0x4d0] sm:$0xff]  ;;  %v15956_v13 = vld [vmem:[%s21794_s1 + $0x4c8] sm:$0xff]  ;;  %v15931_v16 = vld [vmem:[%s21794_s1 + $0x400] sm:$0xff] }
  0x7e   : > { %2890 = vmatpush.bf16.msrb.mxu1 %v15912_v31  ;;  %v17611_v31 = vld [vmem:[%s17021_s18 + $0x98] sm:$0xff] }
  0x7f   : > { %2904 = vmatpush.bf16.msrb.mxu2 %v15920_v34  ;;  %v11573_v34 = vadd.f32 %v17497_v36, %v17562_v0  ;;  %421 = vst [vmem:[%s17045_s26 + $0x98] sm:$0xff] %v17611_v31  ;;  %v475_v11 = vpack.c.bf16 %v17611_v31, %v17604_v28  ;;  %v15948_v0 = vld [vmem:[%s21794_s1 + $0x488] sm:$0xff] }
  0x80   : > { %2918 = vmatpush.bf16.msrb.mxu3 %v15928_v35  ;;  %v11606_v35 = vadd.f32 %v17499_v37, %v17582_v22 }
  0x81   : > { %2877 = vmatpush.bf16.msrb.mxu0 %v15903_v38  ;;  %v388_v38 = vld [vmem:[%s17021_s18 + $0x190] sm:$0xff]  ;;  %v11574_v36 = vadd.f32 %v11573_v34, %v17571_v19  ;;  %v15939_v19 = vld [vmem:[%s21794_s1 + $0x440] sm:$0xff] }
  0x82   : > { %2891 = vmatpush.bf16.msrb.mxu1 %v15911_v39  ;;  %v15953_v39 = vld [vmem:[%s21794_s1 + $0x4b0] sm:$0xff]  ;;  %452 = vst [vmem:[%s17045_s26 + $0x290] sm:$0xff] %v388_v38  ;;  %v11607_v37 = vadd.f32 %v11606_v35, %v17593_v25  ;;  %v17731_v35 = vld [vmem:[%s17021_s18 + $0xa8] sm:$0xff] }
  0x83   : > { %2905 = vmatpush.bf16.msrb.mxu2 %v15919_v40  ;;  %v15961_v40 = vld [vmem:[%s21794_s1 + $0x4f0] sm:$0xff]  ;;  %423 = vst [vmem:[%s17045_s26 + $0xa8] sm:$0xff] %v17731_v35 }
  0x84   : > { %2919 = vmatpush.bf16.msrb.mxu3 %v15927_v41  ;;  %v389_v41 = vld [vmem:[%s17021_s18 + $0x198] sm:$0xff] }
  0x85   : > { %2878 = vmatpush.bf16.msrb.mxu0 %v15902_v42  ;;  %453 = vst [vmem:[%s17045_s26 + $0x298] sm:$0xff] %v389_v41  ;;  %v15936_v42 = vld [vmem:[%s21794_s1 + $0x428] sm:$0xff]  ;;  %v491_v12 = vpack.c.bf16 %v389_v41, %v388_v38 }
  0x86   : > { %2892 = vmatpush.bf16.msrb.mxu1 %v15910_v43  ;;  %v15944_v43 = vld [vmem:[%s21794_s1 + $0x468] sm:$0xff] }
  0x87   : > { %2906 = vmatpush.bf16.msrb.mxu2 %v15918_v44  ;;  %v11575_v44 = vadd.f32 %v11574_v36, %v17604_v28  ;;  %v15955_v28 = vld [vmem:[%s21794_s1 + $0x4c0] sm:$0xff]  ;;  %v1093_v34 = vunpack.c.h.b16 %v491_v12  ;;  %v15994_v36 = vld [vmem:[%s21794_s1 + $0x5f8] sm:$0xff] }
  0x88   : > { %2920 = vmatpush.bf16.msrb.mxu3 %v15926_v45  ;;  %v11608_v45 = vadd.f32 %v11607_v37, %v388_v38  ;;  %v15970_v38 = vld [vmem:[%s21794_s1 + $0x538] sm:$0xff]  ;;  %v17753_v37 = vld [vmem:[%s17021_s18 + $0x1a8] sm:$0xff] }
  0x89   : > { %2879 = vmatpush.bf16.msrb.mxu0 %v15901_v46  ;;  %v15952_v46 = vld [vmem:[%s21794_s1 + $0x4a8] sm:$0xff]  ;;  %455 = vst [vmem:[%s17045_s26 + $0x2a8] sm:$0xff] %v17753_v37 }
  0x8a   : > { %2893 = vmatpush.bf16.msrb.mxu1 %v15909_v47  ;;  %v15960_v47 = vld [vmem:[%s21794_s1 + $0x4e8] sm:$0xff] }
  0x8b   : > { %2907 = vmatpush.bf16.msrb.mxu2 %v15917_v48  ;;  %v17657_v48 = vadd.f32 %v11575_v44, %v17611_v31  ;;  %v1059_v31 = vunpack.c.h.b16 %v474_v62  ;;  %v17764_v44 = vld [vmem:[%s17021_s18 + $0xb0] sm:$0xff] }
  0x8c   : > { %2921 = vmatpush.bf16.msrb.mxu3 %v15925_v49  ;;  %v17659_v49 = vadd.f32 %v11608_v45, %v389_v41  ;;  %v15986_v41 = vld [vmem:[%s21794_s1 + $0x5b8] sm:$0xff]  ;;  %424 = vst [vmem:[%s17045_s26 + $0xb0] sm:$0xff] %v17764_v44 }
  0x8d   : > { %2880 = vmatpush.bf16.msrb.mxu0 %v15900_v51  ;;  %v15943_v51 = vld [vmem:[%s21794_s1 + $0x460] sm:$0xff] }
  0x8e   : > { %2894 = vmatpush.bf16.msrb.mxu1 %v15908_v52  ;;  %v15951_v52 = vld [vmem:[%s21794_s1 + $0x4a0] sm:$0xff] }
  0x8f   : > { %2908 = vmatpush.bf16.msrb.mxu2 %v15916_v56  ;;  %v15950_v56 = vld [vmem:[%s21794_s1 + $0x498] sm:$0xff] }
  0x90   : > { %2922 = vmatpush.bf16.msrb.mxu3 %v15924_v57  ;;  %v15958_v57 = vld [vmem:[%s21794_s1 + $0x4d8] sm:$0xff] }
  0x91   : > { %2881 = vmatpush.bf16.msrb.mxu0 %v15899_v58  ;;  %v15933_v58 = vld [vmem:[%s21794_s1 + $0x410] sm:$0xff] }
  0x92   : > { %2895 = vmatpush.bf16.msrb.mxu1 %v15907_v59  ;;  %v15941_v59 = vld [vmem:[%s21794_s1 + $0x450] sm:$0xff] }
  0x93   : > { %2909 = vmatpush.bf16.msrb.mxu2 %v15915_v1  ;;  %v15940_v1 = vld [vmem:[%s21794_s1 + $0x448] sm:$0xff] }
  0x94   : > { %2923 = vmatpush.bf16.msrb.mxu3 %v15923_v8  ;;  %2882 = vmatmul.bf16.vlgmr.msrb.gmra.mxu0 %v17597_v26  ;;  %v490_v8 = vpack.c.bf16 %v17593_v25, %v17582_v22  ;;  %v1060_v22 = vunpack.c.l.b16 %v475_v11  ;;  %v15947_v25 = vld [vmem:[%s21794_s1 + $0x480] sm:$0xff] }
  0x95   : > { %2930 = vmatpush.bf16.msra.mxu0 %v15938_v20  ;;  %2896 = vmatmul.bf16.vlgmr.msrb.gmra.mxu1 %v17606_v29  ;;  %v1058_v20 = vunpack.c.l.b16 %v474_v62  ;;  %v15984_v62 = vld [vmem:[%s21794_s1 + $0x5a8] sm:$0xff] }
  0x96   : > { %2944 = vmatpush.bf16.msra.mxu1 %v15946_v21  ;;  %2910 = vmatmul.bf16.vlgmr.msrb.gmra.mxu2 %v17599_v27  ;;  %v1090_v21 = vunpack.c.l.b16 %v490_v8 }
  0x97   : > { %2958 = vmatpush.bf16.msra.mxu2 %v15954_v23  ;;  %2924 = vmatmul.bf16.vlgmr.msrb.gmra.mxu3 %v17608_v30  ;;  %v1092_v23 = vunpack.c.l.b16 %v491_v12  ;;  %v15983_v12 = vld [vmem:[%s21794_s1 + $0x5a0] sm:$0xff] }
  0x98   : > { %2972 = vmatpush.bf16.msra.mxu3 %v15962_v24  ;;  %v17722_v24 = vld [vmem:[%s17021_s18 + $0xa0] sm:$0xff] }
  0x99   : > { %2931 = vmatpush.bf16.msra.mxu0 %v15937_v32  ;;  %v1091_v32 = vunpack.c.h.b16 %v490_v8  ;;  %422 = vst [vmem:[%s17045_s26 + $0xa0] sm:$0xff] %v17722_v24  ;;  %v15967_v8 = vld [vmem:[%s21794_s1 + $0x520] sm:$0xff] }
  0x9a   : > { %2945 = vmatpush.bf16.msra.mxu1 %v15945_v33  ;;  %v1061_v33 = vunpack.c.h.b16 %v475_v11  ;;  %v15975_v11 = vld [vmem:[%s21794_s1 + $0x560] sm:$0xff] }
  0x9b   : > { %2959 = vmatpush.bf16.msra.mxu2 %v15953_v39  ;;  %v15978_v39 = vld [vmem:[%s21794_s1 + $0x578] sm:$0xff]  ;;  %v17766_v45 = vpack.c.b16 %v1091_v32, %v1059_v31  ;;  %v15965_v32 = vld [vmem:[%s21794_s1 + $0x510] sm:$0xff] }
  0x9c   : > { %2973 = vmatpush.bf16.msra.mxu3 %v15961_v40  ;;  %v17742_v40 = vld [vmem:[%s17021_s18 + $0x1a0] sm:$0xff] }
  0x9d   : > { %2932 = vmatpush.bf16.msra.mxu0 %v15936_v42  ;;  %454 = vst [vmem:[%s17045_s26 + $0x2a0] sm:$0xff] %v17742_v40  ;;  %v17757_v42 = vpack.c.b16 %v1090_v21, %v1058_v20  ;;  %v15966_v20 = vld [vmem:[%s21794_s1 + $0x518] sm:$0xff] }
  0x9e   : > { %2946 = vmatpush.bf16.msra.mxu1 %v15944_v43  ;;  %v17759_v43 = vpack.c.b16 %v1092_v23, %v1060_v22  ;;  %v15974_v21 = vld [vmem:[%s21794_s1 + $0x558] sm:$0xff] }
  0x9f   : > { %2960 = vmatpush.bf16.msra.mxu2 %v15952_v46  ;;  %v17768_v46 = vpack.c.b16 %v1093_v34, %v1061_v33  ;;  %v15982_v22 = vld [vmem:[%s21794_s1 + $0x598] sm:$0xff]  ;;  %v15973_v33 = vld [vmem:[%s21794_s1 + $0x550] sm:$0xff] }
  0xa0   : > { %2974 = vmatpush.bf16.msra.mxu3 %v15960_v47  ;;  %v17771_v47 = vld [vmem:[%s17021_s18 + $0xb8] sm:$0xff] }
  0xa1   : > { %2933 = vmatpush.bf16.msra.mxu0 %v15935_v50  ;;  %v15969_v50 = vld [vmem:[%s21794_s1 + $0x530] sm:$0xff]  ;;  %425 = vst [vmem:[%s17045_s26 + $0xb8] sm:$0xff] %v17771_v47  ;;  %v15990_v23 = vld [vmem:[%s21794_s1 + $0x5d8] sm:$0xff] }
  0xa2   : > { %2947 = vmatpush.bf16.msra.mxu1 %v15943_v51  ;;  %v15977_v51 = vld [vmem:[%s21794_s1 + $0x570] sm:$0xff] }
  0xa3   : > { %2961 = vmatpush.bf16.msra.mxu2 %v15951_v52  ;;  %v11577_v52 = vadd.f32 %v17657_v48, %v17722_v24 }
  0xa4   : > { %2975 = vmatpush.bf16.msra.mxu3 %v15959_v53  ;;  %v11610_v53 = vadd.f32 %v17659_v49, %v17742_v40 }
  0xa5   : > { %2934 = vmatpush.bf16.msra.mxu0 %v15934_v54  ;;  %v17786_v54 = vld [vmem:[%s17021_s18 + $0x1b0] sm:$0xff]  ;;  %v11578_v48 = vadd.f32 %v11577_v52, %v17731_v35  ;;  %v477_v52 = vpack.c.bf16 %v17771_v47, %v17764_v44 }
  0xa6   : > { %2948 = vmatpush.bf16.msra.mxu1 %v15942_v55  ;;  %v15985_v55 = vld [vmem:[%s21794_s1 + $0x5b0] sm:$0xff]  ;;  %456 = vst [vmem:[%s17045_s26 + $0x2b0] sm:$0xff] %v17786_v54  ;;  %v11611_v49 = vadd.f32 %v11610_v53, %v17753_v37 }
  0xa7   : > { %2962 = vmatpush.bf16.msra.mxu2 %v15950_v56  ;;  %v15993_v56 = vld [vmem:[%s21794_s1 + $0x5f0] sm:$0xff] }
  0xa8   : > { %2976 = vmatpush.bf16.msra.mxu3 %v15958_v57  ;;  %v393_v57 = vld [vmem:[%s17021_s18 + $0x1b8] sm:$0xff] }
  0xa9   : > { %2935 = vmatpush.bf16.msra.mxu0 %v15933_v58  ;;  %457 = vst [vmem:[%s17045_s26 + $0x2b8] sm:$0xff] %v393_v57  ;;  %v15968_v58 = vld [vmem:[%s21794_s1 + $0x528] sm:$0xff]  ;;  %v493_v53 = vpack.c.bf16 %v393_v57, %v17786_v54 }
  0xaa   : > { %2949 = vmatpush.bf16.msra.mxu1 %v15941_v59  ;;  %v15976_v59 = vld [vmem:[%s21794_s1 + $0x568] sm:$0xff] }
  0xab   : > { %2963 = vmatpush.bf16.msra.mxu2 %v15949_v60  ;;  %v17813_v60 = vadd.f32 %v11578_v48, %v17764_v44  ;;  %v15987_v48 = vld [vmem:[%s21794_s1 + $0x5c0] sm:$0xff] }
  0xac   : > { %2977 = vmatpush.bf16.msra.mxu3 %v15957_v61  ;;  %v11612_v61 = vadd.f32 %v11611_v49, %v17786_v54  ;;  %v1064_v54 = vunpack.c.l.b16 %v477_v52 }
  0xad   : > { %2936 = vmatpush.bf16.msra.mxu0 %v15932_v63  ;;  %21828 = vst [vmem:[#allocation6_spill] sm:$0xff] %v17813_v60  ;;  %v15992_v63 = vld [vmem:[%s21794_s1 + $0x5e8] sm:$0xff] }
  0xae   : > { %2950 = vmatpush.bf16.msra.mxu1 %v15940_v1  ;;  %v17822_v1 = vadd.f32 %v11612_v61, %v393_v57  ;;  %v15979_v57 = vld [vmem:[%s21794_s1 + $0x580] sm:$0xff]  ;;  %v1097_v61 = vunpack.c.h.b16 %v493_v53 }
  0xaf   : > { %2964 = vmatpush.bf16.msra.mxu2 %v15948_v0  ;;  %v15991_v0 = vld [vmem:[%s21794_s1 + $0x5e0] sm:$0xff] }
  0xb0   : > { %2978 = vmatpush.bf16.msra.mxu3 %v15956_v13  ;;  %21829 = vst [vmem:[#allocation7_spill] sm:$0xff] %v17822_v1 }
  0xb1   : > { %2937 = vmatpush.bf16.msra.mxu0 %v15931_v16  ;;  %v2715_v13 = vpop.f32.mrf.mxu0 }
  0xb2   : > { %2951 = vmatpush.bf16.msra.mxu1 %v15939_v19  ;;  %v2729_v16 = vpop.f32.mrf.mxu1 }
  0xb3   : > { %2965 = vmatpush.bf16.msra.mxu2 %v15947_v25  ;;  %v2730_v19 = vadd.f32 %v2729_v16, %v2715_v13  ;;  %v17919_v13 = vld [vmem:[%s17021_s18 + $0x1c8] sm:$0xff] }
  0xb4   : > { %2979 = vmatpush.bf16.msra.mxu3 %v15955_v28  ;;  %2938 = vmatmul.bf16.vlgmr.msra.gmra.mxu0 %v17757_v42  ;;  %459 = vst [vmem:[%s17045_s26 + $0x2c8] sm:$0xff] %v17919_v13 }
  0xb5   : > { %2986 = vmatpush.bf16.msrb.mxu0 %v15970_v38  ;;  %2952 = vmatmul.bf16.vlgmr.msra.gmra.mxu1 %v17766_v45  ;;  %v15981_v38 = vld [vmem:[%s21794_s1 + $0x590] sm:$0xff] }
  0xb6   : > { %3000 = vmatpush.bf16.msrb.mxu1 %v15978_v39  ;;  %2966 = vmatmul.bf16.vlgmr.msra.gmra.mxu2 %v17759_v43  ;;  %v15989_v39 = vld [vmem:[%s21794_s1 + $0x5d0] sm:$0xff] }
  0xb7   : > { %3014 = vmatpush.bf16.msrb.mxu2 %v15986_v41  ;;  %2980 = vmatmul.bf16.vlgmr.msra.gmra.mxu3 %v17768_v46  ;;  %v476_v41 = vpack.c.bf16 %v17731_v35, %v17722_v24  ;;  %v15980_v24 = vld [vmem:[%s21794_s1 + $0x588] sm:$0xff] }
  0xb8   : > { %3028 = vmatpush.bf16.msrb.mxu3 %v15994_v36  ;;  %v15964_v36 = vld [vmem:[%s21794_s1 + $0x508] sm:$0xff] }
  0xb9   : > { %2987 = vmatpush.bf16.msrb.mxu0 %v15969_v50  ;;  %v2743_v25 = vpop.f32.mrf.mxu2  ;;  %v15972_v50 = vld [vmem:[%s21794_s1 + $0x548] sm:$0xff]  ;;  %v1062_v44 = vunpack.c.l.b16 %v476_v41  ;;  %v1063_v49 = vunpack.c.h.b16 %v476_v41 }
  0xba   : > { %3001 = vmatpush.bf16.msrb.mxu1 %v15977_v51  ;;  %v2744_v28 = vadd.f32 %v2743_v25, %v2730_v19  ;;  %v2757_v31 = vpop.f32.mrf.mxu3  ;;  %v492_v51 = vpack.c.bf16 %v17753_v37, %v17742_v40  ;;  %v15988_v35 = vld [vmem:[%s21794_s1 + $0x5c8] sm:$0xff]  ;;  %v15963_v40 = vld [vmem:[%s21794_s1 + $0x500] sm:$0xff]  ;;  %v16001_v25 = vld [vmem:[%s21794_s1 + $0x630] sm:$0xff] }
  0xbb   : > { %3015 = vmatpush.bf16.msrb.mxu2 %v15985_v55  ;;  %v15971_v37 = vld [vmem:[%s21794_s1 + $0x540] sm:$0xff]  ;;  %v1096_v55 = vunpack.c.l.b16 %v493_v53  ;;  %v16008_v41 = vld [vmem:[%s21794_s1 + $0x668] sm:$0xff] }
  0xbc   : > { %3029 = vmatpush.bf16.msrb.mxu3 %v15993_v56  ;;  %v17854_v34 = vadd.f32 %v2757_v31, %v2744_v28  ;;  %v1094_v47 = vunpack.c.l.b16 %v492_v51  ;;  %v17888_v56 = vld [vmem:[%s17021_s18 + $0xc0] sm:$0xff]  ;;  %v16009_v28 = vld [vmem:[%s21794_s1 + $0x670] sm:$0xff] }
  0xbd   : > { %2988 = vmatpush.bf16.msrb.mxu0 %v15968_v58  ;;  %v1095_v58 = vunpack.c.h.b16 %v492_v51  ;;  %426 = vst [vmem:[%s17045_s26 + $0xc0] sm:$0xff] %v17888_v56  ;;  %v17925_v19 = vpack.c.b16 %v1096_v55, %v1064_v54  ;;  %v396_v31 = vld [vmem:[%s17021_s18 + $0x1d0] sm:$0xff]  ;;  %v15999_v51 = vld [vmem:[%s21794_s1 + $0x620] sm:$0xff] }
  0xbe   : > { %3002 = vmatpush.bf16.msrb.mxu1 %v15976_v59  ;;  %v1065_v59 = vunpack.c.h.b16 %v477_v52  ;;  %v17923_v16 = vpack.c.b16 %v1094_v47, %v1062_v44  ;;  %460 = vst [vmem:[%s17045_s26 + $0x2d0] sm:$0xff] %v396_v31  ;;  %v16007_v52 = vld [vmem:[%s21794_s1 + $0x660] sm:$0xff]  ;;  %v16022_v44 = vld [vmem:[%s21794_s1 + $0x6d8] sm:$0xff]  ;;  %v15997_v47 = vld [vmem:[%s21794_s1 + $0x610] sm:$0xff] }
  0xbf   : > { %3016 = vmatpush.bf16.msrb.mxu2 %v15984_v62  ;;  %v17897_v62 = vld [vmem:[%s17021_s18 + $0xc8] sm:$0xff]  ;;  %21830 = vst [vmem:[#allocation8_spill] sm:$0xff] %v17925_v19  ;;  %v16015_v53 = vld [vmem:[%s21794_s1 + $0x6a0] sm:$0xff]  ;;  %v16005_v54 = vld [vmem:[%s21794_s1 + $0x650] sm:$0xff] }
  0xc0   : > { %3030 = vmatpush.bf16.msrb.mxu3 %v15992_v63  ;;  %v16002_v63 = vld [vmem:[%s21794_s1 + $0x638] sm:$0xff]  ;;  %427 = vst [vmem:[%s17045_s26 + $0xc8] sm:$0xff] %v17897_v62  ;;  %v16013_v55 = vld [vmem:[%s21794_s1 + $0x690] sm:$0xff] }
  0xc1   : > { %2989 = vmatpush.bf16.msrb.mxu0 %v15967_v8  ;;  %v16010_v8 = vld [vmem:[%s21794_s1 + $0x678] sm:$0xff] }
  0xc2   : > { %3003 = vmatpush.bf16.msrb.mxu1 %v15975_v11  ;;  %v17908_v11 = vld [vmem:[%s17021_s18 + $0x1c0] sm:$0xff] }
  0xc3   : > { %3017 = vmatpush.bf16.msrb.mxu2 %v15983_v12  ;;  %v16018_v12 = vld [vmem:[%s21794_s1 + $0x6b8] sm:$0xff]  ;;  %458 = vst [vmem:[%s17045_s26 + $0x2c0] sm:$0xff] %v17908_v11 }
  0xc4   : > { %3031 = vmatpush.bf16.msrb.mxu3 %v15991_v0  ;;  %v16026_v0 = vld [vmem:[%s21794_s1 + $0x6f8] sm:$0xff] }
  0xc5   : > { %2990 = vmatpush.bf16.msrb.mxu0 %v15966_v20  ;;  %v364_v20 = vld [vmem:[%s17021_s18 + $0xd0] sm:$0xff] }
  0xc6   : > { %3004 = vmatpush.bf16.msrb.mxu1 %v15974_v21  ;;  %v17930_v21 = vpack.c.b16 %v1095_v58, %v1063_v49  ;;  %428 = vst [vmem:[%s17045_s26 + $0xd0] sm:$0xff] %v364_v20  ;;  %v15996_v49 = vld [vmem:[%s21794_s1 + $0x608] sm:$0xff] }
  0xc7   : > { %3018 = vmatpush.bf16.msrb.mxu2 %v15982_v22  ;;  %v17932_v22 = vpack.c.b16 %v1097_v61, %v1065_v59  ;;  %v16004_v58 = vld [vmem:[%s21794_s1 + $0x648] sm:$0xff]  ;;  %v494_v59 = vpack.c.bf16 %v17919_v13, %v17908_v11  ;;  %v15995_v11 = vld [vmem:[%s21794_s1 + $0x600] sm:$0xff] }
  0xc8   : > { %3032 = vmatpush.bf16.msrb.mxu3 %v15990_v23  ;;  %21831 = vst [vmem:[#allocation9_spill] sm:$0xff] %v17930_v21  ;;  %v365_v23 = vld [vmem:[%s17021_s18 + $0xd8] sm:$0xff] }
  0xc9   : > { %2991 = vmatpush.bf16.msrb.mxu0 %v15965_v32  ;;  %21832 = vst [vmem:[#allocation10_spill] sm:$0xff] %v17932_v22  ;;  %v16017_v32 = vld [vmem:[%s21794_s1 + $0x6b0] sm:$0xff]  ;;  %v479_v61 = vpack.c.bf16 %v365_v23, %v364_v20  ;;  %v1098_v13 = vunpack.c.l.b16 %v494_v59 }
  0xca   : > { %3005 = vmatpush.bf16.msrb.mxu1 %v15973_v33  ;;  %429 = vst [vmem:[%s17045_s26 + $0xd8] sm:$0xff] %v365_v23  ;;  %v16025_v33 = vld [vmem:[%s21794_s1 + $0x6f0] sm:$0xff] }
  0xcb   : > { %3019 = vmatpush.bf16.msrb.mxu2 %v15981_v38  ;;  %v397_v38 = vld [vmem:[%s17021_s18 + $0x1d8] sm:$0xff]  ;;  %v1068_v20 = vunpack.c.l.b16 %v479_v61 }
  0xcc   : > { %3033 = vmatpush.bf16.msrb.mxu3 %v15989_v39  ;;  %461 = vst [vmem:[%s17045_s26 + $0x2d8] sm:$0xff] %v397_v38  ;;  %v16000_v39 = vld [vmem:[%s21794_s1 + $0x628] sm:$0xff] }
  0xcd   : > { %2992 = vmatpush.bf16.msrb.mxu0 %v15964_v36  ;;  %v16016_v36 = vld [vmem:[%s21794_s1 + $0x6a8] sm:$0xff] }
  0xce   : > { %3006 = vmatpush.bf16.msrb.mxu1 %v15972_v50  ;;  %v16024_v50 = vld [vmem:[%s21794_s1 + $0x6e8] sm:$0xff] }
  0xcf   : > { %3020 = vmatpush.bf16.msrb.mxu2 %v15980_v24  ;;  %v16023_v24 = vld [vmem:[%s21794_s1 + $0x6e0] sm:$0xff] }
  0xd0   : > { %3034 = vmatpush.bf16.msrb.mxu3 %v15988_v35  ;;  %v15998_v35 = vld [vmem:[%s21794_s1 + $0x618] sm:$0xff] }
  0xd1   : > { %2993 = vmatpush.bf16.msrb.mxu0 %v15963_v40  ;;  %v16006_v40 = vld [vmem:[%s21794_s1 + $0x658] sm:$0xff] }
  0xd2   : > { %3007 = vmatpush.bf16.msrb.mxu1 %v15971_v37  ;;  %v16014_v37 = vld [vmem:[%s21794_s1 + $0x698] sm:$0xff] }
  0xd3   : > { %3021 = vmatpush.bf16.msrb.mxu2 %v15979_v57  ;;  %v16021_v57 = vld [vmem:[%s21794_s1 + $0x6d0] sm:$0xff] }
  0xd4   : > { %3035 = vmatpush.bf16.msrb.mxu3 %v15987_v48  ;;  %2994 = vmatmul.bf16.vlgmr.msrb.gmra.mxu0 %v17923_v16  ;;  %v478_v48 = vpack.c.bf16 %v17897_v62, %v17888_v56  ;;  %v16012_v56 = vld [vmem:[%s21794_s1 + $0x688] sm:$0xff] }
  0xd5   : > { %3042 = vmatpush.bf16.msra.mxu0 %v16002_v63  ;;  %3008 = vmatmul.bf16.vlgmr.msrb.gmra.mxu1 %v17930_v21  ;;  %v495_v63 = vpack.c.bf16 %v397_v38, %v396_v31  ;;  %v16020_v62 = vld [vmem:[%s21794_s1 + $0x6c8] sm:$0xff]  ;;  %v16019_v31 = vld [vmem:[%s21794_s1 + $0x6c0] sm:$0xff]  ;;  %v1069_v38 = vunpack.c.h.b16 %v479_v61 }
  0xd6   : > { %3056 = vmatpush.bf16.msra.mxu1 %v16010_v8  ;;  %3022 = vmatmul.bf16.vlgmr.msrb.gmra.mxu2 %v17925_v19  ;;  %v18022_v8 = vld [vmem:[%s17021_s18 + $0xe0] sm:$0xff]  ;;  %v16040_v61 = vld [vmem:[%s21794_s1 + $0x768] sm:$0xff] }
  0xd7   : > { %3070 = vmatpush.bf16.msra.mxu2 %v16018_v12  ;;  %3036 = vmatmul.bf16.vlgmr.msrb.gmra.mxu3 %v17932_v22  ;;  %v16003_v12 = vld [vmem:[%s21794_s1 + $0x640] sm:$0xff]  ;;  %v1100_v23 = vunpack.c.l.b16 %v495_v63  ;;  %430 = vst [vmem:[%s17045_s26 + $0xe0] sm:$0xff] %v18022_v8 }
  0xd8   : > { %3084 = vmatpush.bf16.msra.mxu3 %v16026_v0  ;;  %v1066_v0 = vunpack.c.l.b16 %v478_v48 }
  0xd9   : > { %3043 = vmatpush.bf16.msra.mxu0 %v16001_v25  ;;  %v18031_v25 = vld [vmem:[%s17021_s18 + $0xe8] sm:$0xff] }
  0xda   : > { %3057 = vmatpush.bf16.msra.mxu1 %v16009_v28  ;;  %v16011_v28 = vld [vmem:[%s21794_s1 + $0x680] sm:$0xff]  ;;  %431 = vst [vmem:[%s17045_s26 + $0xe8] sm:$0xff] %v18031_v25 }
  0xdb   : > { %3071 = vmatpush.bf16.msra.mxu2 %v16017_v32  ;;  %v1067_v32 = vunpack.c.h.b16 %v478_v48  ;;  %v401_v48 = vld [vmem:[%s17021_s18 + $0x1f8] sm:$0xff] }
  0xdc   : > { %3085 = vmatpush.bf16.msra.mxu3 %v16025_v33  ;;  %v1099_v33 = vunpack.c.h.b16 %v494_v59  ;;  %465 = vst [vmem:[%s17045_s26 + $0x2f8] sm:$0xff] %v401_v48  ;;  %v16032_v59 = vld [vmem:[%s21794_s1 + $0x728] sm:$0xff] }
  0xdd   : > { %3044 = vmatpush.bf16.msra.mxu0 %v16000_v39  ;;  %v1101_v39 = vunpack.c.h.b16 %v495_v63  ;;  %v16048_v63 = vld [vmem:[%s21794_s1 + $0x7a8] sm:$0xff] }
  0xde   : > { %3058 = vmatpush.bf16.msra.mxu1 %v16008_v41  ;;  %v18042_v41 = vld [vmem:[%s17021_s18 + $0x1e0] sm:$0xff] }
  0xdf   : > { %3072 = vmatpush.bf16.msra.mxu2 %v16016_v36  ;;  %v16034_v36 = vld [vmem:[%s21794_s1 + $0x738] sm:$0xff]  ;;  %462 = vst [vmem:[%s17045_s26 + $0x2e0] sm:$0xff] %v18042_v41 }
  0xe0   : > { %3086 = vmatpush.bf16.msra.mxu3 %v16024_v50  ;;  %v16042_v50 = vld [vmem:[%s21794_s1 + $0x778] sm:$0xff] }
  0xe1   : > { %3045 = vmatpush.bf16.msra.mxu0 %v15999_v51  ;;  %v18053_v51 = vld [vmem:[%s17021_s18 + $0x1e8] sm:$0xff] }
  0xe2   : > { %3059 = vmatpush.bf16.msra.mxu1 %v16007_v52  ;;  %v16050_v52 = vld [vmem:[%s21794_s1 + $0x7b8] sm:$0xff]  ;;  %463 = vst [vmem:[%s17045_s26 + $0x2e8] sm:$0xff] %v18053_v51 }
  0xe3   : > { %3073 = vmatpush.bf16.msra.mxu2 %v16015_v53  ;;  %v16058_v53 = vld [vmem:[%s21794_s1 + $0x7f8] sm:$0xff] }
  0xe4   : > { %3087 = vmatpush.bf16.msra.mxu3 %v16023_v24  ;;  %v18066_v24 = vld [vmem:[%s17021_s18 + $0xf0] sm:$0xff] }
  0xe5   : > { %3046 = vmatpush.bf16.msra.mxu0 %v15998_v35  ;;  %v18068_v35 = vpack.c.b16 %v1098_v13, %v1066_v0  ;;  %432 = vst [vmem:[%s17045_s26 + $0xf0] sm:$0xff] %v18066_v24  ;;  %v16055_v0 = vld [vmem:[%s21794_s1 + $0x7e0] sm:$0xff]  ;;  %v16030_v13 = vld [vmem:[%s21794_s1 + $0x718] sm:$0xff] }
  0xe6   : > { %3060 = vmatpush.bf16.msra.mxu1 %v16006_v40  ;;  %v18070_v40 = vpack.c.b16 %v1100_v23, %v1068_v20  ;;  %v16038_v20 = vld [vmem:[%s21794_s1 + $0x758] sm:$0xff] }
  0xe7   : > { %3074 = vmatpush.bf16.msra.mxu2 %v16014_v37  ;;  %21833 = vst [vmem:[#allocation11_spill] sm:$0xff] %v18068_v35  ;;  %v369_v37 = vld [vmem:[%s17021_s18 + $0xf8] sm:$0xff] }
  0xe8   : > { %3088 = vmatpush.bf16.msra.mxu3 %v16022_v44  ;;  %21834 = vst [vmem:[#allocation12_spill] sm:$0xff] %v18070_v40  ;;  %v18075_v44 = vpack.c.b16 %v1099_v33, %v1067_v32  ;;  %v16046_v23 = vld [vmem:[%s21794_s1 + $0x798] sm:$0xff]  ;;  %v16037_v32 = vld [vmem:[%s21794_s1 + $0x750] sm:$0xff] }
  0xe9   : > { %3047 = vmatpush.bf16.msra.mxu0 %v15997_v47  ;;  %v18077_v47 = vpack.c.b16 %v1101_v39, %v1069_v38  ;;  %433 = vst [vmem:[%s17045_s26 + $0xf8] sm:$0xff] %v369_v37  ;;  %v16045_v33 = vld [vmem:[%s21794_s1 + $0x790] sm:$0xff]  ;;  %v480_v39 = vpack.c.bf16 %v18031_v25, %v18022_v8  ;;  %v16044_v8 = vld [vmem:[%s21794_s1 + $0x788] sm:$0xff] }
  0xea   : > { %3061 = vmatpush.bf16.msra.mxu1 %v16005_v54  ;;  %21835 = vst [vmem:[#allocation13_spill] sm:$0xff] %v18075_v44  ;;  %v400_v54 = vld [vmem:[%s17021_s18 + $0x1f0] sm:$0xff]  ;;  %v16052_v25 = vld [vmem:[%s21794_s1 + $0x7c8] sm:$0xff]  ;;  %s11904_s18 = scalar_lea.hbm %s21802_s9, %s16732_s24 }
  0xeb   : > { %3075 = vmatpush.bf16.msra.mxu2 %v16013_v55  ;;  %21836 = vst [vmem:[#allocation14_spill] sm:$0xff] %v18077_v47  ;;  %v16033_v55 = vld [vmem:[%s21794_s1 + $0x730] sm:$0xff]  ;;  %s11907_s28 = sshll.u32 %s11904_s18, 4  ;;  %s11908_s28 = int_to_ptr.hbm [resolvable:$true] %s11907_s28 }
  0xec   : > { %3089 = vmatpush.bf16.msra.mxu3 %v16021_v57  ;;  %v16041_v57 = vld [vmem:[%s21794_s1 + $0x770] sm:$0xff]  ;;  %464 = vst [vmem:[%s17045_s26 + $0x2f0] sm:$0xff] %v400_v54  ;;  %s16813_s17 = sshra.s32 %s11908_s28, 4  ;;  %s16814_s17 = int_to_ptr.hbm [resolvable:$true] %s16813_s17 }
  0xed   : > { %3048 = vmatpush.bf16.msra.mxu0 %v15996_v49  ;;  %v16049_v49 = vld [vmem:[%s21794_s1 + $0x7b0] sm:$0xff]  ;;  %s16815_s29 = scalar_lea.hbm %s16814_s17, 1024  ;;  %p16820_p0 = scmp.lt.s32.totalorder %s16814_s17, %s21802_s9 }
  0xee   : > { %3062 = vmatpush.bf16.msra.mxu1 %v16004_v58  ;;  %v16057_v58 = vld [vmem:[%s21794_s1 + $0x7f0] sm:$0xff]  ;;  %p16816_p11 = scmp.ne.s32.totalorder %s16814_s17, %s16815_s29  ;;  %p16821_p1 = scmp.lt.s32.totalorder %s16819_s23, %s16815_s29 }
  0xef   : > { %3076 = vmatpush.bf16.msra.mxu2 %v16012_v56  ;;  %v16056_v56 = vld [vmem:[%s21794_s1 + $0x7e8] sm:$0xff]  ;;  %v16053_v38 = vld [vmem:[%s21794_s1 + $0x7d0] sm:$0xff] }
  0xf0   : > { %3090 = vmatpush.bf16.msra.mxu3 %v16020_v62  ;;  %v16031_v62 = vld [vmem:[%s21794_s1 + $0x720] sm:$0xff]  ;;  %p16817_p12 = pnand %p16816_p11, %p16956_p5  ;;  %p16822_p2 = por %p16821_p1, %p16820_p0 }
  0xf1   : > { %3049 = vmatpush.bf16.msra.mxu0 %v15995_v11  ;;  %v16039_v11 = vld [vmem:[%s21794_s1 + $0x760] sm:$0xff] }
  0xf2   : > { %3063 = vmatpush.bf16.msra.mxu1 %v16003_v12  ;;  %v16047_v12 = vld [vmem:[%s21794_s1 + $0x7a0] sm:$0xff]  ;;  %p16818_p13 = pneg %p16817_p12 }
  0xf3   : > { %3077 = vmatpush.bf16.msra.mxu2 %v16011_v28  ;;  %v16054_v28 = vld [vmem:[%s21794_s1 + $0x7d8] sm:$0xff] }
  0xf4   : > { %3091 = vmatpush.bf16.msra.mxu3 %v16019_v31  ;;  %3050 = vmatmul.bf16.vlgmr.msra.gmra.mxu0 %v18068_v35  ;;  %v16029_v31 = vld [vmem:[%s21794_s1 + $0x710] sm:$0xff]  ;;  %p16823_p3 = pnand %p16822_p2, %p16818_p13 }
  0xf5   : > { %3098 = vmatpush.bf16.msrb.mxu0 %v16034_v36  ;;  %3064 = vmatmul.bf16.vlgmr.msra.gmra.mxu1 %v18075_v44  ;;  %v496_v36 = vpack.c.bf16 %v18053_v51, %v18042_v41  ;;  %v1070_v41 = vunpack.c.l.b16 %v480_v39 }
  0xf6   : > { %3112 = vmatpush.bf16.msrb.mxu1 %v16042_v50  ;;  %3078 = vmatmul.bf16.vlgmr.msra.gmra.mxu2 %v18070_v40  ;;  %v16028_v50 = vld [vmem:[%s21794_s1 + $0x708] sm:$0xff] }
  0xf7   : > { %3126 = vmatpush.bf16.msrb.mxu2 %v16050_v52  ;;  %3092 = vmatmul.bf16.vlgmr.msra.gmra.mxu3 %v18077_v47  ;;  %v16036_v52 = vld [vmem:[%s21794_s1 + $0x748] sm:$0xff]  ;;  %v1102_v51 = vunpack.c.l.b16 %v496_v36 }
  0xf8   : > { %3140 = vmatpush.bf16.msrb.mxu3 %v16058_v53  ;;  %v481_v53 = vpack.c.bf16 %v369_v37, %v18066_v24  ;;  %v16027_v24 = vld [vmem:[%s21794_s1 + $0x700] sm:$0xff] }
  0xf9   : > { %3099 = vmatpush.bf16.msrb.mxu0 %v16033_v55  ;;  %v497_v55 = vpack.c.bf16 %v401_v48, %v400_v54  ;;  %v16035_v37 = vld [vmem:[%s21794_s1 + $0x740] sm:$0xff] }
  0xfa   : > { %3113 = vmatpush.bf16.msrb.mxu1 %v16041_v57  ;;  %v1071_v57 = vunpack.c.h.b16 %v480_v39  ;;  %v1072_v54 = vunpack.c.l.b16 %v481_v53 }
  0xfb   : > { %3127 = vmatpush.bf16.msrb.mxu2 %v16049_v49  ;;  %v1103_v49 = vunpack.c.h.b16 %v496_v36  ;;  %v1104_v48 = vunpack.c.l.b16 %v497_v55 }
  0xfc   : > { %3141 = vmatpush.bf16.msrb.mxu3 %v16057_v58  ;;  %v1073_v58 = vunpack.c.h.b16 %v481_v53 }
  0xfd   : > { %3100 = vmatpush.bf16.msrb.mxu0 %v16032_v59  ;;  %v1105_v59 = vunpack.c.h.b16 %v497_v55 }
  0xfe   : > { %3114 = vmatpush.bf16.msrb.mxu1 %v16040_v61  ;;  %v16043_v61 = vld [vmem:[%s21794_s1 + $0x780] sm:$0xff] }
  0xff   : > { %3128 = vmatpush.bf16.msrb.mxu2 %v16048_v63  ;;  %v16051_v63 = vld [vmem:[%s21794_s1 + $0x7c0] sm:$0xff] }
 0x100   : > { %3142 = vmatpush.bf16.msrb.mxu3 %v16056_v56  ;;  %v18177_v56 = vpack.c.b16 %v1102_v51, %v1070_v41 }
 0x101   : > { %3101 = vmatpush.bf16.msrb.mxu0 %v16031_v62  ;;  %v18179_v62 = vpack.c.b16 %v1103_v49, %v1071_v57 }
 0x102   : > { %3115 = vmatpush.bf16.msrb.mxu1 %v16039_v11  ;;  %21837 = vst [vmem:[#allocation15_spill] sm:$0xff] %v18177_v56  ;;  %v18181_v11 = vpack.c.b16 %v1104_v48, %v1072_v54 }
 0x103   : > { %3129 = vmatpush.bf16.msrb.mxu2 %v16047_v12  ;;  %21838 = vst [vmem:[#allocation16_spill] sm:$0xff] %v18179_v62  ;;  %v18183_v12 = vpack.c.b16 %v1105_v59, %v1073_v58 }
 0x104   : > { %3143 = vmatpush.bf16.msrb.mxu3 %v16055_v0  ;;  %21839 = vst [vmem:[#allocation17_spill] sm:$0xff] %v18181_v11  ;;  %v2717_v0 = vpop.f32.mrf.mxu0 }
 0x105   : > { %3102 = vmatpush.bf16.msrb.mxu0 %v16030_v13  ;;  %21840 = vst [vmem:[#allocation18_spill] sm:$0xff] %v18183_v12  ;;  %v2731_v13 = vpop.f32.mrf.mxu1 }
 0x106   : > { %3116 = vmatpush.bf16.msrb.mxu1 %v16038_v20  ;;  %v2745_v20 = vpop.f32.mrf.mxu2  ;;  %v2732_v49 = vadd.f32 %v2731_v13, %v2717_v0 }
 0x107   : > { %3130 = vmatpush.bf16.msrb.mxu2 %v16046_v23  ;;  %v2759_v23 = vpop.f32.mrf.mxu3 }
 0x108   : > { %3144 = vmatpush.bf16.msrb.mxu3 %v16054_v28  ;;  %v2746_v54 = vadd.f32 %v2745_v20, %v2732_v49 }
 0x109   : > { %3103 = vmatpush.bf16.msrb.mxu0 %v16029_v31 }
 0x10a   : > { %3117 = vmatpush.bf16.msrb.mxu1 %v16037_v32  ;;  %v2760_v59 = vadd.f32 %v2759_v23, %v2746_v54 }
 0x10b   : > { %3131 = vmatpush.bf16.msrb.mxu2 %v16045_v33 }
 0x10c   : > { %3145 = vmatpush.bf16.msrb.mxu3 %v16053_v38  ;;  %v2771_v28 = vpop.f32.mrf.mxu0 }
 0x10d   : > { %3104 = vmatpush.bf16.msrb.mxu0 %v16028_v50  ;;  %v2785_v31 = vpop.f32.mrf.mxu1 }
 0x10e   : > { %3118 = vmatpush.bf16.msrb.mxu1 %v16036_v52  ;;  %v2799_v32 = vpop.f32.mrf.mxu2 }
 0x10f   : > { %3132 = vmatpush.bf16.msrb.mxu2 %v16044_v8  ;;  %v2813_v33 = vpop.f32.mrf.mxu3 }
 0x110   : > { %3146 = vmatpush.bf16.msrb.mxu3 %v16052_v25 }
 0x111   : > { %3105 = vmatpush.bf16.msrb.mxu0 %v16027_v24 }
 0x112   : > { %3119 = vmatpush.bf16.msrb.mxu1 %v16035_v37 }
 0x113   : > { %3133 = vmatpush.bf16.msrb.mxu2 %v16043_v61  ;;  %v2772_v61 = vadd.f32 %v2771_v28, %v17854_v34 }
 0x114   : > { %3147 = vmatpush.bf16.msrb.mxu3 %v16051_v63  ;;  %3106 = vmatmul.bf16.vlgmr.msrb.gmra.mxu0 %v18177_v56  ;;  %v2773_v38 = vpop.f32.mrf.mxu0 }
 0x115   : > { %3120 = vmatmul.bf16.vlgmr.msrb.gmra.mxu1 %v18179_v62  ;;  %v2787_v39 = vpop.f32.mrf.mxu1  ;;  %v2774_v63 = vadd.f32 %v2773_v38, %v2760_v59  ;;  %v2786_v1 = vadd.f32 %v2785_v31, %v2772_v61 }
 0x116   : > { %3134 = vmatmul.bf16.vlgmr.msrb.gmra.mxu2 %v18181_v11  ;;  %v2801_v36 = vpop.f32.mrf.mxu2 }
 0x117   : > { %3148 = vmatmul.bf16.vlgmr.msrb.gmra.mxu3 %v18183_v12  ;;  %v2815_v50 = vpop.f32.mrf.mxu3  ;;  %v2788_v11 = vadd.f32 %v2787_v39, %v2774_v63  ;;  %v2800_v62 = vadd.f32 %v2799_v32, %v2786_v1 }
 0x119   : > { %v2802_v56 = vadd.f32 %v2801_v36, %v2788_v11  ;;  %v2814_v35 = vadd.f32 %v2813_v33, %v2800_v62 }
 0x11b   : > { %v2816_v0 = vadd.f32 %v2815_v50, %v2802_v56 }
 0x11c   : > { %v2827_v52 = vpop.f32.mrf.mxu0 }
 0x11d   : > { %v2841_v53 = vpop.f32.mrf.mxu1  ;;  %v2828_v22 = vadd.f32 %v2827_v52, %v2814_v35 }
 0x11e   : > { %v2855_v55 = vpop.f32.mrf.mxu2 }
 0x11f   : > { %v2869_v8 = vpop.f32.mrf.mxu3  ;;  %v2842_v23 = vadd.f32 %v2841_v53, %v2828_v22 }
 0x121   : > { %v2856_v34 = vadd.f32 %v2855_v55, %v2842_v23 }
 0x123   : > { %v2870_v59 = vadd.f32 %v2869_v8, %v2856_v34 }
 0x124   : > { %v2829_v25 = vpop.f32.mrf.mxu0 }
 0x125   : > { %v2843_v41 = vpop.f32.mrf.mxu1  ;;  %v2830_v20 = vadd.f32 %v2829_v25, %v2816_v0 }
 0x126   : > { %v2857_v51 = vpop.f32.mrf.mxu2 }
 0x127   : > { %v2871_v57 = vpop.f32.mrf.mxu3  ;;  %v2844_v54 = vadd.f32 %v2843_v41, %v2830_v20 }
 0x129   : > { %v2858_v28 = vadd.f32 %v2857_v51, %v2844_v54 }
 0x12b   : > { %v2872_v39 = vadd.f32 %v2871_v57, %v2858_v28 }
 0x12c   : > { %v2883_v24 = vpop.f32.mrf.mxu0 }
 0x12d   : > { %v2897_v37 = vpop.f32.mrf.mxu1  ;;  %v2884_v1 = vadd.f32 %v2883_v24, %v2870_v59 }
 0x12e   : > { %v2911_v48 = vpop.f32.mrf.mxu2 }
 0x12f   : > { %v2925_v58 = vpop.f32.mrf.mxu3  ;;  %v2898_v62 = vadd.f32 %v2897_v37, %v2884_v1 }
 0x131   : > { %v2912_v35 = vadd.f32 %v2911_v48, %v2898_v62 }
 0x133   : > { %v2926_v22 = vadd.f32 %v2925_v58, %v2912_v35 }
 0x134   : > { %v2885_v60 = vpop.f32.mrf.mxu0 }
 0x135   : > { %v2899_v12 = vpop.f32.mrf.mxu1  ;;  %v2886_v11 = vadd.f32 %v2885_v60, %v2872_v39 }
 0x136   : > { %v2913_v47 = vpop.f32.mrf.mxu2 }
 0x137   : > { %v2927_v40 = vpop.f32.mrf.mxu3  ;;  %v2900_v56 = vadd.f32 %v2899_v12, %v2886_v11 }
 0x139   : > { %v2914_v50 = vadd.f32 %v2913_v47, %v2900_v56 }
 0x13b   : > { %v2928_v53 = vadd.f32 %v2927_v40, %v2914_v50 }
 0x13c   : > { %v2939_v44 = vpop.f32.mrf.mxu0 }
 0x13d   : > { %v2953_v13 = vpop.f32.mrf.mxu1  ;;  %v2940_v55 = vadd.f32 %v2939_v44, %v2926_v22  ;;  %v3155_v44 = vld [vmem:[%s21801_s8] sm:$0xf] }
 0x13e   : > { %v2967_v49 = vpop.f32.mrf.mxu2 }
 0x13f   : > { %v2981_v19 = vpop.f32.mrf.mxu3  ;;  %v2954_v8 = vadd.f32 %v2953_v13, %v2940_v55 }
 0x141   : > { %v2968_v24 = vadd.f32 %v2967_v49, %v2954_v8 }
 0x143   : > { %v2982_v37 = vadd.f32 %v2981_v19, %v2968_v24 }
 0x144   : > { %v2941_v38 = vpop.f32.mrf.mxu0 }
 0x145   : > { %v2955_v31 = vpop.f32.mrf.mxu1  ;;  %v2942_v41 = vadd.f32 %v2941_v38, %v2928_v53 }
 0x146   : > { %v2969_v32 = vpop.f32.mrf.mxu2 }
 0x147   : > { %v2983_v36 = vpop.f32.mrf.mxu3  ;;  %v2956_v57 = vadd.f32 %v2955_v31, %v2942_v41  ;;  %v16863_v31 = vmov 0  }
 0x148   : > { %16777 = vset.pattern.permute.xlu0 %v16863_v31  ;;  %16778 = vset.pattern.permute.xlu1 %v16863_v31 }
 0x149   : > { %v2970_v60 = vadd.f32 %v2969_v32, %v2956_v57  ;;  %3158 = vperm.xlu0 %16777, %v3155_v44   ;;  %16779 = vset.pattern.permute.xlu2 %v16863_v31  ;;  %v14572_v32 = vld [vmem:[%s21801_s8 + $0x4] sm:$0xf]  ;;  %v16172_v44 = vld [vmem:[%s21797_s4 + $0x384] sm:$0xf0]  ;;  %v13399_v31 = vld [vmem:[%s21797_s4 + $0x388] sm:$0xf0] }
 0x14b   : > { %v2984_v12 = vadd.f32 %v2983_v36, %v2970_v60 }
 0x151   : > { %v2995_v61 = vpop.f32.mrf.mxu0  ;;  %7204 = vperm.xlu0 %16777, %v14572_v32  }
 0x152   : > { %v3009_v33 = vpop.f32.mrf.mxu1  ;;  %v2996_v48 = vadd.f32 %v2995_v61, %v2982_v37 }
 0x154   : > { %v3010_v58 = vadd.f32 %v3009_v33, %v2996_v48  ;;  %v13389_v48 = vld [vmem:[%s21797_s4 + $0x300] sm:$0xf] }
 0x159   : > { %v3023_v52 = vpop.f32.mrf.mxu2  ;;  %v2997_v51 = vpop.f32.mrf.mxu0 }
 0x15a   : > { %v3037_v25 = vpop.f32.mrf.mxu3  ;;  %v3011_v63 = vpop.f32.mrf.mxu1  ;;  %v2998_v47 = vadd.f32 %v2997_v51, %v2984_v12  ;;  %v3024_v13 = vadd.f32 %v3023_v52, %v3010_v58  ;;  %v13391_v58 = vld [vmem:[%s21797_s4 + $0x380] sm:$0xf0] }
 0x15c   : > { %v3012_v40 = vadd.f32 %v3011_v63, %v2998_v47  ;;  %v3038_v59 = vadd.f32 %v3037_v25, %v3024_v13  ;;  %v16171_v47 = vld [vmem:[%s21797_s4 + $0x37c] sm:$0xf0] }
 0x161   : > { %v3025_v0 = vpop.f32.mrf.mxu2 }
 0x162   : > { %v3039_v20 = vpop.f32.mrf.mxu3  ;;  %v3026_v38 = vadd.f32 %v3025_v0, %v3012_v40  ;;  %v13397_v40 = vld [vmem:[%s21797_s4 + $0x308] sm:$0xf] }
 0x164   : > { %v3040_v39 = vadd.f32 %v3039_v20, %v3026_v38  ;;  %v13398_v38 = vor.u32 %v16172_v44, %v13397_v40  ;;  %v13405_v44 = vld [vmem:[%s21797_s4 + $0x310] sm:$0xf] }
 0x166   : > { %3989 = vmatpush.bf16.msra.mxu3 %v13398_v38  ;;  %v16157_v38 = vld [vmem:[%s21797_s4 + $0x314] sm:$0xf] }
 0x171   : > { %v3051_v23 = vpop.f32.mrf.mxu0 }
 0x172   : > { %v3065_v54 = vpop.f32.mrf.mxu1  ;;  %v3052_v1 = vadd.f32 %v3051_v23, %v3038_v59 }
 0x174   : > { %v3066_v56 = vadd.f32 %v3065_v54, %v3052_v1  ;;  %v3154_v54 = vld [vmem:[%s21800_s7] sm:$0xf]  ;;  %v16123_v1 = vld [vmem:[%s21797_s4 + $0x204] sm:$0xf] }
 0x179   : > { %v3079_v34 = vpop.f32.mrf.mxu2  ;;  %v3053_v49 = vpop.f32.mrf.mxu0 }
 0x17a   : > { %v3093_v28 = vpop.f32.mrf.mxu3  ;;  %v3067_v19 = vpop.f32.mrf.mxu1  ;;  %v3054_v11 = vadd.f32 %v3053_v49, %v3040_v39  ;;  %v3080_v50 = vadd.f32 %v3079_v34, %v3066_v56  ;;  %v16155_v34 = vld [vmem:[%s21797_s4 + $0x304] sm:$0xf]  ;;  %v16156_v49 = vld [vmem:[%s21797_s4 + $0x30c] sm:$0xf]  ;;  %v16139_v39 = vld [vmem:[%s21797_s4 + $0x27c] sm:$0xf0] }
 0x17b   : > { %v13394_v13 = vor.u32 %v16155_v34, %v13391_v58  ;;  %v13402_v59 = vor.u32 %v16156_v49, %v13399_v31  ;;  %v16124_v56 = vld [vmem:[%s21797_s4 + $0x20c] sm:$0xf]  ;;  %v13407_v31 = vld [vmem:[%s21797_s4 + $0x390] sm:$0xf0] }
 0x17c   : > { %v3068_v33 = vadd.f32 %v3067_v19, %v3054_v11  ;;  %v3094_v55 = vadd.f32 %v3093_v28, %v3080_v50  ;;  %v13390_v28 = vor.u32 %v16171_v47, %v13389_v48  ;;  %v13261_v19 = vld [vmem:[%s21797_s4 + $0x200] sm:$0xf]  ;;  %v13263_v11 = vld [vmem:[%s21797_s4 + $0x280] sm:$0xf0]  ;;  %v16076_v48 = vld [vmem:[%s21797_s4 + $0x84] sm:$0xf0] }
 0x17d   : > { %3976 = vmatpush.bf16.msra.mxu2 %v13394_v13  ;;  %v13262_v32 = vor.u32 %v16139_v39, %v13261_v19  ;;  %v13015_v58 = vld [vmem:[%s21797_s4 + $0x88] sm:$0xf0]  ;;  %v16173_v13 = vld [vmem:[%s21797_s4 + $0x38c] sm:$0xf0]  ;;  %v13413_v19 = vld [vmem:[%s21797_s4 + $0x318] sm:$0xf]  ;;  %v13410_v39 = vor.u32 %v16157_v38, %v13407_v31 }
 0x17e   : > { %3963 = vmatpush.bf16.msra.mxu1 %v13390_v28  ;;  %v16060_v28 = vld [vmem:[%s21797_s4 + $0xc] sm:$0xf]  ;;  %v13406_v49 = vor.u32 %v16173_v13, %v13405_v44  ;;  %v16062_v44 = vld [vmem:[%s21797_s4 + $0x1c] sm:$0xf] }
 0x17f   : > { %v13018_v40 = vor.u32 %v16060_v28, %v13015_v58  ;;  %v13023_v28 = vld [vmem:[%s21797_s4 + $0x90] sm:$0xf0]  ;;  %v13029_v58 = vld [vmem:[%s21797_s4 + $0x18] sm:$0xf]  ;;  %v13031_v13 = vld [vmem:[%s21797_s4 + $0x98] sm:$0xf0] }
 0x181   : > { %v3081_v36 = vpop.f32.mrf.mxu2 }
 0x182   : > { %v3095_v61 = vpop.f32.mrf.mxu3  ;;  %v3082_v52 = vadd.f32 %v3081_v36, %v3068_v33  ;;  %v13266_v36 = vor.u32 %v16123_v1, %v13263_v11  ;;  %3964 = vmatpush.bf16.msra.mxu1 %v13262_v32  ;;  %v16158_v11 = vld [vmem:[%s21797_s4 + $0x31c] sm:$0xf] }
 0x183   : > { %v13415_v32 = vld [vmem:[%s21797_s4 + $0x398] sm:$0xf0] }
 0x184   : > { %v3096_v25 = vadd.f32 %v3095_v61, %v3082_v52  ;;  %v13269_v61 = vld [vmem:[%s21797_s4 + $0x208] sm:$0xf]  ;;  %3977 = vmatpush.bf16.msra.mxu2 %v13266_v36  ;;  %v13133_v52 = vld [vmem:[%s21797_s4 + $0x100] sm:$0xf]  ;;  %v13277_v36 = vld [vmem:[%s21797_s4 + $0x210] sm:$0xf] }
 0x191   : > { %v3107_v62 = vpop.f32.mrf.mxu0 }
 0x192   : > { %v3121_v35 = vpop.f32.mrf.mxu1  ;;  %v3108_v51 = vadd.f32 %v3107_v62, %v3094_v55  ;;  %v16140_v62 = vld [vmem:[%s21797_s4 + $0x284] sm:$0xf0] }
 0x193   : > { %v13270_v33 = vor.u32 %v16140_v62, %v13269_v61  ;;  %v13418_v61 = vor.u32 %v16158_v11, %v13415_v32  ;;  %v16141_v62 = vld [vmem:[%s21797_s4 + $0x28c] sm:$0xf0]  ;;  %v13421_v11 = vld [vmem:[%s21797_s4 + $0x320] sm:$0xf] }
 0x194   : > { %v3122_v57 = vadd.f32 %v3121_v35, %v3108_v51  ;;  %v13271_v35 = vld [vmem:[%s21797_s4 + $0x288] sm:$0xf0]  ;;  %v16108_v51 = vld [vmem:[%s21797_s4 + $0x184] sm:$0xf0]  ;;  %v16175_v32 = vld [vmem:[%s21797_s4 + $0x39c] sm:$0xf0] }
 0x195   : > { %v13274_v50 = vor.u32 %v16124_v56, %v13271_v35  ;;  %3990 = vmatpush.bf16.msra.mxu3 %v13270_v33  ;;  %v16125_v56 = vld [vmem:[%s21797_s4 + $0x214] sm:$0xf]  ;;  %v13278_v35 = vor.u32 %v16141_v62, %v13277_v36  ;;  %v16159_v36 = vld [vmem:[%s21797_s4 + $0x324] sm:$0xf]  ;;  %v13429_v62 = vld [vmem:[%s21797_s4 + $0x328] sm:$0xf] }
 0x196   : > { %v13279_v33 = vld [vmem:[%s21797_s4 + $0x290] sm:$0xf0] }
 0x199   : > { %v3135_v22 = vpop.f32.mrf.mxu2  ;;  %v3109_v41 = vpop.f32.mrf.mxu0 }
 0x19a   : > { %v3149_v53 = vpop.f32.mrf.mxu3  ;;  %v3110_v63 = vadd.f32 %v3109_v41, %v3096_v25  ;;  %v3123_v8 = vpop.f32.mrf.mxu1  ;;  %v3136_v0 = vadd.f32 %v3135_v22, %v3122_v57  ;;  %v16107_v22 = vld [vmem:[%s21797_s4 + $0x17c] sm:$0xf0]  ;;  %v13135_v25 = vld [vmem:[%s21797_s4 + $0x180] sm:$0xf0]  ;;  %v13141_v41 = vld [vmem:[%s21797_s4 + $0x108] sm:$0xf] }
 0x19b   : > { %v13134_v55 = vor.u32 %v16107_v22, %v13133_v52  ;;  %v16092_v57 = vld [vmem:[%s21797_s4 + $0x10c] sm:$0xf]  ;;  %v13285_v52 = vld [vmem:[%s21797_s4 + $0x218] sm:$0xf] }
 0x19c   : > { %v3124_v24 = vadd.f32 %v3123_v8, %v3110_v63  ;;  %v3150_v12 = vadd.f32 %v3149_v53, %v3136_v0  ;;  %v16091_v53 = vld [vmem:[%s21797_s4 + $0x104] sm:$0xf]  ;;  %v13142_v8 = vor.u32 %v16108_v51, %v13141_v41  ;;  %v13005_v0 = vld [vmem:[%s21797_s4] sm:$0xf]  ;;  %v16142_v22 = vld [vmem:[%s21797_s4 + $0x294] sm:$0xf0] }
 0x19d   : > { %v13138_v63 = vor.u32 %v16091_v53, %v13135_v25  ;;  %3965 = vmatpush.bf16.msra.mxu1 %v13134_v55  ;;  %v16126_v53 = vld [vmem:[%s21797_s4 + $0x21c] sm:$0xf]  ;;  %v13286_v55 = vor.u32 %v16142_v22, %v13285_v52  ;;  %v13149_v41 = vld [vmem:[%s21797_s4 + $0x110] sm:$0xf]  ;;  %v13422_v22 = vor.u32 %v16175_v32, %v13421_v11  ;;  %v13045_v11 = vld [vmem:[%s21797_s4 + $0x28] sm:$0xf] }
 0x19e   : > { %3991 = vmatpush.bf16.msra.mxu3 %v13142_v8  ;;  %v13287_v25 = vld [vmem:[%s21797_s4 + $0x298] sm:$0xf0]  ;;  %v16109_v51 = vld [vmem:[%s21797_s4 + $0x18c] sm:$0xf0]  ;;  %v16093_v8 = vld [vmem:[%s21797_s4 + $0x114] sm:$0xf] }
 0x19f   : > { %3978 = vmatpush.bf16.msra.mxu2 %v13138_v63  ;;  %v13290_v63 = vor.u32 %v16126_v53, %v13287_v25  ;;  %v16143_v25 = vld [vmem:[%s21797_s4 + $0x29c] sm:$0xf0]  ;;  %v16080_v32 = vld [vmem:[%s21797_s4 + $0xa4] sm:$0xf0] }
 0x1a1   : > { %v3137_v60 = vpop.f32.mrf.mxu2 }
 0x1a2   : > { %v3138_v20 = vadd.f32 %v3137_v60, %v3124_v24  ;;  %v3151_v23 = vpop.f32.mrf.mxu3  ;;  %v13143_v24 = vld [vmem:[%s21797_s4 + $0x188] sm:$0xf0] }
 0x1a3   : > { %v13146_v60 = vor.u32 %v16092_v57, %v13143_v24  ;;  %v13151_v57 = vld [vmem:[%s21797_s4 + $0x190] sm:$0xf0]  ;;  %v13157_v24 = vld [vmem:[%s21797_s4 + $0x118] sm:$0xf] }
 0x1a4   : > { %v3152_v37 = vadd.f32 %v3151_v23, %v3138_v20  ;;  %v16075_v20 = vld [vmem:[%s21797_s4 + $0x7c] sm:$0xf0]  ;;  %v16059_v23 = vld [vmem:[%s21797_s4 + $0x4] sm:$0xf] }
 0x1a6   : > { %3179 = vmatpush.msra.mxu0 %v3152_v37  ;;  %v13006_v37 = vor.u32 %v16075_v20, %v13005_v0  ;;  %v16110_v0 = vld [vmem:[%s21797_s4 + $0x194] sm:$0xf0]  ;;  %v16094_v20 = vld [vmem:[%s21797_s4 + $0x11c] sm:$0xf] }
 0x1a8   : > { %3180 = vmatpush.msra.mxu0 %v3150_v12  ;;  %v13007_v12 = vld [vmem:[%s21797_s4 + $0x80] sm:$0xf0]  ;;  %3966 = vmatpush.bf16.msra.mxu1 %v13006_v37  ;;  %v13154_v37 = vor.u32 %v16093_v8, %v13151_v57  ;;  %v13301_v57 = vld [vmem:[%s21797_s4 + $0x228] sm:$0xf] }
 0x1a9   : > { %13002 = vmatmul.msk.f32.vlgmr.msra.gmra.mxu0 %vm3161_vm0, %v3154_v54  ;;  %v13013_v54 = vld [vmem:[%s21797_s4 + $0x8] sm:$0xf]  ;;  %v13010_v47 = vor.u32 %v16059_v23, %v13007_v12  ;;  %v13159_v23 = vld [vmem:[%s21797_s4 + $0x198] sm:$0xf0]  ;;  %v13158_v12 = vor.u32 %v16110_v0, %v13157_v24  ;;  %v13295_v8 = vld [vmem:[%s21797_s4 + $0x2a0] sm:$0xf0] }
 0x1aa   : > { %4002 = vmatpush.bf16.msrb.mxu0 %v13402_v59  ;;  %v13014_v34 = vor.u32 %v16076_v48, %v13013_v54  ;;  %v16174_v59 = vld [vmem:[%s21797_s4 + $0x394] sm:$0xf0]  ;;  %v13021_v54 = vld [vmem:[%s21797_s4 + $0x10] sm:$0xf]  ;;  %v16144_v24 = vld [vmem:[%s21797_s4 + $0x2a4] sm:$0xf0] }
 0x1ab   : > { %3979 = vmatpush.bf16.msra.mxu2 %v13010_v47  ;;  %v13414_v1 = vor.u32 %v16174_v59, %v13413_v19  ;;  %v16077_v48 = vld [vmem:[%s21797_s4 + $0x8c] sm:$0xf0]  ;;  %v16061_v47 = vld [vmem:[%s21797_s4 + $0x14] sm:$0xf]  ;;  %v13034_v19 = vor.u32 %v16062_v44, %v13031_v13  ;;  %v13303_v0 = vld [vmem:[%s21797_s4 + $0x2a8] sm:$0xf0] }
 0x1ac   : > { %3992 = vmatpush.bf16.msra.mxu3 %v13014_v34  ;;  %4015 = vmatpush.bf16.msrb.mxu1 %v13406_v49  ;;  %v13162_v34 = vor.u32 %v16094_v20, %v13159_v23  ;;  %v13022_v38 = vor.u32 %v16077_v48, %v13021_v54  ;;  %v13026_v49 = vor.u32 %v16061_v47, %v13023_v28  ;;  %v16095_v47 = vld [vmem:[%s21797_s4 + $0x124] sm:$0xf]  ;;  %v13173_v28 = vld [vmem:[%s21797_s4 + $0x128] sm:$0xf]  ;;  %v13175_v44 = vld [vmem:[%s21797_s4 + $0x1a8] sm:$0xf0] }
 0x1ad   : > { %v13302_v54 = vor.u32 %v16144_v24, %v13301_v57  ;;  %v13309_v24 = vld [vmem:[%s21797_s4 + $0x230] sm:$0xf] }
 0x1ae   : > { %4003 = vmatpush.bf16.msrb.mxu0 %v13274_v50  ;;  %v13282_v50 = vor.u32 %v16125_v56, %v13279_v33  ;;  %v16176_v56 = vld [vmem:[%s21797_s4 + $0x3a4] sm:$0xf0] }
 0x1af   : > { %4028 = vmatpush.bf16.msrb.mxu2 %v13410_v39 }
 0x1b0   : > { %4041 = vmatpush.bf16.msrb.mxu3 %v13414_v1  ;;  %4016 = vmatpush.bf16.msrb.mxu1 %v13278_v35  ;;  %v16160_v35 = vld [vmem:[%s21797_s4 + $0x32c] sm:$0xf] }
 0x1b2   : > { %4004 = vmatpush.bf16.msrb.mxu0 %v13146_v60  ;;  %v13150_v60 = vor.u32 %v16109_v51, %v13149_v41  ;;  %v13430_v41 = vor.u32 %v16176_v56, %v13429_v62 }
 0x1b3   : > { %4029 = vmatpush.bf16.msrb.mxu2 %v13282_v50  ;;  %v13431_v50 = vld [vmem:[%s21797_s4 + $0x3a8] sm:$0xf0] }
 0x1b4   : > { %4042 = vmatpush.bf16.msrb.mxu3 %v13286_v55  ;;  %4017 = vmatpush.bf16.msrb.mxu1 %v13150_v60  ;;  %v13293_v55 = vld [vmem:[%s21797_s4 + $0x220] sm:$0xf]  ;;  %v13434_v51 = vor.u32 %v16160_v35, %v13431_v50  ;;  %v16128_v60 = vld [vmem:[%s21797_s4 + $0x22c] sm:$0xf]  ;;  %v16177_v35 = vld [vmem:[%s21797_s4 + $0x3ac] sm:$0xf0]  ;;  %v13046_v50 = vor.u32 %v16080_v32, %v13045_v11 }
 0x1b5   : > { %v13294_v20 = vor.u32 %v16143_v25, %v13293_v55  ;;  %v13306_v48 = vor.u32 %v16128_v60, %v13303_v0  ;;  %v13439_v55 = vld [vmem:[%s21797_s4 + $0x3b0] sm:$0xf0]  ;;  %v13445_v25 = vld [vmem:[%s21797_s4 + $0x338] sm:$0xf]  ;;  %v16145_v60 = vld [vmem:[%s21797_s4 + $0x2ac] sm:$0xf0] }
 0x1b6   : > { %4005 = vmatpush.bf16.msrb.mxu0 %v13018_v40  ;;  %v16078_v40 = vld [vmem:[%s21797_s4 + $0x94] sm:$0xf0]  ;;  %v13053_v32 = vld [vmem:[%s21797_s4 + $0x30] sm:$0xf] }
 0x1b7   : > { %4030 = vmatpush.bf16.msrb.mxu2 %v13154_v37  ;;  %v13030_v31 = vor.u32 %v16078_v40, %v13029_v58  ;;  %v13165_v37 = vld [vmem:[%s21797_s4 + $0x120] sm:$0xf]  ;;  %v16112_v58 = vld [vmem:[%s21797_s4 + $0x1a4] sm:$0xf0]  ;;  %v16096_v40 = vld [vmem:[%s21797_s4 + $0x12c] sm:$0xf] }
 0x1b8   : > { %4043 = vmatpush.bf16.msrb.mxu3 %v13158_v12  ;;  %4018 = vmatpush.bf16.msrb.mxu1 %v13022_v38  ;;  %v16111_v12 = vld [vmem:[%s21797_s4 + $0x19c] sm:$0xf0] }
 0x1b9   : > { %v13166_v13 = vor.u32 %v16111_v12, %v13165_v37  ;;  %v13311_v37 = vld [vmem:[%s21797_s4 + $0x2b0] sm:$0xf0]  ;;  %v13317_v12 = vld [vmem:[%s21797_s4 + $0x238] sm:$0xf] }
 0x1ba   : > { %4054 = vmatpush.bf16.msra.mxu0 %v13418_v61  ;;  %v13423_v61 = vld [vmem:[%s21797_s4 + $0x3a0] sm:$0xf0] }
 0x1bb   : > { %4031 = vmatpush.bf16.msrb.mxu2 %v13026_v49  ;;  %v3159_v59 = vpop.permute.xlu0 %3158  ;;  %v13426_v53 = vor.u32 %v16159_v36, %v13423_v61  ;;  %v13037_v49 = vld [vmem:[%s21797_s4 + $0x20] sm:$0xf]  ;;  %v16064_v36 = vld [vmem:[%s21797_s4 + $0x2c] sm:$0xf] }
 0x1bc   : > { %4044 = vmatpush.bf16.msrb.mxu3 %v13030_v31  ;;  %v16079_v31 = vld [vmem:[%s21797_s4 + $0x9c] sm:$0xf0]  ;;  %v13047_v61 = vld [vmem:[%s21797_s4 + $0xa8] sm:$0xf0] }
 0x1bd   : > { %v13038_v62 = vor.u32 %v16079_v31, %v13037_v49  ;;  %v13183_v49 = vld [vmem:[%s21797_s4 + $0x1b0] sm:$0xf0]  ;;  %v13189_v31 = vld [vmem:[%s21797_s4 + $0x138] sm:$0xf] }
 0x1be   : > { %4055 = vmatpush.bf16.msra.mxu0 %v13290_v63  ;;  %v16127_v63 = vld [vmem:[%s21797_s4 + $0x224] sm:$0xf] }
 0x1bf   : > { %v13298_v23 = vor.u32 %v16127_v63, %v13295_v8  ;;  %v13447_v63 = vld [vmem:[%s21797_s4 + $0x3b8] sm:$0xf0] }
 0x1c2   : > { %4056 = vmatpush.bf16.msra.mxu0 %v13162_v34  ;;  %v13167_v34 = vld [vmem:[%s21797_s4 + $0x1a0] sm:$0xf0] }
 0x1c3   : > { %v13170_v38 = vor.u32 %v16095_v47, %v13167_v34  ;;  %v13319_v47 = vld [vmem:[%s21797_s4 + $0x2b8] sm:$0xf0]  ;;  %v13310_v34 = vor.u32 %v16145_v60, %v13309_v24  ;;  %v13461_v24 = vld [vmem:[%s21797_s4 + $0x348] sm:$0xf] }
 0x1c6   : > { %4057 = vmatpush.bf16.msra.mxu0 %v13034_v19  ;;  %v13174_v19 = vor.u32 %v16112_v58, %v13173_v28  ;;  %v13181_v58 = vld [vmem:[%s21797_s4 + $0x130] sm:$0xf] }
 0x226   : > { %v3182_v39 = vpop.f32.mrf.mxu0 }
 0x227   : > { %v3183_v1 = vadd.f32 %v3182_v39, %v3159_v59  ;;  %v13178_v59 = vor.u32 %v16096_v40, %v13175_v44  ;;  %v16063_v39 = vld [vmem:[%s21797_s4 + $0x24] sm:$0xf]  ;;  %v16113_v40 = vld [vmem:[%s21797_s4 + $0x1ac] sm:$0xf0] }
 0x229   : > { %v3185_v33 = vmax.f32 %v3183_v1, 0.0  ;;  %v13039_v1 = vld [vmem:[%s21797_s4 + $0xa0] sm:$0xf0] }
 0x22a   : > { %v13042_v56 = vor.u32 %v16063_v39, %v13039_v1  ;;  %v13191_v39 = vld [vmem:[%s21797_s4 + $0x1b8] sm:$0xf0]  ;;  %v13182_v1 = vor.u32 %v16113_v40, %v13181_v58  ;;  %v13327_v58 = vld [vmem:[%s21797_s4 + $0x2c0] sm:$0xf0]  ;;  %v13333_v40 = vld [vmem:[%s21797_s4 + $0x248] sm:$0xf] }
 0x22b   : > { %v18416_v52 = vpack.c.bf16 %v3185_v33, %v3185_v33  ;;  %v13437_v33 = vld [vmem:[%s21797_s4 + $0x330] sm:$0xf] }
 0x22c   : > { %v13438_v8 = vor.u32 %v16177_v35, %v13437_v33  ;;  %v13055_v33 = vld [vmem:[%s21797_s4 + $0xb0] sm:$0xf0]  ;;  %v13061_v35 = vld [vmem:[%s21797_s4 + $0x38] sm:$0xf] }
 0x22d   : > { %13515 = vmatmul.msk.bf16.vlgmr.msra.gmra.mxu1 %vm3955_vm1, %v18416_v52  ;;  %13516 = vmatmul.msk.bf16.vlgmr.msra.gmra.mxu2 %vm3955_vm1, %v18416_v52 }
 0x22e   : > { %13517 = vmatmul.msk.bf16.vlgmr.msra.gmra.mxu3 %vm3955_vm1, %v18416_v52  ;;  %13518 = vmatmul.msk.bf16.vlgmr.msrb.gmra.mxu0 %vm3955_vm1, %v18416_v52 }
 0x22f   : > { %4067 = vmatpush.bf16.msra.mxu1 %v13422_v22  ;;  %4080 = vmatpush.bf16.msra.mxu2 %v13426_v53  ;;  %v13050_v22 = vor.u32 %v16064_v36, %v13047_v61  ;;  %v16161_v53 = vld [vmem:[%s21797_s4 + $0x334] sm:$0xf]  ;;  %v16081_v36 = vld [vmem:[%s21797_s4 + $0xac] sm:$0xf0] }
 0x230   : > { %4093 = vmatpush.bf16.msra.mxu3 %v13430_v41  ;;  %4106 = vmatpush.bf16.msrb.mxu0 %v13434_v51  ;;  %v16178_v41 = vld [vmem:[%s21797_s4 + $0x3b4] sm:$0xf0]  ;;  %v16162_v51 = vld [vmem:[%s21797_s4 + $0x33c] sm:$0xf]  ;;  %v13442_v57 = vor.u32 %v16161_v53, %v13439_v55  ;;  %v13054_v55 = vor.u32 %v16081_v36, %v13053_v32  ;;  %v13199_v32 = vld [vmem:[%s21797_s4 + $0x1c0] sm:$0xf0] }
 0x231   : > { %v13446_v0 = vor.u32 %v16178_v41, %v13445_v25  ;;  %v13063_v53 = vld [vmem:[%s21797_s4 + $0xb8] sm:$0xf0]  ;;  %v13453_v41 = vld [vmem:[%s21797_s4 + $0x340] sm:$0xf]  ;;  %v13205_v36 = vld [vmem:[%s21797_s4 + $0x148] sm:$0xf] }
 0x233   : > { %4068 = vmatpush.bf16.msra.mxu1 %v13294_v20  ;;  %4081 = vmatpush.bf16.msra.mxu2 %v13298_v23  ;;  %v13450_v20 = vor.u32 %v16162_v51, %v13447_v63  ;;  %v16129_v23 = vld [vmem:[%s21797_s4 + $0x234] sm:$0xf]  ;;  %v16179_v51 = vld [vmem:[%s21797_s4 + $0x3bc] sm:$0xf0] }
 0x234   : > { %4094 = vmatpush.bf16.msra.mxu3 %v13302_v54  ;;  %4107 = vmatpush.bf16.msrb.mxu0 %v13306_v48  ;;  %v16146_v54 = vld [vmem:[%s21797_s4 + $0x2b4] sm:$0xf0]  ;;  %v16130_v48 = vld [vmem:[%s21797_s4 + $0x23c] sm:$0xf]  ;;  %v13314_v28 = vor.u32 %v16129_v23, %v13311_v37  ;;  %v13463_v23 = vld [vmem:[%s21797_s4 + $0x3c8] sm:$0xf0]  ;;  %v13454_v37 = vor.u32 %v16179_v51, %v13453_v41 }
 0x235   : > { %v13318_v44 = vor.u32 %v16146_v54, %v13317_v12  ;;  %v13325_v54 = vld [vmem:[%s21797_s4 + $0x240] sm:$0xf]  ;;  %v13071_v41 = vld [vmem:[%s21797_s4 + $0xc0] sm:$0xf0]  ;;  %v13077_v51 = vld [vmem:[%s21797_s4 + $0x48] sm:$0xf] }
 0x237   : > { %4069 = vmatpush.bf16.msra.mxu1 %v13166_v13  ;;  %4082 = vmatpush.bf16.msra.mxu2 %v13170_v38  ;;  %v13322_v13 = vor.u32 %v16130_v48, %v13319_v47  ;;  %v16097_v38 = vld [vmem:[%s21797_s4 + $0x134] sm:$0xf]  ;;  %v16147_v48 = vld [vmem:[%s21797_s4 + $0x2bc] sm:$0xf0] }
 0x238   : > { %4095 = vmatpush.bf16.msra.mxu3 %v13174_v19  ;;  %4108 = vmatpush.bf16.msrb.mxu0 %v13178_v59  ;;  %v16114_v19 = vld [vmem:[%s21797_s4 + $0x1b4] sm:$0xf0]  ;;  %v16098_v59 = vld [vmem:[%s21797_s4 + $0x13c] sm:$0xf]  ;;  %v13186_v11 = vor.u32 %v16097_v38, %v13183_v49  ;;  %v13335_v38 = vld [vmem:[%s21797_s4 + $0x2c8] sm:$0xf0]  ;;  %v13326_v49 = vor.u32 %v16147_v48, %v13325_v54 }
 0x239   : > { %v13190_v61 = vor.u32 %v16114_v19, %v13189_v31  ;;  %v13197_v19 = vld [vmem:[%s21797_s4 + $0x140] sm:$0xf]  ;;  %v13477_v54 = vld [vmem:[%s21797_s4 + $0x358] sm:$0xf] }
 0x23b   : > { %4070 = vmatpush.bf16.msra.mxu1 %v13038_v62  ;;  %4083 = vmatpush.bf16.msra.mxu2 %v13042_v56  ;;  %v13194_v62 = vor.u32 %v16098_v59, %v13191_v39  ;;  %v16065_v56 = vld [vmem:[%s21797_s4 + $0x34] sm:$0xf]  ;;  %v16115_v59 = vld [vmem:[%s21797_s4 + $0x1bc] sm:$0xf0] }
 0x23c   : > { %4096 = vmatpush.bf16.msra.mxu3 %v13046_v50  ;;  %4109 = vmatpush.bf16.msrb.mxu0 %v13050_v22  ;;  %v16082_v50 = vld [vmem:[%s21797_s4 + $0xb4] sm:$0xf0]  ;;  %v16066_v22 = vld [vmem:[%s21797_s4 + $0x3c] sm:$0xf]  ;;  %v13058_v25 = vor.u32 %v16065_v56, %v13055_v33  ;;  %v13207_v56 = vld [vmem:[%s21797_s4 + $0x1c8] sm:$0xf0]  ;;  %v13198_v33 = vor.u32 %v16115_v59, %v13197_v19 }
 0x23d   : > { %13519 = vmatmul.msk.bf16.vlgmr.msrb.gmra.mxu1 %vm3955_vm1, %v18416_v52  ;;  %13520 = vmatmul.msk.bf16.vlgmr.msrb.gmra.mxu2 %vm3955_vm1, %v18416_v52  ;;  %v13062_v63 = vor.u32 %v16082_v50, %v13061_v35  ;;  %v13066_v60 = vor.u32 %v16066_v22, %v13063_v53  ;;  %v13069_v50 = vld [vmem:[%s21797_s4 + $0x40] sm:$0xf]  ;;  %v13343_v19 = vld [vmem:[%s21797_s4 + $0x2d0] sm:$0xf0]  ;;  %v13349_v59 = vld [vmem:[%s21797_s4 + $0x258] sm:$0xf] }
 0x23e   : > { %13521 = vmatmul.msk.bf16.vlgmr.msrb.gmra.mxu3 %vm3955_vm1, %v18416_v52  ;;  %13522 = vmatmul.msk.bf16.vlgmr.msra.gmra.mxu0 %vm3955_vm1, %v18416_v52  ;;  %v16083_v22 = vld [vmem:[%s21797_s4 + $0xbc] sm:$0xf0] }
 0x23f   : > { %4119 = vmatpush.bf16.msrb.mxu1 %v13438_v8  ;;  %4132 = vmatpush.bf16.msrb.mxu2 %v13442_v57  ;;  %v16163_v8 = vld [vmem:[%s21797_s4 + $0x344] sm:$0xf] }
 0x240   : > { %4145 = vmatpush.bf16.msrb.mxu3 %v13446_v0  ;;  %4158 = vmatpush.bf16.msra.mxu0 %v13450_v20  ;;  %v13455_v57 = vld [vmem:[%s21797_s4 + $0x3c0] sm:$0xf0]  ;;  %v16180_v0 = vld [vmem:[%s21797_s4 + $0x3c4] sm:$0xf0]  ;;  %v16164_v20 = vld [vmem:[%s21797_s4 + $0x34c] sm:$0xf] }
 0x241   : > { %v13458_v12 = vor.u32 %v16163_v8, %v13455_v57  ;;  %v13462_v47 = vor.u32 %v16180_v0, %v13461_v24  ;;  %v16068_v8 = vld [vmem:[%s21797_s4 + $0x4c] sm:$0xf]  ;;  %v13070_v24 = vor.u32 %v16083_v22, %v13069_v50  ;;  %v13469_v0 = vld [vmem:[%s21797_s4 + $0x350] sm:$0xf]  ;;  %v13215_v50 = vld [vmem:[%s21797_s4 + $0x1d0] sm:$0xf0] }
 0x242   : > { %v13079_v57 = vld [vmem:[%s21797_s4 + $0xc8] sm:$0xf0]  ;;  %v13221_v22 = vld [vmem:[%s21797_s4 + $0x158] sm:$0xf] }
 0x243   : > { %4120 = vmatpush.bf16.msrb.mxu1 %v13310_v34  ;;  %4133 = vmatpush.bf16.msrb.mxu2 %v13314_v28  ;;  %v13466_v34 = vor.u32 %v16164_v20, %v13463_v23  ;;  %v16131_v28 = vld [vmem:[%s21797_s4 + $0x244] sm:$0xf]  ;;  %v16181_v20 = vld [vmem:[%s21797_s4 + $0x3cc] sm:$0xf0]  ;;  %v13082_v48 = vor.u32 %v16068_v8, %v13079_v57 }
 0x244   : > { %4146 = vmatpush.bf16.msrb.mxu3 %v13318_v44  ;;  %4159 = vmatpush.bf16.msra.mxu0 %v13322_v13  ;;  %v16148_v44 = vld [vmem:[%s21797_s4 + $0x2c4] sm:$0xf0]  ;;  %v16132_v13 = vld [vmem:[%s21797_s4 + $0x24c] sm:$0xf]  ;;  %v13330_v31 = vor.u32 %v16131_v28, %v13327_v58  ;;  %v13479_v28 = vld [vmem:[%s21797_s4 + $0x3d8] sm:$0xf0]  ;;  %v13470_v58 = vor.u32 %v16181_v20, %v13469_v0 }
 0x245   : > { %v13334_v39 = vor.u32 %v16148_v44, %v13333_v40  ;;  %v13341_v44 = vld [vmem:[%s21797_s4 + $0x250] sm:$0xf]  ;;  %v13087_v0 = vld [vmem:[%s21797_s4 + $0xd0] sm:$0xf0]  ;;  %v13093_v20 = vld [vmem:[%s21797_s4 + $0x58] sm:$0xf] }
 0x246   : > { %v16085_v8 = vld [vmem:[%s21797_s4 + $0xcc] sm:$0xf0] }
 0x247   : > { %4121 = vmatpush.bf16.msrb.mxu1 %v13182_v1  ;;  %4134 = vmatpush.bf16.msrb.mxu2 %v13186_v11  ;;  %v13338_v1 = vor.u32 %v16132_v13, %v13335_v38  ;;  %v16099_v11 = vld [vmem:[%s21797_s4 + $0x144] sm:$0xf]  ;;  %v16149_v13 = vld [vmem:[%s21797_s4 + $0x2cc] sm:$0xf0] }
 0x248   : > { %4147 = vmatpush.bf16.msrb.mxu3 %v13190_v61  ;;  %4160 = vmatpush.bf16.msra.mxu0 %v13194_v62  ;;  %v16116_v61 = vld [vmem:[%s21797_s4 + $0x1c4] sm:$0xf0]  ;;  %v16100_v62 = vld [vmem:[%s21797_s4 + $0x14c] sm:$0xf]  ;;  %v13202_v35 = vor.u32 %v16099_v11, %v13199_v32  ;;  %v13351_v11 = vld [vmem:[%s21797_s4 + $0x2d8] sm:$0xf0]  ;;  %v13342_v32 = vor.u32 %v16149_v13, %v13341_v44 }
 0x249   : > { %v13206_v53 = vor.u32 %v16116_v61, %v13205_v36  ;;  %v13213_v61 = vld [vmem:[%s21797_s4 + $0x150] sm:$0xf]  ;;  %v13493_v44 = vld [vmem:[%s21797_s4 + $0x368] sm:$0xf] }
 0x24b   : > { %4122 = vmatpush.bf16.msrb.mxu1 %v13054_v55  ;;  %4135 = vmatpush.bf16.msrb.mxu2 %v13058_v25  ;;  %v13210_v55 = vor.u32 %v16100_v62, %v13207_v56  ;;  %v16067_v25 = vld [vmem:[%s21797_s4 + $0x44] sm:$0xf]  ;;  %v16117_v62 = vld [vmem:[%s21797_s4 + $0x1cc] sm:$0xf0] }
 0x24c   : > { %4148 = vmatpush.bf16.msrb.mxu3 %v13062_v63  ;;  %4161 = vmatpush.bf16.msra.mxu0 %v13066_v60  ;;  %v16084_v63 = vld [vmem:[%s21797_s4 + $0xc4] sm:$0xf0]  ;;  %v13074_v60 = vor.u32 %v16067_v25, %v13071_v41  ;;  %v13223_v25 = vld [vmem:[%s21797_s4 + $0x1d8] sm:$0xf0]  ;;  %v13214_v41 = vor.u32 %v16117_v62, %v13213_v61  ;;  %v13359_v61 = vld [vmem:[%s21797_s4 + $0x2e0] sm:$0xf0] }
 0x24d   : > { %13523 = vmatmul.msk.bf16.vlgmr.msra.gmra.mxu1 %vm3955_vm1, %v18416_v52  ;;  %13524 = vmatmul.msk.bf16.vlgmr.msra.gmra.mxu2 %vm3955_vm1, %v18416_v52  ;;  %v13078_v23 = vor.u32 %v16084_v63, %v13077_v51  ;;  %v13085_v63 = vld [vmem:[%s21797_s4 + $0x50] sm:$0xf]  ;;  %v13365_v62 = vld [vmem:[%s21797_s4 + $0x268] sm:$0xf] }
 0x24e   : > { %13525 = vmatmul.msk.bf16.vlgmr.msra.gmra.mxu3 %vm3955_vm1, %v18416_v52  ;;  %13526 = vmatmul.msk.bf16.vlgmr.msrb.gmra.mxu0 %vm3955_vm1, %v18416_v52 }
 0x24f   : > { %4171 = vmatpush.bf16.msra.mxu1 %v13454_v37  ;;  %4184 = vmatpush.bf16.msra.mxu2 %v13458_v12  ;;  %v16165_v37 = vld [vmem:[%s21797_s4 + $0x354] sm:$0xf] }
 0x250   : > { %4197 = vmatpush.bf16.msra.mxu3 %v13462_v47  ;;  %4210 = vmatpush.bf16.msrb.mxu0 %v13466_v34  ;;  %v13471_v12 = vld [vmem:[%s21797_s4 + $0x3d0] sm:$0xf0]  ;;  %v16182_v47 = vld [vmem:[%s21797_s4 + $0x3d4] sm:$0xf0]  ;;  %v16166_v34 = vld [vmem:[%s21797_s4 + $0x35c] sm:$0xf] }
 0x251   : > { %v13474_v40 = vor.u32 %v16165_v37, %v13471_v12  ;;  %v13478_v38 = vor.u32 %v16182_v47, %v13477_v54  ;;  %v16070_v37 = vld [vmem:[%s21797_s4 + $0x5c] sm:$0xf]  ;;  %v13086_v54 = vor.u32 %v16085_v8, %v13085_v63  ;;  %v13485_v47 = vld [vmem:[%s21797_s4 + $0x360] sm:$0xf]  ;;  %v13231_v63 = vld [vmem:[%s21797_s4 + $0x1e0] sm:$0xf0] }
 0x252   : > { %v13095_v12 = vld [vmem:[%s21797_s4 + $0xd8] sm:$0xf0]  ;;  %v13237_v8 = vld [vmem:[%s21797_s4 + $0x168] sm:$0xf] }
 0x253   : > { %4172 = vmatpush.bf16.msra.mxu1 %v13326_v49  ;;  %4185 = vmatpush.bf16.msra.mxu2 %v13330_v31  ;;  %v13482_v49 = vor.u32 %v16166_v34, %v13479_v28  ;;  %v16133_v31 = vld [vmem:[%s21797_s4 + $0x254] sm:$0xf]  ;;  %v16183_v34 = vld [vmem:[%s21797_s4 + $0x3dc] sm:$0xf0]  ;;  %v13098_v13 = vor.u32 %v16070_v37, %v13095_v12 }
 0x254   : > { %4198 = vmatpush.bf16.msra.mxu3 %v13334_v39  ;;  %4211 = vmatpush.bf16.msrb.mxu0 %v13338_v1  ;;  %v16150_v39 = vld [vmem:[%s21797_s4 + $0x2d4] sm:$0xf0]  ;;  %v16134_v1 = vld [vmem:[%s21797_s4 + $0x25c] sm:$0xf]  ;;  %v13346_v36 = vor.u32 %v16133_v31, %v13343_v19  ;;  %v13495_v31 = vld [vmem:[%s21797_s4 + $0x3e8] sm:$0xf0]  ;;  %v13486_v19 = vor.u32 %v16183_v34, %v13485_v47 }
 0x255   : > { %v13350_v56 = vor.u32 %v16150_v39, %v13349_v59  ;;  %v13357_v39 = vld [vmem:[%s21797_s4 + $0x260] sm:$0xf]  ;;  %v13103_v47 = vld [vmem:[%s21797_s4 + $0xe0] sm:$0xf0]  ;;  %v13109_v34 = vld [vmem:[%s21797_s4 + $0x68] sm:$0xf] }
 0x256   : > { %v16087_v37 = vld [vmem:[%s21797_s4 + $0xdc] sm:$0xf0] }
 0x257   : > { %4173 = vmatpush.bf16.msra.mxu1 %v13198_v33  ;;  %4186 = vmatpush.bf16.msra.mxu2 %v13202_v35  ;;  %v13354_v33 = vor.u32 %v16134_v1, %v13351_v11  ;;  %v16101_v35 = vld [vmem:[%s21797_s4 + $0x154] sm:$0xf]  ;;  %v16151_v1 = vld [vmem:[%s21797_s4 + $0x2dc] sm:$0xf0] }
 0x258   : > { %4199 = vmatpush.bf16.msra.mxu3 %v13206_v53  ;;  %4212 = vmatpush.bf16.msrb.mxu0 %v13210_v55  ;;  %v16118_v53 = vld [vmem:[%s21797_s4 + $0x1d4] sm:$0xf0]  ;;  %v16102_v55 = vld [vmem:[%s21797_s4 + $0x15c] sm:$0xf]  ;;  %v13218_v51 = vor.u32 %v16101_v35, %v13215_v50  ;;  %v13367_v35 = vld [vmem:[%s21797_s4 + $0x2e8] sm:$0xf0]  ;;  %v13358_v50 = vor.u32 %v16151_v1, %v13357_v39 }
 0x259   : > { %v13222_v57 = vor.u32 %v16118_v53, %v13221_v22  ;;  %v13229_v53 = vld [vmem:[%s21797_s4 + $0x160] sm:$0xf]  ;;  %v13509_v39 = vld [vmem:[%s21797_s4 + $0x378] sm:$0xf] }
 0x25b   : > { %4174 = vmatpush.bf16.msra.mxu1 %v13070_v24  ;;  %4187 = vmatpush.bf16.msra.mxu2 %v13074_v60  ;;  %v13226_v24 = vor.u32 %v16102_v55, %v13223_v25  ;;  %v16069_v60 = vld [vmem:[%s21797_s4 + $0x54] sm:$0xf]  ;;  %v16119_v55 = vld [vmem:[%s21797_s4 + $0x1dc] sm:$0xf0] }
 0x25c   : > { %4200 = vmatpush.bf16.msra.mxu3 %v13078_v23  ;;  %4213 = vmatpush.bf16.msrb.mxu0 %v13082_v48  ;;  %v16086_v23 = vld [vmem:[%s21797_s4 + $0xd4] sm:$0xf0]  ;;  %v13090_v48 = vor.u32 %v16069_v60, %v13087_v0  ;;  %v13239_v60 = vld [vmem:[%s21797_s4 + $0x1e8] sm:$0xf0]  ;;  %v13230_v0 = vor.u32 %v16119_v55, %v13229_v53  ;;  %v13375_v53 = vld [vmem:[%s21797_s4 + $0x2f0] sm:$0xf0] }
 0x25d   : > { %13527 = vmatmul.msk.bf16.vlgmr.msrb.gmra.mxu1 %vm3955_vm1, %v18416_v52  ;;  %13528 = vmatmul.msk.bf16.vlgmr.msrb.gmra.mxu2 %vm3955_vm1, %v18416_v52  ;;  %v13094_v28 = vor.u32 %v16086_v23, %v13093_v20  ;;  %v13101_v23 = vld [vmem:[%s21797_s4 + $0x60] sm:$0xf]  ;;  %v13381_v55 = vld [vmem:[%s21797_s4 + $0x278] sm:$0xf] }
 0x25e   : > { %13529 = vmatmul.msk.bf16.vlgmr.msrb.gmra.mxu3 %vm3955_vm1, %v18416_v52  ;;  %13530 = vmatmul.msk.bf16.vlgmr.msra.gmra.mxu0 %vm3955_vm1, %v18416_v52 }
 0x25f   : > { %4223 = vmatpush.bf16.msrb.mxu1 %v13470_v58  ;;  %4236 = vmatpush.bf16.msrb.mxu2 %v13474_v40  ;;  %v16167_v58 = vld [vmem:[%s21797_s4 + $0x364] sm:$0xf] }
 0x260   : > { %4249 = vmatpush.bf16.msrb.mxu3 %v13478_v38  ;;  %4262 = vmatpush.bf16.msra.mxu0 %v13482_v49  ;;  %v13487_v40 = vld [vmem:[%s21797_s4 + $0x3e0] sm:$0xf0]  ;;  %v16184_v38 = vld [vmem:[%s21797_s4 + $0x3e4] sm:$0xf0]  ;;  %v16168_v49 = vld [vmem:[%s21797_s4 + $0x36c] sm:$0xf] }
 0x261   : > { %v13490_v59 = vor.u32 %v16167_v58, %v13487_v40  ;;  %v13494_v11 = vor.u32 %v16184_v38, %v13493_v44  ;;  %v16072_v58 = vld [vmem:[%s21797_s4 + $0x6c] sm:$0xf]  ;;  %v13102_v44 = vor.u32 %v16087_v37, %v13101_v23  ;;  %v13501_v38 = vld [vmem:[%s21797_s4 + $0x370] sm:$0xf]  ;;  %v13247_v23 = vld [vmem:[%s21797_s4 + $0x1f0] sm:$0xf0] }
 0x262   : > { %v13111_v40 = vld [vmem:[%s21797_s4 + $0xe8] sm:$0xf0]  ;;  %v13253_v37 = vld [vmem:[%s21797_s4 + $0x178] sm:$0xf] }
 0x263   : > { %4224 = vmatpush.bf16.msrb.mxu1 %v13342_v32  ;;  %4237 = vmatpush.bf16.msrb.mxu2 %v13346_v36  ;;  %v13498_v32 = vor.u32 %v16168_v49, %v13495_v31  ;;  %v16135_v36 = vld [vmem:[%s21797_s4 + $0x264] sm:$0xf]  ;;  %v16185_v49 = vld [vmem:[%s21797_s4 + $0x3ec] sm:$0xf0]  ;;  %v13114_v1 = vor.u32 %v16072_v58, %v13111_v40 }
 0x264   : > { %4250 = vmatpush.bf16.msrb.mxu3 %v13350_v56  ;;  %4263 = vmatpush.bf16.msra.mxu0 %v13354_v33  ;;  %v16152_v56 = vld [vmem:[%s21797_s4 + $0x2e4] sm:$0xf0]  ;;  %v16136_v33 = vld [vmem:[%s21797_s4 + $0x26c] sm:$0xf]  ;;  %v13362_v22 = vor.u32 %v16135_v36, %v13359_v61  ;;  %v13511_v36 = vld [vmem:[%s21797_s4 + $0x3f8] sm:$0xf0]  ;;  %v13502_v61 = vor.u32 %v16185_v49, %v13501_v38 }
 0x265   : > { %v13366_v25 = vor.u32 %v16152_v56, %v13365_v62  ;;  %v13373_v56 = vld [vmem:[%s21797_s4 + $0x270] sm:$0xf]  ;;  %v13119_v38 = vld [vmem:[%s21797_s4 + $0xf0] sm:$0xf0]  ;;  %v13125_v49 = vld [vmem:[%s21797_s4 + $0x78] sm:$0xf] }
 0x266   : > { %v16089_v58 = vld [vmem:[%s21797_s4 + $0xec] sm:$0xf0] }
 0x267   : > { %4225 = vmatpush.bf16.msrb.mxu1 %v13214_v41  ;;  %4238 = vmatpush.bf16.msrb.mxu2 %v13218_v51  ;;  %v13370_v41 = vor.u32 %v16136_v33, %v13367_v35  ;;  %v16103_v51 = vld [vmem:[%s21797_s4 + $0x164] sm:$0xf]  ;;  %v16153_v33 = vld [vmem:[%s21797_s4 + $0x2ec] sm:$0xf0] }
 0x268   : > { %4251 = vmatpush.bf16.msrb.mxu3 %v13222_v57  ;;  %4264 = vmatpush.bf16.msra.mxu0 %v13226_v24  ;;  %v16120_v57 = vld [vmem:[%s21797_s4 + $0x1e4] sm:$0xf0]  ;;  %v16104_v24 = vld [vmem:[%s21797_s4 + $0x16c] sm:$0xf]  ;;  %v13234_v20 = vor.u32 %v16103_v51, %v13231_v63  ;;  %v13383_v51 = vld [vmem:[%s21797_s4 + $0x2f8] sm:$0xf0]  ;;  %v13374_v63 = vor.u32 %v16153_v33, %v13373_v56 }
 0x269   : > { %v13238_v12 = vor.u32 %v16120_v57, %v13237_v8  ;;  %v13245_v57 = vld [vmem:[%s21797_s4 + $0x170] sm:$0xf]  ;;  %v16218_v56 = vld [vmem:[%s21795_s2 + $0xf8] sm:$0xff] }
 0x26a   : > { %v16193_v33 = vld [vmem:[%s21795_s2 + $0x30] sm:$0xff] }
 0x26b   : > { %4226 = vmatpush.bf16.msrb.mxu1 %v13086_v54  ;;  %4239 = vmatpush.bf16.msrb.mxu2 %v13090_v48  ;;  %v13242_v54 = vor.u32 %v16104_v24, %v13239_v60  ;;  %v16071_v48 = vld [vmem:[%s21797_s4 + $0x64] sm:$0xf]  ;;  %v16121_v24 = vld [vmem:[%s21797_s4 + $0x1ec] sm:$0xf0] }
 0x26c   : > { %4252 = vmatpush.bf16.msrb.mxu3 %v13094_v28  ;;  %4265 = vmatpush.bf16.msra.mxu0 %v13098_v13  ;;  %v16088_v28 = vld [vmem:[%s21797_s4 + $0xe4] sm:$0xf0]  ;;  %v13106_v13 = vor.u32 %v16071_v48, %v13103_v47  ;;  %v13255_v48 = vld [vmem:[%s21797_s4 + $0x1f8] sm:$0xf0]  ;;  %v13246_v47 = vor.u32 %v16121_v24, %v13245_v57  ;;  %v16215_v57 = vld [vmem:[%s21795_s2 + $0xe0] sm:$0xff] }
 0x26d   : > { %13531 = vmatmul.msk.bf16.vlgmr.msra.gmra.mxu1 %vm3955_vm1, %v18416_v52  ;;  %13532 = vmatmul.msk.bf16.vlgmr.msra.gmra.mxu2 %vm3955_vm1, %v18416_v52  ;;  %v13110_v31 = vor.u32 %v16088_v28, %v13109_v34  ;;  %v13117_v28 = vld [vmem:[%s21797_s4 + $0x70] sm:$0xf]  ;;  %v16190_v24 = vld [vmem:[%s21795_s2 + $0x18] sm:$0xff] }
 0x26e   : > { %13533 = vmatmul.msk.bf16.vlgmr.msra.gmra.mxu3 %vm3955_vm1, %v18416_v52  ;;  %13534 = vmatmul.msk.bf16.vlgmr.msrb.gmra.mxu0 %vm3955_vm1, %v18416_v52 }
 0x26f   : > { %4275 = vmatpush.bf16.msra.mxu1 %v13486_v19  ;;  %4288 = vmatpush.bf16.msra.mxu2 %v13490_v59  ;;  %v16169_v19 = vld [vmem:[%s21797_s4 + $0x374] sm:$0xf] }
 0x270   : > { %4301 = vmatpush.bf16.msra.mxu3 %v13494_v11  ;;  %4314 = vmatpush.bf16.msrb.mxu0 %v13498_v32  ;;  %v13503_v59 = vld [vmem:[%s21797_s4 + $0x3f0] sm:$0xf0]  ;;  %v16186_v11 = vld [vmem:[%s21797_s4 + $0x3f4] sm:$0xf0]  ;;  %v16170_v32 = vld [vmem:[%s21797_s4 + $0x37c] sm:$0xf] }
 0x271   : > { %v13506_v62 = vor.u32 %v16169_v19, %v13503_v59  ;;  %v13510_v35 = vor.u32 %v16186_v11, %v13509_v39  ;;  %v16074_v19 = vld [vmem:[%s21797_s4 + $0x7c] sm:$0xf]  ;;  %v13118_v39 = vor.u32 %v16089_v58, %v13117_v28  ;;  %v16187_v28 = vld [vmem:[%s21795_s2] sm:$0xff] }
 0x272   : > { %v13127_v59 = vld [vmem:[%s21797_s4 + $0xf8] sm:$0xf0]  ;;  %v16195_v58 = vld [vmem:[%s21795_s2 + $0x40] sm:$0xff] }
 0x273   : > { %4276 = vmatpush.bf16.msra.mxu1 %v13358_v50  ;;  %4289 = vmatpush.bf16.msra.mxu2 %v13362_v22  ;;  %v13514_v50 = vor.u32 %v16170_v32, %v13511_v36  ;;  %v16137_v22 = vld [vmem:[%s21797_s4 + $0x274] sm:$0xf]  ;;  %v13130_v32 = vor.u32 %v16074_v19, %v13127_v59  ;;  %v16194_v36 = vld [vmem:[%s21795_s2 + $0x38] sm:$0xff] }
 0x274   : > { %4302 = vmatpush.bf16.msra.mxu3 %v13366_v25  ;;  %4315 = vmatpush.bf16.msrb.mxu0 %v13370_v41  ;;  %v16154_v25 = vld [vmem:[%s21797_s4 + $0x2f4] sm:$0xf0]  ;;  %v16138_v41 = vld [vmem:[%s21797_s4 + $0x27c] sm:$0xf]  ;;  %v13378_v8 = vor.u32 %v16137_v22, %v13375_v53  ;;  %v16217_v22 = vld [vmem:[%s21795_s2 + $0xf0] sm:$0xff] }
 0x275   : > { %v13382_v60 = vor.u32 %v16154_v25, %v13381_v55  ;;  %v16192_v53 = vld [vmem:[%s21795_s2 + $0x28] sm:$0xff]  ;;  %v16250_v59 = vld [vmem:[%s21795_s2 + $0x1f8] sm:$0xff] }
 0x276   : > { %v16200_v55 = vld [vmem:[%s21795_s2 + $0x68] sm:$0xff] }
 0x277   : > { %4277 = vmatpush.bf16.msra.mxu1 %v13230_v0  ;;  %4290 = vmatpush.bf16.msra.mxu2 %v13234_v20  ;;  %v13386_v0 = vor.u32 %v16138_v41, %v13383_v51  ;;  %v16105_v20 = vld [vmem:[%s21797_s4 + $0x174] sm:$0xf]  ;;  %v16208_v25 = vld [vmem:[%s21795_s2 + $0xa8] sm:$0xff]  ;;  %v16191_v51 = vld [vmem:[%s21795_s2 + $0x20] sm:$0xff] }
 0x278   : > { %4303 = vmatpush.bf16.msra.mxu3 %v13238_v12  ;;  %4316 = vmatpush.bf16.msrb.mxu0 %v13242_v54  ;;  %v16122_v12 = vld [vmem:[%s21797_s4 + $0x1f4] sm:$0xf0]  ;;  %v16106_v54 = vld [vmem:[%s21797_s4 + $0x17c] sm:$0xf]  ;;  %v13250_v34 = vor.u32 %v16105_v20, %v13247_v23  ;;  %v16216_v41 = vld [vmem:[%s21795_s2 + $0xe8] sm:$0xff] }
 0x279   : > { %v13254_v40 = vor.u32 %v16122_v12, %v13253_v37  ;;  %v16214_v20 = vld [vmem:[%s21795_s2 + $0xd8] sm:$0xff]  ;;  %v16189_v23 = vld [vmem:[%s21795_s2 + $0x10] sm:$0xff] }
 0x27a   : > { %v16197_v37 = vld [vmem:[%s21795_s2 + $0x50] sm:$0xff] }
 0x27b   : > { %4278 = vmatpush.bf16.msra.mxu1 %v13102_v44  ;;  %4291 = vmatpush.bf16.msra.mxu2 %v13106_v13  ;;  %v13258_v44 = vor.u32 %v16106_v54, %v13255_v48  ;;  %v16073_v13 = vld [vmem:[%s21797_s4 + $0x74] sm:$0xf]  ;;  %v16188_v54 = vld [vmem:[%s21795_s2 + $0x8] sm:$0xff] }
 0x27c   : > { %4304 = vmatpush.bf16.msra.mxu3 %v13110_v31  ;;  %4317 = vmatpush.bf16.msrb.mxu0 %v13114_v1  ;;  %v16090_v31 = vld [vmem:[%s21797_s4 + $0xf4] sm:$0xf0]  ;;  %v13122_v1 = vor.u32 %v16073_v13, %v13119_v38  ;;  %v16205_v12 = vld [vmem:[%s21795_s2 + $0x90] sm:$0xff]  ;;  %v16196_v48 = vld [vmem:[%s21795_s2 + $0x48] sm:$0xff] }
 0x27d   : > { %13535 = vmatmul.msk.bf16.vlgmr.msrb.gmra.mxu1 %vm3955_vm1, %v18416_v52  ;;  %13536 = vmatmul.msk.bf16.vlgmr.msrb.gmra.mxu2 %vm3955_vm1, %v18416_v52  ;;  %v13126_v11 = vor.u32 %v16090_v31, %v13125_v49  ;;  %v16234_v13 = vld [vmem:[%s21795_s2 + $0x178] sm:$0xff]  ;;  %v16211_v31 = vld [vmem:[%s21795_s2 + $0xc0] sm:$0xff] }
 0x27e   : > { %13537 = vmatmul.msk.bf16.vlgmr.msrb.gmra.mxu3 %vm3955_vm1, %v18416_v52  ;;  %13538 = vmatmul.msk.bf16.vlgmr.msra.gmra.mxu0 %vm3955_vm1, %v18416_v52  ;;  %v16242_v38 = vld [vmem:[%s21795_s2 + $0x1b8] sm:$0xff] }
 0x27f   : > { %4327 = vmatpush.bf16.msrb.mxu1 %v13502_v61  ;;  %4340 = vmatpush.bf16.msrb.mxu2 %v13506_v62  ;;  %v16202_v61 = vld [vmem:[%s21795_s2 + $0x78] sm:$0xff] }
 0x280   : > { %4353 = vmatpush.bf16.msrb.mxu3 %v13510_v35  ;;  %4366 = vmatpush.bf16.msra.mxu0 %v13514_v50  ;;  %v16210_v62 = vld [vmem:[%s21795_s2 + $0xb8] sm:$0xff]  ;;  %v16201_v35 = vld [vmem:[%s21795_s2 + $0x70] sm:$0xff] }
 0x281   : > { %v16209_v50 = vld [vmem:[%s21795_s2 + $0xb0] sm:$0xff] }
 0x283   : > { %4328 = vmatpush.bf16.msrb.mxu1 %v13374_v63  ;;  %4341 = vmatpush.bf16.msrb.mxu2 %v13378_v8  ;;  %v16199_v63 = vld [vmem:[%s21795_s2 + $0x60] sm:$0xff] }
 0x284   : > { %4354 = vmatpush.bf16.msrb.mxu3 %v13382_v60  ;;  %4367 = vmatpush.bf16.msra.mxu0 %v13386_v0  ;;  %v16207_v8 = vld [vmem:[%s21795_s2 + $0xa0] sm:$0xff]  ;;  %v16198_v60 = vld [vmem:[%s21795_s2 + $0x58] sm:$0xff] }
 0x285   : > { %v16206_v0 = vld [vmem:[%s21795_s2 + $0x98] sm:$0xff] }
 0x287   : > { %4329 = vmatpush.bf16.msrb.mxu1 %v13246_v47  ;;  %4342 = vmatpush.bf16.msrb.mxu2 %v13250_v34  ;;  %v16204_v47 = vld [vmem:[%s21795_s2 + $0x88] sm:$0xff] }
 0x288   : > { %4355 = vmatpush.bf16.msrb.mxu3 %v13254_v40  ;;  %4368 = vmatpush.bf16.msra.mxu0 %v13258_v44  ;;  %v16212_v34 = vld [vmem:[%s21795_s2 + $0xc8] sm:$0xff]  ;;  %v16203_v40 = vld [vmem:[%s21795_s2 + $0x80] sm:$0xff]  ;;  %v16226_v44 = vld [vmem:[%s21795_s2 + $0x138] sm:$0xff] }
 0x28b   : > { %4330 = vmatpush.bf16.msrb.mxu1 %v13118_v39  ;;  %4343 = vmatpush.bf16.msrb.mxu2 %v13122_v1  ;;  %v16225_v39 = vld [vmem:[%s21795_s2 + $0x130] sm:$0xff] }
 0x28c   : > { %4356 = vmatpush.bf16.msrb.mxu3 %v13126_v11  ;;  %4369 = vmatpush.bf16.msra.mxu0 %v13130_v32  ;;  %v16233_v1 = vld [vmem:[%s21795_s2 + $0x170] sm:$0xff] }
 0x28d   : > { %13539 = vmatmul.msk.bf16.vlgmr.msra.gmra.mxu1 %vm3955_vm1, %v18416_v52  ;;  %13540 = vmatmul.msk.bf16.vlgmr.msra.gmra.mxu2 %vm3955_vm1, %v18416_v52  ;;  %v16241_v11 = vld [vmem:[%s21795_s2 + $0x1b0] sm:$0xff] }
 0x28e   : > { %13541 = vmatmul.msk.bf16.vlgmr.msra.gmra.mxu3 %vm3955_vm1, %v18416_v52  ;;  %13542 = vmatmul.msk.bf16.vlgmr.msrb.gmra.mxu0 %vm3955_vm1, %v18416_v52  ;;  %v16249_v32 = vld [vmem:[%s21795_s2 + $0x1f0] sm:$0xff] }
 0x28f   : > { %6750 = vmatpush.bf16.msra.mxu1 %v16194_v36  ;;  %6764 = vmatpush.bf16.msra.mxu2 %v16202_v61  ;;  %v16224_v61 = vld [vmem:[%s21795_s2 + $0x128] sm:$0xff] }
 0x290   : > { %6778 = vmatpush.bf16.msra.mxu3 %v16210_v62  ;;  %6792 = vmatpush.bf16.msrb.mxu0 %v16218_v56 }
 0x293   : > { %6751 = vmatpush.bf16.msra.mxu1 %v16193_v33  ;;  %6765 = vmatpush.bf16.msra.mxu2 %v16201_v35  ;;  %v16232_v33 = vld [vmem:[%s21795_s2 + $0x168] sm:$0xff] }
 0x294   : > { %6779 = vmatpush.bf16.msra.mxu3 %v16209_v50  ;;  %6793 = vmatpush.bf16.msrb.mxu0 %v16217_v22  ;;  %v16240_v35 = vld [vmem:[%s21795_s2 + $0x1a8] sm:$0xff] }
 0x297   : > { %6752 = vmatpush.bf16.msra.mxu1 %v16192_v53  ;;  %6766 = vmatpush.bf16.msra.mxu2 %v16200_v55 }
 0x298   : > { %6780 = vmatpush.bf16.msra.mxu3 %v16208_v25  ;;  %6794 = vmatpush.bf16.msrb.mxu0 %v16216_v41 }
 0x29b   : > { %6753 = vmatpush.bf16.msra.mxu1 %v16191_v51  ;;  %6767 = vmatpush.bf16.msra.mxu2 %v16199_v63  ;;  %v16248_v51 = vld [vmem:[%s21795_s2 + $0x1e8] sm:$0xff] }
 0x29c   : > { %6781 = vmatpush.bf16.msra.mxu3 %v16207_v8  ;;  %6795 = vmatpush.bf16.msrb.mxu0 %v16215_v57  ;;  %v16223_v57 = vld [vmem:[%s21795_s2 + $0x120] sm:$0xff] }
 0x29d   : > { %13543 = vmatmul.msk.bf16.vlgmr.msrb.gmra.mxu1 %vm3955_vm1, %v18416_v52  ;;  %13544 = vmatmul.msk.bf16.vlgmr.msrb.gmra.mxu2 %vm3955_vm1, %v18416_v52 }
 0x29e   : > { %13545 = vmatmul.msk.bf16.vlgmr.msrb.gmra.mxu3 %vm3955_vm1, %v18416_v52  ;;  %13546 = vmatmul.msk.bf16.vlgmr.msra.gmra.mxu0 %vm3955_vm1, %v18416_v52  ;;  %v16213_v52 = vld [vmem:[%s21795_s2 + $0xd0] sm:$0xff] }
 0x29f   : > { %6754 = vmatpush.bf16.msra.mxu1 %v16190_v24  ;;  %6768 = vmatpush.bf16.msra.mxu2 %v16198_v60 }
 0x2a0   : > { %6782 = vmatpush.bf16.msra.mxu3 %v16206_v0  ;;  %6796 = vmatpush.bf16.msrb.mxu0 %v16214_v20  ;;  %v16231_v0 = vld [vmem:[%s21795_s2 + $0x160] sm:$0xff] }
 0x2a1   : > { %v16239_v20 = vld [vmem:[%s21795_s2 + $0x1a0] sm:$0xff] }
 0x2a3   : > { %6755 = vmatpush.bf16.msra.mxu1 %v16189_v23  ;;  %6769 = vmatpush.bf16.msra.mxu2 %v16197_v37  ;;  %v16247_v23 = vld [vmem:[%s21795_s2 + $0x1e0] sm:$0xff] }
 0x2a4   : > { %6783 = vmatpush.bf16.msra.mxu3 %v16205_v12  ;;  %6797 = vmatpush.bf16.msrb.mxu0 %v16213_v52  ;;  %v16222_v12 = vld [vmem:[%s21795_s2 + $0x118] sm:$0xff] }
 0x2a7   : > { %6756 = vmatpush.bf16.msra.mxu1 %v16188_v54  ;;  %6770 = vmatpush.bf16.msra.mxu2 %v16196_v48  ;;  %v16230_v54 = vld [vmem:[%s21795_s2 + $0x158] sm:$0xff] }
 0x2a8   : > { %6784 = vmatpush.bf16.msra.mxu3 %v16204_v47  ;;  %6798 = vmatpush.bf16.msrb.mxu0 %v16212_v34  ;;  %v16238_v48 = vld [vmem:[%s21795_s2 + $0x198] sm:$0xff] }
 0x2aa   : > { %v3968_v49 = vpop.f32.mrf.mxu1 }
 0x2ab   : > { %6757 = vmatpush.bf16.msra.mxu1 %v16187_v28  ;;  %6771 = vmatpush.bf16.msra.mxu2 %v16195_v58  ;;  %v4007_v19 = vpop.f32.mrf.mxu0  ;;  %v16246_v28 = vld [vmem:[%s21795_s2 + $0x1d8] sm:$0xff]  ;;  %v16221_v58 = vld [vmem:[%s21795_s2 + $0x110] sm:$0xff] }
 0x2ac   : > { %6785 = vmatpush.bf16.msra.mxu3 %v16203_v40  ;;  %6799 = vmatpush.bf16.msrb.mxu0 %v16211_v31  ;;  %v4409_v50 = vrot.slane %v4007_v19, 2  ;;  %v16229_v40 = vld [vmem:[%s21795_s2 + $0x150] sm:$0xff] }
 0x2ad   : > { %v16245_v19 = vld [vmem:[%s21795_s2 + $0x1d0] sm:$0xff] }
 0x2ae   : > { %6758 = vmatmul.bf16.vlgmr.msra.gmra.mxu1 %v17119_v2  ;;  %6772 = vmatmul.bf16.vlgmr.msra.gmra.mxu2 %v17128_v5 }
 0x2af   : > { %6806 = vmatpush.bf16.msrb.mxu1 %v16226_v44  ;;  %6820 = vmatpush.bf16.msrb.mxu2 %v16234_v13  ;;  %v16237_v44 = vld [vmem:[%s21795_s2 + $0x190] sm:$0xff] }
 0x2b0   : > { %6834 = vmatpush.bf16.msrb.mxu3 %v16242_v38  ;;  %6848 = vmatpush.bf16.msra.mxu0 %v16250_v59  ;;  %v3981_v36 = vpop.f32.mrf.mxu2 }
 0x2b1   : > { %6786 = vmatmul.bf16.vlgmr.msra.gmra.mxu3 %v17121_v3  ;;  %v4407_v62 = vrot.slane %v3981_v36, 6  ;;  %v3994_v56 = vpop.f32.mrf.mxu3  ;;  %6800 = vmatmul.bf16.vlgmr.msrb.gmra.mxu0 %v17130_v6  ;;  %v16236_v36 = vld [vmem:[%s21795_s2 + $0x188] sm:$0xff] }
 0x2b2   : > { %v4408_v22 = vrot.slane %v3994_v56, 4  ;;  %v3970_v53 = vpop.f32.mrf.mxu1 }
 0x2b3   : > { %6807 = vmatpush.bf16.msrb.mxu1 %v16225_v39  ;;  %6821 = vmatpush.bf16.msrb.mxu2 %v16233_v1  ;;  %v4432_v55 = vsel %vm4431_vm2, %v3968_v49, %v4407_v62  ;;  %v4459_v25 = vsel %vm4458_vm3, %v3968_v49, %v4407_v62  ;;  %v4009_v41 = vpop.f32.mrf.mxu0  ;;  %v16220_v39 = vld [vmem:[%s21795_s2 + $0x108] sm:$0xff] }
 0x2b4   : > { %6835 = vmatpush.bf16.msrb.mxu3 %v16241_v11  ;;  %6849 = vmatpush.bf16.msra.mxu0 %v16249_v32  ;;  %v4434_v63 = vsel %vm4433_vm4, %v4408_v22, %v4409_v50  ;;  %v4461_v8 = vsel %vm4460_vm5, %v4409_v50, %v4408_v22  ;;  %v16228_v32 = vld [vmem:[%s21795_s2 + $0x148] sm:$0xff] }
 0x2b5   : > { %v4436_v24 = vsel %vm4435_vm6, %v4432_v55, %v4434_v63  ;;  %v19179_v60 = vsel %vm4462_vm7, %v4459_v25, %v4461_v8  ;;  %v16244_v22 = vld [vmem:[%s21795_s2 + $0x1c8] sm:$0xff]  ;;  %v16219_v25 = vld [vmem:[%s21795_s2 + $0x100] sm:$0xff] }
 0x2b6   : > { %4493 = vst [vmem:[#allocation1] ss:$4 sm:$0xff] %v4436_v24  ;;  %v16227_v63 = vld [vmem:[%s21795_s2 + $0x140] sm:$0xff]  ;;  %v16266_v24 = vld [vmem:[%s21795_s2 + $0x278] sm:$0xff] }
 0x2b7   : > { %6808 = vmatpush.bf16.msrb.mxu1 %v16224_v61  ;;  %6822 = vmatpush.bf16.msrb.mxu2 %v16232_v33  ;;  %v16235_v8 = vld [vmem:[%s21795_s2 + $0x180] sm:$0xff] }
 0x2b8   : > { %6836 = vmatpush.bf16.msrb.mxu3 %v16240_v35  ;;  %6850 = vmatpush.bf16.msra.mxu0 %v16248_v51  ;;  %v3983_v37 = vpop.f32.mrf.mxu2 }
 0x2b9   : > { %v3996_v52 = vpop.f32.mrf.mxu3 }
 0x2ba   : > { %v4020_v47 = vpop.f32.mrf.mxu1 }
 0x2bb   : > { %6809 = vmatpush.bf16.msrb.mxu1 %v16223_v57  ;;  %6823 = vmatpush.bf16.msrb.mxu2 %v16231_v0  ;;  %v4059_v34 = vpop.f32.mrf.mxu0  ;;  %v16258_v57 = vld [vmem:[%s21795_s2 + $0x238] sm:$0xff] }
 0x2bc   : > { %6837 = vmatpush.bf16.msrb.mxu3 %v16239_v20  ;;  %6851 = vmatpush.bf16.msra.mxu0 %v16247_v23  ;;  %v4412_v61 = vrot.slane %v4059_v34, 2  ;;  %v16274_v0 = vld [vmem:[%s21795_s2 + $0x2b8] sm:$0xff]  ;;  %v16243_v20 = vld [vmem:[%s21795_s2 + $0x1c0] sm:$0xff]  ;;  %v16273_v34 = vld [vmem:[%s21795_s2 + $0x2b0] sm:$0xff] }
 0x2bd   : > { %v4496_v13 = vld.sshfl [vmem:[#allocation1] sm:$0xff pattern:$0x73625140]  ;;  %v4497_v38 = vld.sshfl [vmem:[#allocation1 + $0x8] sm:$0xff pattern:$0x73625140] }
 0x2be   : > { %v4498_v49 = vld.sshfl [vmem:[#allocation1 + $0x10] sm:$0xff pattern:$0x73625140]  ;;  %v4499_v31 = vld.sshfl [vmem:[#allocation1 + $0x18] sm:$0xff pattern:$0x73625140] }
 0x2bf   : > { %6810 = vmatpush.bf16.msrb.mxu1 %v16222_v12  ;;  %6824 = vmatpush.bf16.msrb.mxu2 %v16230_v54  ;;  %4638 = vst [vmem:[%s17045_s26 + $0x100] sm:$0x3] %v4496_v13  ;;  %v16282_v12 = vld [vmem:[%s21795_s2 + $0x2f8] sm:$0xff]  ;;  %v16257_v54 = vld [vmem:[%s21795_s2 + $0x230] sm:$0xff]  ;;  %v16256_v13 = vld [vmem:[%s21795_s2 + $0x228] sm:$0xff] }
 0x2c0   : > { %6838 = vmatpush.bf16.msrb.mxu3 %v16238_v48  ;;  %6852 = vmatpush.bf16.msra.mxu0 %v16246_v28  ;;  %4639 = vst [vmem:[%s17045_s26 + $0x108] sm:$0x3] %v4497_v38  ;;  %v4033_v59 = vpop.f32.mrf.mxu2  ;;  %v16265_v48 = vld [vmem:[%s21795_s2 + $0x270] sm:$0xff]  ;;  %v16264_v38 = vld [vmem:[%s21795_s2 + $0x268] sm:$0xff] }
 0x2c1   : > { %4640 = vst [vmem:[%s17045_s26 + $0x110] sm:$0x3] %v4498_v49  ;;  %v4410_v1 = vrot.slane %v4033_v59, 6  ;;  %v4046_v11 = vpop.f32.mrf.mxu3  ;;  %v16281_v28 = vld [vmem:[%s21795_s2 + $0x2f0] sm:$0xff] }
 0x2c2   : > { %4641 = vst [vmem:[%s17045_s26 + $0x118] sm:$0x3] %v4499_v31  ;;  %v4411_v62 = vrot.slane %v4046_v11, 4  ;;  %v4022_v56 = vpop.f32.mrf.mxu1  ;;  %v16272_v31 = vld [vmem:[%s21795_s2 + $0x2a8] sm:$0xff] }
 0x2c3   : > { %6811 = vmatpush.bf16.msrb.mxu1 %v16221_v58  ;;  %6825 = vmatpush.bf16.msrb.mxu2 %v16229_v40  ;;  %v4437_v33 = vsel %vm4431_vm2, %v4020_v47, %v4410_v1  ;;  %v4465_v35 = vsel %vm4458_vm3, %v4020_v47, %v4410_v1  ;;  %v4061_v50 = vpop.f32.mrf.mxu0  ;;  %v16280_v1 = vld [vmem:[%s21795_s2 + $0x2e8] sm:$0xff] }
 0x2c4   : > { %6839 = vmatpush.bf16.msrb.mxu3 %v16237_v44  ;;  %6853 = vmatpush.bf16.msra.mxu0 %v16245_v19  ;;  %v4438_v53 = vsel %vm4433_vm4, %v4411_v62, %v4412_v61  ;;  %v4466_v55 = vsel %vm4460_vm5, %v4412_v61, %v4411_v62  ;;  %v16255_v61 = vld [vmem:[%s21795_s2 + $0x220] sm:$0xff] }
 0x2c5   : > { %v4439_v41 = vsel %vm4435_vm6, %v4437_v33, %v4438_v53  ;;  %v19239_v51 = vsel %vm4462_vm7, %v4465_v35, %v4466_v55  ;;  %v16263_v62 = vld [vmem:[%s21795_s2 + $0x260] sm:$0xff] }
 0x2c6   : > { %4495 = vst [vmem:[#allocation1 + $0x20] ss:$4 sm:$0xff] %v4439_v41  ;;  %v16271_v50 = vld [vmem:[%s21795_s2 + $0x2a0] sm:$0xff] }
 0x2c7   : > { %6812 = vmatpush.bf16.msrb.mxu1 %v16220_v39  ;;  %6826 = vmatpush.bf16.msrb.mxu2 %v16228_v32  ;;  %v16279_v41 = vld [vmem:[%s21795_s2 + $0x2e0] sm:$0xff] }
 0x2c8   : > { %6840 = vmatpush.bf16.msrb.mxu3 %v16236_v36  ;;  %6854 = vmatpush.bf16.msra.mxu0 %v16244_v22  ;;  %v4035_v23 = vpop.f32.mrf.mxu2 }
 0x2c9   : > { %v4048_v37 = vpop.f32.mrf.mxu3 }
 0x2ca   : > { %v4072_v52 = vpop.f32.mrf.mxu1  ;;  %v16253_v37 = vld [vmem:[%s21795_s2 + $0x210] sm:$0xff] }
 0x2cb   : > { %6813 = vmatpush.bf16.msrb.mxu1 %v16219_v25  ;;  %6827 = vmatpush.bf16.msrb.mxu2 %v16227_v63  ;;  %v4111_v47 = vpop.f32.mrf.mxu0  ;;  %v16254_v63 = vld [vmem:[%s21795_s2 + $0x218] sm:$0xff] }
 0x2cc   : > { %6841 = vmatpush.bf16.msrb.mxu3 %v16235_v8  ;;  %6855 = vmatpush.bf16.msra.mxu0 %v16243_v20  ;;  %v4415_v11 = vrot.slane %v4111_v47, 2  ;;  %v16262_v8 = vld [vmem:[%s21795_s2 + $0x258] sm:$0xff] }
 0x2cd   : > { %v4500_v58 = vld.sshfl [vmem:[#allocation1 + $0x20] sm:$0xff pattern:$0x73625140]  ;;  %v4501_v40 = vld.sshfl [vmem:[#allocation1 + $0x28] sm:$0xff pattern:$0x73625140] }
 0x2ce   : > { %6814 = vmatmul.bf16.vlgmr.msrb.gmra.mxu1 %v17277_v4  ;;  %6828 = vmatmul.bf16.vlgmr.msrb.gmra.mxu2 %v17286_v9  ;;  %v4502_v44 = vld.sshfl [vmem:[#allocation1 + $0x30] sm:$0xff pattern:$0x73625140]  ;;  %v4503_v49 = vld.sshfl [vmem:[#allocation1 + $0x38] sm:$0xff pattern:$0x73625140] }
 0x2cf   : > { %6862 = vmatpush.bf16.msra.mxu1 %v16258_v57  ;;  %6876 = vmatpush.bf16.msra.mxu2 %v16266_v24  ;;  %4642 = vst [vmem:[%s17045_s26 + $0x120] sm:$0x3] %v4500_v58  ;;  %v16270_v57 = vld [vmem:[%s21795_s2 + $0x298] sm:$0xff]  ;;  %v16252_v58 = vld [vmem:[%s21795_s2 + $0x208] sm:$0xff] }
 0x2d0   : > { %6890 = vmatpush.bf16.msra.mxu3 %v16274_v0  ;;  %6904 = vmatpush.bf16.msrb.mxu0 %v16282_v12  ;;  %4643 = vst [vmem:[%s17045_s26 + $0x128] sm:$0x3] %v4501_v40  ;;  %v4085_v19 = vpop.f32.mrf.mxu2  ;;  %v16278_v20 = vld [vmem:[%s21795_s2 + $0x2d8] sm:$0xff]  ;;  %v16261_v12 = vld [vmem:[%s21795_s2 + $0x250] sm:$0xff]  ;;  %v16260_v40 = vld [vmem:[%s21795_s2 + $0x248] sm:$0xff] }
 0x2d1   : > { %6842 = vmatmul.bf16.vlgmr.msrb.gmra.mxu3 %v17279_v7  ;;  %6856 = vmatmul.bf16.vlgmr.msra.gmra.mxu0 %v17288_v10  ;;  %4644 = vst [vmem:[%s17045_s26 + $0x130] sm:$0x3] %v4502_v44  ;;  %v4413_v59 = vrot.slane %v4085_v19, 6  ;;  %v4098_v39 = vpop.f32.mrf.mxu3  ;;  %v16276_v19 = vld [vmem:[%s21795_s2 + $0x2c8] sm:$0xff] }
 0x2d2   : > { %4645 = vst [vmem:[%s17045_s26 + $0x138] sm:$0x3] %v4503_v49  ;;  %v4414_v32 = vrot.slane %v4098_v39, 4  ;;  %v4074_v36 = vpop.f32.mrf.mxu1 }
 0x2d3   : > { %6863 = vmatpush.bf16.msra.mxu1 %v16257_v54  ;;  %6877 = vmatpush.bf16.msra.mxu2 %v16265_v48  ;;  %v4440_v56 = vsel %vm4431_vm2, %v4072_v52, %v4413_v59  ;;  %v4469_v33 = vsel %vm4458_vm3, %v4072_v52, %v4413_v59  ;;  %v4113_v35 = vpop.f32.mrf.mxu0  ;;  %v16269_v54 = vld [vmem:[%s21795_s2 + $0x290] sm:$0xff] }
 0x2d4   : > { %6891 = vmatpush.bf16.msra.mxu3 %v16273_v34  ;;  %6905 = vmatpush.bf16.msrb.mxu0 %v16281_v28  ;;  %v4441_v22 = vsel %vm4433_vm4, %v4414_v32, %v4415_v11  ;;  %v4470_v53 = vsel %vm4460_vm5, %v4415_v11, %v4414_v32  ;;  %v16277_v48 = vld [vmem:[%s21795_s2 + $0x2d0] sm:$0xff]  ;;  %v16251_v11 = vld [vmem:[%s21795_s2 + $0x200] sm:$0xff] }
 0x2d5   : > { %v4442_v55 = vsel %vm4435_vm6, %v4440_v56, %v4441_v22  ;;  %v19309_v25 = vsel %vm4462_vm7, %v4469_v33, %v4470_v53  ;;  %v16259_v32 = vld [vmem:[%s21795_s2 + $0x240] sm:$0xff]  ;;  %v16290_v33 = vld [vmem:[%s21795_s2 + $0x338] sm:$0xff] }
 0x2d6   : > { %4504 = vst [vmem:[#allocation1] ss:$4 sm:$0xff] %v4442_v55  ;;  %v16267_v56 = vld [vmem:[%s21795_s2 + $0x280] sm:$0xff]  ;;  %v16298_v22 = vld [vmem:[%s21795_s2 + $0x378] sm:$0xff] }
 0x2d7   : > { %6864 = vmatpush.bf16.msra.mxu1 %v16256_v13  ;;  %6878 = vmatpush.bf16.msra.mxu2 %v16264_v38  ;;  %v16268_v13 = vld [vmem:[%s21795_s2 + $0x288] sm:$0xff]  ;;  %v16306_v53 = vld [vmem:[%s21795_s2 + $0x3b8] sm:$0xff] }
 0x2d8   : > { %6892 = vmatpush.bf16.msra.mxu3 %v16272_v31  ;;  %6906 = vmatpush.bf16.msrb.mxu0 %v16280_v1  ;;  %v4087_v24 = vpop.f32.mrf.mxu2 }
 0x2d9   : > { %v4100_v0 = vpop.f32.mrf.mxu3 }
 0x2da   : > { %v4124_v23 = vpop.f32.mrf.mxu1  ;;  %v16297_v0 = vld [vmem:[%s21795_s2 + $0x370] sm:$0xff] }
 0x2db   : > { %6865 = vmatpush.bf16.msra.mxu1 %v16255_v61  ;;  %6879 = vmatpush.bf16.msra.mxu2 %v16263_v62  ;;  %v4163_v52 = vpop.f32.mrf.mxu0 }
 0x2dc   : > { %6893 = vmatpush.bf16.msra.mxu3 %v16271_v50  ;;  %6907 = vmatpush.bf16.msrb.mxu0 %v16279_v41  ;;  %v4418_v59 = vrot.slane %v4163_v52, 2 }
 0x2dd   : > { %v4506_v47 = vld.sshfl [vmem:[#allocation1] sm:$0xff pattern:$0x73625140]  ;;  %v4507_v34 = vld.sshfl [vmem:[#allocation1 + $0x8] sm:$0xff pattern:$0x73625140] }
 0x2de   : > { %v4508_v28 = vld.sshfl [vmem:[#allocation1 + $0x10] sm:$0xff pattern:$0x73625140]  ;;  %v4509_v44 = vld.sshfl [vmem:[#allocation1 + $0x18] sm:$0xff pattern:$0x73625140] }
 0x2df   : > { %6866 = vmatpush.bf16.msra.mxu1 %v16254_v63  ;;  %6880 = vmatpush.bf16.msra.mxu2 %v16262_v8  ;;  %4646 = vst [vmem:[%s17045_s26 + $0x140] sm:$0x3] %v4506_v47  ;;  %v16275_v63 = vld [vmem:[%s21795_s2 + $0x2c0] sm:$0xff]  ;;  %v16314_v8 = vld [vmem:[%s21795_s2 + $0x3f8] sm:$0xff]  ;;  %v16304_v47 = vld [vmem:[%s21795_s2 + $0x3a8] sm:$0xff] }
 0x2e0   : > { %6894 = vmatpush.bf16.msra.mxu3 %v16270_v57  ;;  %6908 = vmatpush.bf16.msrb.mxu0 %v16278_v20  ;;  %4647 = vst [vmem:[%s17045_s26 + $0x148] sm:$0x3] %v4507_v34  ;;  %v4137_v38 = vpop.f32.mrf.mxu2  ;;  %v16289_v57 = vld [vmem:[%s21795_s2 + $0x330] sm:$0xff] }
 0x2e1   : > { %4648 = vst [vmem:[%s17045_s26 + $0x150] sm:$0x3] %v4508_v28  ;;  %v4416_v49 = vrot.slane %v4137_v38, 6  ;;  %v4150_v31 = vpop.f32.mrf.mxu3  ;;  %v16305_v20 = vld [vmem:[%s21795_s2 + $0x3b0] sm:$0xff] }
 0x2e2   : > { %4649 = vst [vmem:[%s17045_s26 + $0x158] sm:$0x3] %v4509_v44  ;;  %v4417_v39 = vrot.slane %v4150_v31, 4  ;;  %v4126_v1 = vpop.f32.mrf.mxu1  ;;  %v16303_v31 = vld [vmem:[%s21795_s2 + $0x3a0] sm:$0xff] }
 0x2e3   : > { %6867 = vmatpush.bf16.msra.mxu1 %v16253_v37  ;;  %6881 = vmatpush.bf16.msra.mxu2 %v16261_v12  ;;  %v4443_v36 = vsel %vm4431_vm2, %v4124_v23, %v4416_v49  ;;  %v4473_v61 = vsel %vm4458_vm3, %v4124_v23, %v4416_v49  ;;  %v4165_v62 = vpop.f32.mrf.mxu0  ;;  %v16313_v12 = vld [vmem:[%s21795_s2 + $0x3f0] sm:$0xff]  ;;  %v16295_v49 = vld [vmem:[%s21795_s2 + $0x360] sm:$0xff] }
 0x2e4   : > { %6895 = vmatpush.bf16.msra.mxu3 %v16269_v54  ;;  %6909 = vmatpush.bf16.msrb.mxu0 %v16277_v48  ;;  %v4444_v35 = vsel %vm4433_vm4, %v4417_v39, %v4418_v59  ;;  %v4474_v50 = vsel %vm4460_vm5, %v4418_v59, %v4417_v39  ;;  %v16288_v54 = vld [vmem:[%s21795_s2 + $0x328] sm:$0xff]  ;;  %v16286_v62 = vld [vmem:[%s21795_s2 + $0x318] sm:$0xff] }
 0x2e5   : > { %v4445_v55 = vsel %vm4435_vm6, %v4443_v36, %v4444_v35  ;;  %v19378_v41 = vsel %vm4462_vm7, %v4473_v61, %v4474_v50  ;;  %v16296_v48 = vld [vmem:[%s21795_s2 + $0x368] sm:$0xff]  ;;  %v16302_v35 = vld [vmem:[%s21795_s2 + $0x398] sm:$0xff] }
 0x2e6   : > { %4505 = vst [vmem:[#allocation1 + $0x20] ss:$4 sm:$0xff] %v4445_v55 }
 0x2e7   : > { %6868 = vmatpush.bf16.msra.mxu1 %v16252_v58  ;;  %6882 = vmatpush.bf16.msra.mxu2 %v16260_v40  ;;  %v16312_v40 = vld [vmem:[%s21795_s2 + $0x3e8] sm:$0xff] }
 0x2e8   : > { %6896 = vmatpush.bf16.msra.mxu3 %v16268_v13  ;;  %6910 = vmatpush.bf16.msrb.mxu0 %v16276_v19  ;;  %v4139_v24 = vpop.f32.mrf.mxu2  ;;  %v16287_v13 = vld [vmem:[%s21795_s2 + $0x320] sm:$0xff] }
 0x2e9   : > { %v4152_v23 = vpop.f32.mrf.mxu3 }
 0x2ea   : > { %v19397_v37 = vpop.f32.mrf.mxu1  ;;  %v16284_v23 = vld [vmem:[%s21795_s2 + $0x308] sm:$0xff] }
 0x2eb   : > { %6869 = vmatpush.bf16.msra.mxu1 %v16251_v11  ;;  %6883 = vmatpush.bf16.msra.mxu2 %v16259_v32  ;;  %v19403_v52 = vpop.f32.mrf.mxu0  ;;  %v16311_v32 = vld [vmem:[%s21795_s2 + $0x3e0] sm:$0xff] }
 0x2ec   : > { %6897 = vmatpush.bf16.msra.mxu3 %v16267_v56  ;;  %6911 = vmatpush.bf16.msrb.mxu0 %v16275_v63  ;;  %v4421_v39 = vrot.slane %v19403_v52, 2  ;;  %v16293_v63 = vld [vmem:[%s21795_s2 + $0x350] sm:$0xff]  ;;  %v16351_v52 = vld [vmem:[%s21795_s2 + $0x520] sm:$0xff] }
 0x2ed   : > { %v4510_v34 = vld.sshfl [vmem:[#allocation1 + $0x20] sm:$0xff pattern:$0x73625140]  ;;  %v4511_v28 = vld.sshfl [vmem:[#allocation1 + $0x28] sm:$0xff pattern:$0x73625140] }
 0x2ee   : > { %6870 = vmatmul.bf16.vlgmr.msra.gmra.mxu1 %v17437_v14  ;;  %6884 = vmatmul.bf16.vlgmr.msra.gmra.mxu2 %v17446_v17  ;;  %v4512_v58 = vld.sshfl [vmem:[#allocation1 + $0x30] sm:$0xff pattern:$0x73625140]  ;;  %v4513_v44 = vld.sshfl [vmem:[#allocation1 + $0x38] sm:$0xff pattern:$0x73625140] }
 0x2ef   : > { %6918 = vmatpush.bf16.msrb.mxu1 %v16290_v33  ;;  %6932 = vmatpush.bf16.msrb.mxu2 %v16298_v22  ;;  %4650 = vst [vmem:[%s17045_s26 + $0x160] sm:$0x3] %v4510_v34  ;;  %v16294_v33 = vld [vmem:[%s21795_s2 + $0x358] sm:$0xff] }
 0x2f0   : > { %6946 = vmatpush.bf16.msrb.mxu3 %v16306_v53  ;;  %6960 = vmatpush.bf16.msra.mxu0 %v16314_v8  ;;  %4651 = vst [vmem:[%s17045_s26 + $0x168] sm:$0x3] %v4511_v28  ;;  %v19423_v38 = vpop.f32.mrf.mxu2  ;;  %v16310_v22 = vld [vmem:[%s21795_s2 + $0x3d8] sm:$0xff]  ;;  %v16285_v53 = vld [vmem:[%s21795_s2 + $0x310] sm:$0xff]  ;;  %v16308_v28 = vld [vmem:[%s21795_s2 + $0x3c8] sm:$0xff] }
 0x2f1   : > { %6898 = vmatmul.bf16.vlgmr.msra.gmra.mxu3 %v17439_v15  ;;  %6912 = vmatmul.bf16.vlgmr.msrb.gmra.mxu0 %v17448_v18  ;;  %4652 = vst [vmem:[%s17045_s26 + $0x170] sm:$0x3] %v4512_v58  ;;  %v4419_v19 = vrot.slane %v19423_v38, 6  ;;  %v19433_v59 = vpop.f32.mrf.mxu3  ;;  %v16301_v8 = vld [vmem:[%s21795_s2 + $0x390] sm:$0xff]  ;;  %v16376_v38 = vld [vmem:[%s21795_s2 + $0x5e8] sm:$0xff] }
 0x2f2   : > { %4653 = vst [vmem:[%s17045_s26 + $0x178] sm:$0x3] %v4513_v44  ;;  %v4420_v1 = vrot.slane %v19433_v59, 4  ;;  %v4178_v11 = vpop.f32.mrf.mxu1  ;;  %v16359_v59 = vld [vmem:[%s21795_s2 + $0x560] sm:$0xff] }
 0x2f3   : > { %6919 = vmatpush.bf16.msrb.mxu1 %v16289_v57  ;;  %6933 = vmatpush.bf16.msrb.mxu2 %v16297_v0  ;;  %v4446_v36 = vsel %vm4431_vm2, %v19397_v37, %v4419_v19  ;;  %v4217_v61 = vpop.f32.mrf.mxu0  ;;  %v16309_v0 = vld [vmem:[%s21795_s2 + $0x3d0] sm:$0xff] }
 0x2f4   : > { %6947 = vmatpush.bf16.msrb.mxu3 %v16305_v20  ;;  %6961 = vmatpush.bf16.msra.mxu0 %v16313_v12  ;;  %v4447_v56 = vsel %vm4433_vm4, %v4420_v1, %v4421_v39  ;;  %v16292_v12 = vld [vmem:[%s21795_s2 + $0x348] sm:$0xff] }
 0x2f5   : > { %v4448_v50 = vsel %vm4435_vm6, %v4446_v36, %v4447_v56  ;;  %v16330_v36 = vld [vmem:[%s21795_s2 + $0x478] sm:$0xff] }
 0x2f6   : > { %4514 = vst [vmem:[#allocation1] ss:$4 sm:$0xff] %v4448_v50  ;;  %v16338_v56 = vld [vmem:[%s21795_s2 + $0x4b8] sm:$0xff] }
 0x2f7   : > { %6920 = vmatpush.bf16.msrb.mxu1 %v16288_v54  ;;  %6934 = vmatpush.bf16.msrb.mxu2 %v16296_v48  ;;  %v16300_v54 = vld [vmem:[%s21795_s2 + $0x388] sm:$0xff] }
 0x2f8   : > { %6948 = vmatpush.bf16.msrb.mxu3 %v16304_v47  ;;  %6962 = vmatpush.bf16.msra.mxu0 %v16312_v40  ;;  %v4191_v55 = vpop.f32.mrf.mxu2  ;;  %v16283_v40 = vld [vmem:[%s21795_s2 + $0x300] sm:$0xff] }
 0x2f9   : > { %v4204_v57 = vpop.f32.mrf.mxu3 }
 0x2fa   : > { %v4228_v24 = vpop.f32.mrf.mxu1 }
 0x2fb   : > { %6921 = vmatpush.bf16.msrb.mxu1 %v16287_v13  ;;  %6935 = vmatpush.bf16.msrb.mxu2 %v16295_v49  ;;  %v4267_v20 = vpop.f32.mrf.mxu0  ;;  %v16291_v13 = vld [vmem:[%s21795_s2 + $0x340] sm:$0xff] }
 0x2fc   : > { %6949 = vmatpush.bf16.msrb.mxu3 %v16303_v31  ;;  %6963 = vmatpush.bf16.msra.mxu0 %v16311_v32  ;;  %v16299_v49 = vld [vmem:[%s21795_s2 + $0x380] sm:$0xff]  ;;  %v16322_v32 = vld [vmem:[%s21795_s2 + $0x438] sm:$0xff]  ;;  %v4424_v61 = vrot.slane %v4267_v20, 2  ;;  %v16329_v20 = vld [vmem:[%s21795_s2 + $0x470] sm:$0xff] }
 0x2fd   : > { %v4516_v48 = vld.sshfl [vmem:[#allocation1] sm:$0xff pattern:$0x73625140]  ;;  %v4517_v47 = vld.sshfl [vmem:[#allocation1 + $0x8] sm:$0xff pattern:$0x73625140] }
 0x2fe   : > { %v4518_v34 = vld.sshfl [vmem:[#allocation1 + $0x10] sm:$0xff pattern:$0x73625140]  ;;  %v4519_v58 = vld.sshfl [vmem:[#allocation1 + $0x18] sm:$0xff pattern:$0x73625140] }
 0x2ff   : > { %6922 = vmatpush.bf16.msrb.mxu1 %v16286_v62  ;;  %6936 = vmatpush.bf16.msrb.mxu2 %v16294_v33  ;;  %4654 = vst [vmem:[%s17045_s26 + $0x180] sm:$0x3] %v4516_v48 }
 0x300   : > { %6950 = vmatpush.bf16.msrb.mxu3 %v16302_v35  ;;  %6964 = vmatpush.bf16.msra.mxu0 %v16310_v22  ;;  %4655 = vst [vmem:[%s17045_s26 + $0x188] sm:$0x3] %v4517_v47  ;;  %v4241_v44 = vpop.f32.mrf.mxu2  ;;  %v16307_v35 = vld [vmem:[%s21795_s2 + $0x3c0] sm:$0xff]  ;;  %v16320_v47 = vld [vmem:[%s21795_s2 + $0x428] sm:$0xff] }
 0x301   : > { %4656 = vst [vmem:[%s17045_s26 + $0x190] sm:$0x3] %v4518_v34  ;;  %v4422_v31 = vrot.slane %v4241_v44, 6  ;;  %v4254_v11 = vpop.f32.mrf.mxu3  ;;  %v16328_v34 = vld [vmem:[%s21795_s2 + $0x468] sm:$0xff] }
 0x302   : > { %4657 = vst [vmem:[%s17045_s26 + $0x198] sm:$0x3] %v4519_v58  ;;  %v4423_v62 = vrot.slane %v4254_v11, 4  ;;  %v4230_v33 = vpop.f32.mrf.mxu1  ;;  %v16344_v44 = vld [vmem:[%s21795_s2 + $0x4e8] sm:$0xff] }
 0x303   : > { %6923 = vmatpush.bf16.msrb.mxu1 %v16285_v53  ;;  %6937 = vmatpush.bf16.msrb.mxu2 %v16293_v63  ;;  %v4449_v50 = vsel %vm4431_vm2, %v4228_v24, %v4422_v31  ;;  %v4481_v22 = vsel %vm4458_vm3, %v4228_v24, %v4422_v31  ;;  %v4269_v53 = vpop.f32.mrf.mxu0  ;;  %v16321_v24 = vld [vmem:[%s21795_s2 + $0x430] sm:$0xff] }
 0x304   : > { %6951 = vmatpush.bf16.msrb.mxu3 %v16301_v8  ;;  %6965 = vmatpush.bf16.msra.mxu0 %v16309_v0  ;;  %v4450_v55 = vsel %vm4433_vm4, %v4423_v62, %v4424_v61  ;;  %v4482_v63 = vsel %vm4460_vm5, %v4424_v61, %v4423_v62  ;;  %v16346_v8 = vld [vmem:[%s21795_s2 + $0x4f8] sm:$0xff]  ;;  %v16343_v62 = vld [vmem:[%s21795_s2 + $0x4e0] sm:$0xff] }
 0x305   : > { %v4451_v57 = vsel %vm4435_vm6, %v4449_v50, %v4450_v55  ;;  %v19521_v0 = vsel %vm4462_vm7, %v4481_v22, %v4482_v63  ;;  %v16318_v50 = vld [vmem:[%s21795_s2 + $0x418] sm:$0xff] }
 0x306   : > { %4515 = vst [vmem:[#allocation1 + $0x20] ss:$4 sm:$0xff] %v4451_v57  ;;  %v16326_v22 = vld [vmem:[%s21795_s2 + $0x458] sm:$0xff] }
 0x307   : > { %6924 = vmatpush.bf16.msrb.mxu1 %v16284_v23  ;;  %6938 = vmatpush.bf16.msrb.mxu2 %v16292_v12  ;;  %v16337_v23 = vld [vmem:[%s21795_s2 + $0x4b0] sm:$0xff]  ;;  %v16334_v63 = vld [vmem:[%s21795_s2 + $0x498] sm:$0xff] }
 0x308   : > { %6952 = vmatpush.bf16.msrb.mxu3 %v16300_v54  ;;  %6966 = vmatpush.bf16.msra.mxu0 %v16308_v28  ;;  %v16345_v12 = vld [vmem:[%s21795_s2 + $0x4f0] sm:$0xff]  ;;  %v4243_v54 = vpop.f32.mrf.mxu2  ;;  %v16336_v28 = vld [vmem:[%s21795_s2 + $0x4a8] sm:$0xff] }
 0x309   : > { %v4256_v48 = vpop.f32.mrf.mxu3  ;;  %v16317_v54 = vld [vmem:[%s21795_s2 + $0x410] sm:$0xff] }
 0x30a   : > { %v19547_v58 = vpop.f32.mrf.mxu1  ;;  %v16325_v48 = vld [vmem:[%s21795_s2 + $0x450] sm:$0xff] }
 0x30b   : > { %6925 = vmatpush.bf16.msrb.mxu1 %v16283_v40  ;;  %6939 = vmatpush.bf16.msrb.mxu2 %v16291_v13  ;;  %v19550_v40 = vpop.f32.mrf.mxu0  ;;  %v16319_v13 = vld [vmem:[%s21795_s2 + $0x420] sm:$0xff] }
 0x30c   : > { %6953 = vmatpush.bf16.msrb.mxu3 %v16299_v49  ;;  %6967 = vmatpush.bf16.msra.mxu0 %v16307_v35  ;;  %v16327_v49 = vld [vmem:[%s21795_s2 + $0x460] sm:$0xff]  ;;  %v4427_v53 = vrot.slane %v19550_v40, 2 }
 0x30d   : > { %v4520_v31 = vld.sshfl [vmem:[#allocation1 + $0x20] sm:$0xff pattern:$0x73625140]  ;;  %v4521_v11 = vld.sshfl [vmem:[#allocation1 + $0x28] sm:$0xff pattern:$0x73625140] }
 0x30e   : > { %6926 = vmatmul.bf16.vlgmr.msrb.gmra.mxu1 %v17597_v26  ;;  %6940 = vmatmul.bf16.vlgmr.msrb.gmra.mxu2 %v17606_v29  ;;  %v4523_v61 = vld.sshfl [vmem:[#allocation1 + $0x38] sm:$0xff pattern:$0x73625140]  ;;  %4658 = vst [vmem:[%s17045_s26 + $0x1a0] sm:$0x3] %v4520_v31  ;;  %v16332_v31 = vld [vmem:[%s21795_s2 + $0x488] sm:$0xff] }
 0x30f   : > { %6974 = vmatpush.bf16.msra.mxu1 %v16322_v32  ;;  %6988 = vmatpush.bf16.msra.mxu2 %v16330_v36  ;;  %v4522_v32 = vld.sshfl [vmem:[#allocation1 + $0x30] sm:$0xff pattern:$0x73625140]  ;;  %v16335_v36 = vld [vmem:[%s21795_s2 + $0x4a0] sm:$0xff]  ;;  %4659 = vst [vmem:[%s17045_s26 + $0x1a8] sm:$0x3] %v4521_v11 }
 0x310   : > { %7002 = vmatpush.bf16.msra.mxu3 %v16338_v56  ;;  %7016 = vmatpush.bf16.msrb.mxu0 %v16346_v8  ;;  %v19569_v56 = vpop.f32.mrf.mxu2  ;;  %4660 = vst [vmem:[%s17045_s26 + $0x1b0] sm:$0x3] %v4522_v32 }
 0x311   : > { %6954 = vmatmul.bf16.vlgmr.msrb.gmra.mxu3 %v17599_v27  ;;  %6968 = vmatmul.bf16.vlgmr.msra.gmra.mxu0 %v17608_v30  ;;  %v4425_v33 = vrot.slane %v19569_v56, 6  ;;  %v19573_v35 = vpop.f32.mrf.mxu3  ;;  %4661 = vst [vmem:[%s17045_s26 + $0x1b8] sm:$0x3] %v4523_v61  ;;  %v16315_v61 = vld [vmem:[%s21795_s2 + $0x400] sm:$0xff]  ;;  %v16356_v56 = vld [vmem:[%s21795_s2 + $0x548] sm:$0xff] }
 0x312   : > { %v4426_v55 = vrot.slane %v19573_v35, 4  ;;  %v4282_v8 = vpop.f32.mrf.mxu1 }
 0x313   : > { %6975 = vmatpush.bf16.msra.mxu1 %v16321_v24  ;;  %6989 = vmatpush.bf16.msra.mxu2 %v16329_v20  ;;  %v4452_v57 = vsel %vm4431_vm2, %v19547_v58, %v4425_v33  ;;  %v4321_v24 = vpop.f32.mrf.mxu0 }
 0x314   : > { %7003 = vmatpush.bf16.msra.mxu3 %v16337_v23  ;;  %7017 = vmatpush.bf16.msrb.mxu0 %v16345_v12  ;;  %v4453_v20 = vsel %vm4433_vm4, %v4426_v55, %v4427_v53  ;;  %v16342_v23 = vld [vmem:[%s21795_s2 + $0x4d8] sm:$0xff] }
 0x315   : > { %v4454_v12 = vsel %vm4435_vm6, %v4452_v57, %v4453_v20  ;;  %v16362_v20 = vld [vmem:[%s21795_s2 + $0x578] sm:$0xff] }
 0x316   : > { %4524 = vst [vmem:[#allocation1] ss:$4 sm:$0xff] %v4454_v12  ;;  %v16339_v12 = vld [vmem:[%s21795_s2 + $0x4c0] sm:$0xff] }
 0x317   : > { %6976 = vmatpush.bf16.msra.mxu1 %v16320_v47  ;;  %6990 = vmatpush.bf16.msra.mxu2 %v16328_v34  ;;  %v16333_v47 = vld [vmem:[%s21795_s2 + $0x490] sm:$0xff] }
 0x318   : > { %7004 = vmatpush.bf16.msra.mxu3 %v16336_v28  ;;  %7018 = vmatpush.bf16.msrb.mxu0 %v16344_v44  ;;  %v16341_v34 = vld [vmem:[%s21795_s2 + $0x4d0] sm:$0xff]  ;;  %v4295_v28 = vpop.f32.mrf.mxu2 }
 0x319   : > { %v4308_v44 = vpop.f32.mrf.mxu3  ;;  %v16353_v28 = vld [vmem:[%s21795_s2 + $0x530] sm:$0xff] }
 0x31a   : > { %v19621_v11 = vpop.f32.mrf.mxu1 }
 0x31b   : > { %6977 = vmatpush.bf16.msra.mxu1 %v16319_v13  ;;  %6991 = vmatpush.bf16.msra.mxu2 %v16327_v49  ;;  %v16316_v13 = vld [vmem:[%s21795_s2 + $0x408] sm:$0xff]  ;;  %v19623_v32 = vpop.f32.mrf.mxu0 }
 0x31c   : > { %7005 = vmatpush.bf16.msra.mxu3 %v16335_v36  ;;  %7019 = vmatpush.bf16.msrb.mxu0 %v16343_v62  ;;  %v16324_v49 = vld [vmem:[%s21795_s2 + $0x448] sm:$0xff]  ;;  %v4464_v62 = vrot.slane %v19179_v60, 2 }
 0x31d   : > { %v16340_v36 = vld [vmem:[%s21795_s2 + $0x4c8] sm:$0xff]  ;;  %v4526_v8 = vld.sshfl [vmem:[#allocation1] sm:$0xff pattern:$0x73625140] }
 0x31e   : > { %v4527_v57 = vld.sshfl [vmem:[#allocation1 + $0x8] sm:$0xff pattern:$0x73625140]  ;;  %v4528_v60 = vld.sshfl [vmem:[#allocation1 + $0x10] sm:$0xff pattern:$0x73625140] }
 0x31f   : > { %6978 = vmatpush.bf16.msra.mxu1 %v16318_v50  ;;  %6992 = vmatpush.bf16.msra.mxu2 %v16326_v22  ;;  %v16323_v50 = vld [vmem:[%s21795_s2 + $0x440] sm:$0xff]  ;;  %v4529_v24 = vld.sshfl [vmem:[#allocation1 + $0x18] sm:$0xff pattern:$0x73625140]  ;;  %4662 = vst [vmem:[%s17045_s26 + $0x1c0] sm:$0x3] %v4526_v8 }
 0x320   : > { %7006 = vmatpush.bf16.msra.mxu3 %v16334_v63  ;;  %7020 = vmatpush.bf16.msrb.mxu0 %v16342_v23  ;;  %v16331_v22 = vld [vmem:[%s21795_s2 + $0x480] sm:$0xff]  ;;  %v16354_v63 = vld [vmem:[%s21795_s2 + $0x538] sm:$0xff]  ;;  %4534 = vst [vmem:[#allocation1] ss:$4 sm:$0xff] %v4464_v62  ;;  %v4472_v62 = vrot.slane %v19309_v25, 2  ;;  %v16368_v8 = vld [vmem:[%s21795_s2 + $0x5a8] sm:$0xff] }
 0x321   : > { %v16370_v23 = vld [vmem:[%s21795_s2 + $0x5b8] sm:$0xff]  ;;  %4663 = vst [vmem:[%s17045_s26 + $0x1c8] sm:$0x3] %v4527_v57 }
 0x322   : > { %4664 = vst [vmem:[%s17045_s26 + $0x1d0] sm:$0x3] %v4528_v60 }
 0x323   : > { %6979 = vmatpush.bf16.msra.mxu1 %v16317_v54  ;;  %6993 = vmatpush.bf16.msra.mxu2 %v16325_v48  ;;  %v19651_v54 = vpop.f32.mrf.mxu2  ;;  %v19654_v48 = vpop.f32.mrf.mxu3  ;;  %4665 = vst [vmem:[%s17045_s26 + $0x1d8] sm:$0x3] %v4529_v24 }
 0x324   : > { %7007 = vmatpush.bf16.msra.mxu3 %v16333_v47  ;;  %7021 = vmatpush.bf16.msrb.mxu0 %v16341_v34  ;;  %v16378_v47 = vld [vmem:[%s21795_s2 + $0x5f8] sm:$0xff]  ;;  %v4334_v34 = vpop.f32.mrf.mxu1  ;;  %v4428_v44 = vrot.slane %v19651_v54, 6  ;;  %v16397_v54 = vld [vmem:[%s21795_s2 + $0x690] sm:$0xff] }
 0x327   : > { %6980 = vmatpush.bf16.msra.mxu1 %v16316_v13  ;;  %6994 = vmatpush.bf16.msra.mxu2 %v16324_v49  ;;  %v4429_v13 = vrot.slane %v19654_v48, 4  ;;  %v4373_v49 = vpop.f32.mrf.mxu0  ;;  %v4536_v57 = vld.sshfl [vmem:[#allocation1] sm:$0xff pattern:$0x73625140] }
 0x328   : > { %7008 = vmatpush.bf16.msra.mxu3 %v16332_v31  ;;  %7022 = vmatpush.bf16.msrb.mxu0 %v16340_v36  ;;  %v16361_v31 = vld [vmem:[%s21795_s2 + $0x570] sm:$0xff]  ;;  %v4537_v25 = vld.sshfl [vmem:[#allocation1 + $0x8] sm:$0xff pattern:$0x73625140]  ;;  %4670 = vst [vmem:[%s17045_s26 + $0x300] sm:$0x3] %v4536_v57 }
 0x329   : > { %v16369_v36 = vld [vmem:[%s21795_s2 + $0x5b0] sm:$0xff]  ;;  %v4539_v24 = vld.sshfl [vmem:[#allocation1 + $0x18] sm:$0xff pattern:$0x73625140]  ;;  %4671 = vst [vmem:[%s17045_s26 + $0x308] sm:$0x3] %v4537_v25 }
 0x32a   : > { %v4538_v60 = vld.sshfl [vmem:[#allocation1 + $0x10] sm:$0xff pattern:$0x73625140]  ;;  %4673 = vst [vmem:[%s17045_s26 + $0x318] sm:$0x3] %v4539_v24  ;;  %v16374_v57 = vld [vmem:[%s21795_s2 + $0x5d8] sm:$0xff] }
 0x32b   : > { %6981 = vmatpush.bf16.msra.mxu1 %v16315_v61  ;;  %6995 = vmatpush.bf16.msra.mxu2 %v16323_v50  ;;  %v16377_v61 = vld [vmem:[%s21795_s2 + $0x5f0] sm:$0xff]  ;;  %v4430_v50 = vrot.slane %v19623_v32, 2  ;;  %4544 = vst [vmem:[#allocation1] ss:$4 sm:$0xff] %v4472_v62  ;;  %v4347_v34 = vpop.f32.mrf.mxu2 }
 0x32c   : > { %7009 = vmatpush.bf16.msra.mxu3 %v16331_v22  ;;  %7023 = vmatpush.bf16.msrb.mxu0 %v16339_v12  ;;  %v16352_v22 = vld [vmem:[%s21795_s2 + $0x528] sm:$0xff]  ;;  %v4477_v12 = vsel %vm4458_vm3, %v19397_v37, %v4419_v19  ;;  %4672 = vst [vmem:[%s17045_s26 + $0x310] sm:$0x3] %v4538_v60  ;;  %v16349_v25 = vld [vmem:[%s21795_s2 + $0x510] sm:$0xff]  ;;  %v4468_v60 = vrot.slane %v19239_v51, 2  ;;  %v4485_v34 = vsel %vm4458_vm3, %v19547_v58, %v4425_v33 }
 0x32d   : > { %v16357_v24 = vld [vmem:[%s21795_s2 + $0x550] sm:$0xff]  ;;  %v16348_v51 = vld [vmem:[%s21795_s2 + $0x508] sm:$0xff] }
 0x32e   : > { %6982 = vmatmul.bf16.vlgmr.msra.gmra.mxu1 %v17757_v42  ;;  %6996 = vmatmul.bf16.vlgmr.msra.gmra.mxu2 %v17766_v45  ;;  %v16364_v58 = vld [vmem:[%s21795_s2 + $0x588] sm:$0xff]  ;;  %v16389_v32 = vld [vmem:[%s21795_s2 + $0x650] sm:$0xff] }
 0x32f   : > { %7030 = vmatpush.bf16.msrb.mxu1 %v16354_v63  ;;  %7044 = vmatpush.bf16.msrb.mxu2 %v16362_v20  ;;  %v16360_v63 = vld [vmem:[%s21795_s2 + $0x568] sm:$0xff]  ;;  %v4455_v20 = vsel %vm4431_vm2, %v19621_v11, %v4428_v44 }
 0x330   : > { %7058 = vmatpush.bf16.msrb.mxu3 %v16370_v23  ;;  %7072 = vmatpush.bf16.msra.mxu0 %v16378_v47  ;;  %v4456_v23 = vsel %vm4433_vm4, %v4429_v13, %v4430_v50  ;;  %v4478_v47 = vsel %vm4460_vm5, %v4421_v39, %v4420_v1  ;;  %v16367_v39 = vld [vmem:[%s21795_s2 + $0x5a0] sm:$0xff] }
 0x331   : > { %7010 = vmatmul.bf16.vlgmr.msra.gmra.mxu3 %v17759_v43  ;;  %7024 = vmatmul.bf16.vlgmr.msrb.gmra.mxu0 %v17768_v46  ;;  %v4457_v37 = vsel %vm4435_vm6, %v4455_v20, %v4456_v23  ;;  %v4479_v19 = vsel %vm4462_vm7, %v4477_v12, %v4478_v47  ;;  %v16375_v1 = vld [vmem:[%s21795_s2 + $0x5e0] sm:$0xff]  ;;  %v16365_v20 = vld [vmem:[%s21795_s2 + $0x590] sm:$0xff] }
 0x332   : > { %4525 = vst [vmem:[#allocation1 + $0x20] ss:$4 sm:$0xff] %v4457_v37  ;;  %v4480_v49 = vrot.slane %v4479_v19, 2  ;;  %v4546_v62 = vld.sshfl [vmem:[#allocation1] sm:$0xff pattern:$0x73625140] }
 0x333   : > { %7031 = vmatpush.bf16.msrb.mxu1 %v16353_v28  ;;  %7045 = vmatpush.bf16.msrb.mxu2 %v16361_v31  ;;  %v4360_v28 = vpop.f32.mrf.mxu3  ;;  %v16350_v31 = vld [vmem:[%s21795_s2 + $0x518] sm:$0xff]  ;;  %4678 = vst [vmem:[%s17045_s26 + $0x340] sm:$0x3] %v4546_v62  ;;  %v16373_v12 = vld [vmem:[%s21795_s2 + $0x5d0] sm:$0xff]  ;;  %v6773_v19 = vpop.f32.mrf.mxu2  ;;  %v16363_v62 = vld [vmem:[%s21795_s2 + $0x580] sm:$0xff] }
 0x334   : > { %7059 = vmatpush.bf16.msrb.mxu3 %v16369_v36  ;;  %7073 = vmatpush.bf16.msra.mxu0 %v16377_v61  ;;  %v16358_v36 = vld [vmem:[%s21795_s2 + $0x558] sm:$0xff]  ;;  %v4486_v28 = vsel %vm4460_vm5, %v4427_v53, %v4426_v55 }
 0x335   : > { %v16366_v61 = vld [vmem:[%s21795_s2 + $0x598] sm:$0xff]  ;;  %v4487_v55 = vsel %vm4462_vm7, %v4485_v34, %v4486_v28 }
 0x337   : > { %7032 = vmatpush.bf16.msrb.mxu1 %v16352_v22  ;;  %7046 = vmatpush.bf16.msrb.mxu2 %v16360_v63  ;;  %v4547_v22 = vld.sshfl [vmem:[#allocation1 + $0x8] sm:$0xff pattern:$0x73625140]  ;;  %v4548_v63 = vld.sshfl [vmem:[#allocation1 + $0x10] sm:$0xff pattern:$0x73625140] }
 0x338   : > { %7060 = vmatpush.bf16.msrb.mxu3 %v16368_v8  ;;  %7074 = vmatpush.bf16.msra.mxu0 %v16376_v38  ;;  %v4549_v8 = vld.sshfl [vmem:[#allocation1 + $0x18] sm:$0xff pattern:$0x73625140]  ;;  %4679 = vst [vmem:[%s17045_s26 + $0x348] sm:$0x3] %v4547_v22 }
 0x339   : > { %4554 = vst [vmem:[#allocation1] ss:$4 sm:$0xff] %v4480_v49  ;;  %v4530_v23 = vld.sshfl [vmem:[#allocation1 + $0x20] sm:$0xff pattern:$0x73625140] }
 0x33a   : > { %4680 = vst [vmem:[%s17045_s26 + $0x350] sm:$0x3] %v4548_v63  ;;  %v4531_v47 = vld.sshfl [vmem:[#allocation1 + $0x28] sm:$0xff pattern:$0x73625140]  ;;  %v4488_v63 = vrot.slane %v4487_v55, 2 }
 0x33b   : > { %7033 = vmatpush.bf16.msrb.mxu1 %v16351_v52  ;;  %7047 = vmatpush.bf16.msrb.mxu2 %v16359_v59  ;;  %4681 = vst [vmem:[%s17045_s26 + $0x358] sm:$0x3] %v4549_v8  ;;  %v4532_v38 = vld.sshfl [vmem:[#allocation1 + $0x30] sm:$0xff pattern:$0x73625140]  ;;  %v6759_v52 = vpop.f32.mrf.mxu1  ;;  %v6787_v53 = vpop.f32.mrf.mxu3  ;;  %v16386_v8 = vld [vmem:[%s21795_s2 + $0x638] sm:$0xff] }
 0x33c   : > { %7061 = vmatpush.bf16.msrb.mxu3 %v16367_v39  ;;  %7075 = vmatpush.bf16.msra.mxu0 %v16375_v1  ;;  %v4533_v37 = vld.sshfl [vmem:[#allocation1 + $0x38] sm:$0xff pattern:$0x73625140]  ;;  %v6774_v40 = vadd.f32 %v6773_v19, %v6759_v52  ;;  %v16372_v39 = vld [vmem:[%s21795_s2 + $0x5c8] sm:$0xff]  ;;  %4666 = vst [vmem:[%s17045_s26 + $0x1e0] sm:$0x3] %v4530_v23 }
 0x33d   : > { %4535 = vst [vmem:[#allocation1 + $0x20] ss:$4 sm:$0xff] %v4468_v60  ;;  %v16402_v60 = vld [vmem:[%s21795_s2 + $0x6b8] sm:$0xff]  ;;  %v16393_v52 = vld [vmem:[%s21795_s2 + $0x670] sm:$0xff]  ;;  %v16399_v55 = vld [vmem:[%s21795_s2 + $0x6a0] sm:$0xff] }
 0x33e   : > { %v6788_v1 = vadd.f32 %v6787_v53, %v6774_v40  ;;  %v16401_v19 = vld [vmem:[%s21795_s2 + $0x6b0] sm:$0xff]  ;;  %4667 = vst [vmem:[%s17045_s26 + $0x1e8] sm:$0x3] %v4531_v47  ;;  %v21841_v23 = vld [vmem:[#allocation8_spill] sm:$0xff]  ;;  %v16384_v47 = vld [vmem:[%s21795_s2 + $0x628] sm:$0xff] }
 0x33f   : > { %7034 = vmatpush.bf16.msrb.mxu1 %v16350_v31  ;;  %7048 = vmatpush.bf16.msrb.mxu2 %v16358_v36  ;;  %v16347_v31 = vld [vmem:[%s21795_s2 + $0x500] sm:$0xff]  ;;  %v6801_v36 = vpop.f32.mrf.mxu0  ;;  %4668 = vst [vmem:[%s17045_s26 + $0x1f0] sm:$0x3] %v4532_v38  ;;  %v16400_v38 = vld [vmem:[%s21795_s2 + $0x6a8] sm:$0xff] }
 0x340   : > { %7062 = vmatpush.bf16.msrb.mxu3 %v16366_v61  ;;  %7076 = vmatpush.bf16.msra.mxu0 %v16374_v57  ;;  %v4556_v33 = vld.sshfl [vmem:[#allocation1] sm:$0xff pattern:$0x73625140]  ;;  %v4557_v35 = vld.sshfl [vmem:[#allocation1 + $0x8] sm:$0xff pattern:$0x73625140]  ;;  %v19791_v22 = vadd.f32 %v6801_v36, %v6788_v1 }
 0x341   : > { %v4558_v59 = vld.sshfl [vmem:[#allocation1 + $0x10] sm:$0xff pattern:$0x73625140]  ;;  %v4559_v49 = vld.sshfl [vmem:[#allocation1 + $0x18] sm:$0xff pattern:$0x73625140] }
 0x342   : > { %4686 = vst [vmem:[%s17045_s26 + $0x380] sm:$0x3] %v4556_v33  ;;  %v16355_v61 = vld [vmem:[%s21795_s2 + $0x540] sm:$0xff]  ;;  %v16394_v57 = vld [vmem:[%s21795_s2 + $0x678] sm:$0xff]  ;;  %v21842_v40 = vld [vmem:[#allocation10_spill] sm:$0xff]  ;;  %v4484_v33 = vrot.slane %v19521_v0, 2 }
 0x343   : > { %7035 = vmatpush.bf16.msrb.mxu1 %v16349_v25  ;;  %7049 = vmatpush.bf16.msrb.mxu2 %v16357_v24  ;;  %4687 = vst [vmem:[%s17045_s26 + $0x388] sm:$0x3] %v4557_v35  ;;  %v4476_v25 = vrot.slane %v19378_v41, 2  ;;  %v16371_v24 = vld [vmem:[%s21795_s2 + $0x5c0] sm:$0xff]  ;;  %v16385_v41 = vld [vmem:[%s21795_s2 + $0x630] sm:$0xff]  ;;  %v16390_v36 = vld [vmem:[%s21795_s2 + $0x658] sm:$0xff] }
 0x344   : > { %7063 = vmatpush.bf16.msrb.mxu3 %v16365_v20  ;;  %7077 = vmatpush.bf16.msra.mxu0 %v16373_v12  ;;  %4688 = vst [vmem:[%s17045_s26 + $0x390] sm:$0x3] %v4558_v59  ;;  %v16410_v20 = vld [vmem:[%s21795_s2 + $0x6f8] sm:$0xff]  ;;  %v4540_v12 = vld.sshfl [vmem:[#allocation1 + $0x20] sm:$0xff pattern:$0x73625140] }
 0x345   : > { %4689 = vst [vmem:[%s17045_s26 + $0x398] sm:$0x3] %v4559_v49  ;;  %v4542_v34 = vld.sshfl [vmem:[#allocation1 + $0x30] sm:$0xff pattern:$0x73625140]  ;;  %v16383_v35 = vld [vmem:[%s21795_s2 + $0x620] sm:$0xff] }
 0x346   : > { %4564 = vst [vmem:[#allocation1] ss:$4 sm:$0xff] %v4488_v63  ;;  %v4543_v28 = vld.sshfl [vmem:[#allocation1 + $0x38] sm:$0xff pattern:$0x73625140]  ;;  %v16391_v53 = vld [vmem:[%s21795_s2 + $0x660] sm:$0xff]  ;;  %v4489_v63 = vsel %vm4458_vm3, %v19621_v11, %v4428_v44 }
 0x347   : > { %7036 = vmatpush.bf16.msrb.mxu1 %v16348_v51  ;;  %7050 = vmatpush.bf16.msrb.mxu2 %v16356_v56  ;;  %v4541_v51 = vld.sshfl [vmem:[#allocation1 + $0x28] sm:$0xff pattern:$0x73625140]  ;;  %v16409_v56 = vld [vmem:[%s21795_s2 + $0x6f0] sm:$0xff]  ;;  %4669 = vst [vmem:[%s17045_s26 + $0x1f8] sm:$0x3] %v4533_v37 }
 0x348   : > { %7064 = vmatpush.bf16.msrb.mxu3 %v16364_v58  ;;  %7078 = vmatpush.bf16.msra.mxu0 %v16372_v39  ;;  %4545 = vst [vmem:[#allocation1 + $0x20] ss:$4 sm:$0xff] %v4476_v25  ;;  %v16392_v58 = vld [vmem:[%s21795_s2 + $0x668] sm:$0xff]  ;;  %v16407_v49 = vld [vmem:[%s21795_s2 + $0x6e0] sm:$0xff]  ;;  %v16381_v11 = vld [vmem:[%s21795_s2 + $0x610] sm:$0xff] }
 0x349   : > { %4674 = vst [vmem:[%s17045_s26 + $0x320] sm:$0x3] %v4540_v12  ;;  %v16408_v37 = vld [vmem:[%s21795_s2 + $0x6e8] sm:$0xff] }
 0x34a   : > { %4675 = vst [vmem:[%s17045_s26 + $0x328] sm:$0x3] %v4541_v51  ;;  %v16388_v12 = vld [vmem:[%s21795_s2 + $0x648] sm:$0xff] }
 0x34b   : > { %7037 = vmatpush.bf16.msrb.mxu1 %v16347_v31  ;;  %7051 = vmatpush.bf16.msrb.mxu2 %v16355_v61  ;;  %4676 = vst [vmem:[%s17045_s26 + $0x330] sm:$0x3] %v4542_v34  ;;  %v16382_v31 = vld [vmem:[%s21795_s2 + $0x618] sm:$0xff] }
 0x34c   : > { %7065 = vmatpush.bf16.msrb.mxu3 %v16363_v62  ;;  %7079 = vmatpush.bf16.msra.mxu0 %v16371_v24  ;;  %v16398_v61 = vld [vmem:[%s21795_s2 + $0x698] sm:$0xff]  ;;  %4677 = vst [vmem:[%s17045_s26 + $0x338] sm:$0x3] %v4543_v28  ;;  %v16404_v28 = vld [vmem:[%s21795_s2 + $0x6c8] sm:$0xff] }
 0x34d   : > { %v4566_v62 = vld.sshfl [vmem:[#allocation1] sm:$0xff pattern:$0x73625140]  ;;  %v4567_v51 = vld.sshfl [vmem:[#allocation1 + $0x8] sm:$0xff pattern:$0x73625140] }
 0x34e   : > { %7038 = vmatmul.bf16.vlgmr.msrb.gmra.mxu1 %v17923_v16  ;;  %7052 = vmatmul.bf16.vlgmr.msrb.gmra.mxu2 %v17930_v21  ;;  %4694 = vst [vmem:[%s17045_s26 + $0x3c0] sm:$0x3] %v4566_v62  ;;  %v4568_v34 = vld.sshfl [vmem:[#allocation1 + $0x10] sm:$0xff pattern:$0x73625140]  ;;  %v21845_v62 = vld [vmem:[#allocation12_spill] sm:$0xff] }
 0x34f   : > { %7086 = vmatpush.bf16.msra.mxu1 %v16386_v8  ;;  %7100 = vmatpush.bf16.msra.mxu2 %v16394_v57  ;;  %v4550_v59 = vld.sshfl [vmem:[#allocation1 + $0x20] sm:$0xff pattern:$0x73625140]  ;;  %v4551_v39 = vld.sshfl [vmem:[#allocation1 + $0x28] sm:$0xff pattern:$0x73625140]  ;;  %v4490_v8 = vsel %vm4460_vm5, %v4430_v50, %v4429_v13 }
 0x350   : > { %7114 = vmatpush.bf16.msra.mxu3 %v16402_v60  ;;  %7128 = vmatpush.bf16.msrb.mxu0 %v16410_v20  ;;  %v4552_v0 = vld.sshfl [vmem:[#allocation1 + $0x30] sm:$0xff pattern:$0x73625140]  ;;  %v4553_v1 = vld.sshfl [vmem:[#allocation1 + $0x38] sm:$0xff pattern:$0x73625140]  ;;  %v4491_v48 = vsel %vm4462_vm7, %v4489_v63, %v4490_v8 }
 0x351   : > { %7066 = vmatmul.bf16.vlgmr.msrb.gmra.mxu3 %v21841_v23  ;;  %7080 = vmatmul.bf16.vlgmr.msra.gmra.mxu0 %v21842_v40  ;;  %4555 = vst [vmem:[#allocation1 + $0x20] ss:$4 sm:$0xff] %v4484_v33  ;;  %v16406_v57 = vld [vmem:[%s21795_s2 + $0x6d8] sm:$0xff]  ;;  %v16405_v60 = vld [vmem:[%s21795_s2 + $0x6d0] sm:$0xff]  ;;  %v4492_v24 = vrot.slane %v4491_v48, 2  ;;  %v16380_v20 = vld [vmem:[%s21795_s2 + $0x608] sm:$0xff] }
 0x352   : > { %4682 = vst [vmem:[%s17045_s26 + $0x360] sm:$0x3] %v4550_v59  ;;  %v16403_v33 = vld [vmem:[%s21795_s2 + $0x6c0] sm:$0xff]  ;;  %v16433_v59 = vld [vmem:[%s21795_s2 + $0x7b0] sm:$0xff]  ;;  %v16416_v63 = vld [vmem:[%s21795_s2 + $0x728] sm:$0xff] }
 0x353   : > { %7087 = vmatpush.bf16.msra.mxu1 %v16385_v41  ;;  %7101 = vmatpush.bf16.msra.mxu2 %v16393_v52  ;;  %4683 = vst [vmem:[%s17045_s26 + $0x368] sm:$0x3] %v4551_v39  ;;  %v16396_v41 = vld [vmem:[%s21795_s2 + $0x688] sm:$0xff]  ;;  %v4569_v52 = vld.sshfl [vmem:[#allocation1 + $0x18] sm:$0xff pattern:$0x73625140] }
 0x354   : > { %7115 = vmatpush.bf16.msra.mxu3 %v16401_v19  ;;  %7129 = vmatpush.bf16.msrb.mxu0 %v16409_v56  ;;  %4684 = vst [vmem:[%s17045_s26 + $0x370] sm:$0x3] %v4552_v0  ;;  %v16379_v19 = vld [vmem:[%s21795_s2 + $0x600] sm:$0xff]  ;;  %v16424_v8 = vld [vmem:[%s21795_s2 + $0x768] sm:$0xff] }
 0x355   : > { %4685 = vst [vmem:[%s17045_s26 + $0x378] sm:$0x3] %v4553_v1  ;;  %v16387_v56 = vld [vmem:[%s21795_s2 + $0x640] sm:$0xff]  ;;  %v21843_v1 = vld [vmem:[#allocation11_spill] sm:$0xff] }
 0x356   : > { %4695 = vst [vmem:[%s17045_s26 + $0x3c8] sm:$0x3] %v4567_v51  ;;  %v16423_v48 = vld [vmem:[%s21795_s2 + $0x760] sm:$0xff]  ;;  %v16437_v51 = vld [vmem:[%s21795_s2 + $0x7d0] sm:$0xff] }
 0x357   : > { %7088 = vmatpush.bf16.msra.mxu1 %v16384_v47  ;;  %7102 = vmatpush.bf16.msra.mxu2 %v16392_v58  ;;  %v16395_v47 = vld [vmem:[%s21795_s2 + $0x680] sm:$0xff]  ;;  %v16418_v58 = vld [vmem:[%s21795_s2 + $0x738] sm:$0xff]  ;;  %4696 = vst [vmem:[%s17045_s26 + $0x3d0] sm:$0x3] %v4568_v34  ;;  %v16412_v34 = vld [vmem:[%s21795_s2 + $0x708] sm:$0xff] }
 0x358   : > { %7116 = vmatpush.bf16.msra.mxu3 %v16400_v38  ;;  %7130 = vmatpush.bf16.msrb.mxu0 %v16408_v37  ;;  %v4560_v44 = vld.sshfl [vmem:[#allocation1 + $0x20] sm:$0xff pattern:$0x73625140]  ;;  %v4561_v13 = vld.sshfl [vmem:[#allocation1 + $0x28] sm:$0xff pattern:$0x73625140] }
 0x359   : > { %v4562_v50 = vld.sshfl [vmem:[#allocation1 + $0x30] sm:$0xff pattern:$0x73625140]  ;;  %v4563_v25 = vld.sshfl [vmem:[#allocation1 + $0x38] sm:$0xff pattern:$0x73625140] }
 0x35a   : > { %4690 = vst [vmem:[%s17045_s26 + $0x3a0] sm:$0x3] %v4560_v44  ;;  %v16426_v38 = vld [vmem:[%s21795_s2 + $0x778] sm:$0xff]  ;;  %v16431_v44 = vld [vmem:[%s21795_s2 + $0x7a0] sm:$0xff] }
 0x35b   : > { %7089 = vmatpush.bf16.msra.mxu1 %v16383_v35  ;;  %7103 = vmatpush.bf16.msra.mxu2 %v16391_v53  ;;  %4691 = vst [vmem:[%s17045_s26 + $0x3a8] sm:$0x3] %v4561_v13  ;;  %v16434_v37 = vld [vmem:[%s21795_s2 + $0x7b8] sm:$0xff]  ;;  %v16417_v53 = vld [vmem:[%s21795_s2 + $0x730] sm:$0xff]  ;;  %v16439_v13 = vld [vmem:[%s21795_s2 + $0x7e0] sm:$0xff] }
 0x35c   : > { %7117 = vmatpush.bf16.msra.mxu3 %v16399_v55  ;;  %7131 = vmatpush.bf16.msrb.mxu0 %v16407_v49  ;;  %4692 = vst [vmem:[%s17045_s26 + $0x3b0] sm:$0x3] %v4562_v50  ;;  %v16442_v35 = vld [vmem:[%s21795_s2 + $0x7f8] sm:$0xff]  ;;  %v16425_v55 = vld [vmem:[%s21795_s2 + $0x770] sm:$0xff] }
 0x35d   : > { %4693 = vst [vmem:[%s17045_s26 + $0x3b8] sm:$0x3] %v4563_v25  ;;  %v16414_v50 = vld [vmem:[%s21795_s2 + $0x718] sm:$0xff] }
 0x35e   : > { %4565 = vst [vmem:[#allocation1 + $0x20] ss:$4 sm:$0xff] %v4492_v24  ;;  %v16422_v25 = vld [vmem:[%s21795_s2 + $0x758] sm:$0xff] }
 0x35f   : > { %7090 = vmatpush.bf16.msra.mxu1 %v16382_v31  ;;  %7104 = vmatpush.bf16.msra.mxu2 %v16390_v36  ;;  %4697 = vst [vmem:[%s17045_s26 + $0x3d8] sm:$0x3] %v4569_v52  ;;  %v21844_v31 = vld [vmem:[#allocation13_spill] sm:$0xff]  ;;  %v16441_v36 = vld [vmem:[%s21795_s2 + $0x7f0] sm:$0xff]  ;;  %v16438_v24 = vld [vmem:[%s21795_s2 + $0x7d8] sm:$0xff] }
 0x360   : > { %7118 = vmatpush.bf16.msra.mxu3 %v16398_v61  ;;  %7132 = vmatpush.bf16.msrb.mxu0 %v16406_v57  ;;  %v16432_v57 = vld [vmem:[%s21795_s2 + $0x7a8] sm:$0xff] }
 0x361   : > { %v16428_v52 = vld [vmem:[%s21795_s2 + $0x788] sm:$0xff] }
 0x363   : > { %7091 = vmatpush.bf16.msra.mxu1 %v16381_v11  ;;  %7105 = vmatpush.bf16.msra.mxu2 %v16389_v32  ;;  %v21846_v11 = vld [vmem:[#allocation14_spill] sm:$0xff] }
 0x364   : > { %7119 = vmatpush.bf16.msra.mxu3 %v16397_v54  ;;  %7133 = vmatpush.bf16.msrb.mxu0 %v16405_v60  ;;  %v16440_v32 = vld [vmem:[%s21795_s2 + $0x7e8] sm:$0xff]  ;;  %v16415_v54 = vld [vmem:[%s21795_s2 + $0x720] sm:$0xff]  ;;  %v16430_v60 = vld [vmem:[%s21795_s2 + $0x798] sm:$0xff] }
 0x365   : > { %v4570_v39 = vld.sshfl [vmem:[#allocation1 + $0x20] sm:$0xff pattern:$0x73625140]  ;;  %v4571_v0 = vld.sshfl [vmem:[#allocation1 + $0x28] sm:$0xff pattern:$0x73625140] }
 0x366   : > { %v4572_v49 = vld.sshfl [vmem:[#allocation1 + $0x30] sm:$0xff pattern:$0x73625140]  ;;  %v4573_v61 = vld.sshfl [vmem:[#allocation1 + $0x38] sm:$0xff pattern:$0x73625140] }
 0x367   : > { %7092 = vmatpush.bf16.msra.mxu1 %v16380_v20  ;;  %7106 = vmatpush.bf16.msra.mxu2 %v16388_v12  ;;  %4698 = vst [vmem:[%s17045_s26 + $0x3e0] sm:$0x3] %v4570_v39  ;;  %v16413_v20 = vld [vmem:[%s21795_s2 + $0x710] sm:$0xff]  ;;  %v6789_v39 = vpop.f32.mrf.mxu3 }
 0x368   : > { %7120 = vmatpush.bf16.msra.mxu3 %v16396_v41  ;;  %7134 = vmatpush.bf16.msrb.mxu0 %v16404_v28  ;;  %4699 = vst [vmem:[%s17045_s26 + $0x3e8] sm:$0x3] %v4571_v0  ;;  %v16421_v12 = vld [vmem:[%s21795_s2 + $0x750] sm:$0xff]  ;;  %v16420_v28 = vld [vmem:[%s21795_s2 + $0x748] sm:$0xff]  ;;  %v6803_v0 = vpop.f32.mrf.mxu0 }
 0x369   : > { %4700 = vst [vmem:[%s17045_s26 + $0x3f0] sm:$0x3] %v4572_v49  ;;  %v16429_v41 = vld [vmem:[%s21795_s2 + $0x790] sm:$0xff] }
 0x36a   : > { %4701 = vst [vmem:[%s17045_s26 + $0x3f8] sm:$0x3] %v4573_v61 }
 0x36b   : > { %7093 = vmatpush.bf16.msra.mxu1 %v16379_v19  ;;  %7107 = vmatpush.bf16.msra.mxu2 %v16387_v56  ;;  %v16436_v19 = vld [vmem:[%s21795_s2 + $0x7c8] sm:$0xff]  ;;  %v16411_v56 = vld [vmem:[%s21795_s2 + $0x700] sm:$0xff] }
 0x36c   : > { %7121 = vmatpush.bf16.msra.mxu3 %v16395_v47  ;;  %7135 = vmatpush.bf16.msrb.mxu0 %v16403_v33  ;;  %v16419_v47 = vld [vmem:[%s21795_s2 + $0x740] sm:$0xff]  ;;  %v21848_v33 = vld [vmem:[#allocation16_spill] sm:$0xff] }
 0x36e   : > { %7094 = vmatmul.bf16.vlgmr.msra.gmra.mxu1 %v21843_v1  ;;  %7108 = vmatmul.bf16.vlgmr.msra.gmra.mxu2 %v21844_v31 }
 0x36f   : > { %7142 = vmatpush.bf16.msrb.mxu1 %v16418_v58  ;;  %7156 = vmatpush.bf16.msrb.mxu2 %v16426_v38  ;;  %v16427_v58 = vld [vmem:[%s21795_s2 + $0x780] sm:$0xff]  ;;  %v6843_v61 = vpop.f32.mrf.mxu3 }
 0x370   : > { %7170 = vmatpush.bf16.msrb.mxu3 %v16434_v37  ;;  %7184 = vmatpush.bf16.msra.mxu0 %v16442_v35  ;;  %v16435_v38 = vld [vmem:[%s21795_s2 + $0x7c0] sm:$0xff]  ;;  %v21847_v37 = vld [vmem:[#allocation15_spill] sm:$0xff] }
 0x371   : > { %7122 = vmatmul.bf16.vlgmr.msra.gmra.mxu3 %v21845_v62  ;;  %7136 = vmatmul.bf16.vlgmr.msrb.gmra.mxu0 %v21846_v11  ;;  %v21849_v35 = vld [vmem:[#allocation17_spill] sm:$0xff] }
 0x373   : > { %7143 = vmatpush.bf16.msrb.mxu1 %v16417_v53  ;;  %7157 = vmatpush.bf16.msrb.mxu2 %v16425_v55  ;;  %v21850_v53 = vld [vmem:[#allocation18_spill] sm:$0xff]  ;;  %v6761_v55 = vpop.f32.mrf.mxu1 }
 0x374   : > { %7171 = vmatpush.bf16.msrb.mxu3 %v16433_v59  ;;  %7185 = vmatpush.bf16.msra.mxu0 %v16441_v36  ;;  %v6775_v59 = vpop.f32.mrf.mxu2 }
 0x377   : > { %7144 = vmatpush.bf16.msrb.mxu1 %v16416_v63  ;;  %7158 = vmatpush.bf16.msrb.mxu2 %v16424_v8  ;;  %v6857_v63 = vpop.f32.mrf.mxu0 }
 0x378   : > { %7172 = vmatpush.bf16.msrb.mxu3 %v16432_v57  ;;  %7186 = vmatpush.bf16.msra.mxu0 %v16440_v32  ;;  %v6845_v32 = vpop.f32.mrf.mxu3 }
 0x37b   : > { %7145 = vmatpush.bf16.msrb.mxu1 %v16415_v54  ;;  %7159 = vmatpush.bf16.msrb.mxu2 %v16423_v48  ;;  %v6815_v49 = vpop.f32.mrf.mxu1 }
 0x37c   : > { %7173 = vmatpush.bf16.msrb.mxu3 %v16431_v44  ;;  %7187 = vmatpush.bf16.msra.mxu0 %v16439_v13  ;;  %v6829_v36 = vpop.f32.mrf.mxu2 }
 0x37f   : > { %7146 = vmatpush.bf16.msrb.mxu1 %v16414_v50  ;;  %7160 = vmatpush.bf16.msrb.mxu2 %v16422_v25  ;;  %v6859_v54 = vpop.f32.mrf.mxu0 }
 0x380   : > { %7174 = vmatpush.bf16.msrb.mxu3 %v16430_v60  ;;  %7188 = vmatpush.bf16.msra.mxu0 %v16438_v24  ;;  %v6899_v13 = vpop.f32.mrf.mxu3 }
 0x383   : > { %7147 = vmatpush.bf16.msrb.mxu1 %v16413_v20  ;;  %7161 = vmatpush.bf16.msrb.mxu2 %v16421_v12  ;;  %v6817_v8 = vpop.f32.mrf.mxu1 }
 0x384   : > { %7175 = vmatpush.bf16.msrb.mxu3 %v16429_v41  ;;  %7189 = vmatpush.bf16.msra.mxu0 %v16437_v51  ;;  %v6831_v57 = vpop.f32.mrf.mxu2  ;;  %v6776_v41 = vadd.f32 %v6775_v59, %v6761_v55 }
 0x386   : > { %v6790_v51 = vadd.f32 %v6789_v39, %v6776_v41 }
 0x387   : > { %7148 = vmatpush.bf16.msrb.mxu1 %v16412_v34  ;;  %7162 = vmatpush.bf16.msrb.mxu2 %v16420_v28  ;;  %v6913_v50 = vpop.f32.mrf.mxu0 }
 0x388   : > { %7176 = vmatpush.bf16.msrb.mxu3 %v16428_v52  ;;  %7190 = vmatpush.bf16.msra.mxu0 %v16436_v19  ;;  %v6901_v24 = vpop.f32.mrf.mxu3  ;;  %v6816_v19 = vadd.f32 %v6815_v49, %v19791_v22 }
 0x38b   : > { %7149 = vmatpush.bf16.msrb.mxu1 %v16411_v56  ;;  %7163 = vmatpush.bf16.msrb.mxu2 %v16419_v47  ;;  %v6871_v48 = vpop.f32.mrf.mxu1  ;;  %v6804_v56 = vadd.f32 %v6803_v0, %v6790_v51 }
 0x38c   : > { %7177 = vmatpush.bf16.msrb.mxu3 %v16427_v58  ;;  %7191 = vmatpush.bf16.msra.mxu0 %v16435_v38  ;;  %v6885_v44 = vpop.f32.mrf.mxu2  ;;  %v6830_v58 = vadd.f32 %v6829_v36, %v6816_v19 }
 0x38d   : > { %v6818_v38 = vadd.f32 %v6817_v8, %v6804_v56 }
 0x38e   : > { %7150 = vmatmul.bf16.vlgmr.msrb.gmra.mxu1 %v21847_v37  ;;  %7164 = vmatmul.bf16.vlgmr.msrb.gmra.mxu2 %v21848_v33  ;;  %v6844_v37 = vadd.f32 %v6843_v61, %v6830_v58 }
 0x38f   : > { %7178 = vmatmul.bf16.vlgmr.msrb.gmra.mxu3 %v21849_v35  ;;  %7192 = vmatmul.bf16.vlgmr.msra.gmra.mxu0 %v21850_v53  ;;  %v6915_v20 = vpop.f32.mrf.mxu0  ;;  %v6832_v53 = vadd.f32 %v6831_v57, %v6818_v38 }
 0x390   : > { %v6858_v1 = vadd.f32 %v6857_v63, %v6844_v37 }
 0x391   : > { %v6846_v31 = vadd.f32 %v6845_v32, %v6832_v53 }
 0x392   : > { %v6872_v55 = vadd.f32 %v6871_v48, %v6858_v1 }
 0x393   : > { %v6873_v25 = vpop.f32.mrf.mxu1  ;;  %v6860_v40 = vadd.f32 %v6859_v54, %v6846_v31 }
 0x394   : > { %v6887_v60 = vpop.f32.mrf.mxu2  ;;  %v6955_v28 = vpop.f32.mrf.mxu3  ;;  %v6886_v41 = vadd.f32 %v6885_v44, %v6872_v55 }
 0x395   : > { %v6874_v23 = vadd.f32 %v6873_v25, %v6860_v40 }
 0x396   : > { %v6900_v49 = vadd.f32 %v6899_v13, %v6886_v41 }
 0x397   : > { %v6969_v52 = vpop.f32.mrf.mxu0  ;;  %v6888_v22 = vadd.f32 %v6887_v60, %v6874_v23 }
 0x398   : > { %v6914_v8 = vadd.f32 %v6913_v50, %v6900_v49 }
 0x399   : > { %v6902_v36 = vadd.f32 %v6901_v24, %v6888_v22 }
 0x39b   : > { %v6927_v12 = vpop.f32.mrf.mxu1  ;;  %v6916_v19 = vadd.f32 %v6915_v20, %v6902_v36 }
 0x39c   : > { %v6941_v34 = vpop.f32.mrf.mxu2  ;;  %v6957_v33 = vpop.f32.mrf.mxu3  ;;  %v6928_v61 = vadd.f32 %v6927_v12, %v6914_v8 }
 0x39e   : > { %v6942_v53 = vadd.f32 %v6941_v34, %v6928_v61 }
 0x39f   : > { %v6971_v11 = vpop.f32.mrf.mxu0 }
 0x3a0   : > { %v6956_v1 = vadd.f32 %v6955_v28, %v6942_v53 }
 0x3a2   : > { %v6970_v48 = vadd.f32 %v6969_v52, %v6956_v1 }
 0x3a3   : > { %v6929_v47 = vpop.f32.mrf.mxu1 }
 0x3a4   : > { %v6943_v35 = vpop.f32.mrf.mxu2  ;;  %v6930_v37 = vadd.f32 %v6929_v47, %v6916_v19 }
 0x3a6   : > { %v6944_v31 = vadd.f32 %v6943_v35, %v6930_v37 }
 0x3a8   : > { %v6958_v54 = vadd.f32 %v6957_v33, %v6944_v31 }
 0x3aa   : > { %v6972_v44 = vadd.f32 %v6971_v11, %v6958_v54 }
 0x3ab   : > { %v6983_v62 = vpop.f32.mrf.mxu1 }
 0x3ac   : > { %v6984_v13 = vadd.f32 %v6983_v62, %v6970_v48 }
 0x3ae   : > { %v7025_v21 = vpop.f32.mrf.mxu0 }
 0x3b1   : > { %v6997_v59 = vpop.f32.mrf.mxu2 }
 0x3b2   : > { %v6998_v25 = vadd.f32 %v6997_v59, %v6984_v13 }
 0x3b3   : > { %v6985_v0 = vpop.f32.mrf.mxu1 }
 0x3b4   : > { %v7011_v39 = vpop.f32.mrf.mxu3  ;;  %v6986_v50 = vadd.f32 %v6985_v0, %v6972_v44 }
 0x3b5   : > { %v7012_v12 = vadd.f32 %v7011_v39, %v6998_v25 }
 0x3b6   : > { %v7027_v56 = vpop.f32.mrf.mxu0 }
 0x3b7   : > { %v7026_v47 = vadd.f32 %v7025_v21, %v7012_v12 }
 0x3b9   : > { %v6999_v57 = vpop.f32.mrf.mxu2 }
 0x3ba   : > { %v7000_v60 = vadd.f32 %v6999_v57, %v6986_v50 }
 0x3bc   : > { %v7013_v51 = vpop.f32.mrf.mxu3 }
 0x3bd   : > { %v7014_v34 = vadd.f32 %v7013_v51, %v7000_v60 }
 0x3bf   : > { %v7028_v35 = vadd.f32 %v7027_v56, %v7014_v34  ;;  %v14576_v34 = vld [vmem:[%s21798_s5] sm:$0xf] }
 0x3cb   : > { %v7039_v58 = vpop.f32.mrf.mxu1 }
 0x3cc   : > { %v7040_v28 = vadd.f32 %v7039_v58, %v7026_v47  ;;  %v16459_v47 = vld [vmem:[%s21798_s5 + $0x7c] sm:$0xf0] }
 0x3ce   : > { %v7081_v40 = vpop.f32.mrf.mxu0 }
 0x3d1   : > { %v7053_v63 = vpop.f32.mrf.mxu2 }
 0x3d2   : > { %v7054_v33 = vadd.f32 %v7053_v63, %v7040_v28  ;;  %v14577_v28 = vor.u32 %v16459_v47, %v14576_v34  ;;  %v16449_v34 = vld [vmem:[%s21798_s5 + $0x34] sm:$0xf] }
 0x3d3   : > { %v7041_v23 = vpop.f32.mrf.mxu1  ;;  %v14626_v47 = vld [vmem:[%s21798_s5 + $0xb0] sm:$0xf0] }
 0x3d4   : > { %v7067_v32 = vpop.f32.mrf.mxu3  ;;  %v7042_v49 = vadd.f32 %v7041_v23, %v7028_v35  ;;  %v16443_v35 = vld [vmem:[%s21798_s5 + $0x4] sm:$0xf]  ;;  %7434 = vmatpush.bf16.msra.mxu2 %v14577_v28  ;;  %v16466_v28 = vld [vmem:[%s21798_s5 + $0xb4] sm:$0xf0] }
 0x3d5   : > { %v7068_v62 = vadd.f32 %v7067_v32, %v7054_v33  ;;  %v16460_v33 = vld [vmem:[%s21798_s5 + $0x84] sm:$0xf0] }
 0x3d6   : > { %v7083_v38 = vpop.f32.mrf.mxu0 }
 0x3d7   : > { %v7082_v0 = vadd.f32 %v7081_v40, %v7068_v62 }
 0x3d9   : > { %v7055_v24 = vpop.f32.mrf.mxu2 }
 0x3da   : > { %v7056_v36 = vadd.f32 %v7055_v24, %v7042_v49 }
 0x3dc   : > { %v7069_v20 = vpop.f32.mrf.mxu3 }
 0x3dd   : > { %v7070_v59 = vadd.f32 %v7069_v20, %v7056_v36  ;;  %v16444_v36 = vld [vmem:[%s21798_s5 + $0xc] sm:$0xf] }
 0x3df   : > { %v7084_v19 = vadd.f32 %v7083_v38, %v7070_v59  ;;  %v14592_v59 = vld [vmem:[%s21798_s5 + $0x10] sm:$0xf] }
 0x3eb   : > { %v7095_v55 = vpop.f32.mrf.mxu1 }
 0x3ec   : > { %v7096_v39 = vadd.f32 %v7095_v55, %v7082_v0  ;;  %v14571_v55 = vld [vmem:[%s21800_s7 + $0x4] sm:$0xf]  ;;  %v16461_v0 = vld [vmem:[%s21798_s5 + $0x8c] sm:$0xf0] }
 0x3ee   : > { %v7137_v52 = vpop.f32.mrf.mxu0 }
 0x3f1   : > { %v7109_v41 = vpop.f32.mrf.mxu2 }
 0x3f2   : > { %v7110_v51 = vadd.f32 %v7109_v41, %v7096_v39  ;;  %v14578_v41 = vld [vmem:[%s21798_s5 + $0x80] sm:$0xf0]  ;;  %v14600_v39 = vld [vmem:[%s21798_s5 + $0x18] sm:$0xf] }
 0x3f3   : > { %v7097_v11 = vpop.f32.mrf.mxu1  ;;  %v14581_v49 = vor.u32 %v16443_v35, %v14578_v41  ;;  %v14632_v35 = vld [vmem:[%s21798_s5 + $0x38] sm:$0xf]  ;;  %v16450_v41 = vld [vmem:[%s21798_s5 + $0x3c] sm:$0xf] }
 0x3f4   : > { %v7123_v22 = vpop.f32.mrf.mxu3  ;;  %v7098_v21 = vadd.f32 %v7097_v11, %v7084_v19  ;;  %v14586_v11 = vld [vmem:[%s21798_s5 + $0x88] sm:$0xf0]  ;;  %v14594_v19 = vld [vmem:[%s21798_s5 + $0x90] sm:$0xf0] }
 0x3f5   : > { %v7124_v58 = vadd.f32 %v7123_v22, %v7110_v51  ;;  %v14584_v22 = vld [vmem:[%s21798_s5 + $0x8] sm:$0xf]  ;;  %v14589_v62 = vor.u32 %v16444_v36, %v14586_v11  ;;  %7447 = vmatpush.bf16.msra.mxu3 %v14581_v49  ;;  %v14629_v49 = vor.u32 %v16449_v34, %v14626_v47  ;;  %v14640_v11 = vld [vmem:[%s21798_s5 + $0x40] sm:$0xf] }
 0x3f6   : > { %v7139_v61 = vpop.f32.mrf.mxu0 }
 0x3f7   : > { %v7138_v54 = vadd.f32 %v7137_v52, %v7124_v58  ;;  %v14585_v52 = vor.u32 %v16460_v33, %v14584_v22  ;;  %7473 = vmatpush.bf16.msrb.mxu0 %v14589_v62  ;;  %v14634_v22 = vld [vmem:[%s21798_s5 + $0xb8] sm:$0xf0]  ;;  %v16467_v62 = vld [vmem:[%s21798_s5 + $0xbc] sm:$0xf0] }
 0x3f8   : > { %v14637_v36 = vor.u32 %v16450_v41, %v14634_v22  ;;  %v14688_v41 = vld [vmem:[%s21798_s5 + $0x70] sm:$0xf] }
 0x3f9   : > { %v7111_v8 = vpop.f32.mrf.mxu2  ;;  %v16473_v22 = vld [vmem:[%s21798_s5 + $0xec] sm:$0xf0] }
 0x3fa   : > { %v7112_v56 = vadd.f32 %v7111_v8, %v7098_v21  ;;  %v16445_v8 = vld [vmem:[%s21798_s5 + $0x14] sm:$0xf]  ;;  %v16446_v21 = vld [vmem:[%s21798_s5 + $0x1c] sm:$0xf] }
 0x3fc   : > { %v7125_v57 = vpop.f32.mrf.mxu3 }
 0x3fd   : > { %v7126_v1 = vadd.f32 %v7125_v57, %v7112_v56  ;;  %v14593_v57 = vor.u32 %v16461_v0, %v14592_v59  ;;  %v14602_v56 = vld [vmem:[%s21798_s5 + $0x98] sm:$0xf0]  ;;  %v16451_v59 = vld [vmem:[%s21798_s5 + $0x44] sm:$0xf] }
 0x3fe   : > { %v14605_v58 = vor.u32 %v16446_v21, %v14602_v56  ;;  %v14642_v0 = vld [vmem:[%s21798_s5 + $0xc0] sm:$0xf0]  ;;  %v14656_v56 = vld [vmem:[%s21798_s5 + $0x50] sm:$0xf] }
 0x3ff   : > { %v7140_v23 = vadd.f32 %v7139_v61, %v7126_v1  ;;  %v16462_v61 = vld [vmem:[%s21798_s5 + $0x94] sm:$0xf0]  ;;  %7486 = vmatpush.bf16.msrb.mxu2 %v14593_v57  ;;  %v16468_v57 = vld [vmem:[%s21798_s5 + $0xc4] sm:$0xf0] }
 0x400   : > { %v14601_v51 = vor.u32 %v16462_v61, %v14600_v39  ;;  %7525 = vmatpush.bf16.msra.mxu0 %v14605_v58  ;;  %v14650_v39 = vld [vmem:[%s21798_s5 + $0xc8] sm:$0xf0]  ;;  %v14641_v61 = vor.u32 %v16467_v62, %v14640_v11  ;;  %v16469_v58 = vld [vmem:[%s21798_s5 + $0xcc] sm:$0xf0]  ;;  %v16458_v11 = vld [vmem:[%s21798_s5 + $0x7c] sm:$0xf] }
 0x401   : > { %v14698_v62 = vld [vmem:[%s21798_s5 + $0xf8] sm:$0xf0] }
 0x40b   : > { %v7151_v53 = vpop.f32.mrf.mxu1 }
 0x40c   : > { %v7193_v63 = vpop.f32.mrf.mxu0  ;;  %v7152_v32 = vadd.f32 %v7151_v53, %v7138_v54  ;;  %v14597_v53 = vor.u32 %v16445_v8, %v14594_v19  ;;  %v16463_v54 = vld [vmem:[%s21798_s5 + $0x9c] sm:$0xf0]  ;;  %v14648_v8 = vld [vmem:[%s21798_s5 + $0x48] sm:$0xf]  ;;  %v16452_v19 = vld [vmem:[%s21798_s5 + $0x4c] sm:$0xf] }
 0x40d   : > { %v14653_v21 = vor.u32 %v16452_v19, %v14650_v39  ;;  %v16482_v19 = vld [vmem:[%s21796_s3 + $0x38] sm:$0xff] }
 0x40e   : > { %7499 = vmatpush.bf16.msrb.mxu3 %v14597_v53  ;;  %v14645_v53 = vor.u32 %v16451_v59, %v14642_v0  ;;  %v14689_v59 = vor.u32 %v16473_v22, %v14688_v41  ;;  %v16490_v39 = vld [vmem:[%s21796_s3 + $0x78] sm:$0xff]  ;;  %v16499_v41 = vld [vmem:[%s21796_s3 + $0xc0] sm:$0xff] }
 0x40f   : > { %v16514_v22 = vld [vmem:[%s21796_s3 + $0x138] sm:$0xff] }
 0x411   : > { %v7165_v37 = vpop.f32.mrf.mxu2 }
 0x412   : > { %v7179_v31 = vpop.f32.mrf.mxu3  ;;  %v7166_v44 = vadd.f32 %v7165_v37, %v7152_v32  ;;  %v7205_v37 = vpop.permute.xlu0 %7204  ;;  %v14616_v32 = vld [vmem:[%s21798_s5 + $0x28] sm:$0xf] }
 0x413   : > { %v7153_v48 = vpop.f32.mrf.mxu1 }
 0x414   : > { %v7154_v40 = vadd.f32 %v7153_v48, %v7140_v23  ;;  %v7180_v60 = vadd.f32 %v7179_v31, %v7166_v44  ;;  %v7195_v20 = vpop.f32.mrf.mxu0  ;;  %v16447_v48 = vld [vmem:[%s21798_s5 + $0x24] sm:$0xf]  ;;  %v16464_v44 = vld [vmem:[%s21798_s5 + $0xa4] sm:$0xf0] }
 0x415   : > { %v14610_v23 = vld [vmem:[%s21798_s5 + $0xa0] sm:$0xf0] }
 0x416   : > { %v7194_v38 = vadd.f32 %v7193_v63, %v7180_v60  ;;  %v14608_v63 = vld [vmem:[%s21798_s5 + $0x20] sm:$0xf] }
 0x417   : > { %v14609_v60 = vor.u32 %v16463_v54, %v14608_v63  ;;  %v16470_v63 = vld [vmem:[%s21798_s5 + $0xd4] sm:$0xf0]  ;;  %v16454_v54 = vld [vmem:[%s21798_s5 + $0x5c] sm:$0xf] }
 0x419   : > { %v7167_v13 = vpop.f32.mrf.mxu2 }
 0x41a   : > { %v7168_v25 = vadd.f32 %v7167_v13, %v7154_v40  ;;  %v7181_v50 = vpop.f32.mrf.mxu3  ;;  %v16448_v13 = vld [vmem:[%s21798_s5 + $0x2c] sm:$0xf] }
 0x41c   : > { %v7182_v24 = vadd.f32 %v7181_v50, %v7168_v25  ;;  %v14618_v25 = vld [vmem:[%s21798_s5 + $0xa8] sm:$0xf0] }
 0x41e   : > { %v7196_v12 = vadd.f32 %v7195_v20, %v7182_v24  ;;  %v14613_v24 = vor.u32 %v16447_v48, %v14610_v23  ;;  %v14617_v20 = vor.u32 %v16464_v44, %v14616_v32  ;;  %v14666_v48 = vld [vmem:[%s21798_s5 + $0xd8] sm:$0xf0]  ;;  %v14657_v23 = vor.u32 %v16469_v58, %v14656_v56  ;;  %v16497_v56 = vld [vmem:[%s21796_s3 + $0xb0] sm:$0xff] }
 0x41f   : > { %v16505_v58 = vld [vmem:[%s21796_s3 + $0xf0] sm:$0xff] }
 0x420   : > { %7224 = vmatpush.msra.mxu1 %v7196_v12  ;;  %v14621_v12 = vor.u32 %v16448_v13, %v14618_v25  ;;  %v14672_v13 = vld [vmem:[%s21798_s5 + $0x60] sm:$0xf] }
 0x421   : > { %v16471_v25 = vld [vmem:[%s21798_s5 + $0xdc] sm:$0xf0] }
 0x422   : > { %7225 = vmatpush.msra.mxu1 %v7194_v38  ;;  %v14624_v38 = vld [vmem:[%s21798_s5 + $0x30] sm:$0xf]  ;;  %v14673_v34 = vor.u32 %v16471_v25, %v14672_v13  ;;  %v16494_v13 = vld [vmem:[%s21796_s3 + $0x98] sm:$0xff] }
 0x423   : > { %14573 = vmatmul.msk.f32.vlgmr.msra.gmra.mxu1 %vm3161_vm0, %v14571_v55  ;;  %v16465_v55 = vld [vmem:[%s21798_s5 + $0xac] sm:$0xf0]  ;;  %v16502_v25 = vld [vmem:[%s21796_s3 + $0xd8] sm:$0xff] }
 0x424   : > { %7460 = vmatpush.bf16.msrb.mxu1 %v14585_v52  ;;  %v14625_v33 = vor.u32 %v16465_v55, %v14624_v38  ;;  %v14633_v52 = vor.u32 %v16466_v28, %v14632_v35  ;;  %v16456_v38 = vld [vmem:[%s21798_s5 + $0x6c] sm:$0xf] }
 0x425   : > { %v14682_v55 = vld [vmem:[%s21798_s5 + $0xe8] sm:$0xf0] }
 0x426   : > { %v14685_v28 = vor.u32 %v16456_v38, %v14682_v55  ;;  %v16484_v38 = vld [vmem:[%s21796_s3 + $0x48] sm:$0xff] }
 0x427   : > { %v16492_v55 = vld [vmem:[%s21796_s3 + $0x88] sm:$0xff] }
 0x428   : > { %7512 = vmatpush.bf16.msra.mxu1 %v14601_v51  ;;  %v14649_v51 = vor.u32 %v16468_v57, %v14648_v8  ;;  %v14701_v57 = vor.u32 %v16458_v11, %v14698_v62 }
 0x4a0   : > { %v7227_v31 = vpop.f32.mrf.mxu1 }
 0x4a1   : > { %v7228_v1 = vadd.f32 %v7227_v31, %v7205_v37  ;;  %v16453_v37 = vld [vmem:[%s21798_s5 + $0x54] sm:$0xf] }
 0x4a2   : > { %v14658_v31 = vld [vmem:[%s21798_s5 + $0xd0] sm:$0xf0] }
 0x4a3   : > { %v7230_v40 = vmax.f32 %v7228_v1, 0.0  ;;  %v14664_v1 = vld [vmem:[%s21798_s5 + $0x58] sm:$0xf]  ;;  %v14661_v32 = vor.u32 %v16453_v37, %v14658_v31  ;;  %v16480_v37 = vld [vmem:[%s21796_s3 + $0x28] sm:$0xff] }
 0x4a4   : > { %v14665_v44 = vor.u32 %v16470_v63, %v14664_v1  ;;  %v16488_v31 = vld [vmem:[%s21796_s3 + $0x68] sm:$0xff] }
 0x4a5   : > { %v20115_v50 = vpack.c.bf16 %v7230_v40, %v7230_v40  ;;  %v14669_v40 = vor.u32 %v16454_v54, %v14666_v48  ;;  %v16496_v1 = vld [vmem:[%s21796_s3 + $0xa8] sm:$0xff]  ;;  %v16479_v54 = vld [vmem:[%s21796_s3 + $0x20] sm:$0xff] }
 0x4a6   : > { %v16504_v63 = vld [vmem:[%s21796_s3 + $0xe8] sm:$0xff]  ;;  %v16487_v48 = vld [vmem:[%s21796_s3 + $0x60] sm:$0xff] }
 0x4a7   : > { %14702 = vmatmul.msk.bf16.vlgmr.msra.gmra.mxu2 %vm3161_vm0, %v20115_v50  ;;  %14703 = vmatmul.msk.bf16.vlgmr.msra.gmra.mxu3 %vm3161_vm0, %v20115_v50 }
 0x4a8   : > { %14704 = vmatmul.msk.bf16.vlgmr.msrb.gmra.mxu1 %vm3161_vm0, %v20115_v50  ;;  %14705 = vmatmul.msk.bf16.vlgmr.msrb.gmra.mxu0 %vm3161_vm0, %v20115_v50 }
 0x4a9   : > { %7538 = vmatpush.bf16.msra.mxu2 %v14609_v60  ;;  %7551 = vmatpush.bf16.msra.mxu3 %v14613_v24  ;;  %v16455_v60 = vld [vmem:[%s21798_s5 + $0x64] sm:$0xf] }
 0x4aa   : > { %7564 = vmatpush.bf16.msrb.mxu1 %v14617_v20  ;;  %7577 = vmatpush.bf16.msrb.mxu0 %v14621_v12  ;;  %v14674_v24 = vld [vmem:[%s21798_s5 + $0xe0] sm:$0xf0]  ;;  %v14680_v20 = vld [vmem:[%s21798_s5 + $0x68] sm:$0xf] }
 0x4ab   : > { %v16472_v12 = vld [vmem:[%s21798_s5 + $0xe4] sm:$0xf0]  ;;  %v14677_v47 = vor.u32 %v16455_v60, %v14674_v24  ;;  %v16477_v60 = vld [vmem:[%s21796_s3 + $0x10] sm:$0xff] }
 0x4ac   : > { %v14681_v35 = vor.u32 %v16472_v12, %v14680_v20  ;;  %v16485_v24 = vld [vmem:[%s21796_s3 + $0x50] sm:$0xff]  ;;  %v16476_v12 = vld [vmem:[%s21796_s3 + $0x8] sm:$0xff] }
 0x4ad   : > { %v16493_v20 = vld [vmem:[%s21796_s3 + $0x90] sm:$0xff] }
 0x4b7   : > { %14706 = vmatmul.msk.bf16.vlgmr.msrb.gmra.mxu2 %vm3161_vm0, %v20115_v50  ;;  %14707 = vmatmul.msk.bf16.vlgmr.msrb.gmra.mxu3 %vm3161_vm0, %v20115_v50 }
 0x4b8   : > { %14708 = vmatmul.msk.bf16.vlgmr.msra.gmra.mxu1 %vm3161_vm0, %v20115_v50  ;;  %14709 = vmatmul.msk.bf16.vlgmr.msra.gmra.mxu0 %vm3161_vm0, %v20115_v50 }
 0x4b9   : > { %7590 = vmatpush.bf16.msrb.mxu2 %v14625_v33  ;;  %7603 = vmatpush.bf16.msrb.mxu3 %v14629_v49  ;;  %v16457_v33 = vld [vmem:[%s21798_s5 + $0x74] sm:$0xf] }
 0x4ba   : > { %7616 = vmatpush.bf16.msra.mxu1 %v14633_v52  ;;  %7629 = vmatpush.bf16.msra.mxu0 %v14637_v36  ;;  %v14690_v49 = vld [vmem:[%s21798_s5 + $0xf0] sm:$0xf0]  ;;  %v14696_v52 = vld [vmem:[%s21798_s5 + $0x78] sm:$0xf] }
 0x4bb   : > { %v16474_v36 = vld [vmem:[%s21798_s5 + $0xf4] sm:$0xf0]  ;;  %v14693_v0 = vor.u32 %v16457_v33, %v14690_v49 }
 0x4bc   : > { %v14697_v8 = vor.u32 %v16474_v36, %v14696_v52  ;;  %v16522_v33 = vld [vmem:[%s21796_s3 + $0x178] sm:$0xff] }
 0x4bd   : > { %v16530_v49 = vld [vmem:[%s21796_s3 + $0x1b8] sm:$0xff] }
 0x4be   : > { %v16538_v52 = vld [vmem:[%s21796_s3 + $0x1f8] sm:$0xff] }
 0x4c7   : > { %14710 = vmatmul.msk.bf16.vlgmr.msra.gmra.mxu2 %vm3161_vm0, %v20115_v50  ;;  %14711 = vmatmul.msk.bf16.vlgmr.msra.gmra.mxu3 %vm3161_vm0, %v20115_v50 }
 0x4c8   : > { %14712 = vmatmul.msk.bf16.vlgmr.msrb.gmra.mxu1 %vm3161_vm0, %v20115_v50  ;;  %14713 = vmatmul.msk.bf16.vlgmr.msrb.gmra.mxu0 %vm3161_vm0, %v20115_v50 }
 0x4c9   : > { %7642 = vmatpush.bf16.msra.mxu2 %v14641_v61  ;;  %7655 = vmatpush.bf16.msra.mxu3 %v14645_v53  ;;  %v16498_v61 = vld [vmem:[%s21796_s3 + $0xb8] sm:$0xff] }
 0x4ca   : > { %7668 = vmatpush.bf16.msrb.mxu1 %v14649_v51  ;;  %7681 = vmatpush.bf16.msrb.mxu0 %v14653_v21  ;;  %v16506_v53 = vld [vmem:[%s21796_s3 + $0xf8] sm:$0xff]  ;;  %v16481_v51 = vld [vmem:[%s21796_s3 + $0x30] sm:$0xff] }
 0x4cb   : > { %v16489_v21 = vld [vmem:[%s21796_s3 + $0x70] sm:$0xff] }
 0x4d7   : > { %14714 = vmatmul.msk.bf16.vlgmr.msrb.gmra.mxu2 %vm3161_vm0, %v20115_v50  ;;  %14715 = vmatmul.msk.bf16.vlgmr.msrb.gmra.mxu3 %vm3161_vm0, %v20115_v50 }
 0x4d8   : > { %14716 = vmatmul.msk.bf16.vlgmr.msra.gmra.mxu1 %vm3161_vm0, %v20115_v50  ;;  %14717 = vmatmul.msk.bf16.vlgmr.msra.gmra.mxu0 %vm3161_vm0, %v20115_v50 }
 0x4d9   : > { %7694 = vmatpush.bf16.msrb.mxu2 %v14657_v23  ;;  %7707 = vmatpush.bf16.msrb.mxu3 %v14661_v32  ;;  %v16495_v23 = vld [vmem:[%s21796_s3 + $0xa0] sm:$0xff] }
 0x4da   : > { %7720 = vmatpush.bf16.msra.mxu1 %v14665_v44  ;;  %7733 = vmatpush.bf16.msra.mxu0 %v14669_v40  ;;  %v16503_v32 = vld [vmem:[%s21796_s3 + $0xe0] sm:$0xff]  ;;  %v16478_v44 = vld [vmem:[%s21796_s3 + $0x18] sm:$0xff] }
 0x4db   : > { %v16486_v40 = vld [vmem:[%s21796_s3 + $0x58] sm:$0xff] }
 0x4e7   : > { %14718 = vmatmul.msk.bf16.vlgmr.msra.gmra.mxu2 %vm3161_vm0, %v20115_v50  ;;  %14719 = vmatmul.msk.bf16.vlgmr.msra.gmra.mxu3 %vm3161_vm0, %v20115_v50 }
 0x4e8   : > { %14720 = vmatmul.msk.bf16.vlgmr.msrb.gmra.mxu1 %vm3161_vm0, %v20115_v50  ;;  %14721 = vmatmul.msk.bf16.vlgmr.msrb.gmra.mxu0 %vm3161_vm0, %v20115_v50 }
 0x4e9   : > { %7746 = vmatpush.bf16.msra.mxu2 %v14673_v34  ;;  %7759 = vmatpush.bf16.msra.mxu3 %v14677_v47  ;;  %v16500_v34 = vld [vmem:[%s21796_s3 + $0xc8] sm:$0xff]  ;;  %v16475_v47 = vld [vmem:[%s21796_s3] sm:$0xff] }
 0x4ea   : > { %7772 = vmatpush.bf16.msrb.mxu1 %v14681_v35  ;;  %7785 = vmatpush.bf16.msrb.mxu0 %v14685_v28  ;;  %v16483_v35 = vld [vmem:[%s21796_s3 + $0x40] sm:$0xff] }
 0x4eb   : > { %v16491_v28 = vld [vmem:[%s21796_s3 + $0x80] sm:$0xff] }
 0x4f7   : > { %14722 = vmatmul.msk.bf16.vlgmr.msrb.gmra.mxu2 %vm3161_vm0, %v20115_v50  ;;  %14723 = vmatmul.msk.bf16.vlgmr.msrb.gmra.mxu3 %vm3161_vm0, %v20115_v50 }
 0x4f8   : > { %14724 = vmatmul.msk.bf16.vlgmr.msra.gmra.mxu1 %vm3161_vm0, %v20115_v50  ;;  %14725 = vmatmul.msk.bf16.vlgmr.msra.gmra.mxu0 %vm3161_vm0, %v20115_v50 }
 0x4f9   : > { %7798 = vmatpush.bf16.msrb.mxu2 %v14689_v59  ;;  %7811 = vmatpush.bf16.msrb.mxu3 %v14693_v0  ;;  %v16513_v0 = vld [vmem:[%s21796_s3 + $0x130] sm:$0xff] }
 0x4fa   : > { %7824 = vmatpush.bf16.msra.mxu1 %v14697_v8  ;;  %7837 = vmatpush.bf16.msra.mxu0 %v14701_v57  ;;  %v16521_v8 = vld [vmem:[%s21796_s3 + $0x170] sm:$0xff] }
 0x507   : > { %14726 = vmatmul.msk.bf16.vlgmr.msra.gmra.mxu2 %vm3161_vm0, %v20115_v50  ;;  %14727 = vmatmul.msk.bf16.vlgmr.msra.gmra.mxu3 %vm3161_vm0, %v20115_v50 }
 0x508   : > { %14728 = vmatmul.msk.bf16.vlgmr.msrb.gmra.mxu1 %vm3161_vm0, %v20115_v50  ;;  %14729 = vmatmul.msk.bf16.vlgmr.msrb.gmra.mxu0 %vm3161_vm0, %v20115_v50 }
 0x509   : > { %10213 = vmatpush.bf16.msra.mxu2 %v16482_v19  ;;  %10227 = vmatpush.bf16.msra.mxu3 %v16490_v39  ;;  %v16529_v19 = vld [vmem:[%s21796_s3 + $0x1b0] sm:$0xff] }
 0x50a   : > { %10241 = vmatpush.bf16.msrb.mxu1 %v16498_v61  ;;  %10255 = vmatpush.bf16.msrb.mxu0 %v16506_v53  ;;  %v16537_v39 = vld [vmem:[%s21796_s3 + $0x1f0] sm:$0xff] }
 0x50d   : > { %10214 = vmatpush.bf16.msra.mxu2 %v16481_v51  ;;  %10228 = vmatpush.bf16.msra.mxu3 %v16489_v21  ;;  %v16512_v21 = vld [vmem:[%s21796_s3 + $0x128] sm:$0xff] }
 0x50e   : > { %10242 = vmatpush.bf16.msrb.mxu1 %v16497_v56  ;;  %10256 = vmatpush.bf16.msrb.mxu0 %v16505_v58  ;;  %v16520_v56 = vld [vmem:[%s21796_s3 + $0x168] sm:$0xff] }
 0x511   : > { %10215 = vmatpush.bf16.msra.mxu2 %v16480_v37  ;;  %10229 = vmatpush.bf16.msra.mxu3 %v16488_v31 }
 0x512   : > { %10243 = vmatpush.bf16.msrb.mxu1 %v16496_v1  ;;  %10257 = vmatpush.bf16.msrb.mxu0 %v16504_v63 }
 0x515   : > { %10216 = vmatpush.bf16.msra.mxu2 %v16479_v54  ;;  %10230 = vmatpush.bf16.msra.mxu3 %v16487_v48  ;;  %v16511_v54 = vld [vmem:[%s21796_s3 + $0x120] sm:$0xff] }
 0x516   : > { %10244 = vmatpush.bf16.msrb.mxu1 %v16495_v23  ;;  %10258 = vmatpush.bf16.msrb.mxu0 %v16503_v32  ;;  %v16519_v48 = vld [vmem:[%s21796_s3 + $0x160] sm:$0xff] }
 0x517   : > { %14730 = vmatmul.msk.bf16.vlgmr.msrb.gmra.mxu2 %vm3161_vm0, %v20115_v50  ;;  %14731 = vmatmul.msk.bf16.vlgmr.msrb.gmra.mxu3 %vm3161_vm0, %v20115_v50  ;;  %v16527_v23 = vld [vmem:[%s21796_s3 + $0x1a0] sm:$0xff] }
 0x518   : > { %14732 = vmatmul.msk.bf16.vlgmr.msra.gmra.mxu1 %vm3161_vm0, %v20115_v50  ;;  %14733 = vmatmul.msk.bf16.vlgmr.msra.gmra.mxu0 %vm3161_vm0, %v20115_v50  ;;  %v16501_v50 = vld [vmem:[%s21796_s3 + $0xd0] sm:$0xff]  ;;  %v16535_v32 = vld [vmem:[%s21796_s3 + $0x1e0] sm:$0xff] }
 0x519   : > { %10217 = vmatpush.bf16.msra.mxu2 %v16478_v44  ;;  %10231 = vmatpush.bf16.msra.mxu3 %v16486_v40 }
 0x51a   : > { %10245 = vmatpush.bf16.msrb.mxu1 %v16494_v13  ;;  %10259 = vmatpush.bf16.msrb.mxu0 %v16502_v25  ;;  %v16510_v13 = vld [vmem:[%s21796_s3 + $0x118] sm:$0xff] }
 0x51b   : > { %v16518_v25 = vld [vmem:[%s21796_s3 + $0x158] sm:$0xff] }
 0x51d   : > { %10218 = vmatpush.bf16.msra.mxu2 %v16477_v60  ;;  %10232 = vmatpush.bf16.msra.mxu3 %v16485_v24  ;;  %v16526_v60 = vld [vmem:[%s21796_s3 + $0x198] sm:$0xff] }
 0x51e   : > { %10246 = vmatpush.bf16.msrb.mxu1 %v16493_v20  ;;  %10260 = vmatpush.bf16.msrb.mxu0 %v16501_v50  ;;  %v16534_v24 = vld [vmem:[%s21796_s3 + $0x1d8] sm:$0xff] }
 0x521   : > { %10219 = vmatpush.bf16.msra.mxu2 %v16476_v12  ;;  %10233 = vmatpush.bf16.msra.mxu3 %v16484_v38  ;;  %v16509_v12 = vld [vmem:[%s21796_s3 + $0x110] sm:$0xff] }
 0x522   : > { %10247 = vmatpush.bf16.msrb.mxu1 %v16492_v55  ;;  %10261 = vmatpush.bf16.msrb.mxu0 %v16500_v34  ;;  %v16517_v38 = vld [vmem:[%s21796_s3 + $0x150] sm:$0xff] }
 0x525   : > { %10220 = vmatpush.bf16.msra.mxu2 %v16475_v47  ;;  %10234 = vmatpush.bf16.msra.mxu3 %v16483_v35  ;;  %v7462_v36 = vpop.f32.mrf.mxu1  ;;  %v7475_v11 = vpop.f32.mrf.mxu0 }
 0x526   : > { %10248 = vmatpush.bf16.msrb.mxu1 %v16491_v28  ;;  %10262 = vmatpush.bf16.msrb.mxu0 %v16499_v41  ;;  %v7876_v62 = vrot.slane %v7462_v36, 4  ;;  %v7877_v59 = vrot.slane %v7475_v11, 2 }
 0x528   : > { %v7924_v57 = vsel %vm4460_vm5, %v7877_v59, %v7876_v62  ;;  %10221 = vmatmul.bf16.vlgmr.msra.gmra.mxu2 %v17119_v2  ;;  %10235 = vmatmul.bf16.vlgmr.msra.gmra.mxu3 %v17128_v5  ;;  %v16528_v2 = vld [vmem:[%s21796_s3 + $0x1a8] sm:$0xff]  ;;  %v7900_v5 = vsel %vm4433_vm4, %v7876_v62, %v7877_v59 }
 0x529   : > { %10269 = vmatpush.bf16.msrb.mxu2 %v16514_v22  ;;  %10283 = vmatpush.bf16.msrb.mxu3 %v16522_v33  ;;  %v16525_v22 = vld [vmem:[%s21796_s3 + $0x190] sm:$0xff]  ;;  %v16508_v62 = vld [vmem:[%s21796_s3 + $0x108] sm:$0xff] }
 0x52a   : > { %10297 = vmatpush.bf16.msra.mxu1 %v16530_v49  ;;  %10311 = vmatpush.bf16.msra.mxu0 %v16538_v52  ;;  %v7436_v61 = vpop.f32.mrf.mxu2  ;;  %v7449_v53 = vpop.f32.mrf.mxu3  ;;  %v16533_v33 = vld [vmem:[%s21796_s3 + $0x1d0] sm:$0xff]  ;;  %v16516_v59 = vld [vmem:[%s21796_s3 + $0x148] sm:$0xff] }
 0x52b   : > { %10249 = vmatmul.bf16.vlgmr.msrb.gmra.mxu1 %v17121_v3  ;;  %10263 = vmatmul.bf16.vlgmr.msrb.gmra.mxu0 %v17130_v6  ;;  %v7875_v51 = vrot.slane %v7449_v53, 6  ;;  %v16536_v3 = vld [vmem:[%s21796_s3 + $0x1e8] sm:$0xff] }
 0x52d   : > { %10270 = vmatpush.bf16.msrb.mxu2 %v16513_v0  ;;  %10284 = vmatpush.bf16.msrb.mxu3 %v16521_v8  ;;  %v7899_v6 = vsel %vm4431_vm2, %v7436_v61, %v7875_v51  ;;  %v7923_v58 = vsel %vm4458_vm3, %v7436_v61, %v7875_v51  ;;  %v7464_v37 = vpop.f32.mrf.mxu1  ;;  %v7477_v31 = vpop.f32.mrf.mxu0  ;;  %v16524_v0 = vld [vmem:[%s21796_s3 + $0x188] sm:$0xff] }
 0x52e   : > { %10298 = vmatpush.bf16.msra.mxu1 %v16529_v19  ;;  %10312 = vmatpush.bf16.msra.mxu0 %v16537_v39  ;;  %v7901_v1 = vsel %vm4435_vm6, %v7899_v6, %v7900_v5  ;;  %v20443_v63 = vsel %vm4462_vm7, %v7923_v58, %v7924_v57  ;;  %v16532_v8 = vld [vmem:[%s21796_s3 + $0x1c8] sm:$0xff]  ;;  %v16531_v5 = vld [vmem:[%s21796_s3 + $0x1c0] sm:$0xff]  ;;  %v16546_v6 = vld [vmem:[%s21796_s3 + $0x238] sm:$0xff] }
 0x52f   : > { %7956 = vst [vmem:[#allocation1 + $0x1] ss:$4 sm:$0xff] %v7901_v1  ;;  %v16554_v58 = vld [vmem:[%s21796_s3 + $0x278] sm:$0xff] }
 0x530   : > { %v16562_v37 = vld [vmem:[%s21796_s3 + $0x2b8] sm:$0xff] }
 0x531   : > { %10271 = vmatpush.bf16.msrb.mxu2 %v16512_v21  ;;  %10285 = vmatpush.bf16.msrb.mxu3 %v16520_v56  ;;  %v16507_v56 = vld [vmem:[%s21796_s3 + $0x100] sm:$0xff]  ;;  %v16570_v31 = vld [vmem:[%s21796_s3 + $0x2f8] sm:$0xff] }
 0x532   : > { %10299 = vmatpush.bf16.msra.mxu1 %v16528_v2  ;;  %10313 = vmatpush.bf16.msra.mxu0 %v16536_v3  ;;  %v7438_v44 = vpop.f32.mrf.mxu2  ;;  %v7451_v40 = vpop.f32.mrf.mxu3  ;;  %v16515_v2 = vld [vmem:[%s21796_s3 + $0x140] sm:$0xff] }
 0x533   : > { %v16523_v3 = vld [vmem:[%s21796_s3 + $0x180] sm:$0xff]  ;;  %v16553_v44 = vld [vmem:[%s21796_s3 + $0x270] sm:$0xff] }
 0x534   : > { %v16561_v40 = vld [vmem:[%s21796_s3 + $0x2b0] sm:$0xff] }
 0x535   : > { %10272 = vmatpush.bf16.msrb.mxu2 %v16511_v54  ;;  %10286 = vmatpush.bf16.msrb.mxu3 %v16519_v48  ;;  %v7514_v20 = vpop.f32.mrf.mxu1  ;;  %v7527_v50 = vpop.f32.mrf.mxu0  ;;  %v16545_v48 = vld [vmem:[%s21796_s3 + $0x230] sm:$0xff] }
 0x536   : > { %10300 = vmatpush.bf16.msra.mxu1 %v16527_v23  ;;  %10314 = vmatpush.bf16.msra.mxu0 %v16535_v32  ;;  %v7959_v55 = vld.sshfl [vmem:[#allocation1] sm:$0xff pattern:$0x73625140]  ;;  %v7960_v34 = vld.sshfl [vmem:[#allocation1 + $0x8] sm:$0xff pattern:$0x73625140] }
 0x537   : > { %v7961_v47 = vld.sshfl [vmem:[#allocation1 + $0x10] sm:$0xff pattern:$0x73625140]  ;;  %v7962_v35 = vld.sshfl [vmem:[#allocation1 + $0x18] sm:$0xff pattern:$0x73625140] }
 0x538   : > { %8101 = vst [vmem:[%s17045_s26 + $0x100] sm:$0xc] %v7959_v55  ;;  %v7879_v28 = vrot.slane %v7514_v20, 4  ;;  %v7880_v41 = vrot.slane %v7527_v50, 2 }
 0x539   : > { %10273 = vmatpush.bf16.msrb.mxu2 %v16510_v13  ;;  %10287 = vmatpush.bf16.msrb.mxu3 %v16518_v25  ;;  %8102 = vst [vmem:[%s17045_s26 + $0x108] sm:$0xc] %v7960_v34  ;;  %v16569_v13 = vld [vmem:[%s21796_s3 + $0x2f0] sm:$0xff] }
 0x53a   : > { %10301 = vmatpush.bf16.msra.mxu1 %v16526_v60  ;;  %10315 = vmatpush.bf16.msra.mxu0 %v16534_v24  ;;  %8103 = vst [vmem:[%s17045_s26 + $0x110] sm:$0xc] %v7961_v47  ;;  %v7928_v49 = vsel %vm4460_vm5, %v7880_v41, %v7879_v28  ;;  %v7488_v52 = vpop.f32.mrf.mxu2  ;;  %v7501_v36 = vpop.f32.mrf.mxu3  ;;  %v7903_v57 = vsel %vm4433_vm4, %v7879_v28, %v7880_v41 }
 0x53b   : > { %8104 = vst [vmem:[%s17045_s26 + $0x118] sm:$0xc] %v7962_v35  ;;  %v7878_v11 = vrot.slane %v7501_v36, 6 }
 0x53d   : > { %10274 = vmatpush.bf16.msrb.mxu2 %v16509_v12  ;;  %10288 = vmatpush.bf16.msrb.mxu3 %v16517_v38  ;;  %v7902_v19 = vsel %vm4431_vm2, %v7488_v52, %v7878_v11  ;;  %v7927_v39 = vsel %vm4458_vm3, %v7488_v52, %v7878_v11  ;;  %v7516_v61 = vpop.f32.mrf.mxu1  ;;  %v7529_v53 = vpop.f32.mrf.mxu0  ;;  %v16544_v38 = vld [vmem:[%s21796_s3 + $0x228] sm:$0xff]  ;;  %v16551_v52 = vld [vmem:[%s21796_s3 + $0x260] sm:$0xff] }
 0x53e   : > { %10302 = vmatpush.bf16.msra.mxu1 %v16525_v22  ;;  %10316 = vmatpush.bf16.msra.mxu0 %v16533_v33  ;;  %v7904_v51 = vsel %vm4435_vm6, %v7902_v19, %v7903_v57  ;;  %v20503_v21 = vsel %vm4462_vm7, %v7927_v39, %v7928_v49  ;;  %v16543_v49 = vld [vmem:[%s21796_s3 + $0x220] sm:$0xff]  ;;  %v16558_v57 = vld [vmem:[%s21796_s3 + $0x298] sm:$0xff]  ;;  %v16541_v53 = vld [vmem:[%s21796_s3 + $0x210] sm:$0xff] }
 0x53f   : > { %7958 = vst [vmem:[#allocation1 + $0x21] ss:$4 sm:$0xff] %v7904_v51  ;;  %v16566_v19 = vld [vmem:[%s21796_s3 + $0x2d8] sm:$0xff] }
 0x541   : > { %10275 = vmatpush.bf16.msrb.mxu2 %v16508_v62  ;;  %10289 = vmatpush.bf16.msrb.mxu3 %v16516_v59  ;;  %v16559_v62 = vld [vmem:[%s21796_s3 + $0x2a0] sm:$0xff] }
 0x542   : > { %10303 = vmatpush.bf16.msra.mxu1 %v16524_v0  ;;  %10317 = vmatpush.bf16.msra.mxu0 %v16532_v8  ;;  %v7490_v1 = vpop.f32.mrf.mxu2  ;;  %v7503_v54 = vpop.f32.mrf.mxu3  ;;  %v16567_v59 = vld [vmem:[%s21796_s3 + $0x2e0] sm:$0xff]  ;;  %v16542_v0 = vld [vmem:[%s21796_s3 + $0x218] sm:$0xff] }
 0x543   : > { %v16550_v8 = vld [vmem:[%s21796_s3 + $0x258] sm:$0xff] }
 0x545   : > { %10276 = vmatpush.bf16.msrb.mxu2 %v16507_v56  ;;  %10290 = vmatpush.bf16.msrb.mxu3 %v16515_v2  ;;  %v7566_v23 = vpop.f32.mrf.mxu1  ;;  %v7579_v32 = vpop.f32.mrf.mxu0  ;;  %v16549_v2 = vld [vmem:[%s21796_s3 + $0x250] sm:$0xff] }
 0x546   : > { %10304 = vmatpush.bf16.msra.mxu1 %v16523_v3  ;;  %10318 = vmatpush.bf16.msra.mxu0 %v16531_v5  ;;  %v7963_v25 = vld.sshfl [vmem:[#allocation1 + $0x20] sm:$0xff pattern:$0x73625140]  ;;  %v7964_v60 = vld.sshfl [vmem:[#allocation1 + $0x28] sm:$0xff pattern:$0x73625140] }
 0x547   : > { %v7965_v24 = vld.sshfl [vmem:[#allocation1 + $0x30] sm:$0xff pattern:$0x73625140]  ;;  %v7966_v20 = vld.sshfl [vmem:[#allocation1 + $0x38] sm:$0xff pattern:$0x73625140] }
 0x548   : > { %10277 = vmatmul.bf16.vlgmr.msrb.gmra.mxu2 %v17277_v4  ;;  %10291 = vmatmul.bf16.vlgmr.msrb.gmra.mxu3 %v17286_v9  ;;  %8105 = vst [vmem:[%s17045_s26 + $0x120] sm:$0xc] %v7963_v25  ;;  %v7882_v50 = vrot.slane %v7566_v23, 4  ;;  %v7883_v12 = vrot.slane %v7579_v32, 2  ;;  %v16552_v4 = vld [vmem:[%s21796_s3 + $0x268] sm:$0xff]  ;;  %v16557_v3 = vld [vmem:[%s21796_s3 + $0x290] sm:$0xff] }
 0x549   : > { %10325 = vmatpush.bf16.msra.mxu2 %v16546_v6  ;;  %10339 = vmatpush.bf16.msra.mxu3 %v16554_v58  ;;  %8106 = vst [vmem:[%s17045_s26 + $0x128] sm:$0xc] %v7964_v60  ;;  %v16565_v5 = vld [vmem:[%s21796_s3 + $0x2d0] sm:$0xff]  ;;  %v16548_v23 = vld [vmem:[%s21796_s3 + $0x248] sm:$0xff] }
 0x54a   : > { %10353 = vmatpush.bf16.msrb.mxu1 %v16562_v37  ;;  %10367 = vmatpush.bf16.msrb.mxu0 %v16570_v31  ;;  %8107 = vst [vmem:[%s17045_s26 + $0x130] sm:$0xc] %v7965_v24  ;;  %v7932_v9 = vsel %vm4460_vm5, %v7883_v12, %v7882_v50  ;;  %v7540_v55 = vpop.f32.mrf.mxu2  ;;  %v7553_v34 = vpop.f32.mrf.mxu3  ;;  %v7906_v35 = vsel %vm4433_vm4, %v7882_v50, %v7883_v12 }
 0x54b   : > { %10305 = vmatmul.bf16.vlgmr.msra.gmra.mxu1 %v17279_v7  ;;  %10319 = vmatmul.bf16.vlgmr.msra.gmra.mxu0 %v17288_v10  ;;  %v16560_v7 = vld [vmem:[%s21796_s3 + $0x2a8] sm:$0xff]  ;;  %8108 = vst [vmem:[%s17045_s26 + $0x138] sm:$0xc] %v7966_v20  ;;  %v7881_v47 = vrot.slane %v7553_v34, 6  ;;  %v16563_v34 = vld [vmem:[%s21796_s3 + $0x2c0] sm:$0xff] }
 0x54c   : > { %v16568_v10 = vld [vmem:[%s21796_s3 + $0x2e8] sm:$0xff] }
 0x54d   : > { %10326 = vmatpush.bf16.msra.mxu2 %v16545_v48  ;;  %10340 = vmatpush.bf16.msra.mxu3 %v16553_v44  ;;  %v7905_v28 = vsel %vm4431_vm2, %v7540_v55, %v7881_v47  ;;  %v7931_v41 = vsel %vm4458_vm3, %v7540_v55, %v7881_v47  ;;  %v7568_v22 = vpop.f32.mrf.mxu1  ;;  %v7581_v33 = vpop.f32.mrf.mxu0  ;;  %v16540_v48 = vld [vmem:[%s21796_s3 + $0x208] sm:$0xff]  ;;  %v16555_v55 = vld [vmem:[%s21796_s3 + $0x280] sm:$0xff]  ;;  %v16578_v47 = vld [vmem:[%s21796_s3 + $0x338] sm:$0xff] }
 0x54e   : > { %10354 = vmatpush.bf16.msrb.mxu1 %v16561_v40  ;;  %10368 = vmatpush.bf16.msrb.mxu0 %v16569_v13  ;;  %v7907_v36 = vsel %vm4435_vm6, %v7905_v28, %v7906_v35  ;;  %v20573_v11 = vsel %vm4462_vm7, %v7931_v41, %v7932_v9  ;;  %v16556_v44 = vld [vmem:[%s21796_s3 + $0x288] sm:$0xff]  ;;  %v16547_v9 = vld [vmem:[%s21796_s3 + $0x240] sm:$0xff]  ;;  %v16586_v35 = vld [vmem:[%s21796_s3 + $0x378] sm:$0xff] }
 0x54f   : > { %7967 = vst [vmem:[#allocation1 + $0x1] ss:$4 sm:$0xff] %v7907_v36  ;;  %v16564_v40 = vld [vmem:[%s21796_s3 + $0x2c8] sm:$0xff]  ;;  %v16594_v28 = vld [vmem:[%s21796_s3 + $0x3b8] sm:$0xff]  ;;  %v16593_v36 = vld [vmem:[%s21796_s3 + $0x3b0] sm:$0xff] }
 0x550   : > { %v16602_v41 = vld [vmem:[%s21796_s3 + $0x3f8] sm:$0xff] }
 0x551   : > { %10327 = vmatpush.bf16.msra.mxu2 %v16544_v38  ;;  %10341 = vmatpush.bf16.msra.mxu3 %v16552_v4  ;;  %v16539_v4 = vld [vmem:[%s21796_s3 + $0x200] sm:$0xff] }
 0x552   : > { %10355 = vmatpush.bf16.msrb.mxu1 %v16560_v7  ;;  %10369 = vmatpush.bf16.msrb.mxu0 %v16568_v10  ;;  %v7542_v39 = vpop.f32.mrf.mxu2  ;;  %v7555_v61 = vpop.f32.mrf.mxu3 }
 0x555   : > { %10328 = vmatpush.bf16.msra.mxu2 %v16543_v49  ;;  %10342 = vmatpush.bf16.msra.mxu3 %v16551_v52  ;;  %v7618_v51 = vpop.f32.mrf.mxu1  ;;  %v7631_v56 = vpop.f32.mrf.mxu0  ;;  %v16577_v49 = vld [vmem:[%s21796_s3 + $0x330] sm:$0xff] }
 0x556   : > { %10356 = vmatpush.bf16.msrb.mxu1 %v16559_v62  ;;  %10370 = vmatpush.bf16.msrb.mxu0 %v16567_v59  ;;  %v7969_v6 = vld.sshfl [vmem:[#allocation1] sm:$0xff pattern:$0x73625140]  ;;  %v7970_v58 = vld.sshfl [vmem:[#allocation1 + $0x8] sm:$0xff pattern:$0x73625140] }
 0x557   : > { %v7971_v37 = vld.sshfl [vmem:[#allocation1 + $0x10] sm:$0xff pattern:$0x73625140]  ;;  %v7972_v31 = vld.sshfl [vmem:[#allocation1 + $0x18] sm:$0xff pattern:$0x73625140] }
 0x558   : > { %8109 = vst [vmem:[%s17045_s26 + $0x140] sm:$0xc] %v7969_v6  ;;  %v7885_v1 = vrot.slane %v7618_v51, 4  ;;  %v7886_v54 = vrot.slane %v7631_v56, 2  ;;  %v16585_v52 = vld [vmem:[%s21796_s3 + $0x370] sm:$0xff]  ;;  %v16592_v51 = vld [vmem:[%s21796_s3 + $0x3a8] sm:$0xff] }
 0x559   : > { %10329 = vmatpush.bf16.msra.mxu2 %v16542_v0  ;;  %10343 = vmatpush.bf16.msra.mxu3 %v16550_v8  ;;  %8110 = vst [vmem:[%s17045_s26 + $0x148] sm:$0xc] %v7970_v58  ;;  %v16601_v62 = vld [vmem:[%s21796_s3 + $0x3f0] sm:$0xff]  ;;  %v16576_v8 = vld [vmem:[%s21796_s3 + $0x328] sm:$0xff]  ;;  %v16583_v6 = vld [vmem:[%s21796_s3 + $0x360] sm:$0xff] }
 0x55a   : > { %10357 = vmatpush.bf16.msrb.mxu1 %v16558_v57  ;;  %10371 = vmatpush.bf16.msrb.mxu0 %v16566_v19  ;;  %8111 = vst [vmem:[%s17045_s26 + $0x150] sm:$0xc] %v7971_v37  ;;  %v7936_v32 = vsel %vm4460_vm5, %v7886_v54, %v7885_v1  ;;  %v7592_v13 = vpop.f32.mrf.mxu2  ;;  %v7605_v25 = vpop.f32.mrf.mxu3  ;;  %v7909_v24 = vsel %vm4433_vm4, %v7885_v1, %v7886_v54  ;;  %v16584_v57 = vld [vmem:[%s21796_s3 + $0x368] sm:$0xff]  ;;  %v16591_v58 = vld [vmem:[%s21796_s3 + $0x3a0] sm:$0xff] }
 0x55b   : > { %8112 = vst [vmem:[%s17045_s26 + $0x158] sm:$0xc] %v7972_v31  ;;  %v7884_v60 = vrot.slane %v7605_v25, 6  ;;  %v16599_v37 = vld [vmem:[%s21796_s3 + $0x3e0] sm:$0xff]  ;;  %v16590_v25 = vld [vmem:[%s21796_s3 + $0x398] sm:$0xff] }
 0x55d   : > { %10330 = vmatpush.bf16.msra.mxu2 %v16541_v53  ;;  %10344 = vmatpush.bf16.msra.mxu3 %v16549_v2  ;;  %v7908_v20 = vsel %vm4431_vm2, %v7592_v13, %v7884_v60  ;;  %v7935_v50 = vsel %vm4458_vm3, %v7592_v13, %v7884_v60  ;;  %v7620_v12 = vpop.f32.mrf.mxu1  ;;  %v7633_v38 = vpop.f32.mrf.mxu0  ;;  %v16582_v13 = vld [vmem:[%s21796_s3 + $0x358] sm:$0xff] }
 0x55e   : > { %10358 = vmatpush.bf16.msrb.mxu1 %v16557_v3  ;;  %10372 = vmatpush.bf16.msrb.mxu0 %v16565_v5  ;;  %v7910_v7 = vsel %vm4435_vm6, %v7908_v20, %v7909_v24  ;;  %v20633_v10 = vsel %vm4462_vm7, %v7935_v50, %v7936_v32  ;;  %v16575_v5 = vld [vmem:[%s21796_s3 + $0x320] sm:$0xff]  ;;  %v16598_v60 = vld [vmem:[%s21796_s3 + $0x3d8] sm:$0xff]  ;;  %v16573_v50 = vld [vmem:[%s21796_s3 + $0x310] sm:$0xff] }
 0x55f   : > { %7968 = vst [vmem:[#allocation1 + $0x21] ss:$4 sm:$0xff] %v7910_v7  ;;  %v16581_v12 = vld [vmem:[%s21796_s3 + $0x350] sm:$0xff] }
 0x560   : > { %v16589_v38 = vld [vmem:[%s21796_s3 + $0x390] sm:$0xff] }
 0x561   : > { %10331 = vmatpush.bf16.msra.mxu2 %v16540_v48  ;;  %10345 = vmatpush.bf16.msra.mxu3 %v16548_v23 }
 0x562   : > { %10359 = vmatpush.bf16.msrb.mxu1 %v16556_v44  ;;  %10373 = vmatpush.bf16.msrb.mxu0 %v16564_v40  ;;  %v7594_v22 = vpop.f32.mrf.mxu2  ;;  %v7607_v33 = vpop.f32.mrf.mxu3  ;;  %v16574_v40 = vld [vmem:[%s21796_s3 + $0x318] sm:$0xff] }
 0x565   : > { %10332 = vmatpush.bf16.msra.mxu2 %v16539_v4  ;;  %10346 = vmatpush.bf16.msra.mxu3 %v16547_v9  ;;  %v7670_v59 = vpop.f32.mrf.mxu1  ;;  %v7683_v0 = vpop.f32.mrf.mxu0  ;;  %v16597_v4 = vld [vmem:[%s21796_s3 + $0x3d0] sm:$0xff] }
 0x566   : > { %10360 = vmatpush.bf16.msrb.mxu1 %v16555_v55  ;;  %10374 = vmatpush.bf16.msrb.mxu0 %v16563_v34  ;;  %v7973_v19 = vld.sshfl [vmem:[#allocation1 + $0x20] sm:$0xff pattern:$0x73625140]  ;;  %v7974_v39 = vld.sshfl [vmem:[#allocation1 + $0x28] sm:$0xff pattern:$0x73625140] }
 0x567   : > { %8113 = vst [vmem:[%s17045_s26 + $0x160] sm:$0xc] %v7973_v19  ;;  %v7888_v61 = vrot.slane %v7670_v59, 4  ;;  %v7889_v53 = vrot.slane %v7683_v0, 2  ;;  %v16572_v55 = vld [vmem:[%s21796_s3 + $0x308] sm:$0xff]  ;;  %v16587_v19 = vld [vmem:[%s21796_s3 + $0x380] sm:$0xff] }
 0x568   : > { %10333 = vmatmul.bf16.vlgmr.msra.gmra.mxu2 %v17437_v14  ;;  %10347 = vmatmul.bf16.vlgmr.msra.gmra.mxu3 %v17446_v17  ;;  %v7975_v14 = vld.sshfl [vmem:[#allocation1 + $0x30] sm:$0xff pattern:$0x73625140]  ;;  %v7976_v17 = vld.sshfl [vmem:[#allocation1 + $0x38] sm:$0xff pattern:$0x73625140] }
 0x569   : > { %10381 = vmatpush.bf16.msrb.mxu2 %v16578_v47  ;;  %10395 = vmatpush.bf16.msrb.mxu3 %v16586_v35  ;;  %8114 = vst [vmem:[%s17045_s26 + $0x168] sm:$0xc] %v7974_v39  ;;  %v7912_v31 = vsel %vm4433_vm4, %v7888_v61, %v7889_v53  ;;  %v16580_v34 = vld [vmem:[%s21796_s3 + $0x348] sm:$0xff]  ;;  %v16595_v39 = vld [vmem:[%s21796_s3 + $0x3c0] sm:$0xff] }
 0x56a   : > { %10409 = vmatpush.bf16.msra.mxu1 %v16594_v28  ;;  %10423 = vmatpush.bf16.msra.mxu0 %v16602_v41  ;;  %8115 = vst [vmem:[%s17045_s26 + $0x170] sm:$0xc] %v7975_v14  ;;  %v7644_v56 = vpop.f32.mrf.mxu2  ;;  %v7657_v2 = vpop.f32.mrf.mxu3 }
 0x56b   : > { %10361 = vmatmul.bf16.vlgmr.msrb.gmra.mxu1 %v17439_v15  ;;  %10375 = vmatmul.bf16.vlgmr.msrb.gmra.mxu0 %v17448_v18  ;;  %v16600_v15 = vld [vmem:[%s21796_s3 + $0x3e8] sm:$0xff]  ;;  %v7940_v18 = vsel %vm4460_vm5, %v7889_v53, %v7888_v61  ;;  %8116 = vst [vmem:[%s17045_s26 + $0x178] sm:$0xc] %v7976_v17  ;;  %v7887_v3 = vrot.slane %v7657_v2, 6  ;;  %v16610_v53 = vld [vmem:[%s21796_s3 + $0x438] sm:$0xff] }
 0x56d   : > { %10382 = vmatpush.bf16.msrb.mxu2 %v16577_v49  ;;  %10396 = vmatpush.bf16.msrb.mxu3 %v16585_v52  ;;  %v7911_v1 = vsel %vm4431_vm2, %v7644_v56, %v7887_v3  ;;  %v7939_v54 = vsel %vm4458_vm3, %v7644_v56, %v7887_v3  ;;  %v7672_v48 = vpop.f32.mrf.mxu1  ;;  %v7685_v23 = vpop.f32.mrf.mxu0  ;;  %v16588_v49 = vld [vmem:[%s21796_s3 + $0x388] sm:$0xff]  ;;  %v16626_v3 = vld [vmem:[%s21796_s3 + $0x4b8] sm:$0xff] }
 0x56e   : > { %10410 = vmatpush.bf16.msra.mxu1 %v16593_v36  ;;  %10424 = vmatpush.bf16.msra.mxu0 %v16601_v62  ;;  %v7913_v32 = vsel %vm4435_vm6, %v7911_v1, %v7912_v31  ;;  %v20703_v44 = vsel %vm4462_vm7, %v7939_v54, %v7940_v18  ;;  %v16596_v52 = vld [vmem:[%s21796_s3 + $0x3c8] sm:$0xff]  ;;  %v16633_v31 = vld [vmem:[%s21796_s3 + $0x4f0] sm:$0xff] }
 0x56f   : > { %7977 = vst [vmem:[#allocation1 + $0x1] ss:$4 sm:$0xff] %v7913_v32  ;;  %v16608_v48 = vld [vmem:[%s21796_s3 + $0x428] sm:$0xff] }
 0x570   : > { %v16616_v23 = vld [vmem:[%s21796_s3 + $0x468] sm:$0xff] }
 0x571   : > { %10383 = vmatpush.bf16.msrb.mxu2 %v16576_v8  ;;  %10397 = vmatpush.bf16.msrb.mxu3 %v16584_v57  ;;  %v16571_v8 = vld [vmem:[%s21796_s3 + $0x300] sm:$0xff] }
 0x572   : > { %10411 = vmatpush.bf16.msra.mxu1 %v16592_v51  ;;  %10425 = vmatpush.bf16.msra.mxu0 %v16600_v15  ;;  %v7646_v24 = vpop.f32.mrf.mxu2  ;;  %v7659_v20 = vpop.f32.mrf.mxu3  ;;  %v16579_v57 = vld [vmem:[%s21796_s3 + $0x340] sm:$0xff]  ;;  %v16618_v51 = vld [vmem:[%s21796_s3 + $0x478] sm:$0xff] }
 0x573   : > { %v16607_v20 = vld [vmem:[%s21796_s3 + $0x420] sm:$0xff] }
 0x575   : > { %10384 = vmatpush.bf16.msrb.mxu2 %v16575_v5  ;;  %10398 = vmatpush.bf16.msrb.mxu3 %v16583_v6  ;;  %v7722_v9 = vpop.f32.mrf.mxu1  ;;  %v7735_v7 = vpop.f32.mrf.mxu0  ;;  %v16634_v5 = vld [vmem:[%s21796_s3 + $0x4f8] sm:$0xff]  ;;  %v16609_v6 = vld [vmem:[%s21796_s3 + $0x430] sm:$0xff] }
 0x576   : > { %10412 = vmatpush.bf16.msra.mxu1 %v16591_v58  ;;  %10426 = vmatpush.bf16.msra.mxu0 %v16599_v37  ;;  %v7979_v47 = vld.sshfl [vmem:[#allocation1] sm:$0xff pattern:$0x73625140]  ;;  %v7980_v35 = vld.sshfl [vmem:[#allocation1 + $0x8] sm:$0xff pattern:$0x73625140] }
 0x577   : > { %v7981_v28 = vld.sshfl [vmem:[#allocation1 + $0x10] sm:$0xff pattern:$0x73625140]  ;;  %v7982_v41 = vld.sshfl [vmem:[#allocation1 + $0x18] sm:$0xff pattern:$0x73625140] }
 0x578   : > { %8117 = vst [vmem:[%s17045_s26 + $0x180] sm:$0xc] %v7979_v47  ;;  %v7891_v22 = vrot.slane %v7722_v9, 4  ;;  %v7892_v33 = vrot.slane %v7735_v7, 2  ;;  %v16617_v58 = vld [vmem:[%s21796_s3 + $0x470] sm:$0xff]  ;;  %v16606_v47 = vld [vmem:[%s21796_s3 + $0x418] sm:$0xff] }
 0x579   : > { %10385 = vmatpush.bf16.msrb.mxu2 %v16574_v40  ;;  %10399 = vmatpush.bf16.msrb.mxu3 %v16582_v13  ;;  %8118 = vst [vmem:[%s17045_s26 + $0x188] sm:$0xc] %v7980_v35  ;;  %v16625_v37 = vld [vmem:[%s21796_s3 + $0x4b0] sm:$0xff]  ;;  %v16614_v35 = vld [vmem:[%s21796_s3 + $0x458] sm:$0xff] }
 0x57a   : > { %10413 = vmatpush.bf16.msra.mxu1 %v16590_v25  ;;  %10427 = vmatpush.bf16.msra.mxu0 %v16598_v60  ;;  %8119 = vst [vmem:[%s17045_s26 + $0x190] sm:$0xc] %v7981_v28  ;;  %v7944_v36 = vsel %vm4460_vm5, %v7892_v33, %v7891_v22  ;;  %v7696_v62 = vpop.f32.mrf.mxu2  ;;  %v7709_v59 = vpop.f32.mrf.mxu3  ;;  %v7915_v14 = vsel %vm4433_vm4, %v7891_v22, %v7892_v33  ;;  %v16622_v33 = vld [vmem:[%s21796_s3 + $0x498] sm:$0xff] }
 0x57b   : > { %8120 = vst [vmem:[%s17045_s26 + $0x198] sm:$0xc] %v7982_v41  ;;  %v7890_v0 = vrot.slane %v7709_v59, 6  ;;  %v16629_v59 = vld [vmem:[%s21796_s3 + $0x4d0] sm:$0xff] }
 0x57d   : > { %10386 = vmatpush.bf16.msrb.mxu2 %v16573_v50  ;;  %10400 = vmatpush.bf16.msrb.mxu3 %v16581_v12  ;;  %v7914_v17 = vsel %vm4431_vm2, %v7696_v62, %v7890_v0  ;;  %v7943_v61 = vsel %vm4458_vm3, %v7696_v62, %v7890_v0  ;;  %v7724_v15 = vpop.f32.mrf.mxu1  ;;  %v7737_v18 = vpop.f32.mrf.mxu0  ;;  %v16615_v50 = vld [vmem:[%s21796_s3 + $0x460] sm:$0xff]  ;;  %v16621_v62 = vld [vmem:[%s21796_s3 + $0x490] sm:$0xff] }
 0x57e   : > { %10414 = vmatpush.bf16.msra.mxu1 %v16589_v38  ;;  %10428 = vmatpush.bf16.msra.mxu0 %v16597_v4  ;;  %v7916_v56 = vsel %vm4435_vm6, %v7914_v17, %v7915_v14  ;;  %v20769_v2 = vsel %vm4462_vm7, %v7943_v61, %v7944_v36  ;;  %v16623_v12 = vld [vmem:[%s21796_s3 + $0x4a0] sm:$0xff]  ;;  %v16613_v36 = vld [vmem:[%s21796_s3 + $0x450] sm:$0xff]  ;;  %v16628_v14 = vld [vmem:[%s21796_s3 + $0x4c8] sm:$0xff] }
 0x57f   : > { %7978 = vst [vmem:[#allocation1 + $0x21] ss:$4 sm:$0xff] %v7916_v56  ;;  %v16631_v38 = vld [vmem:[%s21796_s3 + $0x4e0] sm:$0xff] }
 0x581   : > { %10387 = vmatpush.bf16.msrb.mxu2 %v16572_v55  ;;  %10401 = vmatpush.bf16.msrb.mxu3 %v16580_v34 }
 0x582   : > { %10415 = vmatpush.bf16.msra.mxu1 %v16588_v49  ;;  %10429 = vmatpush.bf16.msra.mxu0 %v16596_v52  ;;  %v7698_v1 = vpop.f32.mrf.mxu2  ;;  %v7711_v54 = vpop.f32.mrf.mxu3  ;;  %v16630_v49 = vld [vmem:[%s21796_s3 + $0x4d8] sm:$0xff]  ;;  %v16605_v52 = vld [vmem:[%s21796_s3 + $0x410] sm:$0xff] }
 0x585   : > { %10388 = vmatpush.bf16.msrb.mxu2 %v16571_v8  ;;  %10402 = vmatpush.bf16.msrb.mxu3 %v16579_v57  ;;  %v20805_v32 = vpop.f32.mrf.mxu1  ;;  %v16604_v57 = vld [vmem:[%s21796_s3 + $0x408] sm:$0xff] }
 0x586   : > { %10416 = vmatpush.bf16.msra.mxu1 %v16587_v19  ;;  %10430 = vmatpush.bf16.msra.mxu0 %v16595_v39  ;;  %v7984_v40 = vld.sshfl [vmem:[#allocation1 + $0x28] sm:$0xff pattern:$0x73625140]  ;;  %v7985_v13 = vld.sshfl [vmem:[#allocation1 + $0x30] sm:$0xff pattern:$0x73625140] }
 0x587   : > { %v7986_v25 = vld.sshfl [vmem:[#allocation1 + $0x38] sm:$0xff pattern:$0x73625140]  ;;  %8122 = vst [vmem:[%s17045_s26 + $0x1a8] sm:$0xc] %v7984_v40  ;;  %v7894_v60 = vrot.slane %v20805_v32, 4 }
 0x588   : > { %10389 = vmatmul.bf16.vlgmr.msrb.gmra.mxu2 %v17597_v26  ;;  %10403 = vmatmul.bf16.vlgmr.msrb.gmra.mxu3 %v17606_v29  ;;  %v16624_v26 = vld [vmem:[%s21796_s3 + $0x4a8] sm:$0xff]  ;;  %8123 = vst [vmem:[%s17045_s26 + $0x1b0] sm:$0xc] %v7985_v13 }
 0x589   : > { %10437 = vmatpush.bf16.msra.mxu2 %v16610_v53  ;;  %10451 = vmatpush.bf16.msra.mxu3 %v16618_v51  ;;  %v16632_v29 = vld [vmem:[%s21796_s3 + $0x4e8] sm:$0xff]  ;;  %8124 = vst [vmem:[%s17045_s26 + $0x1b8] sm:$0xc] %v7986_v25 }
 0x58a   : > { %10465 = vmatpush.bf16.msrb.mxu1 %v16626_v3  ;;  %10479 = vmatpush.bf16.msrb.mxu0 %v16634_v5  ;;  %v20826_v4 = vpop.f32.mrf.mxu2  ;;  %v20828_v9 = vpop.f32.mrf.mxu3  ;;  %v16612_v19 = vld [vmem:[%s21796_s3 + $0x448] sm:$0xff]  ;;  %v16603_v5 = vld [vmem:[%s21796_s3 + $0x400] sm:$0xff] }
 0x58b   : > { %10417 = vmatmul.bf16.vlgmr.msra.gmra.mxu1 %v17599_v27  ;;  %10431 = vmatmul.bf16.vlgmr.msra.gmra.mxu0 %v17608_v30  ;;  %v20807_v27 = vpop.f32.mrf.mxu0  ;;  %v7983_v30 = vld.sshfl [vmem:[#allocation1 + $0x20] sm:$0xff pattern:$0x73625140]  ;;  %v7893_v7 = vrot.slane %v20828_v9, 6  ;;  %v16620_v39 = vld [vmem:[%s21796_s3 + $0x488] sm:$0xff] }
 0x58c   : > { %8121 = vst [vmem:[%s17045_s26 + $0x1a0] sm:$0xc] %v7983_v30  ;;  %v7895_v24 = vrot.slane %v20807_v27, 2  ;;  %v16652_v32 = vld [vmem:[%s21796_s3 + $0x588] sm:$0xff] }
 0x58d   : > { %10438 = vmatpush.bf16.msra.mxu2 %v16609_v6  ;;  %10452 = vmatpush.bf16.msra.mxu3 %v16617_v58  ;;  %v7917_v34 = vsel %vm4431_vm2, %v20826_v4, %v7893_v7  ;;  %v7776_v28 = vpop.f32.mrf.mxu1  ;;  %v16611_v6 = vld [vmem:[%s21796_s3 + $0x440] sm:$0xff]  ;;  %v7926_v58 = vrot.slane %v20443_v63, 2  ;;  %v16642_v63 = vld [vmem:[%s21796_s3 + $0x538] sm:$0xff]  ;;  %v16660_v27 = vld [vmem:[%s21796_s3 + $0x5c8] sm:$0xff] }
 0x58e   : > { %10466 = vmatpush.bf16.msrb.mxu1 %v16625_v37  ;;  %10480 = vmatpush.bf16.msrb.mxu0 %v16633_v31  ;;  %v7918_v55 = vsel %vm4433_vm4, %v7894_v60, %v7895_v24  ;;  %v16619_v37 = vld [vmem:[%s21796_s3 + $0x480] sm:$0xff]  ;;  %v16656_v28 = vld [vmem:[%s21796_s3 + $0x5a8] sm:$0xff] }
 0x58f   : > { %v7919_v22 = vsel %vm4435_vm6, %v7917_v34, %v7918_v55  ;;  %v16627_v31 = vld [vmem:[%s21796_s3 + $0x4c0] sm:$0xff]  ;;  %v16665_v55 = vld [vmem:[%s21796_s3 + $0x5f0] sm:$0xff]  ;;  %v16640_v34 = vld [vmem:[%s21796_s3 + $0x528] sm:$0xff] }
 0x590   : > { %7987 = vst [vmem:[#allocation1 + $0x1] ss:$4 sm:$0xff] %v7919_v22 }
 0x591   : > { %10439 = vmatpush.bf16.msra.mxu2 %v16608_v48  ;;  %10453 = vmatpush.bf16.msra.mxu3 %v16616_v23  ;;  %v16650_v48 = vld [vmem:[%s21796_s3 + $0x578] sm:$0xff] }
 0x592   : > { %10467 = vmatpush.bf16.msrb.mxu1 %v16624_v26  ;;  %10481 = vmatpush.bf16.msrb.mxu0 %v16632_v29  ;;  %v7750_v0 = vpop.f32.mrf.mxu2  ;;  %v7763_v8 = vpop.f32.mrf.mxu3  ;;  %v16658_v26 = vld [vmem:[%s21796_s3 + $0x5b8] sm:$0xff] }
 0x593   : > { %v7789_v41 = vpop.f32.mrf.mxu0  ;;  %v16666_v29 = vld [vmem:[%s21796_s3 + $0x5f8] sm:$0xff]  ;;  %v16663_v8 = vld [vmem:[%s21796_s3 + $0x5e0] sm:$0xff] }
 0x595   : > { %10440 = vmatpush.bf16.msra.mxu2 %v16607_v20  ;;  %10454 = vmatpush.bf16.msra.mxu3 %v16615_v50  ;;  %v20878_v17 = vpop.f32.mrf.mxu1  ;;  %v16641_v50 = vld [vmem:[%s21796_s3 + $0x530] sm:$0xff] }
 0x596   : > { %10468 = vmatpush.bf16.msrb.mxu1 %v16623_v12  ;;  %10482 = vmatpush.bf16.msrb.mxu0 %v16631_v38  ;;  %v7897_v56 = vrot.slane %v20878_v17, 4  ;;  %v16649_v12 = vld [vmem:[%s21796_s3 + $0x570] sm:$0xff] }
 0x597   : > { %v7989_v53 = vld.sshfl [vmem:[#allocation1] sm:$0xff pattern:$0x73625140]  ;;  %v7990_v51 = vld.sshfl [vmem:[#allocation1 + $0x8] sm:$0xff pattern:$0x73625140] }
 0x598   : > { %v7991_v15 = vld.sshfl [vmem:[#allocation1 + $0x10] sm:$0xff pattern:$0x73625140]  ;;  %v7992_v18 = vld.sshfl [vmem:[#allocation1 + $0x18] sm:$0xff pattern:$0x73625140] }
 0x599   : > { %10441 = vmatpush.bf16.msra.mxu2 %v16606_v47  ;;  %10455 = vmatpush.bf16.msra.mxu3 %v16614_v35  ;;  %8125 = vst [vmem:[%s17045_s26 + $0x1c0] sm:$0xc] %v7989_v53  ;;  %v16657_v38 = vld [vmem:[%s21796_s3 + $0x5b0] sm:$0xff]  ;;  %v7934_v47 = vrot.slane %v20573_v11, 2  ;;  %v16648_v35 = vld [vmem:[%s21796_s3 + $0x568] sm:$0xff] }
 0x59a   : > { %10469 = vmatpush.bf16.msrb.mxu1 %v16622_v33  ;;  %10483 = vmatpush.bf16.msrb.mxu0 %v16630_v49  ;;  %8126 = vst [vmem:[%s17045_s26 + $0x1c8] sm:$0xc] %v7990_v51  ;;  %v20900_v1 = vpop.f32.mrf.mxu2  ;;  %v20902_v54 = vpop.f32.mrf.mxu3  ;;  %v16685_v17 = vld [vmem:[%s21796_s3 + $0x690] sm:$0xff] }
 0x59b   : > { %v20880_v61 = vpop.f32.mrf.mxu0  ;;  %8127 = vst [vmem:[%s17045_s26 + $0x1d0] sm:$0xc] %v7991_v15  ;;  %v7896_v23 = vrot.slane %v20902_v54, 6 }
 0x59c   : > { %v7898_v3 = vrot.slane %v20880_v61, 2  ;;  %8128 = vst [vmem:[%s17045_s26 + $0x1d8] sm:$0xc] %v7992_v18  ;;  %v16693_v61 = vld [vmem:[%s21796_s3 + $0x6d0] sm:$0xff] }
 0x59d   : > { %10442 = vmatpush.bf16.msra.mxu2 %v16605_v52  ;;  %10456 = vmatpush.bf16.msra.mxu3 %v16613_v36  ;;  %7997 = vst [vmem:[#allocation1 + $0x1] ss:$4 sm:$0xff] %v7926_v58  ;;  %v7920_v40 = vsel %vm4431_vm2, %v20900_v1, %v7896_v23  ;;  %v7828_v13 = vpop.f32.mrf.mxu1  ;;  %v16639_v52 = vld [vmem:[%s21796_s3 + $0x520] sm:$0xff]  ;;  %v16637_v58 = vld [vmem:[%s21796_s3 + $0x510] sm:$0xff] }
 0x59e   : > { %10470 = vmatpush.bf16.msrb.mxu1 %v16621_v62  ;;  %10484 = vmatpush.bf16.msrb.mxu0 %v16629_v59  ;;  %v7921_v30 = vsel %vm4433_vm4, %v7897_v56, %v7898_v3  ;;  %v16647_v62 = vld [vmem:[%s21796_s3 + $0x560] sm:$0xff]  ;;  %v7952_v54 = vsel %vm4460_vm5, %v7898_v3, %v7897_v56  ;;  %v16668_v56 = vld [vmem:[%s21796_s3 + $0x608] sm:$0xff] }
 0x59f   : > { %v7922_v20 = vsel %vm4435_vm6, %v7920_v40, %v7921_v30  ;;  %v16655_v59 = vld [vmem:[%s21796_s3 + $0x5a0] sm:$0xff]  ;;  %v16661_v30 = vld [vmem:[%s21796_s3 + $0x5d0] sm:$0xff] }
 0x5a0   : > { %7988 = vst [vmem:[#allocation1 + $0x21] ss:$4 sm:$0xff] %v7922_v20  ;;  %v16643_v20 = vld [vmem:[%s21796_s3 + $0x540] sm:$0xff] }
 0x5a1   : > { %10443 = vmatpush.bf16.msra.mxu2 %v16604_v57  ;;  %10457 = vmatpush.bf16.msra.mxu3 %v16612_v19  ;;  %v7930_v57 = vrot.slane %v20503_v21, 2  ;;  %v16638_v19 = vld [vmem:[%s21796_s3 + $0x518] sm:$0xff] }
 0x5a2   : > { %10471 = vmatpush.bf16.msrb.mxu1 %v16620_v39  ;;  %10485 = vmatpush.bf16.msrb.mxu0 %v16628_v14  ;;  %v7802_v41 = vpop.f32.mrf.mxu2  ;;  %v16646_v39 = vld [vmem:[%s21796_s3 + $0x558] sm:$0xff] }
 0x5a3   : > { %v7841_v25 = vpop.f32.mrf.mxu0  ;;  %v16654_v14 = vld [vmem:[%s21796_s3 + $0x598] sm:$0xff] }
 0x5a4   : > { %v7999_v11 = vld.sshfl [vmem:[#allocation1] sm:$0xff pattern:$0x73625140]  ;;  %v8000_v22 = vld.sshfl [vmem:[#allocation1 + $0x8] sm:$0xff pattern:$0x73625140] }
 0x5a5   : > { %10444 = vmatpush.bf16.msra.mxu2 %v16603_v5  ;;  %10458 = vmatpush.bf16.msra.mxu3 %v16611_v6  ;;  %v8001_v33 = vld.sshfl [vmem:[#allocation1 + $0x10] sm:$0xff pattern:$0x73625140]  ;;  %v8002_v49 = vld.sshfl [vmem:[#allocation1 + $0x18] sm:$0xff pattern:$0x73625140] }
 0x5a6   : > { %10472 = vmatpush.bf16.msrb.mxu1 %v16619_v37  ;;  %10486 = vmatpush.bf16.msrb.mxu0 %v16627_v31  ;;  %8007 = vst [vmem:[#allocation1 + $0x1] ss:$4 sm:$0xff] %v7934_v47  ;;  %v16662_v21 = vld [vmem:[%s21796_s3 + $0x5d8] sm:$0xff]  ;;  %v7942_v6 = vrot.slane %v20703_v44, 2  ;;  %v7947_v44 = vsel %vm4458_vm3, %v20826_v4, %v7893_v7  ;;  %v7948_v4 = vsel %vm4460_vm5, %v7895_v24, %v7894_v60  ;;  %v16636_v7 = vld [vmem:[%s21796_s3 + $0x508] sm:$0xff]  ;;  %v16635_v60 = vld [vmem:[%s21796_s3 + $0x500] sm:$0xff] }
 0x5a7   : > { %v7994_v36 = vld.sshfl [vmem:[#allocation1 + $0x28] sm:$0xff pattern:$0x73625140]  ;;  %v7996_v0 = vld.sshfl [vmem:[#allocation1 + $0x38] sm:$0xff pattern:$0x73625140]  ;;  %v7949_v9 = vsel %vm4462_vm7, %v7947_v44, %v7948_v4  ;;  %v7951_v44 = vsel %vm4458_vm3, %v20900_v1, %v7896_v23 }
 0x5a8   : > { %10445 = vmatmul.bf16.vlgmr.msra.gmra.mxu2 %v17757_v42  ;;  %10459 = vmatmul.bf16.vlgmr.msra.gmra.mxu3 %v17766_v45  ;;  %v16664_v42 = vld [vmem:[%s21796_s3 + $0x5e8] sm:$0xff]  ;;  %v7815_v45 = vpop.f32.mrf.mxu3  ;;  %8130 = vst [vmem:[%s17045_s26 + $0x1e8] sm:$0xc] %v7994_v36  ;;  %v10250_v37 = vpop.f32.mrf.mxu1  ;;  %v7950_v24 = vrot.slane %v7949_v9, 2  ;;  %v16698_v41 = vld [vmem:[%s21796_s3 + $0x6f8] sm:$0xff]  ;;  %v16697_v36 = vld [vmem:[%s21796_s3 + $0x6f0] sm:$0xff]  ;;  %v7953_v1 = vsel %vm4462_vm7, %v7951_v44, %v7952_v54 }
 0x5a9   : > { %10493 = vmatpush.bf16.msrb.mxu2 %v16642_v63  ;;  %10507 = vmatpush.bf16.msrb.mxu3 %v16650_v48  ;;  %8132 = vst [vmem:[%s17045_s26 + $0x1f8] sm:$0xc] %v7996_v0  ;;  %v16645_v63 = vld [vmem:[%s21796_s3 + $0x550] sm:$0xff]  ;;  %v16644_v25 = vld [vmem:[%s21796_s3 + $0x548] sm:$0xff]  ;;  %v7954_v3 = vrot.slane %v7953_v1, 2 }
 0x5aa   : > { %10521 = vmatpush.bf16.msra.mxu1 %v16658_v26  ;;  %10535 = vmatpush.bf16.msra.mxu0 %v16666_v29  ;;  %8133 = vst [vmem:[%s17045_s26 + $0x300] sm:$0xc] %v7999_v11  ;;  %v16653_v29 = vld [vmem:[%s21796_s3 + $0x590] sm:$0xff]  ;;  %v7938_v11 = vrot.slane %v20633_v10, 2  ;;  %v16688_v0 = vld [vmem:[%s21796_s3 + $0x6a8] sm:$0xff] }
 0x5ab   : > { %10473 = vmatmul.bf16.vlgmr.msrb.gmra.mxu1 %v17759_v43  ;;  %10487 = vmatmul.bf16.vlgmr.msrb.gmra.mxu0 %v17768_v46  ;;  %v7993_v43 = vld.sshfl [vmem:[#allocation1 + $0x20] sm:$0xff pattern:$0x73625140]  ;;  %v7995_v46 = vld.sshfl [vmem:[#allocation1 + $0x30] sm:$0xff pattern:$0x73625140]  ;;  %v10222_v53 = vpop.f32.mrf.mxu2  ;;  %v10264_v40 = vpop.f32.mrf.mxu0 }
 0x5ac   : > { %8129 = vst [vmem:[%s17045_s26 + $0x1e0] sm:$0xc] %v7993_v43  ;;  %v16689_v43 = vld [vmem:[%s21796_s3 + $0x6b0] sm:$0xff]  ;;  %v16684_v4 = vld [vmem:[%s21796_s3 + $0x688] sm:$0xff] }
 0x5ad   : > { %10494 = vmatpush.bf16.msrb.mxu2 %v16641_v50  ;;  %10508 = vmatpush.bf16.msrb.mxu3 %v16649_v12  ;;  %8131 = vst [vmem:[%s17045_s26 + $0x1f0] sm:$0xc] %v7995_v46  ;;  %v8009_v18 = vld.sshfl [vmem:[#allocation1] sm:$0xff pattern:$0x73625140]  ;;  %v16669_v23 = vld [vmem:[%s21796_s3 + $0x610] sm:$0xff] }
 0x5ae   : > { %10522 = vmatpush.bf16.msra.mxu1 %v16657_v38  ;;  %10536 = vmatpush.bf16.msra.mxu0 %v16665_v55  ;;  %7998 = vst [vmem:[#allocation1 + $0x21] ss:$4 sm:$0xff] %v7930_v57  ;;  %v8010_v5 = vld.sshfl [vmem:[#allocation1 + $0x8] sm:$0xff pattern:$0x73625140]  ;;  %v16651_v50 = vld [vmem:[%s21796_s3 + $0x580] sm:$0xff] }
 0x5af   : > { %v8011_v31 = vld.sshfl [vmem:[#allocation1 + $0x10] sm:$0xff pattern:$0x73625140]  ;;  %v8012_v26 = vld.sshfl [vmem:[#allocation1 + $0x18] sm:$0xff pattern:$0x73625140] }
 0x5b0   : > { %v10236_v51 = vpop.f32.mrf.mxu3  ;;  %8017 = vst [vmem:[#allocation1 + $0x1] ss:$4 sm:$0xff] %v7942_v6  ;;  %v16659_v12 = vld [vmem:[%s21796_s3 + $0x5c0] sm:$0xff]  ;;  %v16692_v9 = vld [vmem:[%s21796_s3 + $0x6c8] sm:$0xff]  ;;  %v16709_v44 = vld [vmem:[%s21796_s3 + $0x750] sm:$0xff] }
 0x5b1   : > { %10495 = vmatpush.bf16.msrb.mxu2 %v16640_v34  ;;  %10509 = vmatpush.bf16.msrb.mxu3 %v16648_v35  ;;  %v10237_v15 = vadd.f32 %v10236_v51, %v10222_v53  ;;  %8134 = vst [vmem:[%s17045_s26 + $0x308] sm:$0xc] %v8000_v22  ;;  %v16674_v35 = vld [vmem:[%s21796_s3 + $0x638] sm:$0xff]  ;;  %v21851_v46 = vld [vmem:[#allocation9_spill] sm:$0xff] }
 0x5b2   : > { %10523 = vmatpush.bf16.msra.mxu1 %v16656_v28  ;;  %10537 = vmatpush.bf16.msra.mxu0 %v16664_v42  ;;  %8135 = vst [vmem:[%s17045_s26 + $0x310] sm:$0xc] %v8001_v33  ;;  %v16682_v28 = vld [vmem:[%s21796_s3 + $0x678] sm:$0xff]  ;;  %v16673_v33 = vld [vmem:[%s21796_s3 + $0x630] sm:$0xff]  ;;  %v10695_v53 = vld [vmem:[%s21799_s6] sm:$0xff] }
 0x5b3   : > { %v10251_v48 = vadd.f32 %v10250_v37, %v10237_v15  ;;  %8136 = vst [vmem:[%s17045_s26 + $0x318] sm:$0xc] %v8002_v49  ;;  %v16690_v42 = vld [vmem:[%s21796_s3 + $0x6b8] sm:$0xff]  ;;  %v16671_v51 = vld [vmem:[%s21796_s3 + $0x620] sm:$0xff]  ;;  %v7946_v37 = vrot.slane %v20769_v2, 2 }
 0x5b4   : > { %8141 = vst [vmem:[%s17045_s26 + $0x340] sm:$0xc] %v8009_v18  ;;  %v16679_v15 = vld [vmem:[%s21796_s3 + $0x660] sm:$0xff]  ;;  %v16686_v2 = vld [vmem:[%s21796_s3 + $0x698] sm:$0xff] }
 0x5b5   : > { %10496 = vmatpush.bf16.msrb.mxu2 %v16639_v52  ;;  %10510 = vmatpush.bf16.msrb.mxu3 %v16647_v62  ;;  %v21004_v13 = vadd.f32 %v10264_v40, %v10251_v48  ;;  %8142 = vst [vmem:[%s17045_s26 + $0x348] sm:$0xc] %v8010_v5  ;;  %v8003_v45 = vld.sshfl [vmem:[#allocation1 + $0x20] sm:$0xff pattern:$0x73625140]  ;;  %v16681_v52 = vld [vmem:[%s21796_s3 + $0x670] sm:$0xff] }
 0x5b6   : > { %10524 = vmatpush.bf16.msra.mxu1 %v16655_v59  ;;  %10538 = vmatpush.bf16.msra.mxu0 %v16663_v8  ;;  %8143 = vst [vmem:[%s17045_s26 + $0x350] sm:$0xc] %v8011_v31  ;;  %v8004_v22 = vld.sshfl [vmem:[#allocation1 + $0x28] sm:$0xff pattern:$0x73625140]  ;;  %v21852_v8 = vld [vmem:[#allocation8_spill] sm:$0xff] }
 0x5b7   : > { %v8019_v38 = vld.sshfl [vmem:[#allocation1] sm:$0xff pattern:$0x73625140]  ;;  %v8020_v55 = vld.sshfl [vmem:[#allocation1 + $0x8] sm:$0xff pattern:$0x73625140] }
 0x5b8   : > { %v8021_v34 = vld.sshfl [vmem:[#allocation1 + $0x10] sm:$0xff pattern:$0x73625140]  ;;  %v8022_v47 = vld.sshfl [vmem:[#allocation1 + $0x18] sm:$0xff pattern:$0x73625140] }
 0x5b9   : > { %10497 = vmatpush.bf16.msrb.mxu2 %v16638_v19  ;;  %10511 = vmatpush.bf16.msrb.mxu3 %v16646_v39  ;;  %8027 = vst [vmem:[#allocation1 + $0x1] ss:$4 sm:$0xff] %v7950_v24  ;;  %v8005_v49 = vld.sshfl [vmem:[#allocation1 + $0x30] sm:$0xff pattern:$0x73625140]  ;;  %v16672_v62 = vld [vmem:[%s21796_s3 + $0x628] sm:$0xff] }
 0x5ba   : > { %10525 = vmatpush.bf16.msra.mxu1 %v16654_v14  ;;  %10539 = vmatpush.bf16.msra.mxu0 %v16662_v21  ;;  %8144 = vst [vmem:[%s17045_s26 + $0x358] sm:$0xc] %v8012_v26  ;;  %v21065_v10 = vld.sshfl [vmem:[#allocation1 + $0x38] sm:$0xff pattern:$0x73625140]  ;;  %v16680_v59 = vld [vmem:[%s21796_s3 + $0x668] sm:$0xff] }
 0x5bb   : > { %8149 = vst [vmem:[%s17045_s26 + $0x380] sm:$0xc] %v8019_v38  ;;  %v16696_v14 = vld [vmem:[%s21796_s3 + $0x6e8] sm:$0xff]  ;;  %v16687_v18 = vld [vmem:[%s21796_s3 + $0x6a0] sm:$0xff]  ;;  %v16670_v31 = vld [vmem:[%s21796_s3 + $0x618] sm:$0xff] }
 0x5bc   : > { %8150 = vst [vmem:[%s17045_s26 + $0x388] sm:$0xc] %v8020_v55  ;;  %v16695_v5 = vld [vmem:[%s21796_s3 + $0x6e0] sm:$0xff]  ;;  %v16678_v48 = vld [vmem:[%s21796_s3 + $0x658] sm:$0xff]  ;;  %v16676_v40 = vld [vmem:[%s21796_s3 + $0x648] sm:$0xff] }
 0x5bd   : > { %10498 = vmatpush.bf16.msrb.mxu2 %v16637_v58  ;;  %10512 = vmatpush.bf16.msrb.mxu3 %v16645_v63  ;;  %8151 = vst [vmem:[%s17045_s26 + $0x390] sm:$0xc] %v8021_v34  ;;  %v16675_v24 = vld [vmem:[%s21796_s3 + $0x640] sm:$0xff]  ;;  %v16714_v38 = vld [vmem:[%s21796_s3 + $0x778] sm:$0xff] }
 0x5be   : > { %10526 = vmatpush.bf16.msra.mxu1 %v16653_v29  ;;  %10540 = vmatpush.bf16.msra.mxu0 %v16661_v30  ;;  %8152 = vst [vmem:[%s17045_s26 + $0x398] sm:$0xc] %v8022_v47  ;;  %v16694_v29 = vld [vmem:[%s21796_s3 + $0x6d8] sm:$0xff]  ;;  %v16677_v30 = vld [vmem:[%s21796_s3 + $0x650] sm:$0xff] }
 0x5bf   : > { %8008 = vst [vmem:[#allocation1 + $0x21] ss:$4 sm:$0xff] %v7938_v11  ;;  %v16722_v55 = vld [vmem:[%s21796_s3 + $0x7b8] sm:$0xff]  ;;  %v16705_v47 = vld [vmem:[%s21796_s3 + $0x730] sm:$0xff] }
 0x5c0   : > { %v8029_v57 = vld.sshfl [vmem:[#allocation1] sm:$0xff pattern:$0x73625140]  ;;  %v8030_v19 = vld.sshfl [vmem:[#allocation1 + $0x8] sm:$0xff pattern:$0x73625140] }
 0x5c1   : > { %10499 = vmatpush.bf16.msrb.mxu2 %v16636_v7  ;;  %10513 = vmatpush.bf16.msrb.mxu3 %v16644_v25  ;;  %v8031_v39 = vld.sshfl [vmem:[#allocation1 + $0x10] sm:$0xff pattern:$0x73625140]  ;;  %v8032_v21 = vld.sshfl [vmem:[#allocation1 + $0x18] sm:$0xff pattern:$0x73625140] }
 0x5c2   : > { %10527 = vmatpush.bf16.msra.mxu1 %v16652_v32  ;;  %10541 = vmatpush.bf16.msra.mxu0 %v16660_v27  ;;  %8157 = vst [vmem:[%s17045_s26 + $0x3c0] sm:$0xc] %v8029_v57  ;;  %v16730_v34 = vld [vmem:[%s21796_s3 + $0x7f8] sm:$0xff]  ;;  %v16720_v57 = vld [vmem:[%s21796_s3 + $0x7a8] sm:$0xff] }
 0x5c3   : > { %8158 = vst [vmem:[%s17045_s26 + $0x3c8] sm:$0xc] %v8030_v19  ;;  %v16728_v19 = vld [vmem:[%s21796_s3 + $0x7e8] sm:$0xff] }
 0x5c4   : > { %8159 = vst [vmem:[%s17045_s26 + $0x3d0] sm:$0xc] %v8031_v39  ;;  %v16703_v39 = vld [vmem:[%s21796_s3 + $0x720] sm:$0xff] }
 0x5c5   : > { %10500 = vmatpush.bf16.msrb.mxu2 %v16635_v60  ;;  %10514 = vmatpush.bf16.msrb.mxu3 %v16643_v20  ;;  %8160 = vst [vmem:[%s17045_s26 + $0x3d8] sm:$0xc] %v8032_v21  ;;  %v16667_v60 = vld [vmem:[%s21796_s3 + $0x600] sm:$0xff] }
 0x5c6   : > { %10528 = vmatpush.bf16.msra.mxu1 %v16651_v50  ;;  %10542 = vmatpush.bf16.msra.mxu0 %v16659_v12  ;;  %10704 = vst [vmem:[#allocation1] ss:$4 sm:$0xff] %v10695_v53  ;;  %v8013_v6 = vld.sshfl [vmem:[#allocation1 + $0x20] sm:$0xff pattern:$0x73625140]  ;;  %v16706_v12 = vld [vmem:[%s21796_s3 + $0x738] sm:$0xff] }
 0x5c7   : > { %v8014_v58 = vld.sshfl [vmem:[#allocation1 + $0x28] sm:$0xff pattern:$0x73625140]  ;;  %v8015_v63 = vld.sshfl [vmem:[#allocation1 + $0x30] sm:$0xff pattern:$0x73625140] }
 0x5c8   : > { %10501 = vmatmul.bf16.vlgmr.msrb.gmra.mxu2 %v17923_v16  ;;  %10515 = vmatmul.bf16.vlgmr.msrb.gmra.mxu3 %v21851_v46  ;;  %v21853_v16 = vld [vmem:[#allocation10_spill] sm:$0xff]  ;;  %v8016_v26 = vld.sshfl [vmem:[#allocation1 + $0x38] sm:$0xff pattern:$0x73625140]  ;;  %8137 = vst [vmem:[%s17045_s26 + $0x320] sm:$0xc] %v8003_v45 }
 0x5c9   : > { %10549 = vmatpush.bf16.msra.mxu2 %v16674_v35  ;;  %10563 = vmatpush.bf16.msra.mxu3 %v16682_v28  ;;  %8018 = vst [vmem:[#allocation1 + $0x21] ss:$4 sm:$0xff] %v7946_v37  ;;  %v16683_v20 = vld [vmem:[%s21796_s3 + $0x680] sm:$0xff]  ;;  %v16713_v28 = vld [vmem:[%s21796_s3 + $0x770] sm:$0xff]  ;;  %v21856_v46 = vld [vmem:[#allocation12_spill] sm:$0xff] }
 0x5ca   : > { %10577 = vmatpush.bf16.msrb.mxu1 %v16690_v42  ;;  %10591 = vmatpush.bf16.msrb.mxu0 %v16698_v41  ;;  %8138 = vst [vmem:[%s17045_s26 + $0x328] sm:$0xc] %v8004_v22  ;;  %v16691_v50 = vld [vmem:[%s21796_s3 + $0x6c0] sm:$0xff]  ;;  %v16721_v42 = vld [vmem:[%s21796_s3 + $0x7b0] sm:$0xff] }
 0x5cb   : > { %10529 = vmatmul.bf16.vlgmr.msra.gmra.mxu1 %v21852_v8  ;;  %10543 = vmatmul.bf16.vlgmr.msra.gmra.mxu0 %v21853_v16  ;;  %8139 = vst [vmem:[%s17045_s26 + $0x330] sm:$0xc] %v8005_v49  ;;  %v16729_v45 = vld [vmem:[%s21796_s3 + $0x7f0] sm:$0xff]  ;;  %v16704_v49 = vld [vmem:[%s21796_s3 + $0x728] sm:$0xff]  ;;  %v16719_v21 = vld [vmem:[%s21796_s3 + $0x7a0] sm:$0xff] }
 0x5cc   : > { %8140 = vst [vmem:[%s17045_s26 + $0x338] sm:$0xc] %v21065_v10  ;;  %v21854_v22 = vld [vmem:[#allocation11_spill] sm:$0xff]  ;;  %v16712_v8 = vld [vmem:[%s21796_s3 + $0x768] sm:$0xff]  ;;  %v16727_v53 = vld [vmem:[%s21796_s3 + $0x7e0] sm:$0xff] }
 0x5cd   : > { %10550 = vmatpush.bf16.msra.mxu2 %v16673_v33  ;;  %10564 = vmatpush.bf16.msra.mxu3 %v16681_v52  ;;  %8145 = vst [vmem:[%s17045_s26 + $0x360] sm:$0xc] %v8013_v6  ;;  %v21855_v33 = vld [vmem:[#allocation13_spill] sm:$0xff]  ;;  %v21212_v10 = vld.sshfl [vmem:[#allocation1 + $0x8] sm:$0xff pattern:$0x73625140] }
 0x5ce   : > { %10578 = vmatpush.bf16.msrb.mxu1 %v16689_v43  ;;  %10592 = vmatpush.bf16.msrb.mxu0 %v16697_v36  ;;  %8146 = vst [vmem:[%s17045_s26 + $0x368] sm:$0xc] %v8014_v58  ;;  %v21210_v52 = vld.sshfl [vmem:[#allocation1] sm:$0xff pattern:$0x73625140]  ;;  %v10697_v36 = vld [vmem:[%s21799_s6 + $0x10] sm:$0xff] }
 0x5cf   : > { %8147 = vst [vmem:[%s17045_s26 + $0x370] sm:$0xc] %v8015_v63  ;;  %v21230_v16 = vld.sshfl [vmem:[#allocation1 + $0x10] sm:$0xff pattern:$0x73625140]  ;;  %v10698_v6 = vld [vmem:[%s21799_s6 + $0x18] sm:$0xff] }
 0x5d0   : > { %v8023_v7 = vld.sshfl [vmem:[#allocation1 + $0x20] sm:$0xff pattern:$0x73625140]  ;;  %v8024_v25 = vld.sshfl [vmem:[#allocation1 + $0x28] sm:$0xff pattern:$0x73625140] }
 0x5d1   : > { %10551 = vmatpush.bf16.msra.mxu2 %v16672_v62  ;;  %10565 = vmatpush.bf16.msra.mxu3 %v16680_v59  ;;  %v8025_v32 = vld.sshfl [vmem:[#allocation1 + $0x30] sm:$0xff pattern:$0x73625140]  ;;  %v8026_v27 = vld.sshfl [vmem:[#allocation1 + $0x38] sm:$0xff pattern:$0x73625140] }
 0x5d2   : > { %10579 = vmatpush.bf16.msrb.mxu1 %v16688_v0  ;;  %10593 = vmatpush.bf16.msrb.mxu0 %v16696_v14  ;;  %8028 = vst [vmem:[#allocation1 + $0x21] ss:$4 sm:$0xff] %v7954_v3  ;;  %v21857_v62 = vld [vmem:[#allocation14_spill] sm:$0xff]  ;;  %v21220_v59 = vld.sshfl [vmem:[#allocation1 + $0x18] sm:$0xff pattern:$0x73625140] }
 0x5d3   : > { %8148 = vst [vmem:[%s17045_s26 + $0x378] sm:$0xc] %v8016_v26  ;;  %v10696_v0 = vld [vmem:[%s21799_s6 + $0x8] sm:$0xff]  ;;  %v16711_v14 = vld [vmem:[%s21796_s3 + $0x760] sm:$0xff]  ;;  %v16701_v63 = vld [vmem:[%s21796_s3 + $0x710] sm:$0xff] }
 0x5d4   : > { %8153 = vst [vmem:[%s17045_s26 + $0x3a0] sm:$0xc] %v8023_v7  ;;  %v10699_v26 = vld [vmem:[%s21799_s6 + $0x20] sm:$0xff]  ;;  %v16724_v3 = vld [vmem:[%s21796_s3 + $0x7c8] sm:$0xff] }
 0x5d5   : > { %10552 = vmatpush.bf16.msra.mxu2 %v16671_v51  ;;  %10566 = vmatpush.bf16.msra.mxu3 %v16679_v15  ;;  %8154 = vst [vmem:[%s17045_s26 + $0x3a8] sm:$0xc] %v8024_v25  ;;  %v16702_v51 = vld [vmem:[%s21796_s3 + $0x718] sm:$0xff]  ;;  %v16699_v7 = vld [vmem:[%s21796_s3 + $0x700] sm:$0xff] }
 0x5d6   : > { %10580 = vmatpush.bf16.msrb.mxu1 %v16687_v18  ;;  %10594 = vmatpush.bf16.msrb.mxu0 %v16695_v5  ;;  %8155 = vst [vmem:[%s17045_s26 + $0x3b0] sm:$0xc] %v8025_v32  ;;  %v16710_v15 = vld [vmem:[%s21796_s3 + $0x758] sm:$0xff]  ;;  %v16707_v25 = vld [vmem:[%s21796_s3 + $0x740] sm:$0xff] }
 0x5d7   : > { %8156 = vst [vmem:[%s17045_s26 + $0x3b8] sm:$0xc] %v8026_v27  ;;  %v16718_v18 = vld [vmem:[%s21796_s3 + $0x798] sm:$0xff]  ;;  %v16715_v27 = vld [vmem:[%s21796_s3 + $0x780] sm:$0xff] }
 0x5d8   : > { %10717 = vst [vmem:[#allocation1] ss:$4 sm:$0xff] %v10697_v36  ;;  %v16726_v5 = vld [vmem:[%s21796_s3 + $0x7d8] sm:$0xff] }
 0x5d9   : > { %10553 = vmatpush.bf16.msra.mxu2 %v16670_v31  ;;  %10567 = vmatpush.bf16.msra.mxu3 %v16678_v48  ;;  %v8033_v35 = vld.sshfl [vmem:[#allocation1 + $0x20] sm:$0xff pattern:$0x73625140]  ;;  %v8034_v41 = vld.sshfl [vmem:[#allocation1 + $0x28] sm:$0xff pattern:$0x73625140] }
 0x5da   : > { %10581 = vmatpush.bf16.msrb.mxu1 %v16686_v2  ;;  %10595 = vmatpush.bf16.msrb.mxu0 %v16694_v29  ;;  %v8035_v11 = vld.sshfl [vmem:[#allocation1 + $0x30] sm:$0xff pattern:$0x73625140]  ;;  %v8036_v43 = vld.sshfl [vmem:[#allocation1 + $0x38] sm:$0xff pattern:$0x73625140] }
 0x5db   : > { %8161 = vst [vmem:[%s17045_s26 + $0x3e0] sm:$0xc] %v8033_v35  ;;  %v16717_v2 = vld [vmem:[%s21796_s3 + $0x790] sm:$0xff]  ;;  %v10762_v35 = vsel %vm4431_vm2, %v21220_v59, 0  ;;  %v10252_v59 = vpop.f32.mrf.mxu1 }
 0x5dc   : > { %8162 = vst [vmem:[%s17045_s26 + $0x3e8] sm:$0xc] %v8034_v41  ;;  %v16725_v29 = vld [vmem:[%s21796_s3 + $0x7d0] sm:$0xff]  ;;  %v21860_v41 = vld [vmem:[#allocation17_spill] sm:$0xff] }
 0x5dd   : > { %10554 = vmatpush.bf16.msra.mxu2 %v16669_v23  ;;  %10568 = vmatpush.bf16.msra.mxu3 %v16677_v30  ;;  %8163 = vst [vmem:[%s17045_s26 + $0x3f0] sm:$0xc] %v8035_v11 }
 0x5de   : > { %10582 = vmatpush.bf16.msrb.mxu1 %v16685_v17  ;;  %10596 = vmatpush.bf16.msrb.mxu0 %v16693_v61  ;;  %8164 = vst [vmem:[%s17045_s26 + $0x3f8] sm:$0xc] %v8036_v43  ;;  %v16700_v17 = vld [vmem:[%s21796_s3 + $0x708] sm:$0xff] }
 0x5df   : > { %10707 = vst [vmem:[#allocation1 + $0x20] ss:$4 sm:$0xff] %v10696_v0  ;;  %v21283_v54 = vld.sshfl [vmem:[#allocation1] sm:$0xff pattern:$0x73625140]  ;;  %v16708_v61 = vld [vmem:[%s21796_s3 + $0x748] sm:$0xff]  ;;  %v10266_v0 = vpop.f32.mrf.mxu0 }
 0x5e0   : > { %v21285_v1 = vld.sshfl [vmem:[#allocation1 + $0x8] sm:$0xff pattern:$0x73625140]  ;;  %v21287_v23 = vld.sshfl [vmem:[#allocation1 + $0x10] sm:$0xff pattern:$0x73625140] }
 0x5e1   : > { %10555 = vmatpush.bf16.msra.mxu2 %v16668_v56  ;;  %10569 = vmatpush.bf16.msra.mxu3 %v16676_v40  ;;  %v21289_v30 = vld.sshfl [vmem:[#allocation1 + $0x18] sm:$0xff pattern:$0x73625140]  ;;  %v16716_v56 = vld [vmem:[%s21796_s3 + $0x788] sm:$0xff] }
 0x5e2   : > { %10583 = vmatpush.bf16.msrb.mxu1 %v16684_v4  ;;  %10597 = vmatpush.bf16.msrb.mxu0 %v16692_v9  ;;  %10729 = vst [vmem:[#allocation1] ss:$4 sm:$0xff] %v10699_v26  ;;  %v10700_v40 = vld [vmem:[%s21799_s6 + $0x28] sm:$0xff] }
 0x5e5   : > { %10556 = vmatpush.bf16.msra.mxu2 %v16667_v60  ;;  %10570 = vmatpush.bf16.msra.mxu3 %v16675_v24  ;;  %v16723_v60 = vld [vmem:[%s21796_s3 + $0x7c0] sm:$0xff] }
 0x5e6   : > { %10584 = vmatpush.bf16.msrb.mxu1 %v16683_v20  ;;  %10598 = vmatpush.bf16.msrb.mxu0 %v16691_v50  ;;  %v10712_v58 = vld.sshfl [vmem:[#allocation1 + $0x20] sm:$0xff pattern:$0x73625140]  ;;  %v10713_v37 = vld.sshfl [vmem:[#allocation1 + $0x28] sm:$0xff pattern:$0x73625140] }
 0x5e7   : > { %v10715_v31 = vld.sshfl [vmem:[#allocation1 + $0x38] sm:$0xff pattern:$0x73625140]  ;;  %v21269_v48 = vld.sshfl [vmem:[#allocation1 + $0x30] sm:$0xff pattern:$0x73625140] }
 0x5e8   : > { %10557 = vmatmul.bf16.vlgmr.msra.gmra.mxu2 %v21854_v22  ;;  %10571 = vmatmul.bf16.vlgmr.msra.gmra.mxu3 %v21855_v33  ;;  %10719 = vst [vmem:[#allocation1 + $0x20] ss:$4 sm:$0xff] %v10698_v6  ;;  %v10701_v20 = vld [vmem:[%s21799_s6 + $0x30] sm:$0xff]  ;;  %v10766_v11 = vsel %vm4431_vm2, %v10713_v37, 0  ;;  %v10770_v22 = vsel %vm4431_vm2, %v10715_v31, 0  ;;  %v10702_v33 = vld [vmem:[%s21799_s6 + $0x38] sm:$0xff] }
 0x5e9   : > { %10605 = vmatpush.bf16.msrb.mxu2 %v16706_v12  ;;  %10619 = vmatpush.bf16.msrb.mxu3 %v16714_v38  ;;  %v21329_v50 = vld.sshfl [vmem:[#allocation1] sm:$0xff pattern:$0x73625140]  ;;  %v21331_v12 = vld.sshfl [vmem:[#allocation1 + $0x8] sm:$0xff pattern:$0x73625140] }
 0x5ea   : > { %10633 = vmatpush.bf16.msra.mxu1 %v16722_v55  ;;  %10647 = vmatpush.bf16.msra.mxu0 %v16730_v34  ;;  %v21333_v38 = vld.sshfl [vmem:[#allocation1 + $0x10] sm:$0xff pattern:$0x73625140]  ;;  %v10756_v55 = vsel %vm4431_vm2, %v21210_v52, 0  ;;  %v10758_v34 = vsel %vm4431_vm2, %v21212_v10, 0 }
 0x5eb   : > { %10585 = vmatmul.bf16.vlgmr.msrb.gmra.mxu1 %v21856_v46  ;;  %10599 = vmatmul.bf16.vlgmr.msrb.gmra.mxu0 %v21857_v62  ;;  %v10224_v46 = vpop.f32.mrf.mxu2  ;;  %v10238_v62 = vpop.f32.mrf.mxu3 }
 0x5ed   : > { %10606 = vmatpush.bf16.msrb.mxu2 %v16705_v47  ;;  %10620 = vmatpush.bf16.msrb.mxu3 %v16713_v28  ;;  %v21339_v47 = vld.sshfl [vmem:[#allocation1 + $0x18] sm:$0xff pattern:$0x73625140]  ;;  %v21858_v28 = vld [vmem:[#allocation15_spill] sm:$0xff] }
 0x5ee   : > { %10634 = vmatpush.bf16.msra.mxu1 %v16721_v42  ;;  %10648 = vmatpush.bf16.msra.mxu0 %v16729_v45  ;;  %10741 = vst [vmem:[#allocation1] ss:$4 sm:$0xff] %v10701_v20  ;;  %v21859_v42 = vld [vmem:[#allocation16_spill] sm:$0xff]  ;;  %v10764_v45 = vsel %vm4431_vm2, %v10712_v58, 0  ;;  %v10239_v58 = vadd.f32 %v10238_v62, %v10224_v46 }
 0x5ef   : > { %v21306_v4 = vld.sshfl [vmem:[#allocation1 + $0x20] sm:$0xff pattern:$0x73625140]  ;;  %v21308_v9 = vld.sshfl [vmem:[#allocation1 + $0x28] sm:$0xff pattern:$0x73625140] }
 0x5f0   : > { %v21316_v32 = vld.sshfl [vmem:[#allocation1 + $0x30] sm:$0xff pattern:$0x73625140]  ;;  %v21324_v24 = vld.sshfl [vmem:[#allocation1 + $0x38] sm:$0xff pattern:$0x73625140]  ;;  %v10253_v37 = vadd.f32 %v10252_v59, %v10239_v58 }
 0x5f1   : > { %10607 = vmatpush.bf16.msrb.mxu2 %v16704_v49  ;;  %10621 = vmatpush.bf16.msrb.mxu3 %v16712_v8  ;;  %10731 = vst [vmem:[#allocation1 + $0x20] ss:$4 sm:$0xff] %v10700_v40  ;;  %v21861_v49 = vld [vmem:[#allocation18_spill] sm:$0xff] }
 0x5f2   : > { %10635 = vmatpush.bf16.msra.mxu1 %v16720_v57  ;;  %10649 = vmatpush.bf16.msra.mxu0 %v16728_v19  ;;  %v10306_v19 = vpop.f32.mrf.mxu1 }
 0x5f3   : > { %v10278_v8 = vpop.f32.mrf.mxu2  ;;  %v10292_v57 = vpop.f32.mrf.mxu3 }
 0x5f5   : > { %10608 = vmatpush.bf16.msrb.mxu2 %v16703_v39  ;;  %10622 = vmatpush.bf16.msrb.mxu3 %v16711_v14  ;;  %v10320_v39 = vpop.f32.mrf.mxu0 }
 0x5f6   : > { %10636 = vmatpush.bf16.msra.mxu1 %v16719_v21  ;;  %10650 = vmatpush.bf16.msra.mxu0 %v16727_v53 }
 0x5f8   : > { %v21353_v52 = vld.sshfl [vmem:[#allocation1 + $0x20] sm:$0xff pattern:$0x73625140]  ;;  %v21355_v10 = vld.sshfl [vmem:[#allocation1 + $0x28] sm:$0xff pattern:$0x73625140] }
 0x5f9   : > { %10609 = vmatpush.bf16.msrb.mxu2 %v16702_v51  ;;  %10623 = vmatpush.bf16.msrb.mxu3 %v16710_v15  ;;  %v21357_v43 = vld.sshfl [vmem:[#allocation1 + $0x30] sm:$0xff pattern:$0x73625140]  ;;  %v21359_v36 = vld.sshfl [vmem:[#allocation1 + $0x38] sm:$0xff pattern:$0x73625140] }
 0x5fa   : > { %10637 = vmatpush.bf16.msra.mxu1 %v16718_v18  ;;  %10651 = vmatpush.bf16.msra.mxu0 %v16726_v5  ;;  %10743 = vst [vmem:[#allocation1 + $0x20] ss:$4 sm:$0xff] %v10702_v33  ;;  %v10308_v53 = vpop.f32.mrf.mxu1 }
 0x5fb   : > { %v10280_v14 = vpop.f32.mrf.mxu2  ;;  %v10294_v21 = vpop.f32.mrf.mxu3 }
 0x5fd   : > { %10610 = vmatpush.bf16.msrb.mxu2 %v16701_v63  ;;  %10624 = vmatpush.bf16.msrb.mxu3 %v16709_v44  ;;  %v10322_v51 = vpop.f32.mrf.mxu0  ;;  %v10279_v63 = vadd.f32 %v10278_v8, %v21004_v13 }
 0x5fe   : > { %10638 = vmatpush.bf16.msra.mxu1 %v16717_v2  ;;  %10652 = vmatpush.bf16.msra.mxu0 %v16725_v29  ;;  %v10267_v2 = vadd.f32 %v10266_v0, %v10253_v37 }
 0x601   : > { %10611 = vmatpush.bf16.msrb.mxu2 %v16700_v17  ;;  %10625 = vmatpush.bf16.msrb.mxu3 %v16708_v61  ;;  %v10293_v17 = vadd.f32 %v10292_v57, %v10279_v63  ;;  %v10281_v61 = vadd.f32 %v10280_v14, %v10267_v2 }
 0x602   : > { %10639 = vmatpush.bf16.msra.mxu1 %v16716_v56  ;;  %10653 = vmatpush.bf16.msra.mxu0 %v16724_v3  ;;  %v10362_v5 = vpop.f32.mrf.mxu1 }
 0x603   : > { %v10334_v15 = vpop.f32.mrf.mxu2  ;;  %v10348_v18 = vpop.f32.mrf.mxu3  ;;  %v10307_v3 = vadd.f32 %v10306_v19, %v10293_v17  ;;  %v10295_v40 = vadd.f32 %v10294_v21, %v10281_v61 }
 0x605   : > { %10612 = vmatpush.bf16.msrb.mxu2 %v16699_v7  ;;  %10626 = vmatpush.bf16.msrb.mxu3 %v16707_v25  ;;  %v10376_v6 = vpop.f32.mrf.mxu0  ;;  %v10309_v20 = vadd.f32 %v10308_v53, %v10295_v40 }
 0x606   : > { %10640 = vmatpush.bf16.msra.mxu1 %v16715_v27  ;;  %10654 = vmatpush.bf16.msra.mxu0 %v16723_v60  ;;  %v10321_v60 = vadd.f32 %v10320_v39, %v10307_v3 }
 0x608   : > { %10613 = vmatmul.bf16.vlgmr.msrb.gmra.mxu2 %v21858_v28  ;;  %10627 = vmatmul.bf16.vlgmr.msrb.gmra.mxu3 %v21859_v42 }
 0x609   : > { %10827 = vmatpush.bf16.msra.mxu3 %v10756_v55  ;;  %10641 = vmatmul.bf16.vlgmr.msra.gmra.mxu1 %v21860_v41  ;;  %v10335_v55 = vadd.f32 %v10334_v15, %v10321_v60 }
 0x60a   : > { %10840 = vmatpush.bf16.msrb.mxu1 %v10758_v34  ;;  %10866 = vmatpush.bf16.msrb.mxu0 %v10762_v35  ;;  %v10364_v44 = vpop.f32.mrf.mxu1  ;;  %v10323_v34 = vadd.f32 %v10322_v51, %v10309_v20 }
 0x60b   : > { %10655 = vmatmul.bf16.vlgmr.msra.gmra.mxu0 %v21861_v49  ;;  %v10336_v31 = vpop.f32.mrf.mxu2  ;;  %v10350_v26 = vpop.f32.mrf.mxu3  ;;  %v10349_v28 = vadd.f32 %v10348_v18, %v10335_v55 }
 0x60c   : > { %v10337_v42 = vadd.f32 %v10336_v31, %v10323_v34 }
 0x60d   : > { %10879 = vmatpush.bf16.msrb.mxu3 %v10764_v45  ;;  %v10378_v29 = vpop.f32.mrf.mxu0 }
 0x60e   : > { %10892 = vmatpush.bf16.msra.mxu1 %v10766_v11  ;;  %10918 = vmatpush.bf16.msra.mxu0 %v10770_v22  ;;  %v10363_v11 = vadd.f32 %v10362_v5, %v10349_v28  ;;  %v10351_v22 = vadd.f32 %v10350_v26, %v10337_v42 }
 0x610   : > { %v10377_v49 = vadd.f32 %v10376_v6, %v10363_v11  ;;  %v10365_v46 = vadd.f32 %v10364_v44, %v10351_v22 }
 0x612   : > { %v10418_v25 = vpop.f32.mrf.mxu1  ;;  %v10379_v57 = vadd.f32 %v10378_v29, %v10365_v46 }
 0x613   : > { %v10390_v56 = vpop.f32.mrf.mxu2  ;;  %v10404_v7 = vpop.f32.mrf.mxu3 }
 0x614   : > { %v10391_v0 = vadd.f32 %v10390_v56, %v10377_v49 }
 0x615   : > { %v10432_v27 = vpop.f32.mrf.mxu0 }
 0x616   : > { %v10405_v19 = vadd.f32 %v10404_v7, %v10391_v0 }
 0x618   : > { %v10419_v21 = vadd.f32 %v10418_v25, %v10405_v19 }
 0x61a   : > { %v10420_v41 = vpop.f32.mrf.mxu1  ;;  %v10433_v58 = vadd.f32 %v10432_v27, %v10419_v21 }
 0x61b   : > { %v10392_v35 = vpop.f32.mrf.mxu2  ;;  %v10406_v13 = vpop.f32.mrf.mxu3 }
 0x61c   : > { %v10393_v39 = vadd.f32 %v10392_v35, %v10379_v57 }
 0x61d   : > { %v10434_v45 = vpop.f32.mrf.mxu0 }
 0x61e   : > { %v10407_v53 = vadd.f32 %v10406_v13, %v10393_v39 }
 0x620   : > { %v10421_v37 = vadd.f32 %v10420_v41, %v10407_v53 }
 0x622   : > { %v10435_v63 = vadd.f32 %v10434_v45, %v10421_v37 }
 0x628   : > { %v10474_v59 = vpop.f32.mrf.mxu1  ;;  %v10488_v8 = vpop.f32.mrf.mxu0 }
 0x62b   : > { %v10446_v33 = vpop.f32.mrf.mxu2  ;;  %v10460_v62 = vpop.f32.mrf.mxu3 }
 0x62c   : > { %v10447_v5 = vadd.f32 %v10446_v33, %v10433_v58  ;;  %v15759_v33 = vld [vmem:[%s21801_s8 + $0x8] sm:$0xf] }
 0x62d   : > { %10667 = vperm.xlu1 %16778, %v15759_v33  }
 0x62e   : > { %v10461_v44 = vadd.f32 %v10460_v62, %v10447_v5 }
 0x630   : > { %v10476_v15 = vpop.f32.mrf.mxu1  ;;  %v10490_v18 = vpop.f32.mrf.mxu0  ;;  %v10475_v61 = vadd.f32 %v10474_v59, %v10461_v44 }
 0x632   : > { %v10489_v3 = vadd.f32 %v10488_v8, %v10475_v61 }
 0x633   : > { %v10448_v14 = vpop.f32.mrf.mxu2  ;;  %v10462_v51 = vpop.f32.mrf.mxu3 }
 0x634   : > { %v10449_v2 = vadd.f32 %v10448_v14, %v10435_v63 }
 0x636   : > { %v10463_v29 = vadd.f32 %v10462_v51, %v10449_v2 }
 0x638   : > { %v10477_v40 = vadd.f32 %v10476_v15, %v10463_v29 }
 0x63a   : > { %v10491_v55 = vadd.f32 %v10490_v18, %v10477_v40  ;;  %v15758_v40 = vld [vmem:[%s21800_s7 + $0x8] sm:$0xf] }
 0x648   : > { %v10530_v26 = vpop.f32.mrf.mxu1  ;;  %v10544_v17 = vpop.f32.mrf.mxu0 }
 0x64b   : > { %v10502_v31 = vpop.f32.mrf.mxu2  ;;  %v10516_v6 = vpop.f32.mrf.mxu3 }
 0x64c   : > { %v10503_v60 = vadd.f32 %v10502_v31, %v10489_v3 }
 0x64e   : > { %v10517_v27 = vadd.f32 %v10516_v6, %v10503_v60  ;;  %v16782_v60 = vld [vmem:[%s17045_s26 + $0x2c0] sm:$0xff] }
 0x650   : > { %v10532_v25 = vpop.f32.mrf.mxu1  ;;  %v10546_v20 = vpop.f32.mrf.mxu0  ;;  %v10531_v13 = vadd.f32 %v10530_v26, %v10517_v27  ;;  %v16783_v27 = vld [vmem:[%s17045_s26 + $0xb8] sm:$0xff] }
 0x652   : > { %v10545_v11 = vadd.f32 %v10544_v17, %v10531_v13  ;;  %v16785_v13 = vld [vmem:[%s17045_s26 + $0xc0] sm:$0xff] }
 0x653   : > { %v10504_v56 = vpop.f32.mrf.mxu2  ;;  %v10518_v7 = vpop.f32.mrf.mxu3 }
 0x654   : > { %v10505_v34 = vadd.f32 %v10504_v56, %v10491_v55 }
 0x656   : > { %v10519_v41 = vadd.f32 %v10518_v7, %v10505_v34  ;;  %v10760_v7 = vsel %vm4431_vm2, %v21230_v16, 0  ;;  %v21863_v34 = vld [vmem:[#allocation6_spill] sm:$0xff] }
 0x658   : > { %v10533_v22 = vadd.f32 %v10532_v25, %v10519_v41  ;;  %v10768_v25 = vsel %vm4431_vm2, %v21269_v48, 0  ;;  %v16786_v41 = vld [vmem:[%s17045_s26 + $0x2d0] sm:$0xff]  ;;  %v16787_v48 = vld [vmem:[%s17045_s26 + $0xc8] sm:$0xff] }
 0x65a   : > { %v10547_v62 = vadd.f32 %v10546_v20, %v10533_v22  ;;  %v21862_v20 = vld [vmem:[#allocation7_spill] sm:$0xff]  ;;  %v16788_v22 = vld [vmem:[%s17045_s26 + $0x2d8] sm:$0xff] }
 0x65b   : > { %v11614_v55 = vadd.f32 %v16782_v60, %v21862_v20  ;;  %v10747_v60 = vld.sshfl [vmem:[#allocation1 + $0x18] sm:$0xff pattern:$0x73625140]  ;;  %v10748_v20 = vld.sshfl [vmem:[#allocation1 + $0x20] sm:$0xff pattern:$0x73625140] }
 0x668   : > { %v10586_v42 = vpop.f32.mrf.mxu1  ;;  %v10600_v45 = vpop.f32.mrf.mxu0 }
 0x66b   : > { %v10558_v35 = vpop.f32.mrf.mxu2  ;;  %v10572_v28 = vpop.f32.mrf.mxu3 }
 0x66c   : > { %v10559_v49 = vadd.f32 %v10558_v35, %v10545_v11  ;;  %v11580_v35 = vadd.f32 %v16783_v27, %v21863_v34  ;;  %v10750_v27 = vld.sshfl [vmem:[#allocation1 + $0x30] sm:$0xff pattern:$0x73625140]  ;;  %v10751_v34 = vld.sshfl [vmem:[#allocation1 + $0x38] sm:$0xff pattern:$0x73625140] }
 0x66e   : > { %v10573_v8 = vadd.f32 %v10572_v28, %v10559_v49  ;;  %v16784_v28 = vld [vmem:[%s17045_s26 + $0x2c8] sm:$0xff]  ;;  %v11581_v16 = vadd.f32 %v16785_v13, %v11580_v35  ;;  %v16789_v49 = vld [vmem:[%s17045_s26 + $0xd0] sm:$0xff]  ;;  %v10812_v35 = vsel %vm4431_vm2, %v10748_v20, 0  ;;  %v10818_v13 = vsel %vm4431_vm2, %v10751_v34, 0 }
 0x670   : > { %v10588_v0 = vpop.f32.mrf.mxu1  ;;  %v10602_v19 = vpop.f32.mrf.mxu0  ;;  %v10587_v39 = vadd.f32 %v10586_v42, %v10573_v8  ;;  %v11615_v42 = vadd.f32 %v16784_v28, %v11614_v55  ;;  %v11582_v11 = vadd.f32 %v16787_v48, %v11581_v16  ;;  %v10749_v55 = vld.sshfl [vmem:[#allocation1 + $0x28] sm:$0xff pattern:$0x73625140]  ;;  %v16864_v16 = vmov 4096.0  }
 0x671   : > { %v10814_v28 = vsel %vm4431_vm2, %v10749_v55, 0  ;;  %16780 = vrcp.f32 %v16864_v16 }
 0x672   : > { %v10601_v15 = vadd.f32 %v10600_v45, %v10587_v39  ;;  %v11616_v45 = vadd.f32 %v16786_v41, %v11615_v42  ;;  %v16793_v39 = vld [vmem:[%s17045_s26 + $0xe0] sm:$0xff]  ;;  %v10816_v42 = vsel %vm4431_vm2, %v10750_v27, 0 }
 0x673   : > { %v10560_v46 = vpop.f32.mrf.mxu2  ;;  %v10574_v59 = vpop.f32.mrf.mxu3 }
 0x674   : > { %v10561_v57 = vadd.f32 %v10560_v46, %v10547_v62  ;;  %v11617_v33 = vadd.f32 %v16788_v22, %v11616_v45  ;;  %v11583_v46 = vadd.f32 %v16789_v49, %v11582_v11  ;;  %v16790_v62 = vld [vmem:[%s17045_s26 + $0x2e0] sm:$0xff] }
 0x676   : > { %v10575_v14 = vadd.f32 %v10574_v59, %v10561_v57  ;;  %v11618_v59 = vadd.f32 %v16790_v62, %v11617_v33  ;;  %v16792_v57 = vld [vmem:[%s17045_s26 + $0x2e8] sm:$0xff] }
 0x677   : > { %v16781_v41 = vpop.eup %16780 }
 0x678   : > { %v10589_v18 = vadd.f32 %v10588_v0, %v10575_v14  ;;  %v16791_v0 = vld [vmem:[%s17045_s26 + $0xd8] sm:$0xff]  ;;  %v11625_v45 = vmul.f32 4096.0, %v16781_v41  ;;  %vm11629_vm9 = vweird.f32 %v16781_v41 }
 0x679   : > { %v11584_v8 = vadd.f32 %v16791_v0, %v11583_v46 }
 0x67a   : > { %v10603_v5 = vadd.f32 %v10602_v19, %v10589_v18  ;;  %v11619_v19 = vadd.f32 %v16792_v57, %v11618_v59  ;;  %v16796_v18 = vld [vmem:[%s17045_s26 + $0x2f8] sm:$0xff]  ;;  %v11626_v48 = vsub.f32 1.0, %v11625_v45 }
 0x67b   : > { %v11585_v14 = vadd.f32 %v16793_v39, %v11584_v8  ;;  %v15793_v8 = vld [vmem:[%s21800_s7 + $0xc] sm:$0xf] }
 0x67c   : > { %v11627_v11 = vmul.f32 %v16781_v41, %v11626_v48 }
 0x67e   : > { %v11628_v22 = vadd.f32 %v16781_v41, %v11627_v11 }
 0x680   : > { %v11630_v33 = vsel %vm11629_vm9, %v16781_v41, %v11628_v22 }
 0x686   : > { %v10642_v51 = vpop.f32.mrf.mxu1 }
 0x688   : > { %v10656_v58 = vpop.f32.mrf.mxu0 }
 0x68b   : > { %v10614_v21 = vpop.f32.mrf.mxu2  ;;  %v10628_v53 = vpop.f32.mrf.mxu3 }
 0x68c   : > { %v10615_v37 = vadd.f32 %v10614_v21, %v10601_v15  ;;  %v16794_v21 = vld [vmem:[%s17045_s26 + $0x2f0] sm:$0xff] }
 0x68e   : > { %v10629_v63 = vadd.f32 %v10628_v53, %v10615_v37  ;;  %v10644_v2 = vpop.f32.mrf.mxu1  ;;  %v11620_v53 = vadd.f32 %v16794_v21, %v11619_v19  ;;  %v16797_v37 = vld [vmem:[%s17045_s26 + $0xf0] sm:$0xff] }
 0x690   : > { %v10643_v17 = vadd.f32 %v10642_v51, %v10629_v63  ;;  %v10658_v29 = vpop.f32.mrf.mxu0  ;;  %v16795_v51 = vld [vmem:[%s17045_s26 + $0xe8] sm:$0xff] }
 0x691   : > { %v11586_v15 = vadd.f32 %v16795_v51, %v11585_v14 }
 0x692   : > { %v10657_v3 = vadd.f32 %v10656_v58, %v10643_v17  ;;  %v11621_v58 = vadd.f32 %v16796_v18, %v11620_v53 }
 0x693   : > { %v10616_v31 = vpop.f32.mrf.mxu2  ;;  %v10630_v26 = vpop.f32.mrf.mxu3 }
 0x694   : > { %v10617_v6 = vadd.f32 %v10616_v31, %v10603_v5  ;;  %v11587_v5 = vadd.f32 %v16797_v37, %v11586_v15  ;;  %11622 = vadd.xlane.f32.xlu1 %v11621_v58  ;;  %v16798_v31 = vld [vmem:[%s17045_s26 + $0xf8] sm:$0xff] }
 0x696   : > { %v10631_v44 = vadd.f32 %v10630_v26, %v10617_v6  ;;  %v11588_v63 = vadd.f32 %v16798_v31, %v11587_v5 }
 0x698   : > { %v10645_v61 = vadd.f32 %v10644_v2, %v10631_v44  ;;  %11589 = vadd.xlane.f32.xlu2 %v11588_v63 }
 0x69a   : > { %v10659_v56 = vadd.f32 %v10658_v29, %v10645_v61  ;;  %v10772_v61 = vsel %vm4431_vm2, %v21283_v54, 0  ;;  %v10774_v29 = vsel %vm4431_vm2, %v21285_v1, 0  ;;  %v10780_v54 = vsel %vm4431_vm2, %v21306_v4, 0 }
 0x69b   : > { %v10782_v1 = vsel %vm4431_vm2, %v21308_v9, 0  ;;  %v10788_v4 = vsel %vm4431_vm2, %v21329_v50, 0  ;;  %v10790_v9 = vsel %vm4431_vm2, %v21331_v12, 0  ;;  %v10796_v50 = vsel %vm4431_vm2, %v21353_v52, 0 }
 0x69c   : > { %10687 = vmatpush.msra.mxu2 %v10659_v56  ;;  %v10776_v56 = vsel %vm4431_vm2, %v21287_v23, 0  ;;  %v10784_v23 = vsel %vm4431_vm2, %v21316_v32, 0  ;;  %v10792_v32 = vsel %vm4431_vm2, %v21333_v38, 0  ;;  %v10798_v12 = vsel %vm4431_vm2, %v21355_v10, 0 }
 0x69d   : > { %v10800_v38 = vsel %vm4431_vm2, %v21357_v43, 0 }
 0x69e   : > { %10688 = vmatpush.msra.mxu2 %v10657_v3  ;;  %v10778_v3 = vsel %vm4431_vm2, %v21289_v30, 0  ;;  %v10786_v30 = vsel %vm4431_vm2, %v21324_v24, 0  ;;  %v10794_v24 = vsel %vm4431_vm2, %v21339_v47, 0  ;;  %v10802_v47 = vsel %vm4431_vm2, %v21359_v36, 0 }
 0x69f   : > { %15760 = vmatmul.msk.f32.vlgmr.msra.gmra.mxu2 %vm3161_vm0, %v15758_v40  ;;  %v10668_v6 = vpop.permute.xlu1 %10667  ;;  %v10744_v40 = vld.sshfl [vmem:[#allocation1] sm:$0xff pattern:$0x73625140]  ;;  %v10810_v36 = vsel %vm4431_vm2, %v10747_v60, 0 }
 0x6a0   : > { %10853 = vmatpush.bf16.msrb.mxu2 %v10760_v7  ;;  %v10745_v7 = vld.sshfl [vmem:[#allocation1 + $0x8] sm:$0xff pattern:$0x73625140]  ;;  %v10804_v52 = vsel %vm4431_vm2, %v10744_v40, 0 }
 0x6a1   : > { %v10806_v10 = vsel %vm4431_vm2, %v10745_v7, 0 }
 0x6a4   : > { %10905 = vmatpush.bf16.msra.mxu2 %v10768_v25  ;;  %v10746_v25 = vld.sshfl [vmem:[#allocation1 + $0x10] sm:$0xff pattern:$0x73625140] }
 0x6a5   : > { %v10808_v43 = vsel %vm4431_vm2, %v10746_v25, 0 }
 0x707   : > { %v11623_v49 = vpop.xlane.xlu1 %11622 }
 0x708   : > { %v11632_v46 = vmul.f32 %v11630_v33, %v11623_v49 }
 0x70b   : > { %v11590_v62 = vpop.xlane.xlu2 %11589 }
 0x70c   : > { %v11631_v59 = vmul.f32 %v11630_v33, %v11590_v62 }
 0x722   : > { %v10690_v26 = vpop.f32.mrf.mxu2 }
 0x723   : > { %v10691_v44 = vadd.f32 %v10690_v26, %v10668_v6 }
 0x725   : > { %v10693_v2 = vmax.f32 %v10691_v44, 0.0 }
 0x727   : > { %v21392_v17 = vpack.c.bf16 %v10693_v2, %v10693_v2 }
 0x729   : > { %15761 = vmatmul.msk.bf16.vlgmr.msra.gmra.mxu3 %vm10752_vm8, %v21392_v17  ;;  %15762 = vmatmul.msk.bf16.vlgmr.msrb.gmra.mxu1 %vm10752_vm8, %v21392_v17 }
 0x72a   : > { %15763 = vmatmul.msk.bf16.vlgmr.msrb.gmra.mxu2 %vm10752_vm8, %v21392_v17  ;;  %15764 = vmatmul.msk.bf16.vlgmr.msrb.gmra.mxu0 %vm10752_vm8, %v21392_v17 }
 0x72b   : > { %10931 = vmatpush.bf16.msra.mxu3 %v10772_v61  ;;  %10944 = vmatpush.bf16.msrb.mxu1 %v10774_v29 }
 0x72c   : > { %10957 = vmatpush.bf16.msrb.mxu2 %v10776_v56  ;;  %10970 = vmatpush.bf16.msrb.mxu0 %v10778_v3 }
 0x739   : > { %15765 = vmatmul.msk.bf16.vlgmr.msrb.gmra.mxu3 %vm10752_vm8, %v21392_v17  ;;  %15766 = vmatmul.msk.bf16.vlgmr.msra.gmra.mxu1 %vm10752_vm8, %v21392_v17 }
 0x73a   : > { %15767 = vmatmul.msk.bf16.vlgmr.msra.gmra.mxu2 %vm10752_vm8, %v21392_v17  ;;  %15768 = vmatmul.msk.bf16.vlgmr.msra.gmra.mxu0 %vm10752_vm8, %v21392_v17 }
 0x73b   : > { %10983 = vmatpush.bf16.msrb.mxu3 %v10780_v54  ;;  %10996 = vmatpush.bf16.msra.mxu1 %v10782_v1 }
 0x73c   : > { %11009 = vmatpush.bf16.msra.mxu2 %v10784_v23  ;;  %11022 = vmatpush.bf16.msra.mxu0 %v10786_v30 }
 0x749   : > { %15769 = vmatmul.msk.bf16.vlgmr.msra.gmra.mxu3 %vm10752_vm8, %v21392_v17  ;;  %15770 = vmatmul.msk.bf16.vlgmr.msrb.gmra.mxu1 %vm10752_vm8, %v21392_v17 }
 0x74a   : > { %15771 = vmatmul.msk.bf16.vlgmr.msrb.gmra.mxu2 %vm10752_vm8, %v21392_v17  ;;  %15772 = vmatmul.msk.bf16.vlgmr.msrb.gmra.mxu0 %vm10752_vm8, %v21392_v17 }
 0x74b   : > { %11035 = vmatpush.bf16.msra.mxu3 %v10788_v4  ;;  %11048 = vmatpush.bf16.msrb.mxu1 %v10790_v9 }
 0x74c   : > { %11061 = vmatpush.bf16.msrb.mxu2 %v10792_v32  ;;  %11074 = vmatpush.bf16.msrb.mxu0 %v10794_v24 }
 0x759   : > { %15773 = vmatmul.msk.bf16.vlgmr.msrb.gmra.mxu3 %vm10752_vm8, %v21392_v17  ;;  %15774 = vmatmul.msk.bf16.vlgmr.msra.gmra.mxu1 %vm10752_vm8, %v21392_v17 }
 0x75a   : > { %15775 = vmatmul.msk.bf16.vlgmr.msra.gmra.mxu2 %vm10752_vm8, %v21392_v17  ;;  %15776 = vmatmul.msk.bf16.vlgmr.msra.gmra.mxu0 %vm10752_vm8, %v21392_v17 }
 0x75b   : > { %11087 = vmatpush.bf16.msrb.mxu3 %v10796_v50  ;;  %11100 = vmatpush.bf16.msra.mxu1 %v10798_v12 }
 0x75c   : > { %11113 = vmatpush.bf16.msra.mxu2 %v10800_v38  ;;  %11126 = vmatpush.bf16.msra.mxu0 %v10802_v47 }
 0x769   : > { %15777 = vmatmul.msk.bf16.vlgmr.msra.gmra.mxu3 %vm10752_vm8, %v21392_v17  ;;  %15778 = vmatmul.msk.bf16.vlgmr.msrb.gmra.mxu1 %vm10752_vm8, %v21392_v17 }
 0x76a   : > { %15779 = vmatmul.msk.bf16.vlgmr.msrb.gmra.mxu2 %vm10752_vm8, %v21392_v17  ;;  %15780 = vmatmul.msk.bf16.vlgmr.msrb.gmra.mxu0 %vm10752_vm8, %v21392_v17 }
 0x76b   : > { %11139 = vmatpush.bf16.msra.mxu3 %v10804_v52  ;;  %11152 = vmatpush.bf16.msrb.mxu1 %v10806_v10 }
 0x76c   : > { %11165 = vmatpush.bf16.msrb.mxu2 %v10808_v43  ;;  %11178 = vmatpush.bf16.msrb.mxu0 %v10810_v36 }
 0x779   : > { %15781 = vmatmul.msk.bf16.vlgmr.msrb.gmra.mxu3 %vm10752_vm8, %v21392_v17  ;;  %15782 = vmatmul.msk.bf16.vlgmr.msra.gmra.mxu1 %vm10752_vm8, %v21392_v17 }
 0x77a   : > { %15783 = vmatmul.msk.bf16.vlgmr.msra.gmra.mxu2 %vm10752_vm8, %v21392_v17  ;;  %15784 = vmatmul.msk.bf16.vlgmr.msra.gmra.mxu0 %vm10752_vm8, %v21392_v17 }
 0x77b   : > { %11191 = vmatpush.bf16.msrb.mxu3 %v10812_v35  ;;  %11204 = vmatpush.bf16.msra.mxu1 %v10814_v28 }
 0x77c   : > { %11217 = vmatpush.bf16.msra.mxu2 %v10816_v42  ;;  %11230 = vmatpush.bf16.msra.mxu0 %v10818_v13 }
 0x789   : > { %15785 = vmatmul.msk.bf16.vlgmr.msra.gmra.mxu3 %vm10752_vm8, %v21392_v17  ;;  %15786 = vmatmul.msk.bf16.vlgmr.msrb.gmra.mxu1 %vm10752_vm8, %v21392_v17 }
 0x78a   : > { %15787 = vmatmul.msk.bf16.vlgmr.msrb.gmra.mxu2 %vm10752_vm8, %v21392_v17  ;;  %15788 = vmatmul.msk.bf16.vlgmr.msrb.gmra.mxu0 %vm10752_vm8, %v21392_v17 }
 0x78b   : > { %11654 = vmatpush.msra.mxu3 %v11632_v46 }
 0x78d   : > { %11655 = vmatpush.msra.mxu3 %v11631_v59 }
 0x799   : > { %15789 = vmatmul.msk.bf16.vlgmr.msrb.gmra.mxu3 %vm10752_vm8, %v21392_v17  ;;  %15790 = vmatmul.msk.bf16.vlgmr.msra.gmra.mxu1 %vm10752_vm8, %v21392_v17 }
 0x79a   : > { %15791 = vmatmul.msk.bf16.vlgmr.msra.gmra.mxu2 %vm10752_vm8, %v21392_v17  ;;  %15792 = vmatmul.msk.bf16.vlgmr.msra.gmra.mxu0 %vm10752_vm8, %v21392_v17 }
 0x7a6   : > { %v10842_v0 = vpop.f32.mrf.mxu1 }
 0x7a7   : > { %v10868_v57 = vpop.f32.mrf.mxu0  ;;  %v11268_v19 = vrot.slane %v10842_v0, 6 }
 0x7a8   : > { %v11270_v53 = vrot.slane %v10868_v57, 2 }
 0x7a9   : > { %15795 = vmatmul.msk.f32.vlgmr.msra.gmra.mxu3 %vm3161_vm0, %v15793_v8 }
 0x7ac   : > { %v10829_v39 = vpop.f32.mrf.mxu3 }
 0x7ad   : > { %v11316_v14 = vsel %vm4458_vm3, %v10829_v39, %v11268_v19  ;;  %v10855_v21 = vpop.f32.mrf.mxu2  ;;  %v11292_v58 = vsel %vm4431_vm2, %v10829_v39, %v11268_v19 }
 0x7ae   : > { %v11269_v51 = vrot.slane %v10855_v21, 4  ;;  %v10844_v15 = vpop.f32.mrf.mxu1 }
 0x7af   : > { %v10870_v18 = vpop.f32.mrf.mxu0 }
 0x7b0   : > { %v11293_v37 = vsel %vm4433_vm4, %v11269_v51, %v11270_v53  ;;  %v11317_v5 = vsel %vm4460_vm5, %v11270_v53, %v11269_v51 }
 0x7b1   : > { %v11294_v31 = vsel %vm4435_vm6, %v11292_v58, %v11293_v37  ;;  %v21508_v63 = vsel %vm4462_vm7, %v11316_v14, %v11317_v5 }
 0x7b2   : > { %11349 = vst [vmem:[#allocation1 + $0x2] ss:$4 sm:$0xff] %v11294_v31 }
 0x7b4   : > { %v10831_v6 = vpop.f32.mrf.mxu3 }
 0x7b5   : > { %v10857_v26 = vpop.f32.mrf.mxu2 }
 0x7b6   : > { %v10894_v44 = vpop.f32.mrf.mxu1 }
 0x7b7   : > { %v10920_v2 = vpop.f32.mrf.mxu0  ;;  %v11271_v3 = vrot.slane %v10894_v44, 6 }
 0x7b8   : > { %v11273_v30 = vrot.slane %v10920_v2, 2 }
 0x7b9   : > { %v11352_v17 = vld.sshfl [vmem:[#allocation1] sm:$0xff pattern:$0x73625140]  ;;  %v11353_v61 = vld.sshfl [vmem:[#allocation1 + $0x8] sm:$0xff pattern:$0x73625140] }
 0x7ba   : > { %v11354_v29 = vld.sshfl [vmem:[#allocation1 + $0x10] sm:$0xff pattern:$0x73625140]  ;;  %v11355_v56 = vld.sshfl [vmem:[#allocation1 + $0x18] sm:$0xff pattern:$0x73625140] }
 0x7bb   : > { %11494 = vst [vmem:[%s17045_s26 + $0x100] sm:$0x30] %v11352_v17 }
 0x7bc   : > { %11495 = vst [vmem:[%s17045_s26 + $0x108] sm:$0x30] %v11353_v61  ;;  %v10881_v54 = vpop.f32.mrf.mxu3 }
 0x7bd   : > { %11496 = vst [vmem:[%s17045_s26 + $0x110] sm:$0x30] %v11354_v29  ;;  %v11320_v1 = vsel %vm4458_vm3, %v10881_v54, %v11271_v3  ;;  %v10907_v23 = vpop.f32.mrf.mxu2  ;;  %v11295_v24 = vsel %vm4431_vm2, %v10881_v54, %v11271_v3 }
 0x7be   : > { %11497 = vst [vmem:[%s17045_s26 + $0x118] sm:$0x30] %v11355_v56  ;;  %v11272_v4 = vrot.slane %v10907_v23, 4  ;;  %v10896_v9 = vpop.f32.mrf.mxu1 }
 0x7bf   : > { %v10922_v32 = vpop.f32.mrf.mxu0 }
 0x7c0   : > { %v11296_v50 = vsel %vm4433_vm4, %v11272_v4, %v11273_v30  ;;  %v11321_v12 = vsel %vm4460_vm5, %v11273_v30, %v11272_v4 }
 0x7c1   : > { %v11297_v38 = vsel %vm4435_vm6, %v11295_v24, %v11296_v50  ;;  %v21520_v47 = vsel %vm4462_vm7, %v11320_v1, %v11321_v12 }
 0x7c2   : > { %11351 = vst [vmem:[#allocation1 + $0x22] ss:$4 sm:$0xff] %v11297_v38 }
 0x7c4   : > { %v10883_v40 = vpop.f32.mrf.mxu3 }
 0x7c5   : > { %v10909_v7 = vpop.f32.mrf.mxu2 }
 0x7c6   : > { %v10946_v25 = vpop.f32.mrf.mxu1 }
 0x7c7   : > { %v10972_v60 = vpop.f32.mrf.mxu0  ;;  %v11274_v20 = vrot.slane %v10946_v25, 6 }
 0x7c8   : > { %v11276_v35 = vrot.slane %v10972_v60, 2 }
 0x7c9   : > { %v11356_v52 = vld.sshfl [vmem:[#allocation1 + $0x20] sm:$0xff pattern:$0x73625140]  ;;  %v11357_v10 = vld.sshfl [vmem:[#allocation1 + $0x28] sm:$0xff pattern:$0x73625140] }
 0x7ca   : > { %v11358_v43 = vld.sshfl [vmem:[#allocation1 + $0x30] sm:$0xff pattern:$0x73625140]  ;;  %v11359_v36 = vld.sshfl [vmem:[#allocation1 + $0x38] sm:$0xff pattern:$0x73625140] }
 0x7cb   : > { %11498 = vst [vmem:[%s17045_s26 + $0x120] sm:$0x30] %v11356_v52 }
 0x7cc   : > { %11499 = vst [vmem:[%s17045_s26 + $0x128] sm:$0x30] %v11357_v10  ;;  %v10933_v55 = vpop.f32.mrf.mxu3 }
 0x7cd   : > { %11500 = vst [vmem:[%s17045_s26 + $0x130] sm:$0x30] %v11358_v43  ;;  %v11324_v27 = vsel %vm4458_vm3, %v10933_v55, %v11274_v20  ;;  %v10959_v34 = vpop.f32.mrf.mxu2  ;;  %v11298_v16 = vsel %vm4431_vm2, %v10933_v55, %v11274_v20 }
 0x7ce   : > { %11501 = vst [vmem:[%s17045_s26 + $0x138] sm:$0x30] %v11359_v36  ;;  %v11275_v28 = vrot.slane %v10959_v34, 4  ;;  %v10948_v42 = vpop.f32.mrf.mxu1 }
 0x7cf   : > { %v10974_v13 = vpop.f32.mrf.mxu0 }
 0x7d0   : > { %v11299_v41 = vsel %vm4433_vm4, %v11275_v28, %v11276_v35  ;;  %v11325_v45 = vsel %vm4460_vm5, %v11276_v35, %v11275_v28 }
 0x7d1   : > { %v11300_v48 = vsel %vm4435_vm6, %v11298_v16, %v11299_v41  ;;  %v21532_v11 = vsel %vm4462_vm7, %v11324_v27, %v11325_v45 }
 0x7d2   : > { %11360 = vst [vmem:[#allocation1 + $0x2] ss:$4 sm:$0xff] %v11300_v48 }
 0x7d4   : > { %v10935_v22 = vpop.f32.mrf.mxu3 }
 0x7d5   : > { %v10961_v33 = vpop.f32.mrf.mxu2 }
 0x7d6   : > { %v10998_v49 = vpop.f32.mrf.mxu1 }
 0x7d7   : > { %v11024_v46 = vpop.f32.mrf.mxu0  ;;  %v11277_v57 = vrot.slane %v10998_v49, 6 }
 0x7d8   : > { %v11279_v21 = vrot.slane %v11024_v46, 2 }
 0x7d9   : > { %v11362_v62 = vld.sshfl [vmem:[#allocation1] sm:$0xff pattern:$0x73625140]  ;;  %v11363_v59 = vld.sshfl [vmem:[#allocation1 + $0x8] sm:$0xff pattern:$0x73625140] }
 0x7da   : > { %v11364_v0 = vld.sshfl [vmem:[#allocation1 + $0x10] sm:$0xff pattern:$0x73625140]  ;;  %v11365_v8 = vld.sshfl [vmem:[#allocation1 + $0x18] sm:$0xff pattern:$0x73625140] }
 0x7db   : > { %11502 = vst [vmem:[%s17045_s26 + $0x140] sm:$0x30] %v11362_v62 }
 0x7dc   : > { %11503 = vst [vmem:[%s17045_s26 + $0x148] sm:$0x30] %v11363_v59  ;;  %v10985_v19 = vpop.f32.mrf.mxu3 }
 0x7dd   : > { %11504 = vst [vmem:[%s17045_s26 + $0x150] sm:$0x30] %v11364_v0  ;;  %v11328_v39 = vsel %vm4458_vm3, %v10985_v19, %v11277_v57  ;;  %v11011_v14 = vpop.f32.mrf.mxu2  ;;  %v11301_v18 = vsel %vm4431_vm2, %v10985_v19, %v11277_v57 }
 0x7de   : > { %11505 = vst [vmem:[%s17045_s26 + $0x158] sm:$0x30] %v11365_v8  ;;  %v11278_v53 = vrot.slane %v11011_v14, 4  ;;  %v11000_v51 = vpop.f32.mrf.mxu1 }
 0x7df   : > { %v11026_v15 = vpop.f32.mrf.mxu0 }
 0x7e0   : > { %v11302_v58 = vsel %vm4433_vm4, %v11278_v53, %v11279_v21  ;;  %v11329_v37 = vsel %vm4460_vm5, %v11279_v21, %v11278_v53 }
 0x7e1   : > { %v11303_v5 = vsel %vm4435_vm6, %v11301_v18, %v11302_v58  ;;  %v21544_v31 = vsel %vm4462_vm7, %v11328_v39, %v11329_v37 }
 0x7e2   : > { %11361 = vst [vmem:[#allocation1 + $0x22] ss:$4 sm:$0xff] %v11303_v5  ;;  %v11319_v5 = vrot.slane %v21508_v63, 2 }
 0x7e4   : > { %v10987_v6 = vpop.f32.mrf.mxu3 }
 0x7e5   : > { %v11013_v26 = vpop.f32.mrf.mxu2 }
 0x7e6   : > { %v21546_v44 = vpop.f32.mrf.mxu1 }
 0x7e7   : > { %v21548_v2 = vpop.f32.mrf.mxu0  ;;  %v11280_v1 = vrot.slane %v21546_v44, 6 }
 0x7e8   : > { %v11282_v23 = vrot.slane %v21548_v2, 2 }
 0x7e9   : > { %v11366_v17 = vld.sshfl [vmem:[#allocation1 + $0x20] sm:$0xff pattern:$0x73625140]  ;;  %v11367_v61 = vld.sshfl [vmem:[#allocation1 + $0x28] sm:$0xff pattern:$0x73625140] }
 0x7ea   : > { %v11368_v29 = vld.sshfl [vmem:[#allocation1 + $0x30] sm:$0xff pattern:$0x73625140]  ;;  %v11369_v56 = vld.sshfl [vmem:[#allocation1 + $0x38] sm:$0xff pattern:$0x73625140] }
 0x7eb   : > { %11506 = vst [vmem:[%s17045_s26 + $0x160] sm:$0x30] %v11366_v17 }
 0x7ec   : > { %11507 = vst [vmem:[%s17045_s26 + $0x168] sm:$0x30] %v11367_v61  ;;  %v21552_v3 = vpop.f32.mrf.mxu3 }
 0x7ed   : > { %11508 = vst [vmem:[%s17045_s26 + $0x170] sm:$0x30] %v11368_v29  ;;  %v21555_v54 = vpop.f32.mrf.mxu2  ;;  %v11304_v32 = vsel %vm4431_vm2, %v21552_v3, %v11280_v1 }
 0x7ee   : > { %11509 = vst [vmem:[%s17045_s26 + $0x178] sm:$0x30] %v11369_v56  ;;  %v11281_v30 = vrot.slane %v21555_v54, 4  ;;  %v11052_v4 = vpop.f32.mrf.mxu1 }
 0x7ef   : > { %v11078_v9 = vpop.f32.mrf.mxu0 }
 0x7f0   : > { %v11305_v24 = vsel %vm4433_vm4, %v11281_v30, %v11282_v23 }
 0x7f1   : > { %v11306_v50 = vsel %vm4435_vm6, %v11304_v32, %v11305_v24  ;;  %v11327_v32 = vrot.slane %v21532_v11, 2  ;;  %v11333_v11 = vsel %vm4460_vm5, %v11282_v23, %v11281_v30 }
 0x7f2   : > { %11370 = vst [vmem:[#allocation1 + $0x2] ss:$4 sm:$0xff] %v11306_v50 }
 0x7f4   : > { %v11039_v12 = vpop.f32.mrf.mxu3 }
 0x7f5   : > { %v11065_v38 = vpop.f32.mrf.mxu2 }
 0x7f6   : > { %v11102_v40 = vpop.f32.mrf.mxu1 }
 0x7f7   : > { %v11128_v7 = vpop.f32.mrf.mxu0  ;;  %v11283_v43 = vrot.slane %v11102_v40, 6 }
 0x7f8   : > { %v11285_v27 = vrot.slane %v11128_v7, 2 }
 0x7f9   : > { %v11372_v25 = vld.sshfl [vmem:[#allocation1] sm:$0xff pattern:$0x73625140]  ;;  %v11373_v60 = vld.sshfl [vmem:[#allocation1 + $0x8] sm:$0xff pattern:$0x73625140] }
 0x7fa   : > { %v11374_v52 = vld.sshfl [vmem:[#allocation1 + $0x10] sm:$0xff pattern:$0x73625140]  ;;  %v11375_v10 = vld.sshfl [vmem:[#allocation1 + $0x18] sm:$0xff pattern:$0x73625140] }
 0x7fb   : > { %11510 = vst [vmem:[%s17045_s26 + $0x180] sm:$0x30] %v11372_v25 }
 0x7fc   : > { %11511 = vst [vmem:[%s17045_s26 + $0x188] sm:$0x30] %v11373_v60  ;;  %v11089_v36 = vpop.f32.mrf.mxu3 }
 0x7fd   : > { %11512 = vst [vmem:[%s17045_s26 + $0x190] sm:$0x30] %v11374_v52  ;;  %v11336_v20 = vsel %vm4458_vm3, %v11089_v36, %v11283_v43  ;;  %v11115_v55 = vpop.f32.mrf.mxu2  ;;  %v11307_v42 = vsel %vm4431_vm2, %v11089_v36, %v11283_v43 }
 0x7fe   : > { %11513 = vst [vmem:[%s17045_s26 + $0x198] sm:$0x30] %v11375_v10  ;;  %v11284_v34 = vrot.slane %v11115_v55, 4  ;;  %v11104_v35 = vpop.f32.mrf.mxu1 }
 0x7ff   : > { %v11130_v28 = vpop.f32.mrf.mxu0 }
 0x800   : > { %v11308_v13 = vsel %vm4433_vm4, %v11284_v34, %v11285_v27  ;;  %v11337_v16 = vsel %vm4460_vm5, %v11285_v27, %v11284_v34 }
 0x801   : > { %v11309_v41 = vsel %vm4435_vm6, %v11307_v42, %v11308_v13  ;;  %v21581_v45 = vsel %vm4462_vm7, %v11336_v20, %v11337_v16  ;;  %v11332_v20 = vsel %vm4458_vm3, %v21552_v3, %v11280_v1  ;;  %v15794_v1 = vld [vmem:[%s21801_s8 + $0xc] sm:$0xf]  ;;  %v11323_v16 = vrot.slane %v21520_v47, 2 }
 0x802   : > { %11371 = vst [vmem:[#allocation1 + $0x22] ss:$4 sm:$0xff] %v11309_v41  ;;  %v11334_v54 = vsel %vm4462_vm7, %v11332_v20, %v11333_v11 }
 0x803   : > { %v11335_v23 = vrot.slane %v11334_v54, 2 }
 0x804   : > { %v11091_v48 = vpop.f32.mrf.mxu3 }
 0x805   : > { %v11117_v22 = vpop.f32.mrf.mxu2 }
 0x806   : > { %v21583_v33 = vpop.f32.mrf.mxu1 }
 0x807   : > { %v21585_v49 = vpop.f32.mrf.mxu0  ;;  %v11286_v19 = vrot.slane %v21583_v33, 6 }
 0x808   : > { %v11288_v39 = vrot.slane %v21585_v49, 2 }
 0x809   : > { %v11376_v46 = vld.sshfl [vmem:[#allocation1 + $0x20] sm:$0xff pattern:$0x73625140]  ;;  %v11377_v62 = vld.sshfl [vmem:[#allocation1 + $0x28] sm:$0xff pattern:$0x73625140] }
 0x80a   : > { %v11378_v59 = vld.sshfl [vmem:[#allocation1 + $0x30] sm:$0xff pattern:$0x73625140]  ;;  %v11379_v0 = vld.sshfl [vmem:[#allocation1 + $0x38] sm:$0xff pattern:$0x73625140] }
 0x80b   : > { %11514 = vst [vmem:[%s17045_s26 + $0x1a0] sm:$0x30] %v11376_v46 }
 0x80c   : > { %11515 = vst [vmem:[%s17045_s26 + $0x1a8] sm:$0x30] %v11377_v62  ;;  %v11141_v8 = vpop.f32.mrf.mxu3 }
 0x80d   : > { %11516 = vst [vmem:[%s17045_s26 + $0x1b0] sm:$0x30] %v11378_v59  ;;  %v11167_v57 = vpop.f32.mrf.mxu2  ;;  %v11310_v51 = vsel %vm4431_vm2, %v11141_v8, %v11286_v19  ;;  %v11340_v3 = vsel %vm4458_vm3, %v11141_v8, %v11286_v19  ;;  %v11331_v8 = vrot.slane %v21544_v31, 2 }
 0x80e   : > { %11517 = vst [vmem:[%s17045_s26 + $0x1b8] sm:$0x30] %v11379_v0  ;;  %v11287_v14 = vrot.slane %v11167_v57, 4  ;;  %v11156_v21 = vpop.f32.mrf.mxu1 }
 0x80f   : > { %v11182_v53 = vpop.f32.mrf.mxu0  ;;  %v11339_v21 = vrot.slane %v21581_v45, 2 }
 0x810   : > { %v11311_v15 = vsel %vm4433_vm4, %v11287_v14, %v11288_v39  ;;  %v11341_v44 = vsel %vm4460_vm5, %v11288_v39, %v11287_v14 }
 0x811   : > { %v11312_v18 = vsel %vm4435_vm6, %v11310_v51, %v11311_v15  ;;  %v11342_v28 = vsel %vm4462_vm7, %v11340_v3, %v11341_v44 }
 0x812   : > { %11380 = vst [vmem:[#allocation1 + $0x2] ss:$4 sm:$0xff] %v11312_v18  ;;  %v11343_v33 = vrot.slane %v11342_v28, 2 }
 0x814   : > { %v11143_v58 = vpop.f32.mrf.mxu3 }
 0x815   : > { %v11169_v37 = vpop.f32.mrf.mxu2 }
 0x816   : > { %v21597_v17 = vpop.f32.mrf.mxu1 }
 0x817   : > { %v21599_v61 = vpop.f32.mrf.mxu0  ;;  %v11289_v24 = vrot.slane %v21597_v17, 6 }
 0x818   : > { %v11291_v50 = vrot.slane %v21599_v61, 2 }
 0x819   : > { %v11382_v6 = vld.sshfl [vmem:[#allocation1] sm:$0xff pattern:$0x73625140]  ;;  %v11383_v26 = vld.sshfl [vmem:[#allocation1 + $0x8] sm:$0xff pattern:$0x73625140] }
 0x81a   : > { %v11384_v29 = vld.sshfl [vmem:[#allocation1 + $0x10] sm:$0xff pattern:$0x73625140]  ;;  %v11385_v56 = vld.sshfl [vmem:[#allocation1 + $0x18] sm:$0xff pattern:$0x73625140] }
 0x81b   : > { %11390 = vst [vmem:[#allocation1 + $0x2] ss:$4 sm:$0xff] %v11319_v5 }
 0x81c   : > { %11518 = vst [vmem:[%s17045_s26 + $0x1c0] sm:$0x30] %v11382_v6  ;;  %v21602_v4 = vpop.f32.mrf.mxu3 }
 0x81d   : > { %11519 = vst [vmem:[%s17045_s26 + $0x1c8] sm:$0x30] %v11383_v26  ;;  %v21605_v9 = vpop.f32.mrf.mxu2  ;;  %v11313_v43 = vsel %vm4431_vm2, %v21602_v4, %v11289_v24  ;;  %v11344_v45 = vsel %vm4458_vm3, %v21602_v4, %v11289_v24 }
 0x81e   : > { %11520 = vst [vmem:[%s17045_s26 + $0x1d0] sm:$0x30] %v11384_v29  ;;  %v11290_v63 = vrot.slane %v21605_v9, 4  ;;  %v11208_v12 = vpop.f32.mrf.mxu1 }
 0x81f   : > { %11521 = vst [vmem:[%s17045_s26 + $0x1d8] sm:$0x30] %v11385_v56  ;;  %v11234_v38 = vpop.f32.mrf.mxu0 }
 0x820   : > { %v11314_v52 = vsel %vm4433_vm4, %v11290_v63, %v11291_v50  ;;  %v11345_v18 = vsel %vm4460_vm5, %v11291_v50, %v11290_v63  ;;  %v16865_v50 = vmov 269488144  }
 0x821   : > { %v11315_v2 = vsel %vm4435_vm6, %v11313_v43, %v11314_v52  ;;  %v11346_v58 = vsel %vm4462_vm7, %v11344_v45, %v11345_v18  ;;  %v21688_v12 = vunpack.c.l.s4 %v16865_v50 }
 0x822   : > { %v11392_v40 = vld.sshfl [vmem:[#allocation1] sm:$0xff pattern:$0x73625140]  ;;  %v11393_v7 = vld.sshfl [vmem:[#allocation1 + $0x8] sm:$0xff pattern:$0x73625140] }
 0x823   : > { %v11394_v25 = vld.sshfl [vmem:[#allocation1 + $0x10] sm:$0xff pattern:$0x73625140]  ;;  %v11395_v60 = vld.sshfl [vmem:[#allocation1 + $0x18] sm:$0xff pattern:$0x73625140]  ;;  %v11669_v38 = vunpack.c.0.s8 %v21688_v12 }
 0x824   : > { %11400 = vst [vmem:[#allocation1 + $0x2] ss:$4 sm:$0xff] %v11327_v32  ;;  %v11195_v10 = vpop.f32.mrf.mxu3  ;;  %v11347_v5 = vrot.slane %v11346_v58, 2 }
 0x825   : > { %11526 = vst [vmem:[%s17045_s26 + $0x300] sm:$0x30] %v11392_v40  ;;  %v11221_v36 = vpop.f32.mrf.mxu2 }
 0x826   : > { %11527 = vst [vmem:[%s17045_s26 + $0x308] sm:$0x30] %v11393_v7 }
 0x827   : > { %11528 = vst [vmem:[%s17045_s26 + $0x310] sm:$0x30] %v11394_v25 }
 0x828   : > { %11529 = vst [vmem:[%s17045_s26 + $0x318] sm:$0x30] %v11395_v60 }
 0x829   : > { %11381 = vst [vmem:[#allocation1 + $0x22] ss:$4 sm:$0xff] %v11315_v2 }
 0x82b   : > { %v11402_v30 = vld.sshfl [vmem:[#allocation1] sm:$0xff pattern:$0x73625140]  ;;  %v11403_v55 = vld.sshfl [vmem:[#allocation1 + $0x8] sm:$0xff pattern:$0x73625140] }
 0x82c   : > { %v11404_v27 = vld.sshfl [vmem:[#allocation1 + $0x10] sm:$0xff pattern:$0x73625140]  ;;  %v11405_v34 = vld.sshfl [vmem:[#allocation1 + $0x18] sm:$0xff pattern:$0x73625140]  ;;  %v11657_v35 = vpop.f32.mrf.mxu3 }
 0x82d   : > { %11410 = vst [vmem:[#allocation1 + $0x2] ss:$4 sm:$0xff] %v11335_v23  ;;  %v11658_v13 = vadd.f32 %v15794_v1, %v11657_v35 }
 0x82e   : > { %11534 = vst [vmem:[%s17045_s26 + $0x340] sm:$0x30] %v11402_v30 }
 0x82f   : > { %11535 = vst [vmem:[%s17045_s26 + $0x348] sm:$0x30] %v11403_v55  ;;  %v11660_v49 = vmax.f32 %v11658_v13, 0.0 }
 0x830   : > { %11536 = vst [vmem:[%s17045_s26 + $0x350] sm:$0x30] %v11404_v27  ;;  %v11386_v42 = vld.sshfl [vmem:[#allocation1 + $0x20] sm:$0xff pattern:$0x73625140] }
 0x831   : > { %11537 = vst [vmem:[%s17045_s26 + $0x358] sm:$0x30] %v11405_v34  ;;  %v11387_v41 = vld.sshfl [vmem:[#allocation1 + $0x28] sm:$0xff pattern:$0x73625140]  ;;  %11664 = vperm.xlu2 %16779, %v11660_v49   ;;  %v11662_v47 = vrot.slane %v11660_v49, 2 }
 0x832   : > { %v11388_v48 = vld.sshfl [vmem:[#allocation1 + $0x30] sm:$0xff pattern:$0x73625140]  ;;  %v11389_v22 = vld.sshfl [vmem:[#allocation1 + $0x38] sm:$0xff pattern:$0x73625140] }
 0x833   : > { %11391 = vst [vmem:[#allocation1 + $0x22] ss:$4 sm:$0xff] %v11323_v16  ;;  %11672 = vperm.xlu0 %16777, %v11662_v47  }
 0x834   : > { %v11412_v46 = vld.sshfl [vmem:[#allocation1] sm:$0xff pattern:$0x73625140]  ;;  %v11413_v62 = vld.sshfl [vmem:[#allocation1 + $0x8] sm:$0xff pattern:$0x73625140] }
 0x835   : > { %v11414_v59 = vld.sshfl [vmem:[#allocation1 + $0x10] sm:$0xff pattern:$0x73625140]  ;;  %v11415_v0 = vld.sshfl [vmem:[#allocation1 + $0x18] sm:$0xff pattern:$0x73625140] }
 0x836   : > { %11420 = vst [vmem:[#allocation1 + $0x2] ss:$4 sm:$0xff] %v11343_v33 }
 0x837   : > { %11542 = vst [vmem:[%s17045_s26 + $0x380] sm:$0x30] %v11412_v46 }
 0x838   : > { %11543 = vst [vmem:[%s17045_s26 + $0x388] sm:$0x30] %v11413_v62 }
 0x839   : > { %11544 = vst [vmem:[%s17045_s26 + $0x390] sm:$0x30] %v11414_v59 }
 0x83a   : > { %11545 = vst [vmem:[%s17045_s26 + $0x398] sm:$0x30] %v11415_v0  ;;  %v11396_v57 = vld.sshfl [vmem:[#allocation1 + $0x20] sm:$0xff pattern:$0x73625140] }
 0x83b   : > { %v11397_v19 = vld.sshfl [vmem:[#allocation1 + $0x28] sm:$0xff pattern:$0x73625140]  ;;  %v11398_v39 = vld.sshfl [vmem:[#allocation1 + $0x30] sm:$0xff pattern:$0x73625140] }
 0x83c   : > { %v11399_v14 = vld.sshfl [vmem:[#allocation1 + $0x38] sm:$0xff pattern:$0x73625140]  ;;  %11522 = vst [vmem:[%s17045_s26 + $0x1e0] sm:$0x30] %v11386_v42 }
 0x83d   : > { %11401 = vst [vmem:[#allocation1 + $0x22] ss:$4 sm:$0xff] %v11331_v8  ;;  %v11422_v37 = vld.sshfl [vmem:[#allocation1] sm:$0xff pattern:$0x73625140] }
 0x83e   : > { %11523 = vst [vmem:[%s17045_s26 + $0x1e8] sm:$0x30] %v11387_v41  ;;  %v11423_v29 = vld.sshfl [vmem:[#allocation1 + $0x8] sm:$0xff pattern:$0x73625140] }
 0x83f   : > { %11524 = vst [vmem:[%s17045_s26 + $0x1f0] sm:$0x30] %v11388_v48  ;;  %v11424_v56 = vld.sshfl [vmem:[#allocation1 + $0x10] sm:$0xff pattern:$0x73625140] }
 0x840   : > { %11525 = vst [vmem:[%s17045_s26 + $0x1f8] sm:$0x30] %v11389_v22  ;;  %v11425_v4 = vld.sshfl [vmem:[#allocation1 + $0x18] sm:$0xff pattern:$0x73625140] }
 0x841   : > { %11530 = vst [vmem:[%s17045_s26 + $0x320] sm:$0x30] %v11396_v57 }
 0x842   : > { %11531 = vst [vmem:[%s17045_s26 + $0x328] sm:$0x30] %v11397_v19 }
 0x843   : > { %11532 = vst [vmem:[%s17045_s26 + $0x330] sm:$0x30] %v11398_v39 }
 0x844   : > { %v11406_v31 = vld.sshfl [vmem:[#allocation1 + $0x20] sm:$0xff pattern:$0x73625140]  ;;  %v11407_v53 = vld.sshfl [vmem:[#allocation1 + $0x28] sm:$0xff pattern:$0x73625140] }
 0x845   : > { %v11408_v51 = vld.sshfl [vmem:[#allocation1 + $0x30] sm:$0xff pattern:$0x73625140]  ;;  %v11409_v15 = vld.sshfl [vmem:[#allocation1 + $0x38] sm:$0xff pattern:$0x73625140] }
 0x846   : > { %11411 = vst [vmem:[#allocation1 + $0x22] ss:$4 sm:$0xff] %v11339_v21 }
 0x847   : > { %11533 = vst [vmem:[%s17045_s26 + $0x338] sm:$0x30] %v11399_v14 }
 0x848   : > { %11538 = vst [vmem:[%s17045_s26 + $0x360] sm:$0x30] %v11406_v31 }
 0x849   : > { %11539 = vst [vmem:[%s17045_s26 + $0x368] sm:$0x30] %v11407_v53 }
 0x84a   : > { %11540 = vst [vmem:[%s17045_s26 + $0x370] sm:$0x30] %v11408_v51 }
 0x84b   : > { %11541 = vst [vmem:[%s17045_s26 + $0x378] sm:$0x30] %v11409_v15 }
 0x84c   : > { %11550 = vst [vmem:[%s17045_s26 + $0x3c0] sm:$0x30] %v11422_v37 }
 0x84d   : > { %v11416_v6 = vld.sshfl [vmem:[#allocation1 + $0x20] sm:$0xff pattern:$0x73625140]  ;;  %v11417_v26 = vld.sshfl [vmem:[#allocation1 + $0x28] sm:$0xff pattern:$0x73625140] }
 0x84e   : > { %v11418_v17 = vld.sshfl [vmem:[#allocation1 + $0x30] sm:$0xff pattern:$0x73625140]  ;;  %v11419_v61 = vld.sshfl [vmem:[#allocation1 + $0x38] sm:$0xff pattern:$0x73625140] }
 0x84f   : > { %11421 = vst [vmem:[#allocation1 + $0x22] ss:$4 sm:$0xff] %v11347_v5 }
 0x850   : > { %11546 = vst [vmem:[%s17045_s26 + $0x3a0] sm:$0x30] %v11416_v6 }
 0x851   : > { %11547 = vst [vmem:[%s17045_s26 + $0x3a8] sm:$0x30] %v11417_v26 }
 0x852   : > { %11548 = vst [vmem:[%s17045_s26 + $0x3b0] sm:$0x30] %v11418_v17 }
 0x853   : > { %11549 = vst [vmem:[%s17045_s26 + $0x3b8] sm:$0x30] %v11419_v61 }
 0x854   : > { %11551 = vst [vmem:[%s17045_s26 + $0x3c8] sm:$0x30] %v11423_v29 }
 0x855   : > { %11552 = vst [vmem:[%s17045_s26 + $0x3d0] sm:$0x30] %v11424_v56 }
 0x856   : > { %v11426_v9 = vld.sshfl [vmem:[#allocation1 + $0x20] sm:$0xff pattern:$0x73625140]  ;;  %v11427_v63 = vld.sshfl [vmem:[#allocation1 + $0x28] sm:$0xff pattern:$0x73625140] }
 0x857   : > { %v11428_v32 = vld.sshfl [vmem:[#allocation1 + $0x30] sm:$0xff pattern:$0x73625140]  ;;  %11553 = vst [vmem:[%s17045_s26 + $0x3d8] sm:$0x30] %v11425_v4 }
 0x858   : > { %v11429_v24 = vld.sshfl [vmem:[#allocation1 + $0x38] sm:$0xff pattern:$0x73625140]  ;;  %11554 = vst [vmem:[%s17045_s26 + $0x3e0] sm:$0x30] %v11426_v9 }
 0x859   : > { %11555 = vst [vmem:[%s17045_s26 + $0x3e8] sm:$0x30] %v11427_v63 }
 0x85a   : > { %11556 = vst [vmem:[%s17045_s26 + $0x3f0] sm:$0x30] %v11428_v32 }
 0x85b   : > { %11557 = vst [vmem:[%s17045_s26 + $0x3f8] sm:$0x30] %v11429_v24 }
 0x88b   : > { %v11665_v40 = vpop.permute.xlu2 %11664 }
 0x88c   : > { %v11670_v7 = vperm.slane %v11665_v40, %v11669_v38 }
 0x88e   : > { %11682 = vst [vmem:[#allocation1 + $0x3] ss:$4 sm:$0xff] %v11670_v7 }
 0x88f   : > { %11684 = vst [vmem:[#allocation1 + $0x23] ss:$4 sm:$0xff] %v11670_v7 }
 0x895   : > { %v11685_v25 = vld.sshfl [vmem:[#allocation1] sm:$0xff pattern:$0x73625140]  ;;  %v11686_v60 = vld.sshfl [vmem:[#allocation1 + $0x8] sm:$0xff pattern:$0x73625140] }
 0x896   : > { %v11687_v52 = vld.sshfl [vmem:[#allocation1 + $0x10] sm:$0xff pattern:$0x73625140]  ;;  %v11688_v11 = vld.sshfl [vmem:[#allocation1 + $0x18] sm:$0xff pattern:$0x73625140] }
 0x897   : > { %v11689_v10 = vld.sshfl [vmem:[#allocation1 + $0x20] sm:$0xff pattern:$0x73625140]  ;;  %v11690_v43 = vld.sshfl [vmem:[#allocation1 + $0x28] sm:$0xff pattern:$0x73625140] }
 0x898   : > { %v11691_v36 = vld.sshfl [vmem:[#allocation1 + $0x30] sm:$0xff pattern:$0x73625140]  ;;  %v11692_v20 = vld.sshfl [vmem:[#allocation1 + $0x38] sm:$0xff pattern:$0x73625140] }
 0x899   : > { %11693 = vst [vmem:[#allocation1 + $0x3] ss:$4 sm:$0xff] %v11670_v7 }
 0x89a   : > { %11694 = vst [vmem:[#allocation1 + $0x23] ss:$4 sm:$0xff] %v11670_v7 }
 0x89b   : > { %11827 = vst [vmem:[%s17045_s26 + $0x100] sm:$0xc0] %v11685_v25 }
 0x89c   : > { %11828 = vst [vmem:[%s17045_s26 + $0x108] sm:$0xc0] %v11686_v60 }
 0x89d   : > { %11829 = vst [vmem:[%s17045_s26 + $0x110] sm:$0xc0] %v11687_v52 }
 0x89e   : > { %11830 = vst [vmem:[%s17045_s26 + $0x118] sm:$0xc0] %v11688_v11 }
 0x89f   : > { %11831 = vst [vmem:[%s17045_s26 + $0x120] sm:$0xc0] %v11689_v10 }
 0x8a0   : > { %v11695_v2 = vld.sshfl [vmem:[#allocation1] sm:$0xff pattern:$0x73625140]  ;;  %v11696_v54 = vld.sshfl [vmem:[#allocation1 + $0x8] sm:$0xff pattern:$0x73625140] }
 0x8a1   : > { %v11697_v23 = vld.sshfl [vmem:[#allocation1 + $0x10] sm:$0xff pattern:$0x73625140]  ;;  %v11698_v30 = vld.sshfl [vmem:[#allocation1 + $0x18] sm:$0xff pattern:$0x73625140] }
 0x8a2   : > { %v11699_v55 = vld.sshfl [vmem:[#allocation1 + $0x20] sm:$0xff pattern:$0x73625140]  ;;  %v11700_v27 = vld.sshfl [vmem:[#allocation1 + $0x28] sm:$0xff pattern:$0x73625140] }
 0x8a3   : > { %v11701_v34 = vld.sshfl [vmem:[#allocation1 + $0x30] sm:$0xff pattern:$0x73625140]  ;;  %v11702_v44 = vld.sshfl [vmem:[#allocation1 + $0x38] sm:$0xff pattern:$0x73625140] }
 0x8a4   : > { %11703 = vst [vmem:[#allocation1 + $0x3] ss:$4 sm:$0xff] %v11670_v7 }
 0x8a5   : > { %11704 = vst [vmem:[#allocation1 + $0x23] ss:$4 sm:$0xff] %v11670_v7  ;;  %v11673_v0 = vpop.permute.xlu0 %11672 }
 0x8a6   : > { %11832 = vst [vmem:[%s17045_s26 + $0x128] sm:$0xc0] %v11690_v43  ;;  %v11678_v8 = vperm.slane %v11673_v0, %v11669_v38 }
 0x8a7   : > { %11833 = vst [vmem:[%s17045_s26 + $0x130] sm:$0xc0] %v11691_v36 }
 0x8a8   : > { %11834 = vst [vmem:[%s17045_s26 + $0x138] sm:$0xc0] %v11692_v20 }
 0x8a9   : > { %11835 = vst [vmem:[%s17045_s26 + $0x140] sm:$0xc0] %v11695_v2 }
 0x8aa   : > { %11836 = vst [vmem:[%s17045_s26 + $0x148] sm:$0xc0] %v11696_v54 }
 0x8ab   : > { %v11705_v3 = vld.sshfl [vmem:[#allocation1] sm:$0xff pattern:$0x73625140]  ;;  %v11706_v1 = vld.sshfl [vmem:[#allocation1 + $0x8] sm:$0xff pattern:$0x73625140] }
 0x8ac   : > { %v11707_v35 = vld.sshfl [vmem:[#allocation1 + $0x10] sm:$0xff pattern:$0x73625140]  ;;  %v11708_v28 = vld.sshfl [vmem:[#allocation1 + $0x18] sm:$0xff pattern:$0x73625140] }
 0x8ad   : > { %v11709_v42 = vld.sshfl [vmem:[#allocation1 + $0x20] sm:$0xff pattern:$0x73625140]  ;;  %v11710_v13 = vld.sshfl [vmem:[#allocation1 + $0x28] sm:$0xff pattern:$0x73625140] }
 0x8ae   : > { %v11711_v16 = vld.sshfl [vmem:[#allocation1 + $0x30] sm:$0xff pattern:$0x73625140]  ;;  %v11712_v41 = vld.sshfl [vmem:[#allocation1 + $0x38] sm:$0xff pattern:$0x73625140] }
 0x8af   : > { %11713 = vst [vmem:[#allocation1 + $0x3] ss:$4 sm:$0xff] %v11670_v7 }
 0x8b0   : > { %11714 = vst [vmem:[#allocation1 + $0x23] ss:$4 sm:$0xff] %v11670_v7 }
 0x8b1   : > { %11837 = vst [vmem:[%s17045_s26 + $0x150] sm:$0xc0] %v11697_v23 }
 0x8b2   : > { %11838 = vst [vmem:[%s17045_s26 + $0x158] sm:$0xc0] %v11698_v30 }
 0x8b3   : > { %11839 = vst [vmem:[%s17045_s26 + $0x160] sm:$0xc0] %v11699_v55 }
 0x8b4   : > { %11840 = vst [vmem:[%s17045_s26 + $0x168] sm:$0xc0] %v11700_v27 }
 0x8b5   : > { %11841 = vst [vmem:[%s17045_s26 + $0x170] sm:$0xc0] %v11701_v34 }
 0x8b6   : > { %11842 = vst [vmem:[%s17045_s26 + $0x178] sm:$0xc0] %v11702_v44  ;;  %v11715_v48 = vld.sshfl [vmem:[#allocation1] sm:$0xff pattern:$0x73625140] }
 0x8b7   : > { %11843 = vst [vmem:[%s17045_s26 + $0x180] sm:$0xc0] %v11705_v3  ;;  %v11716_v22 = vld.sshfl [vmem:[#allocation1 + $0x8] sm:$0xff pattern:$0x73625140] }
 0x8b8   : > { %11844 = vst [vmem:[%s17045_s26 + $0x188] sm:$0xc0] %v11706_v1  ;;  %v11717_v33 = vld.sshfl [vmem:[#allocation1 + $0x10] sm:$0xff pattern:$0x73625140] }
 0x8b9   : > { %11845 = vst [vmem:[%s17045_s26 + $0x190] sm:$0xc0] %v11707_v35  ;;  %v11718_v49 = vld.sshfl [vmem:[#allocation1 + $0x18] sm:$0xff pattern:$0x73625140] }
 0x8ba   : > { %11846 = vst [vmem:[%s17045_s26 + $0x198] sm:$0xc0] %v11708_v28  ;;  %v11719_v46 = vld.sshfl [vmem:[#allocation1 + $0x20] sm:$0xff pattern:$0x73625140] }
 0x8bb   : > { %11847 = vst [vmem:[%s17045_s26 + $0x1a0] sm:$0xc0] %v11709_v42  ;;  %v11720_v62 = vld.sshfl [vmem:[#allocation1 + $0x28] sm:$0xff pattern:$0x73625140] }
 0x8bc   : > { %11848 = vst [vmem:[%s17045_s26 + $0x1a8] sm:$0xc0] %v11710_v13  ;;  %v11721_v59 = vld.sshfl [vmem:[#allocation1 + $0x30] sm:$0xff pattern:$0x73625140] }
 0x8bd   : > { %11849 = vst [vmem:[%s17045_s26 + $0x1b0] sm:$0xc0] %v11711_v16  ;;  %v11722_v47 = vld.sshfl [vmem:[#allocation1 + $0x38] sm:$0xff pattern:$0x73625140] }
 0x8be   : > { %11850 = vst [vmem:[%s17045_s26 + $0x1b8] sm:$0xc0] %v11712_v41 }
 0x8bf   : > { %11851 = vst [vmem:[%s17045_s26 + $0x1c0] sm:$0xc0] %v11715_v48 }
 0x8c0   : > { %11852 = vst [vmem:[%s17045_s26 + $0x1c8] sm:$0xc0] %v11716_v22 }
 0x8c1   : > { %11853 = vst [vmem:[%s17045_s26 + $0x1d0] sm:$0xc0] %v11717_v33 }
 0x8c2   : > { %11854 = vst [vmem:[%s17045_s26 + $0x1d8] sm:$0xc0] %v11718_v49 }
 0x8c3   : > { %11855 = vst [vmem:[%s17045_s26 + $0x1e0] sm:$0xc0] %v11719_v46 }
 0x8c4   : > { %11856 = vst [vmem:[%s17045_s26 + $0x1e8] sm:$0xc0] %v11720_v62 }
 0x8c5   : > { %11857 = vst [vmem:[%s17045_s26 + $0x1f0] sm:$0xc0] %v11721_v59 }
 0x8c6   : > { %11858 = vst [vmem:[%s17045_s26 + $0x1f8] sm:$0xc0] %v11722_v47 }
 0x8c7   : > { %11723 = vst [vmem:[#allocation1 + $0x3] ss:$4 sm:$0xff] %v11678_v8 }
 0x8c8   : > { %11724 = vst [vmem:[#allocation1 + $0x23] ss:$4 sm:$0xff] %v11678_v8 }
 0x8ce   : > { %v11725_v57 = vld.sshfl [vmem:[#allocation1] sm:$0xff pattern:$0x73625140]  ;;  %v11726_v19 = vld.sshfl [vmem:[#allocation1 + $0x8] sm:$0xff pattern:$0x73625140] }
 0x8cf   : > { %v11727_v39 = vld.sshfl [vmem:[#allocation1 + $0x10] sm:$0xff pattern:$0x73625140]  ;;  %v11728_v14 = vld.sshfl [vmem:[#allocation1 + $0x18] sm:$0xff pattern:$0x73625140] }
 0x8d0   : > { %v11729_v21 = vld.sshfl [vmem:[#allocation1 + $0x20] sm:$0xff pattern:$0x73625140]  ;;  %v11730_v31 = vld.sshfl [vmem:[#allocation1 + $0x28] sm:$0xff pattern:$0x73625140] }
 0x8d1   : > { %v11731_v53 = vld.sshfl [vmem:[#allocation1 + $0x30] sm:$0xff pattern:$0x73625140]  ;;  %v11732_v51 = vld.sshfl [vmem:[#allocation1 + $0x38] sm:$0xff pattern:$0x73625140] }
 0x8d2   : > { %11733 = vst [vmem:[#allocation1 + $0x3] ss:$4 sm:$0xff] %v11678_v8 }
 0x8d3   : > { %11734 = vst [vmem:[#allocation1 + $0x23] ss:$4 sm:$0xff] %v11678_v8 }
 0x8d4   : > { %11859 = vst [vmem:[%s17045_s26 + $0x300] sm:$0xc0] %v11725_v57 }
 0x8d5   : > { %11860 = vst [vmem:[%s17045_s26 + $0x308] sm:$0xc0] %v11726_v19 }
 0x8d6   : > { %11861 = vst [vmem:[%s17045_s26 + $0x310] sm:$0xc0] %v11727_v39 }
 0x8d7   : > { %11862 = vst [vmem:[%s17045_s26 + $0x318] sm:$0xc0] %v11728_v14 }
 0x8d8   : > { %11863 = vst [vmem:[%s17045_s26 + $0x320] sm:$0xc0] %v11729_v21 }
 0x8d9   : > { %v11735_v15 = vld.sshfl [vmem:[#allocation1] sm:$0xff pattern:$0x73625140]  ;;  %v11736_v18 = vld.sshfl [vmem:[#allocation1 + $0x8] sm:$0xff pattern:$0x73625140] }
 0x8da   : > { %v11737_v45 = vld.sshfl [vmem:[#allocation1 + $0x10] sm:$0xff pattern:$0x73625140]  ;;  %v11738_v58 = vld.sshfl [vmem:[#allocation1 + $0x18] sm:$0xff pattern:$0x73625140] }
 0x8db   : > { %v11739_v37 = vld.sshfl [vmem:[#allocation1 + $0x20] sm:$0xff pattern:$0x73625140]  ;;  %v11740_v5 = vld.sshfl [vmem:[#allocation1 + $0x28] sm:$0xff pattern:$0x73625140] }
 0x8dc   : > { %v11741_v6 = vld.sshfl [vmem:[#allocation1 + $0x30] sm:$0xff pattern:$0x73625140]  ;;  %v11742_v26 = vld.sshfl [vmem:[#allocation1 + $0x38] sm:$0xff pattern:$0x73625140] }
 0x8dd   : > { %11743 = vst [vmem:[#allocation1 + $0x3] ss:$4 sm:$0xff] %v11678_v8 }
 0x8de   : > { %11744 = vst [vmem:[#allocation1 + $0x23] ss:$4 sm:$0xff] %v11678_v8 }
 0x8df   : > { %11864 = vst [vmem:[%s17045_s26 + $0x328] sm:$0xc0] %v11730_v31 }
 0x8e0   : > { %11865 = vst [vmem:[%s17045_s26 + $0x330] sm:$0xc0] %v11731_v53 }
 0x8e1   : > { %11866 = vst [vmem:[%s17045_s26 + $0x338] sm:$0xc0] %v11732_v51 }
 0x8e2   : > { %11867 = vst [vmem:[%s17045_s26 + $0x340] sm:$0xc0] %v11735_v15 }
 0x8e3   : > { %11868 = vst [vmem:[%s17045_s26 + $0x348] sm:$0xc0] %v11736_v18 }
 0x8e4   : > { %v11745_v17 = vld.sshfl [vmem:[#allocation1] sm:$0xff pattern:$0x73625140]  ;;  %v11746_v61 = vld.sshfl [vmem:[#allocation1 + $0x8] sm:$0xff pattern:$0x73625140] }
 0x8e5   : > { %v11747_v29 = vld.sshfl [vmem:[#allocation1 + $0x10] sm:$0xff pattern:$0x73625140]  ;;  %v11748_v56 = vld.sshfl [vmem:[#allocation1 + $0x18] sm:$0xff pattern:$0x73625140] }
 0x8e6   : > { %v11749_v4 = vld.sshfl [vmem:[#allocation1 + $0x20] sm:$0xff pattern:$0x73625140]  ;;  %v11750_v9 = vld.sshfl [vmem:[#allocation1 + $0x28] sm:$0xff pattern:$0x73625140] }
 0x8e7   : > { %v11751_v63 = vld.sshfl [vmem:[#allocation1 + $0x30] sm:$0xff pattern:$0x73625140]  ;;  %v11752_v32 = vld.sshfl [vmem:[#allocation1 + $0x38] sm:$0xff pattern:$0x73625140] }
 0x8e8   : > { %11753 = vst [vmem:[#allocation1 + $0x3] ss:$4 sm:$0xff] %v11678_v8 }
 0x8e9   : > { %11754 = vst [vmem:[#allocation1 + $0x23] ss:$4 sm:$0xff] %v11678_v8 }
 0x8ea   : > { %11869 = vst [vmem:[%s17045_s26 + $0x350] sm:$0xc0] %v11737_v45 }
 0x8eb   : > { %11870 = vst [vmem:[%s17045_s26 + $0x358] sm:$0xc0] %v11738_v58 }
 0x8ec   : > { %11871 = vst [vmem:[%s17045_s26 + $0x360] sm:$0xc0] %v11739_v37 }
 0x8ed   : > { %11872 = vst [vmem:[%s17045_s26 + $0x368] sm:$0xc0] %v11740_v5 }
 0x8ee   : > { %11873 = vst [vmem:[%s17045_s26 + $0x370] sm:$0xc0] %v11741_v6 }
 0x8ef   : > { %11874 = vst [vmem:[%s17045_s26 + $0x378] sm:$0xc0] %v11742_v26  ;;  %v11755_v24 = vld.sshfl [vmem:[#allocation1] sm:$0xff pattern:$0x73625140] }
 0x8f0   : > { %11875 = vst [vmem:[%s17045_s26 + $0x380] sm:$0xc0] %v11745_v17  ;;  %v11756_v50 = vld.sshfl [vmem:[#allocation1 + $0x8] sm:$0xff pattern:$0x73625140] }
 0x8f1   : > { %11876 = vst [vmem:[%s17045_s26 + $0x388] sm:$0xc0] %v11746_v61  ;;  %v11757_v12 = vld.sshfl [vmem:[#allocation1 + $0x10] sm:$0xff pattern:$0x73625140] }
 0x8f2   : > { %11877 = vst [vmem:[%s17045_s26 + $0x390] sm:$0xc0] %v11747_v29  ;;  %v11758_v38 = vld.sshfl [vmem:[#allocation1 + $0x18] sm:$0xff pattern:$0x73625140] }
 0x8f3   : > { %11878 = vst [vmem:[%s17045_s26 + $0x398] sm:$0xc0] %v11748_v56  ;;  %v11759_v40 = vld.sshfl [vmem:[#allocation1 + $0x20] sm:$0xff pattern:$0x73625140] }
 0x8f4   : > { %11879 = vst [vmem:[%s17045_s26 + $0x3a0] sm:$0xc0] %v11749_v4  ;;  %v11760_v7 = vld.sshfl [vmem:[#allocation1 + $0x28] sm:$0xff pattern:$0x73625140] }
 0x8f5   : > { %11880 = vst [vmem:[%s17045_s26 + $0x3a8] sm:$0xc0] %v11750_v9  ;;  %v11761_v25 = vld.sshfl [vmem:[#allocation1 + $0x30] sm:$0xff pattern:$0x73625140] }
 0x8f6   : > { %11881 = vst [vmem:[%s17045_s26 + $0x3b0] sm:$0xc0] %v11751_v63  ;;  %v11762_v60 = vld.sshfl [vmem:[#allocation1 + $0x38] sm:$0xff pattern:$0x73625140] }
 0x8f7   : > { %11882 = vst [vmem:[%s17045_s26 + $0x3b8] sm:$0xc0] %v11752_v32 }
 0x8f8   : > { %11883 = vst [vmem:[%s17045_s26 + $0x3c0] sm:$0xc0] %v11755_v24 }
 0x8f9   : > { %11884 = vst [vmem:[%s17045_s26 + $0x3c8] sm:$0xc0] %v11756_v50 }
 0x8fa   : > { %11885 = vst [vmem:[%s17045_s26 + $0x3d0] sm:$0xc0] %v11757_v12 }
 0x8fb   : > { %11886 = vst [vmem:[%s17045_s26 + $0x3d8] sm:$0xc0] %v11758_v38 }
 0x8fc   : > { %11887 = vst [vmem:[%s17045_s26 + $0x3e0] sm:$0xc0] %v11759_v40 }
 0x8fd   : > { %11888 = vst [vmem:[%s17045_s26 + $0x3e8] sm:$0xc0] %v11760_v7 }
 0x8fe   : > { %11889 = vst [vmem:[%s17045_s26 + $0x3f0] sm:$0xc0] %v11761_v25 }
 0x8ff   : > { %11890 = vst [vmem:[%s17045_s26 + $0x3f8] sm:$0xc0] %v11762_v60 }
 0x900   : > { %16826 = shalt.err (!%p16823_p3)
}
 0x901   : > { %s16866_s26 = smov 4096   ;;  %s16867_s25 = smov 256  }
 0x902   : > { %16733 = dma.vmem_to_hbm [thread:$0]  (%p16956_p5), %s11906_s13, 16384, %s11908_s28, %s11892_s16, %s16866_s26, %s16866_s26, %s16867_s25  }
 0x903 PF: > { %p16739_p4 = scmp.ge.s32.totalorder %s16861_s12, 2  ;;  %s11922_s18 = sand.u32 1, %s16849_s30  }
 0x904   : > { %s11923_s14 = scalar_lea.sflag [#allocation3], %s11922_s18 }
 0x905   : > { %p16736_p7 = pnand %p16739_p4, %p16960_p6 }
 0x907   : > { %p16737_p8 = pneg %p16736_p7 }
 0x909   : > { %16844 = dma.done.wait (%p16737_p8), %s11923_s14, 16384  }
 0x90a   : > { %16846 = vsyncadd (%p16737_p8), %s11923_s14, 4294950912  ;;  %s21865_s17 = sld [smem:[#allocation5_spill]]  ;;  %p19_p9 = scmp.ge.s32.totalorder %s16943_s15, 4  }
 0x90b   : > { %s21866_s30 = smov %s16853_s10  ;;  %s21867_s10 = smov %s16857_s11 }
 0x90c   : > { %s21869_s12 = smov %s16943_s15  ;;  %21 = sbr.rel (!%p19_p9) target bundleno = 3 (0x3), region = 105 }
 0x910   : > { %s21868_s11 = smov %s21865_s17 }
 0x911   :  { %11929 = vsyncpa [#allocation3], 1 }
 0x912   :  { %11931 = vsyncpa [#allocation3 + $0x1], 1 }

</bundles_post_ra>
